<compile_context>
chip_gen: v5e
topology: v5e:2x2
jax: 0.10.0
libtpu: 0.0.40
codegen_flags: <defaults>
</compile_context>

<pallas_src>
import functools

import jax
import jax.numpy as jnp
from jax import lax
from jax.experimental import pallas as pl
from jax.experimental.pallas import tpu as pltpu

LANES = 128  # lane-padded channel width


def _round_up(x, m):
    return (x + m - 1) // m * m


def _inblock_kernel(mask_ref, xc_ref, w1_ref, b1_ref, s1_ref, t1_ref,
                    w2_ref, b2_ref, s2_ref, t2_ref,
                    o_ref, h1_ref,
                    *, D, Wp, SROW, PAD, C, cout):
    """Fused InBlock forward, one (batch, depth) step per grid point.

    mask_ref : (SROW, 1)        1.0 at interior (h,w) of the padded slab, 0 at halo
    xc_ref   : (SROW, K1p)      stage-1 im2col for depth slab di = min(t, D-1)
    w1_ref   : (K1p, C)         conv1 weights, im2col layout, channels padded to C
    b1/s1/t1 : (1, C)           conv1 bias, BN1 scale, BN1 shift
    w2_ref   : (9, 3*C, C)      conv2 weights: tap=(kh,kw) leading, kd folded into K
    b2/s2/t2 : (1, C)           conv2 bias, BN2 scale, BN2 shift
    o_ref    : (SROW, cout)     output depth row d = t-1 on the padded H/W grid
    h1_ref   : (3, SROW, C)     rolling window of stage-1 activation slabs (VMEM)
    """
    f32 = jnp.float32
    t = pl.program_id(1)

    # ---- Halo-only zero fill: just the two depth-halo slabs of the ring;
    #      every interior slab is fully overwritten by stage 1.
    @pl.when(t == 0)
    def _():
        h1_ref[0] = jnp.zeros((SROW, C), h1_ref.dtype)

    @pl.when(t == D)
    def _():
        h1_ref[(D + 1) % 3] = jnp.zeros((SROW, C), h1_ref.dtype)

    # ---- Stage 1: conv1 (wrapper-side im2col) + bias + ReLU + Dropout(id)
    #      + BN1 (folded running stats).  One lane-dense MXU dot; the result is
    #      the activation slab for padded depth dp = t+1, stored in ring slot
    #      (t+1)%3.  The mask zeroes the 1-voxel H/W halo.
    @pl.when(t < D)
    def _():
        y = jnp.dot(xc_ref[...], w1_ref[...], preferred_element_type=f32)
        y = jnp.maximum(y + b1_ref[...], 0.0)
        y = (y * s1_ref[...] + t1_ref[...]) * mask_ref[...]
        h1_ref[(t + 1) % 3] = y.astype(h1_ref.dtype)

    # ---- Stage 2: conv2 + bias + ReLU + Dropout(id) + BN2 for output depth
    #      row d = t-1, using resident slabs dp = d, d+1, d+2.
    @pl.when(t > 0)
    def _():
        d = t - 1
        # kd folded into the contraction: lane-aligned concat -> (SROW, 3*C).
        a2 = jnp.concatenate([h1_ref[(d + k) % 3] for k in range(3)], axis=-1)
        zpad = jnp.zeros((PAD, C), f32)
        acc = jnp.zeros((SROW, C), f32)
        for kh in range(3):
            for kw in range(3):
                p = jnp.dot(a2, w2_ref[kh * 3 + kw],
                            preferred_element_type=f32)            # (SROW, C)
                sft = kh * Wp + kw
                if sft:
                    # Spatial (kh,kw) shift realized on the result: rows that
                    # would wrap only ever land beyond H*Wp, which the wrapper
                    # slices away (equivalent to pltpu.roll on the XLU).
                    p = jnp.concatenate([p, zpad], axis=0)[sft:sft + SROW, :]
                acc = acc + p
        y2 = jnp.maximum(acc + b2_ref[...], 0.0)                    # bias + ReLU
        y2 = y2 * s2_ref[...] + t2_ref[...]                         # BatchNorm
        o_ref[...] = y2[:, :cout].astype(o_ref.dtype)


def _fold_bn(gamma, beta, mean, var, eps):
    scale = gamma / jnp.sqrt(var + eps)
    shift = beta - mean * scale
    return scale, shift


def _pad_vec(v, C):
    return jnp.pad(v.astype(jnp.float32), (0, C - v.shape[0])).reshape(1, C)


def _stage1_im2col(x, Hp, Wp, SROW, K1p, compute_dtype):
    """(N, D, H, W, cin) -> (N, D, SROW, K1p) im2col over the padded H/W grid."""
    N, D, H, W, cin = x.shape
    xp = jnp.pad(x, ((0, 0), (1, 1), (2, 2), (2, 2), (0, 0)))
    cols = []
    for kd in range(3):
        for kh in range(3):
            for kw in range(3):
                cols.append(xp[:, kd:kd + D, kh:kh + Hp, kw:kw + Wp, :])
    c = jnp.concatenate(cols, axis=-1).reshape(N, D, Hp * Wp, 27 * cin)
    c = jnp.pad(c, ((0, 0), (0, 0), (0, SROW - Hp * Wp), (0, K1p - 27 * cin)))
    return c.astype(compute_dtype)


def inblock_pallas(x_ndhwc, p, *, eps=1e-5, compute_dtype=jnp.bfloat16):
    """Fused InBlock forward.  x: (N, D, H, W, Cin) f32 -> (N, D, H, W, Cout) f32."""
    N, D, H, W, cin = x_ndhwc.shape
    cout = p["w1"].shape[-1]
    C = LANES
    assert cout <= C, "out_channels > 128 would need an extra channel tile axis"
    Hp, Wp = H + 2, W + 2
    SROW = _round_up(Hp * Wp, 8)          # rows of one padded H/W slab
    PAD = _round_up(2 * Wp + 2, 8)        # tail rows for the stage-2 result shift
    K1 = 27 * cin
    K1p = _round_up(K1, C)                # stage-1 contraction, lane padded

    x = x_ndhwc.astype(jnp.float32)
    xcols = _stage1_im2col(x, Hp, Wp, SROW, K1p, compute_dtype)

    # Interior mask over the padded H/W grid (zero at the 1-voxel halo and at
    # the SROW padding rows).
    m = jnp.zeros((Hp, Wp), jnp.float32).at[1:H + 1, 1:W + 1].set(1.0)
    mask = jnp.pad(m.reshape(Hp * Wp, 1), ((0, SROW - Hp * Wp), (0, 0)))

    # conv1 weights -> im2col layout (K1p, C); K and out-channels zero padded.
    w1 = p["w1"].reshape(K1, cout)
    w1 = jnp.pad(w1, ((0, K1p - K1), (0, C - cout))).astype(compute_dtype)

    # conv2 weights -> (9, 3*C, C): tap=(kh,kw) on the leading axis, kd folded
    # into the contraction dim, both channel axes zero padded to 128 lanes.
    w2p = jnp.pad(p["w2"], ((0, 0),) * 3 + ((0, C - cout), (0, C - cout)))
    w2f = jnp.transpose(w2p, (1, 2, 0, 3, 4)).reshape(9, 3 * C, C)
    w2f = w2f.astype(compute_dtype)

    s1, t1 = _fold_bn(p["g1"], p["be1"], p["m1"], p["v1"], eps)
    s2, t2 = _fold_bn(p["g2"], p["be2"], p["m2"], p["v2"], eps)
    b1, s1, t1 = [_pad_vec(v, C) for v in (p["b1"], s1, t1)]
    b2, s2, t2 = [_pad_vec(v, C) for v in (p["b2"], s2, t2)]

    kernel = functools.partial(_inblock_kernel, D=D, Wp=Wp, SROW=SROW, PAD=PAD,
                               C=C, cout=cout)
    const2 = pl.BlockSpec((1, C), lambda n, t: (0, 0))

    out = pl.pallas_call(
        kernel,
        out_shape=jax.ShapeDtypeStruct((N, D, SROW, cout), jnp.float32),
        grid=(N, D + 1),
        in_specs=[
            pl.BlockSpec((SROW, 1), lambda n, t: (0, 0)),                    # mask
            pl.BlockSpec((None, None, SROW, K1p),
                         lambda n, t: (n, jnp.minimum(t, D - 1), 0, 0)),     # xcols
            pl.BlockSpec((K1p, C), lambda n, t: (0, 0)),                     # w1
            const2, const2, const2,                                          # b1,s1,t1
            pl.BlockSpec((9, 3 * C, C), lambda n, t: (0, 0, 0)),             # w2f
            const2, const2, const2,                                          # b2,s2,t2
        ],
        out_specs=pl.BlockSpec((None, None, SROW, cout),
                               lambda n, t: (n, jnp.maximum(t - 1, 0), 0, 0)),
        scratch_shapes=[pltpu.VMEM((3, SROW, C), compute_dtype)],
        compiler_params=pltpu.CompilerParams(
            dimension_semantics=("parallel", "arbitrary"),  # batch across cores
            vmem_limit_bytes=32 * 1024 * 1024,  # footprint here is only ~4 MiB
        ),
    )(mask, xcols, w1, b1, s1, t1, w2f, b2, s2, t2)

    # Un-pad the small cout-width output (row q of a slab is (h, w) = (q//Wp, q%Wp)).
    y = out[:, :, :H * Wp, :].reshape(N, D, H, Wp, cout)[:, :, :, :W, :]
    return y


def inblock_forward(x_ncdhw, p, *, compute_dtype=jnp.bfloat16):
    """Full InBlock forward. Input/output in PyTorch NCDHW layout."""
    x = jnp.transpose(x_ncdhw, (0, 2, 3, 4, 1))            # NCDHW -> NDHWC
    y = inblock_pallas(x, p, compute_dtype=compute_dtype)
    return jnp.transpose(y, (0, 4, 1, 2, 3))               # NDHWC -> NCDHW


def init_inblock_params(key, in_channels, out_channels):
    """Deterministic synthetic parameters matching InBlock's layer shapes."""
    ks = jax.random.split(key, 8)
    p = {}
    # Conv3d(in_channels, out_channels, 3)
    p["w1"] = 0.1 * jax.random.normal(ks[0], (3, 3, 3, in_channels, out_channels), jnp.float32)
    p["b1"] = 0.1 * jax.random.normal(ks[1], (out_channels,), jnp.float32)
    # BatchNorm3d(out_channels)
    p["g1"] = 1.0 + 0.1 * jax.random.normal(ks[2], (out_channels,), jnp.float32)
    p["be1"] = 0.1 * jax.random.normal(ks[3], (out_channels,), jnp.float32)
    p["m1"] = 0.05 * jax.random.normal(ks[4], (out_channels,), jnp.float32)
    p["v1"] = 0.5 + jnp.abs(0.2 * jax.random.normal(ks[5], (out_channels,), jnp.float32))
    # Conv3d(out_channels, out_channels, 3)
    p["w2"] = 0.1 * jax.random.normal(ks[6], (3, 3, 3, out_channels, out_channels), jnp.float32)
    p["b2"] = 0.1 * jax.random.normal(ks[7], (out_channels,), jnp.float32)
    # second BatchNorm3d (deterministic transforms of the first for variety)
    p["g2"] = 1.0 + 0.05 * p["be1"]
    p["be2"] = -0.5 * p["be1"]
    p["m2"] = 0.5 * p["m1"]
    p["v2"] = 0.75 + 0.5 * (p["v1"] - 0.5)
    return p


def _reference_forward(x_ncdhw, p, eps=1e-5):
    """Plain-JAX reference (XLA conv) for correctness checking."""
    def block(x, w, b, g, be, m, v):
        y = lax.conv_general_dilated(
            x, w, window_strides=(1, 1, 1), padding="SAME",
            dimension_numbers=("NDHWC", "DHWIO", "NDHWC"),
            precision=lax.Precision.HIGHEST)
        y = jnp.maximum(y + b, 0.0)
        scale = g / jnp.sqrt(v + eps)
        return y * scale + (be - m * scale)
    x = jnp.transpose(x_ncdhw, (0, 2, 3, 4, 1))
    y = block(x, p["w1"], p["b1"], p["g1"], p["be1"], p["m1"], p["v1"])
    y = block(y, p["w2"], p["b2"], p["g2"], p["be2"], p["m2"], p["v2"])
    return jnp.transpose(y, (0, 4, 1, 2, 3))


if __name__ == "__main__":
    N, Cin, Cout = 2, 3, 8
    D = H = W = 16

    key = jax.random.PRNGKey(0)
    kx, kp = jax.random.split(key)
    x = jax.random.normal(kx, (N, Cin, D, H, W), jnp.float32)   # NCDHW like PyTorch
    params = init_inblock_params(kp, Cin, Cout)

    ref = jax.block_until_ready(_reference_forward(x, params))

    # f32 MXU-operand path (strict check).
    out = jax.block_until_ready(inblock_forward(x, params, compute_dtype=jnp.float32))
    assert out.shape == (N, Cout, D, H, W), out.shape
    err = float(jnp.max(jnp.abs(out - ref)))
    assert jnp.allclose(out, ref, atol=2e-3, rtol=2e-3), err

    # bf16 MXU-operand path (default; recommended on v6e/v7x).  Matmul operands
    # and the stage-1 activation scratch are bf16; accumulation and the
    # epilogues stay f32 -> loose tolerance.
    out_bf16 = jax.block_until_ready(
        inblock_forward(x, params, compute_dtype=jnp.bfloat16))
    err_bf16 = float(jnp.max(jnp.abs(out_bf16 - ref)))
    assert jnp.allclose(out_bf16, ref, atol=2e-1, rtol=5e-2), err_bf16

    print("KERNEL_OK")
</pallas_src>

<mosaic_0001>
module attributes {stable_mosaic.version = 11 : i64} {
  func.func @_inblock_kernel(%arg0: i32, %arg1: i32, %arg2: memref<328x1xf32, #tpu.memory_space<vmem>>, %arg3: memref<1x1x328x128xf32, #tpu.memory_space<vmem>>, %arg4: memref<128x128xf32, #tpu.memory_space<vmem>>, %arg5: memref<1x128xf32, #tpu.memory_space<vmem>>, %arg6: memref<1x128xf32, #tpu.memory_space<vmem>>, %arg7: memref<1x128xf32, #tpu.memory_space<vmem>>, %arg8: memref<9x384x128xf32, #tpu.memory_space<vmem>>, %arg9: memref<1x128xf32, #tpu.memory_space<vmem>>, %arg10: memref<1x128xf32, #tpu.memory_space<vmem>>, %arg11: memref<1x128xf32, #tpu.memory_space<vmem>>, %arg12: memref<1x1x328x8xf32, #tpu.memory_space<vmem>>, %arg13: memref<3x328x128xf32, #tpu.memory_space<vmem>>) attributes {dimension_semantics = [#tpu.dimension_semantics<parallel>, #tpu.dimension_semantics<arbitrary>], iteration_bounds = array<i64: 2, 17>, scalar_prefetch = 0 : i64, scratch_operands = 1 : i64, tpu.core_type = #tpu.core_type<tc>, window_params = [{pipeline_mode = #tpu.pipeline_mode<synchronous>, transform_indices = @transform_0, window_bounds = array<i64: 328, 1>}, {transform_indices = @transform_1, window_bounds = array<i64: 1, 1, 328, 128>}, {pipeline_mode = #tpu.pipeline_mode<synchronous>, transform_indices = @transform_2, window_bounds = array<i64: 128, 128>}, {pipeline_mode = #tpu.pipeline_mode<synchronous>, transform_indices = @transform_3, window_bounds = array<i64: 1, 128>}, {pipeline_mode = #tpu.pipeline_mode<synchronous>, transform_indices = @transform_4, window_bounds = array<i64: 1, 128>}, {pipeline_mode = #tpu.pipeline_mode<synchronous>, transform_indices = @transform_5, window_bounds = array<i64: 1, 128>}, {pipeline_mode = #tpu.pipeline_mode<synchronous>, transform_indices = @transform_6, window_bounds = array<i64: 9, 384, 128>}, {pipeline_mode = #tpu.pipeline_mode<synchronous>, transform_indices = @transform_7, window_bounds = array<i64: 1, 128>}, {pipeline_mode = #tpu.pipeline_mode<synchronous>, transform_indices = @transform_8, window_bounds = array<i64: 1, 128>}, {pipeline_mode = #tpu.pipeline_mode<synchronous>, transform_indices = @transform_9, window_bounds = array<i64: 1, 128>}, {transform_indices = @transform_10, window_bounds = array<i64: 1, 1, 328, 8>}]} {
    %c0_i32 = arith.constant 0 : i32
    %0 = arith.cmpi eq, %arg1, %c0_i32 : i32
    %1 = arith.extui %0 : i1 to i32
    %c0_i32_0 = arith.constant 0 : i32
    %2 = arith.cmpi ne, %1, %c0_i32_0 : i32
    scf.if %2 {
      %cst = arith.constant 0.000000e+00 : f32
      %12 = vector.broadcast %cst : f32 to vector<328x128xf32>
      %c0 = arith.constant 0 : index
      %c0_6 = arith.constant 0 : index
      %c0_7 = arith.constant 0 : index
      %13 = vector.load %arg13[%c0, %c0_6, %c0_7] : memref<3x328x128xf32, #tpu.memory_space<vmem>>, vector<1x328x128xf32>
      %14 = vector.shape_cast %13 : vector<1x328x128xf32> to vector<328x128xf32>
      %15 = vector.shape_cast %12 : vector<328x128xf32> to vector<1x328x128xf32>
      tpu.vector_store %arg13[%c0, %c0_6, %c0_7], %15 {strides = array<i32>} : memref<3x328x128xf32, #tpu.memory_space<vmem>>, vector<1x328x128xf32>,
    } else {
    }
    %c16_i32 = arith.constant 16 : i32
    %3 = arith.cmpi eq, %arg1, %c16_i32 : i32
    %4 = arith.extui %3 : i1 to i32
    %c0_i32_1 = arith.constant 0 : i32
    %5 = arith.cmpi ne, %4, %c0_i32_1 : i32
    scf.if %5 {
      %cst = arith.constant 0.000000e+00 : f32
      %12 = vector.broadcast %cst : f32 to vector<328x128xf32>
      %c2 = arith.constant 2 : index
      %c0 = arith.constant 0 : index
      %c0_6 = arith.constant 0 : index
      %13 = vector.load %arg13[%c2, %c0, %c0_6] : memref<3x328x128xf32, #tpu.memory_space<vmem>>, vector<1x328x128xf32>
      %14 = vector.shape_cast %13 : vector<1x328x128xf32> to vector<328x128xf32>
      %15 = vector.shape_cast %12 : vector<328x128xf32> to vector<1x328x128xf32>
      tpu.vector_store %arg13[%c2, %c0, %c0_6], %15 {strides = array<i32>} : memref<3x328x128xf32, #tpu.memory_space<vmem>>, vector<1x328x128xf32>,
    } else {
    }
    %c16_i32_2 = arith.constant 16 : i32
    %6 = arith.cmpi slt, %arg1, %c16_i32_2 : i32
    %7 = arith.extui %6 : i1 to i32
    %c0_i32_3 = arith.constant 0 : i32
    %8 = arith.cmpi ne, %7, %c0_i32_3 : i32
    scf.if %8 {
      %c0 = arith.constant 0 : index
      %c0_6 = arith.constant 0 : index
      %c0_7 = arith.constant 0 : index
      %c0_8 = arith.constant 0 : index
      %12 = vector.load %arg3[%c0, %c0_6, %c0_7, %c0_8] : memref<1x1x328x128xf32, #tpu.memory_space<vmem>>, vector<1x1x328x128xf32>
      %13 = vector.shape_cast %12 : vector<1x1x328x128xf32> to vector<328x128xf32>
      %c0_9 = arith.constant 0 : index
      %c0_10 = arith.constant 0 : index
      %14 = vector.load %arg4[%c0_9, %c0_10] : memref<128x128xf32, #tpu.memory_space<vmem>>, vector<128x128xf32>
      %cst = arith.constant dense<0.000000e+00> : vector<328x128xf32>
      %15 = tpu.matmul %13, %14, %cst {dimension_numbers = #tpu.dot_dimension_numbers<[1], [0], [0], [1], [0, 0, 1, 1], [], []>} : vector<328x128xf32>, vector<128x128xf32>, vector<328x128xf32> -> vector<328x128xf32>
      %c0_11 = arith.constant 0 : index
      %c0_12 = arith.constant 0 : index
      %16 = vector.load %arg5[%c0_11, %c0_12] : memref<1x128xf32, #tpu.memory_space<vmem>>, vector<1x128xf32>
      %17 = vector.broadcast %16 : vector<1x128xf32> to vector<328x128xf32>
      %18 = arith.addf %15, %17 : vector<328x128xf32>
      %cst_13 = arith.constant 0.000000e+00 : f32
      %19 = vector.broadcast %cst_13 : f32 to vector<328x128xf32>
      %20 = arith.maximumf %18, %19 : vector<328x128xf32>
      %c0_14 = arith.constant 0 : index
      %c0_15 = arith.constant 0 : index
      %21 = vector.load %arg6[%c0_14, %c0_15] : memref<1x128xf32, #tpu.memory_space<vmem>>, vector<1x128xf32>
      %22 = vector.broadcast %21 : vector<1x128xf32> to vector<328x128xf32>
      %23 = arith.mulf %20, %22 : vector<328x128xf32>
      %c0_16 = arith.constant 0 : index
      %c0_17 = arith.constant 0 : index
      %24 = vector.load %arg7[%c0_16, %c0_17] : memref<1x128xf32, #tpu.memory_space<vmem>>, vector<1x128xf32>
      %25 = vector.broadcast %24 : vector<1x128xf32> to vector<328x128xf32>
      %26 = arith.addf %23, %25 : vector<328x128xf32>
      %c0_18 = arith.constant 0 : index
      %c0_19 = arith.constant 0 : index
      %27 = vector.load %arg2[%c0_18, %c0_19] : memref<328x1xf32, #tpu.memory_space<vmem>>, vector<328x1xf32>
      %28 = vector.broadcast %27 : vector<328x1xf32> to vector<328x128xf32>
      %29 = arith.mulf %26, %28 : vector<328x128xf32>
      %c1_i32 = arith.constant 1 : i32
      %30 = arith.addi %arg1, %c1_i32 : i32
      %c3_i32 = arith.constant 3 : i32
      %c0_i32_20 = arith.constant 0 : i32
      %31 = arith.cmpi eq, %c3_i32, %c0_i32_20 : i32
      %c1_i32_21 = arith.constant 1 : i32
      %32 = arith.select %31, %c1_i32_21, %c3_i32 : i32
      %33 = arith.remsi %30, %32 : i32
      %c0_i32_22 = arith.constant 0 : i32
      %34 = arith.cmpi ne, %33, %c0_i32_22 : i32
      %c0_i32_23 = arith.constant 0 : i32
      %35 = arith.cmpi slt, %33, %c0_i32_23 : i32
      %c0_i32_24 = arith.constant 0 : i32
      %36 = arith.cmpi slt, %32, %c0_i32_24 : i32
      %37 = arith.xori %35, %36 : i1
      %38 = arith.andi %37, %34 : i1
      %39 = arith.addi %33, %32 : i32
      %40 = arith.select %38, %39, %33 : i32
      %41 = arith.index_cast %40 : i32 to index
      %c0_25 = arith.constant 0 : index
      %c0_26 = arith.constant 0 : index
      %42 = vector.load %arg13[%41, %c0_25, %c0_26] : memref<3x328x128xf32, #tpu.memory_space<vmem>>, vector<1x328x128xf32>
      %43 = vector.shape_cast %42 : vector<1x328x128xf32> to vector<328x128xf32>
      %44 = vector.shape_cast %29 : vector<328x128xf32> to vector<1x328x128xf32>
      tpu.vector_store %arg13[%41, %c0_25, %c0_26], %44 {strides = array<i32>} : memref<3x328x128xf32, #tpu.memory_space<vmem>>, vector<1x328x128xf32>,
    } else {
    }
    %c0_i32_4 = arith.constant 0 : i32
    %9 = arith.cmpi sgt, %arg1, %c0_i32_4 : i32
    %10 = arith.extui %9 : i1 to i32
    %c0_i32_5 = arith.constant 0 : i32
    %11 = arith.cmpi ne, %10, %c0_i32_5 : i32
    scf.if %11 {
      %c1_i32 = arith.constant 1 : i32
      %12 = arith.subi %arg1, %c1_i32 : i32
      %c0_i32_6 = arith.constant 0 : i32
      %13 = arith.addi %12, %c0_i32_6 : i32
      %c3_i32 = arith.constant 3 : i32
      %c0_i32_7 = arith.constant 0 : i32
      %14 = arith.cmpi eq, %c3_i32, %c0_i32_7 : i32
      %c1_i32_8 = arith.constant 1 : i32
      %15 = arith.select %14, %c1_i32_8, %c3_i32 : i32
      %16 = arith.remsi %13, %15 : i32
      %c0_i32_9 = arith.constant 0 : i32
      %17 = arith.cmpi ne, %16, %c0_i32_9 : i32
      %c0_i32_10 = arith.constant 0 : i32
      %18 = arith.cmpi slt, %16, %c0_i32_10 : i32
      %c0_i32_11 = arith.constant 0 : i32
      %19 = arith.cmpi slt, %15, %c0_i32_11 : i32
      %20 = arith.xori %18, %19 : i1
      %21 = arith.andi %20, %17 : i1
      %22 = arith.addi %16, %15 : i32
      %23 = arith.select %21, %22, %16 : i32
      %24 = arith.index_cast %23 : i32 to index
      %c0 = arith.constant 0 : index
      %c0_12 = arith.constant 0 : index
      %25 = vector.load %arg13[%24, %c0, %c0_12] : memref<3x328x128xf32, #tpu.memory_space<vmem>>, vector<1x328x128xf32>
      %26 = vector.shape_cast %25 : vector<1x328x128xf32> to vector<328x128xf32>
      %c1_i32_13 = arith.constant 1 : i32
      %27 = arith.addi %12, %c1_i32_13 : i32
      %c3_i32_14 = arith.constant 3 : i32
      %c0_i32_15 = arith.constant 0 : i32
      %28 = arith.cmpi eq, %c3_i32_14, %c0_i32_15 : i32
      %c1_i32_16 = arith.constant 1 : i32
      %29 = arith.select %28, %c1_i32_16, %c3_i32_14 : i32
      %30 = arith.remsi %27, %29 : i32
      %c0_i32_17 = arith.constant 0 : i32
      %31 = arith.cmpi ne, %30, %c0_i32_17 : i32
      %c0_i32_18 = arith.constant 0 : i32
      %32 = arith.cmpi slt, %30, %c0_i32_18 : i32
      %c0_i32_19 = arith.constant 0 : i32
      %33 = arith.cmpi slt, %29, %c0_i32_19 : i32
      %34 = arith.xori %32, %33 : i1
      %35 = arith.andi %34, %31 : i1
      %36 = arith.addi %30, %29 : i32
      %37 = arith.select %35, %36, %30 : i32
      %38 = arith.index_cast %37 : i32 to index
      %c0_20 = arith.constant 0 : index
      %c0_21 = arith.constant 0 : index
      %39 = vector.load %arg13[%38, %c0_20, %c0_21] : memref<3x328x128xf32, #tpu.memory_space<vmem>>, vector<1x328x128xf32>
      %40 = vector.shape_cast %39 : vector<1x328x128xf32> to vector<328x128xf32>
      %c2_i32 = arith.constant 2 : i32
      %41 = arith.addi %12, %c2_i32 : i32
      %c3_i32_22 = arith.constant 3 : i32
      %c0_i32_23 = arith.constant 0 : i32
      %42 = arith.cmpi eq, %c3_i32_22, %c0_i32_23 : i32
      %c1_i32_24 = arith.constant 1 : i32
      %43 = arith.select %42, %c1_i32_24, %c3_i32_22 : i32
      %44 = arith.remsi %41, %43 : i32
      %c0_i32_25 = arith.constant 0 : i32
      %45 = arith.cmpi ne, %44, %c0_i32_25 : i32
      %c0_i32_26 = arith.constant 0 : i32
      %46 = arith.cmpi slt, %44, %c0_i32_26 : i32
      %c0_i32_27 = arith.constant 0 : i32
      %47 = arith.cmpi slt, %43, %c0_i32_27 : i32
      %48 = arith.xori %46, %47 : i1
      %49 = arith.andi %48, %45 : i1
      %50 = arith.addi %44, %43 : i32
      %51 = arith.select %49, %50, %44 : i32
      %52 = arith.index_cast %51 : i32 to index
      %c0_28 = arith.constant 0 : index
      %c0_29 = arith.constant 0 : index
      %53 = vector.load %arg13[%52, %c0_28, %c0_29] : memref<3x328x128xf32, #tpu.memory_space<vmem>>, vector<1x328x128xf32>
      %54 = vector.shape_cast %53 : vector<1x328x128xf32> to vector<328x128xf32>
      %55 = tpu.concatenate %26, %40, %54 in 1 : vector<328x128xf32>, vector<328x128xf32>, vector<328x128xf32> -> vector<328x384xf32>
      %cst = arith.constant 0.000000e+00 : f32
      %56 = vector.broadcast %cst : f32 to vector<40x128xf32>
      %cst_30 = arith.constant 0.000000e+00 : f32
      %57 = vector.broadcast %cst_30 : f32 to vector<328x128xf32>
      %c0_31 = arith.constant 0 : index
      %c0_32 = arith.constant 0 : index
      %c0_33 = arith.constant 0 : index
      %58 = vector.load %arg8[%c0_31, %c0_32, %c0_33] : memref<9x384x128xf32, #tpu.memory_space<vmem>>, vector<1x384x128xf32>
      %59 = vector.shape_cast %58 : vector<1x384x128xf32> to vector<384x128xf32>
      %cst_34 = arith.constant dense<0.000000e+00> : vector<328x128xf32>
      %60 = tpu.matmul %55, %59, %cst_34 {dimension_numbers = #tpu.dot_dimension_numbers<[1], [0], [0], [1], [0, 0, 1, 1], [], []>} : vector<328x384xf32>, vector<384x128xf32>, vector<328x128xf32> -> vector<328x128xf32>
      %61 = arith.addf %57, %60 : vector<328x128xf32>
      %c1 = arith.constant 1 : index
      %c0_35 = arith.constant 0 : index
      %c0_36 = arith.constant 0 : index
      %62 = vector.load %arg8[%c1, %c0_35, %c0_36] : memref<9x384x128xf32, #tpu.memory_space<vmem>>, vector<1x384x128xf32>
      %63 = vector.shape_cast %62 : vector<1x384x128xf32> to vector<384x128xf32>
      %cst_37 = arith.constant dense<0.000000e+00> : vector<328x128xf32>
      %64 = tpu.matmul %55, %63, %cst_37 {dimension_numbers = #tpu.dot_dimension_numbers<[1], [0], [0], [1], [0, 0, 1, 1], [], []>} : vector<328x384xf32>, vector<384x128xf32>, vector<328x128xf32> -> vector<328x128xf32>
      %65 = tpu.concatenate %64, %56 in 0 : vector<328x128xf32>, vector<40x128xf32> -> vector<368x128xf32>
      %66 = vector.extract_strided_slice %65 {offsets = [1, 0], sizes = [328, 128], strides = [1, 1]} : vector<368x128xf32> to vector<328x128xf32>
      %67 = arith.addf %61, %66 : vector<328x128xf32>
      %c2 = arith.constant 2 : index
      %c0_38 = arith.constant 0 : index
      %c0_39 = arith.constant 0 : index
      %68 = vector.load %arg8[%c2, %c0_38, %c0_39] : memref<9x384x128xf32, #tpu.memory_space<vmem>>, vector<1x384x128xf32>
      %69 = vector.shape_cast %68 : vector<1x384x128xf32> to vector<384x128xf32>
      %cst_40 = arith.constant dense<0.000000e+00> : vector<328x128xf32>
      %70 = tpu.matmul %55, %69, %cst_40 {dimension_numbers = #tpu.dot_dimension_numbers<[1], [0], [0], [1], [0, 0, 1, 1], [], []>} : vector<328x384xf32>, vector<384x128xf32>, vector<328x128xf32> -> vector<328x128xf32>
      %71 = tpu.concatenate %70, %56 in 0 : vector<328x128xf32>, vector<40x128xf32> -> vector<368x128xf32>
      %72 = vector.extract_strided_slice %71 {offsets = [2, 0], sizes = [328, 128], strides = [1, 1]} : vector<368x128xf32> to vector<328x128xf32>
      %73 = arith.addf %67, %72 : vector<328x128xf32>
      %c3 = arith.constant 3 : index
      %c0_41 = arith.constant 0 : index
      %c0_42 = arith.constant 0 : index
      %74 = vector.load %arg8[%c3, %c0_41, %c0_42] : memref<9x384x128xf32, #tpu.memory_space<vmem>>, vector<1x384x128xf32>
      %75 = vector.shape_cast %74 : vector<1x384x128xf32> to vector<384x128xf32>
      %cst_43 = arith.constant dense<0.000000e+00> : vector<328x128xf32>
      %76 = tpu.matmul %55, %75, %cst_43 {dimension_numbers = #tpu.dot_dimension_numbers<[1], [0], [0], [1], [0, 0, 1, 1], [], []>} : vector<328x384xf32>, vector<384x128xf32>, vector<328x128xf32> -> vector<328x128xf32>
      %77 = tpu.concatenate %76, %56 in 0 : vector<328x128xf32>, vector<40x128xf32> -> vector<368x128xf32>
      %78 = vector.extract_strided_slice %77 {offsets = [18, 0], sizes = [328, 128], strides = [1, 1]} : vector<368x128xf32> to vector<328x128xf32>
      %79 = arith.addf %73, %78 : vector<328x128xf32>
      %c4 = arith.constant 4 : index
      %c0_44 = arith.constant 0 : index
      %c0_45 = arith.constant 0 : index
      %80 = vector.load %arg8[%c4, %c0_44, %c0_45] : memref<9x384x128xf32, #tpu.memory_space<vmem>>, vector<1x384x128xf32>
      %81 = vector.shape_cast %80 : vector<1x384x128xf32> to vector<384x128xf32>
      %cst_46 = arith.constant dense<0.000000e+00> : vector<328x128xf32>
      %82 = tpu.matmul %55, %81, %cst_46 {dimension_numbers = #tpu.dot_dimension_numbers<[1], [0], [0], [1], [0, 0, 1, 1], [], []>} : vector<328x384xf32>, vector<384x128xf32>, vector<328x128xf32> -> vector<328x128xf32>
      %83 = tpu.concatenate %82, %56 in 0 : vector<328x128xf32>, vector<40x128xf32> -> vector<368x128xf32>
      %84 = vector.extract_strided_slice %83 {offsets = [19, 0], sizes = [328, 128], strides = [1, 1]} : vector<368x128xf32> to vector<328x128xf32>
      %85 = arith.addf %79, %84 : vector<328x128xf32>
      %c5 = arith.constant 5 : index
      %c0_47 = arith.constant 0 : index
      %c0_48 = arith.constant 0 : index
      %86 = vector.load %arg8[%c5, %c0_47, %c0_48] : memref<9x384x128xf32, #tpu.memory_space<vmem>>, vector<1x384x128xf32>
      %87 = vector.shape_cast %86 : vector<1x384x128xf32> to vector<384x128xf32>
      %cst_49 = arith.constant dense<0.000000e+00> : vector<328x128xf32>
      %88 = tpu.matmul %55, %87, %cst_49 {dimension_numbers = #tpu.dot_dimension_numbers<[1], [0], [0], [1], [0, 0, 1, 1], [], []>} : vector<328x384xf32>, vector<384x128xf32>, vector<328x128xf32> -> vector<328x128xf32>
      %89 = tpu.concatenate %88, %56 in 0 : vector<328x128xf32>, vector<40x128xf32> -> vector<368x128xf32>
      %90 = vector.extract_strided_slice %89 {offsets = [20, 0], sizes = [328, 128], strides = [1, 1]} : vector<368x128xf32> to vector<328x128xf32>
      %91 = arith.addf %85, %90 : vector<328x128xf32>
      %c6 = arith.constant 6 : index
      %c0_50 = arith.constant 0 : index
      %c0_51 = arith.constant 0 : index
      %92 = vector.load %arg8[%c6, %c0_50, %c0_51] : memref<9x384x128xf32, #tpu.memory_space<vmem>>, vector<1x384x128xf32>
      %93 = vector.shape_cast %92 : vector<1x384x128xf32> to vector<384x128xf32>
      %cst_52 = arith.constant dense<0.000000e+00> : vector<328x128xf32>
      %94 = tpu.matmul %55, %93, %cst_52 {dimension_numbers = #tpu.dot_dimension_numbers<[1], [0], [0], [1], [0, 0, 1, 1], [], []>} : vector<328x384xf32>, vector<384x128xf32>, vector<328x128xf32> -> vector<328x128xf32>
      %95 = tpu.concatenate %94, %56 in 0 : vector<328x128xf32>, vector<40x128xf32> -> vector<368x128xf32>
      %96 = vector.extract_strided_slice %95 {offsets = [36, 0], sizes = [328, 128], strides = [1, 1]} : vector<368x128xf32> to vector<328x128xf32>
      %97 = arith.addf %91, %96 : vector<328x128xf32>
      %c7 = arith.constant 7 : index
      %c0_53 = arith.constant 0 : index
      %c0_54 = arith.constant 0 : index
      %98 = vector.load %arg8[%c7, %c0_53, %c0_54] : memref<9x384x128xf32, #tpu.memory_space<vmem>>, vector<1x384x128xf32>
      %99 = vector.shape_cast %98 : vector<1x384x128xf32> to vector<384x128xf32>
      %cst_55 = arith.constant dense<0.000000e+00> : vector<328x128xf32>
      %100 = tpu.matmul %55, %99, %cst_55 {dimension_numbers = #tpu.dot_dimension_numbers<[1], [0], [0], [1], [0, 0, 1, 1], [], []>} : vector<328x384xf32>, vector<384x128xf32>, vector<328x128xf32> -> vector<328x128xf32>
      %101 = tpu.concatenate %100, %56 in 0 : vector<328x128xf32>, vector<40x128xf32> -> vector<368x128xf32>
      %102 = vector.extract_strided_slice %101 {offsets = [37, 0], sizes = [328, 128], strides = [1, 1]} : vector<368x128xf32> to vector<328x128xf32>
      %103 = arith.addf %97, %102 : vector<328x128xf32>
      %c8 = arith.constant 8 : index
      %c0_56 = arith.constant 0 : index
      %c0_57 = arith.constant 0 : index
      %104 = vector.load %arg8[%c8, %c0_56, %c0_57] : memref<9x384x128xf32, #tpu.memory_space<vmem>>, vector<1x384x128xf32>
      %105 = vector.shape_cast %104 : vector<1x384x128xf32> to vector<384x128xf32>
      %cst_58 = arith.constant dense<0.000000e+00> : vector<328x128xf32>
      %106 = tpu.matmul %55, %105, %cst_58 {dimension_numbers = #tpu.dot_dimension_numbers<[1], [0], [0], [1], [0, 0, 1, 1], [], []>} : vector<328x384xf32>, vector<384x128xf32>, vector<328x128xf32> -> vector<328x128xf32>
      %107 = tpu.concatenate %106, %56 in 0 : vector<328x128xf32>, vector<40x128xf32> -> vector<368x128xf32>
      %108 = vector.extract_strided_slice %107 {offsets = [38, 0], sizes = [328, 128], strides = [1, 1]} : vector<368x128xf32> to vector<328x128xf32>
      %109 = arith.addf %103, %108 : vector<328x128xf32>
      %c0_59 = arith.constant 0 : index
      %c0_60 = arith.constant 0 : index
      %110 = vector.load %arg9[%c0_59, %c0_60] : memref<1x128xf32, #tpu.memory_space<vmem>>, vector<1x128xf32>
      %111 = vector.broadcast %110 : vector<1x128xf32> to vector<328x128xf32>
      %112 = arith.addf %109, %111 : vector<328x128xf32>
      %cst_61 = arith.constant 0.000000e+00 : f32
      %113 = vector.broadcast %cst_61 : f32 to vector<328x128xf32>
      %114 = arith.maximumf %112, %113 : vector<328x128xf32>
      %c0_62 = arith.constant 0 : index
      %c0_63 = arith.constant 0 : index
      %115 = vector.load %arg10[%c0_62, %c0_63] : memref<1x128xf32, #tpu.memory_space<vmem>>, vector<1x128xf32>
      %116 = vector.broadcast %115 : vector<1x128xf32> to vector<328x128xf32>
      %117 = arith.mulf %114, %116 : vector<328x128xf32>
      %c0_64 = arith.constant 0 : index
      %c0_65 = arith.constant 0 : index
      %118 = vector.load %arg11[%c0_64, %c0_65] : memref<1x128xf32, #tpu.memory_space<vmem>>, vector<1x128xf32>
      %119 = vector.broadcast %118 : vector<1x128xf32> to vector<328x128xf32>
      %120 = arith.addf %117, %119 : vector<328x128xf32>
      %121 = vector.extract_strided_slice %120 {offsets = [0, 0], sizes = [328, 8], strides = [1, 1]} : vector<328x128xf32> to vector<328x8xf32>
      %c0_66 = arith.constant 0 : index
      %c0_67 = arith.constant 0 : index
      %c0_68 = arith.constant 0 : index
      %c0_69 = arith.constant 0 : index
      %122 = vector.load %arg12[%c0_66, %c0_67, %c0_68, %c0_69] : memref<1x1x328x8xf32, #tpu.memory_space<vmem>>, vector<1x1x328x8xf32>
      %123 = vector.shape_cast %122 : vector<1x1x328x8xf32> to vector<328x8xf32>
      %124 = vector.shape_cast %121 : vector<328x8xf32> to vector<1x1x328x8xf32>
      tpu.vector_store %arg12[%c0_66, %c0_67, %c0_68, %c0_69], %124 {strides = array<i32>} : memref<1x1x328x8xf32, #tpu.memory_space<vmem>>, vector<1x1x328x8xf32>,
    } else {
    }
    return
  }
  func.func @transform_0(%arg0: i32, %arg1: i32) -> (i32, i32) {
    %c0_i32 = arith.constant 0 : i32
    %c0_i32_0 = arith.constant 0 : i32
    %c0_i32_1 = arith.constant 0 : i32
    return %c0_i32, %c0_i32_0 : i32, i32
  }
  func.func @transform_1(%arg0: i32, %arg1: i32) -> (i32, i32, i32, i32) {
    %c15_i32 = arith.constant 15 : i32
    %0 = arith.minsi %arg1, %c15_i32 : i32
    %c0_i32 = arith.constant 0 : i32
    %c0_i32_0 = arith.constant 0 : i32
    %c0_i32_1 = arith.constant 0 : i32
    return %arg0, %0, %c0_i32, %c0_i32_0 : i32, i32, i32, i32
  }
  func.func @transform_2(%arg0: i32, %arg1: i32) -> (i32, i32) {
    %c0_i32 = arith.constant 0 : i32
    %c0_i32_0 = arith.constant 0 : i32
    %c0_i32_1 = arith.constant 0 : i32
    return %c0_i32, %c0_i32_0 : i32, i32
  }
  func.func @transform_3(%arg0: i32, %arg1: i32) -> (i32, i32) {
    %c0_i32 = arith.constant 0 : i32
    %c0_i32_0 = arith.constant 0 : i32
    %c0_i32_1 = arith.constant 0 : i32
    return %c0_i32, %c0_i32_0 : i32, i32
  }
  func.func @transform_4(%arg0: i32, %arg1: i32) -> (i32, i32) {
    %c0_i32 = arith.constant 0 : i32
    %c0_i32_0 = arith.constant 0 : i32
    %c0_i32_1 = arith.constant 0 : i32
    return %c0_i32, %c0_i32_0 : i32, i32
  }
  func.func @transform_5(%arg0: i32, %arg1: i32) -> (i32, i32) {
    %c0_i32 = arith.constant 0 : i32
    %c0_i32_0 = arith.constant 0 : i32
    %c0_i32_1 = arith.constant 0 : i32
    return %c0_i32, %c0_i32_0 : i32, i32
  }
  func.func @transform_6(%arg0: i32, %arg1: i32) -> (i32, i32, i32) {
    %c0_i32 = arith.constant 0 : i32
    %c0_i32_0 = arith.constant 0 : i32
    %c0_i32_1 = arith.constant 0 : i32
    %c0_i32_2 = arith.constant 0 : i32
    return %c0_i32, %c0_i32_0, %c0_i32_1 : i32, i32, i32
  }
  func.func @transform_7(%arg0: i32, %arg1: i32) -> (i32, i32) {
    %c0_i32 = arith.constant 0 : i32
    %c0_i32_0 = arith.constant 0 : i32
    %c0_i32_1 = arith.constant 0 : i32
    return %c0_i32, %c0_i32_0 : i32, i32
  }
  func.func @transform_8(%arg0: i32, %arg1: i32) -> (i32, i32) {
    %c0_i32 = arith.constant 0 : i32
    %c0_i32_0 = arith.constant 0 : i32
    %c0_i32_1 = arith.constant 0 : i32
    return %c0_i32, %c0_i32_0 : i32, i32
  }
  func.func @transform_9(%arg0: i32, %arg1: i32) -> (i32, i32) {
    %c0_i32 = arith.constant 0 : i32
    %c0_i32_0 = arith.constant 0 : i32
    %c0_i32_1 = arith.constant 0 : i32
    return %c0_i32, %c0_i32_0 : i32, i32
  }
  func.func @transform_10(%arg0: i32, %arg1: i32) -> (i32, i32, i32, i32) {
    %c1_i32 = arith.constant 1 : i32
    %0 = arith.subi %arg1, %c1_i32 : i32
    %c0_i32 = arith.constant 0 : i32
    %1 = arith.maxsi %0, %c0_i32 : i32
    %c0_i32_0 = arith.constant 0 : i32
    %c0_i32_1 = arith.constant 0 : i32
    %c0_i32_2 = arith.constant 0 : i32
    return %arg0, %1, %c0_i32_0, %c0_i32_1 : i32, i32, i32, i32
  }
}

</mosaic_0001>

<bundles_post_ra>
// kernel: tpu_custom_call.1
= control target key start
LH: loop header
LB: loop body
LE: loop exit
PB: predicated region body
PF: predicated region fallthrough
CT: control target
= control target key end

     0   :  { %s12900_s0 = inlined_call_operand.vmem [shape: f32[328,1], index: 0, kind: input, shape index: {}]   ;;  %s12901_s1 = inlined_call_operand.hbm [shape: f32[2,16,328,128], index: 1, kind: input, shape index: {}]   ;;  %s12902_s2 = inlined_call_operand.hbm [shape: f32[128,128], index: 2, kind: input, shape index: {}]   ;;  %s12903_s3 = inlined_call_operand.hbm [shape: f32[1,128], index: 3, kind: input, shape index: {}]   ;;  %s12904_s4 = inlined_call_operand.hbm [shape: f32[1,128], index: 4, kind: input, shape index: {}]   ;;  %s12905_s5 = inlined_call_operand.hbm [shape: f32[1,128], index: 5, kind: input, shape index: {}]   ;;  %s12906_s6 = inlined_call_operand.hbm [shape: f32[9,384,128], index: 6, kind: input, shape index: {}]   ;;  %s12907_s7 = inlined_call_operand.hbm [shape: f32[1,128], index: 7, kind: input, shape index: {}]   ;;  %s12908_s8 = inlined_call_operand.hbm [shape: f32[1,128], index: 8, kind: input, shape index: {}]   ;;  %s12909_s9 = inlined_call_operand.hbm [shape: f32[1,128], index: 9, kind: input, shape index: {}]   ;;  %s12910_s10 = inlined_call_operand.vmem [shape: f32[2,16,328,8], index: 10, kind: output, shape index: {}]  }
   0x1   :  { %12943 = sst [smem:[#allocation148_spill]] %s12900_s0 }
   0x2   :  { %12944 = sst [smem:[#allocation149_spill]] %s12902_s2 }
   0x3   :  { %12945 = sst [smem:[#allocation150_spill]] %s12903_s3 }
   0x4   :  { %12946 = sst [smem:[#allocation151_spill]] %s12904_s4 }
   0x5   :  { %12947 = sst [smem:[#allocation152_spill]] %s12905_s5 }
   0x6   :  { %12948 = sst [smem:[#allocation153_spill]] %s12906_s6 }
   0x7   :  { %12949 = sst [smem:[#allocation154_spill]] %s12907_s7 }
   0x8   :  { %12950 = sst [smem:[#allocation155_spill]] %s12910_s10 }
   0x9   :  { %15 = vsyncpa [#allocation4], 0 }
   0xa   :  { %17 = vsyncpa [#allocation4 + $0x1], 0 }
   0xb   :  { %18 = vsyncpa [#allocation6], 0 }
   0xc   :  { %19 = vsyncpa [#allocation9], 0 }
   0xd   :  { %20 = vsyncpa [#allocation12], 0 }
   0xe   :  { %21 = vsyncpa [#allocation15], 0  ;;  %s9104_s13 = smov 0   ;;  %s9106_s14 = smov 0  }
   0xf   :  { %s9108_s15 = smov 0   ;;  %s9110_s16 = smov 0  }
  0x10   :  { %s9112_s17 = smov 0   ;;  %s9114_s18 = smov 0  }
  0x11   :  { %s9116_s19 = smov 0   ;;  %s9118_s20 = smov 0  }
  0x12 LB: > { %12951 = sst [smem:[#allocation22_spill]] %s9017_s16  ;;  %s7624_s21 = sadd.s32 4294967295, %s9033_s20   ;;  %s9033_s20 = sphi %s9118_s20, %s27_s20   ;;  %s9029_s19 = sphi %s9116_s19, %s13454_s19   ;;  %s9025_s18 = sphi %s9114_s18, %s13453_s18   ;;  %s9021_s17 = sphi %s9112_s17, %s13452_s17   ;;  %s9017_s16 = sphi %s9110_s16, %s13451_s16   ;;  %s9013_s15 = sphi %s9108_s15, %s13450_s15   ;;  %s9009_s14 = sphi %s9106_s14, %s13449_s14   ;;  %s9005_s13 = sphi %s9104_s13, %s13448_s13  }
  0x13   : > { %12952 = sst [smem:[#allocation23_spill]] %s9021_s17  ;;  %p7628_p0 = scmp.ge.s32.totalorder %s9033_s20, 1 }
  0x14   : > { %p9146_p1 = scmp.eq.s32.totalorder %s7624_s21, 0  ;;  %p299_p2 = scmp.lt.s32.totalorder %s9033_s20, 35 }
  0x15   : > { %s12954_s2 = sld [smem:[#allocation149_spill]]  ;;  %s9035_s27 = smov [#allocation5]  }
  0x16   : > { %p9154_p3 = pnand %p7628_p0, %p299_p2  ;;  %s315_s28 = sshll.u32 %s9035_s27, 4  ;;  %s316_s28 = int_to_ptr.vmem [resolvable:$true] %s315_s28 }
  0x17   : > { %s12957_s4 = sld [smem:[#allocation151_spill]]  ;;  %s12915_s21 = smov 128  }
  0x18   : > { %p7812_p4 = pneg %p9154_p3  ;;  %s12916_s23 = smov 8  }
  0x19   : > { %s9038_s24 = smov [#allocation8]   ;;  %s12958_s6 = sld [smem:[#allocation153_spill]] }
  0x1a   : > { %p9162_p5 = pnand %p7812_p4, %p9146_p1  ;;  %s342_s27 = sshll.u32 %s9038_s24, 4  ;;  %s343_s27 = int_to_ptr.vmem [resolvable:$true] %s342_s27 }
  0x1b   : > { %s313_s25 = sshll.u32 %s12954_s2, 4  ;;  %s9039_s17 = smov [#allocation11]   ;;  %s314_s25 = int_to_ptr.hbm [resolvable:$true] %s313_s25 }
  0x1c   : > { %7815 = dma.hbm_to_vmem [thread:$0]  (!%p9162_p5), %s314_s25, 2048, %s316_s28, [#allocation6], %s12915_s21, %s12915_s21, %s12916_s23  }
  0x1d   : > { %s340_s12 = sshll.u32 %s12957_s4, 4  ;;  %s390_s4 = sshll.u32 %s12908_s8, 4  ;;  %s341_s12 = int_to_ptr.hbm [resolvable:$true] %s340_s12  ;;  %s391_s4 = int_to_ptr.hbm [resolvable:$true] %s390_s4 }
  0x1e   : > { %7821 = dma.hbm_to_vmem [thread:$0]  (!%p9162_p5), %s341_s12, 16, %s343_s27, [#allocation9]  }
  0x1f   : > { %s363_s10 = sshll.u32 %s12958_s6, 4  ;;  %s365_s16 = sshll.u32 %s9039_s17, 4  ;;  %s364_s10 = int_to_ptr.hbm [resolvable:$true] %s363_s10  ;;  %s366_s16 = int_to_ptr.vmem [resolvable:$true] %s365_s16 }
  0x20   : > { %7827 = dma.hbm_to_vmem [thread:$0]  (!%p9162_p5), %s364_s10, 55296, %s366_s16, [#allocation12], %s12915_s21, %s12915_s21, %s12916_s23  }
  0x21   : > { %s9040_s0 = smov [#allocation14]   ;;  %s12959_s3 = sld [smem:[#allocation150_spill]] }
  0x22   : > { %s392_s2 = sshll.u32 %s9040_s0, 4  ;;  %s12960_s5 = sld [smem:[#allocation152_spill]]  ;;  %s393_s2 = int_to_ptr.vmem [resolvable:$true] %s392_s2 }
  0x23   : > { %7833 = dma.hbm_to_vmem [thread:$0]  (!%p9162_p5), %s391_s4, 16, %s393_s2, [#allocation15]  }
  0x24   : > { %s9041_s30 = smov [#allocation7]   ;;  %s9042_s10 = smov [#allocation10]  }
  0x25   : > { %s330_s11 = sshll.u32 %s9041_s30, 4  ;;  %s354_s16 = sshll.u32 %s9042_s10, 4  ;;  %s331_s11 = int_to_ptr.vmem [resolvable:$true] %s330_s11  ;;  %s355_s16 = int_to_ptr.vmem [resolvable:$true] %s354_s16 }
  0x26   : > { %s12961_s7 = sld [smem:[#allocation154_spill]]  ;;  %s9043_s24 = smov [#allocation13]  }
  0x27   : > { %s328_s12 = sshll.u32 %s12959_s3, 4  ;;  %s380_s17 = sshll.u32 %s9043_s24, 4  ;;  %s329_s12 = int_to_ptr.hbm [resolvable:$true] %s328_s12  ;;  %s381_s17 = int_to_ptr.vmem [resolvable:$true] %s380_s17 }
  0x28   : > { %s352_s27 = sshll.u32 %s12960_s5, 4  ;;  %s9044_s30 = smov [#allocation16]   ;;  %s353_s27 = int_to_ptr.hbm [resolvable:$true] %s352_s27 }
  0x29   : > { %7818 = dma.hbm_to_vmem [thread:$0]  (!%p9162_p5), %s329_s12, 16, %s331_s11, [#allocation6]  }
  0x2a   : > { %7824 = dma.hbm_to_vmem [thread:$0]  (!%p9162_p5), %s353_s27, 16, %s355_s16, [#allocation9]  }
  0x2b   : > { %s402_s12 = sshll.u32 %s12909_s9, 4  ;;  %s404_s11 = sshll.u32 %s9044_s30, 4  ;;  %s403_s12 = int_to_ptr.hbm [resolvable:$true] %s402_s12  ;;  %s405_s11 = int_to_ptr.vmem [resolvable:$true] %s404_s11 }
  0x2c   : > { %s378_s4 = sshll.u32 %s12961_s7, 4  ;;  %s36_s27 = sadd.s32 1, %s9025_s18  ;;  %s379_s4 = int_to_ptr.hbm [resolvable:$true] %s378_s4 }
  0x2d   : > { %7830 = dma.hbm_to_vmem [thread:$0]  (!%p9162_p5), %s379_s4, 16, %s381_s17, [#allocation12]  }
  0x2e   : > { %7836 = dma.hbm_to_vmem [thread:$0]  (!%p9162_p5), %s403_s12, 16, %s405_s11, [#allocation15]  }
  0x2f   : > { %s39_s10 = sadd.s32 1, %s9029_s19  ;;  %p37_p6 = scmp.ge.s32.totalorder %s36_s27, 17 }
  0x30   : > { %p64_p7 = scmp.lt.s32.totalorder %s9025_s18, 15  ;;  %p80_p8 = scmp.ne.s32.totalorder %s9013_s15, %s9009_s14 }
  0x31   : > { %s13456_s27 = smov (%p37_p6, %s36_s27), 0  ;;  %s13458_s10 = smov (!%p37_p6, %s39_s10), %s9029_s19 }
  0x32   : > { %s65_s16 = scalar_select %p64_p7, %s9025_s18, 15 }
  0x33   : > { %p41_p9 = scmp.ge.s32.totalorder %s13458_s10, 2  ;;  %p66_p10 = scmp.lt.s32.totalorder %s13456_s27, 15 }
  0x34   : > { %p81_p11 = scmp.eq.s32.totalorder %s9033_s20, 0  ;;  %p86_p12 = scmp.ne.s32.totalorder %s9009_s14, %s9005_s13 }
  0x35   : > { %s13460_s10 = smov (%p41_p9, %s13458_s10), 0  ;;  %s73_s25 = sadd.s32 1, %s9013_s15 }
  0x36   : > { %s67_s29 = scalar_select %p66_p10, %s13456_s27, 15 }
  0x37   : > { %s68_s0 = ssub.s32 %s9029_s19, %s13460_s10  ;;  %p9230_p13 = por %p9146_p1, %p86_p12 }
  0x38   : > { %s69_s4 = ssub.s32 %s65_s16, %s67_s29  ;;  %p82_p0 = por %p81_p11, %p80_p8 }
  0x39   : > { %s70_s28 = sor.u32 %s69_s4, %s68_s0  ;;  %s415_s12 = sand.u32 1, %s9013_s15  }
  0x3a   : > { %p71_p2 = scmp.eq.s32.totalorder %s70_s28, 0  ;;  %p7849_p4 = scmp.lt.s32.totalorder %s9033_s20, 34 }
  0x3b   : > { %s7772_s24 = smul.u32 328, %s415_s12  ;;  %s416_s4 = scalar_lea.sflag [#allocation4], %s415_s12 }
  0x3c   : > { %s9240_s13 = scalar_select %p71_p2, %s9013_s15, %s73_s25  }
  0x3d   : > { %s7773_s17 = smul.u32 41, %s65_s16  ;;  %s419_s11 = scalar_lea.vmem [#allocation3], %s7772_s24 }
  0x3e   : > { %s7774_s30 = smul.u32 656, %s9029_s19  ;;  %s431_s21 = sshll.u32 %s419_s11, 4  ;;  %s432_s21 = int_to_ptr.vmem [resolvable:$true] %s431_s21 }
  0x3f   : > { %p7838_p5 = pnand %p7849_p4, %p82_p0  ;;  %s12963_s28 = smov 8  }
  0x40   : > { %s426_s29 = sadd.s32 %s7774_s30, %s7773_s17  ;;  %s12964_s7 = smov 128  }
  0x41   : > { %s7638_s23 = sshll.u32 %s426_s29, 3  ;;  %443 = sbr.rel (%p9154_p3) target bundleno = 2877 (0xb3d), region = 60 }
  0x42   : > { %s428_s6 = scalar_lea.hbm %s12901_s1, %s7638_s23  ;;  %s445_s16 = sand.u32 (!%p9154_p3), 1, %s9009_s14  }
  0x43   : > { %s429_s0 = sshll.u32 %s428_s6, 4  ;;  %s7775_s25 = smul.u32 (!%p9154_p3), 328, %s445_s16  ;;  %s430_s0 = int_to_ptr.hbm [resolvable:$true] %s429_s0 }
  0x44   : > { %7840 = dma.hbm_to_vmem [thread:$0]  (!%p7838_p5), %s430_s0, 5248, %s432_s21, %s416_s4, %s12964_s7, %s12964_s7, %s12963_s28  }
  0x45   : > { %s446_s24 = scalar_lea.sflag (!%p9154_p3), [#allocation4], %s445_s16  ;;  %s9252_s17 = scalar_lea.vmem (!%p9154_p3), [#allocation3], %s7775_s25 }
  0x46   : > { %8984 = dma.done.wait (%p9230_p13), %s446_s24, 5248  }
  0x47   : > { %8986 = vsyncadd (%p9230_p13), %s446_s24, 4294962048 }
  0x48   : > { %8988 = dma.done.wait (%p9146_p1), [#allocation6], 2064  }
  0x49   : > { %8990 = vsyncadd (%p9146_p1), [#allocation6], 4294965232 }
  0x4a   : > { %8992 = dma.done.wait (%p9146_p1), [#allocation9], 32  }
  0x4b   : > { %8994 = vsyncadd (%p9146_p1), [#allocation9], 4294967264 }
  0x4c   : > { %8996 = dma.done.wait (%p9146_p1), [#allocation12], 55312  }
  0x4d   : > { %8998 = vsyncadd (%p9146_p1), [#allocation12], 4294911984 }
  0x4e   : > { %9000 = dma.done.wait (%p9146_p1), [#allocation15], 32  }
  0x4f   : > { %9002 = vsyncadd (%p9146_p1), [#allocation15], 4294967264  ;;  %s12965_s3 = sld [smem:[#allocation22_spill]] }
  0x50   : > { %s12966_s5 = sld [smem:[#allocation23_spill]] }
  0x51   : > { %s12967_s30 = sld [smem:[#allocation155_spill]] }
  0x55   : > { %s9275_s6 = sadd.s32 4294967295, %s12965_s3  ;;  %p7655_p1 = scmp.ne.s32.totalorder %s12965_s3, 0 }
  0x56   : > { %p539_p3 = scmp.lt.s32.totalorder %s12966_s5, 1  ;;  %p537_p6 = scmp.gt.s32.totalorder %s9275_s6, 0 }
  0x57   : > { %p7649_p7 = scmp.lt.s32.totalorder %s9275_s6, 15 }
  0x58   : > { %s13462_s5 = smov (!%p539_p3, %s12966_s5), 1 }
  0x59   : > { %s538_s7 = scalar_select %p537_p6, %s9275_s6, 0 }
  0x5a   : > { %s7777_s26 = smul.u32 656, %s13462_s5 }
  0x5b   : > { %s13464_s7 = smov (!%p7649_p7, %s538_s7), 15 }
  0x5c   : > { %s7776_s21 = smul.u32 41, %s13464_s7 }
  0x5d   : > { %554 = sbr.rel (%p7655_p1) target bundleno = 140 (0x8c), region = 100 }
  0x5e   : > { %s545_s23 = sadd.s32 %s7777_s26, %s7776_s21 }
  0x5f   : > { %s7654_s2 = sshll.u32 %s545_s23, 3 }
  0x60   : > { %s9285_s11 = scalar_lea.vmem %s12967_s30, %s7654_s2 }
  0x62   : > { %v9045_v0 = vmov 0.0  }
  0x63   : > { %555 = vst [vmem:[#allocation2] sm:$0xff] %v9045_v0 }
  0x64   : > { %556 = vst [vmem:[#allocation2 + $0x8] sm:$0xff] %v9045_v0 }
  0x65   : > { %557 = vst [vmem:[#allocation2 + $0x10] sm:$0xff] %v9045_v0 }
  0x66   : > { %558 = vst [vmem:[#allocation2 + $0x18] sm:$0xff] %v9045_v0 }
  0x67   : > { %559 = vst [vmem:[#allocation2 + $0x20] sm:$0xff] %v9045_v0 }
  0x68   : > { %560 = vst [vmem:[#allocation2 + $0x28] sm:$0xff] %v9045_v0 }
  0x69   : > { %561 = vst [vmem:[#allocation2 + $0x30] sm:$0xff] %v9045_v0 }
  0x6a   : > { %562 = vst [vmem:[#allocation2 + $0x38] sm:$0xff] %v9045_v0 }
  0x6b   : > { %563 = vst [vmem:[#allocation2 + $0x40] sm:$0xff] %v9045_v0 }
  0x6c   : > { %564 = vst [vmem:[#allocation2 + $0x48] sm:$0xff] %v9045_v0 }
  0x6d   : > { %565 = vst [vmem:[#allocation2 + $0x50] sm:$0xff] %v9045_v0 }
  0x6e   : > { %566 = vst [vmem:[#allocation2 + $0x58] sm:$0xff] %v9045_v0 }
  0x6f   : > { %567 = vst [vmem:[#allocation2 + $0x60] sm:$0xff] %v9045_v0 }
  0x70   : > { %568 = vst [vmem:[#allocation2 + $0x68] sm:$0xff] %v9045_v0 }
  0x71   : > { %569 = vst [vmem:[#allocation2 + $0x70] sm:$0xff] %v9045_v0 }
  0x72   : > { %570 = vst [vmem:[#allocation2 + $0x78] sm:$0xff] %v9045_v0 }
  0x73   : > { %571 = vst [vmem:[#allocation2 + $0x80] sm:$0xff] %v9045_v0 }
  0x74   : > { %572 = vst [vmem:[#allocation2 + $0x88] sm:$0xff] %v9045_v0 }
  0x75   : > { %573 = vst [vmem:[#allocation2 + $0x90] sm:$0xff] %v9045_v0 }
  0x76   : > { %574 = vst [vmem:[#allocation2 + $0x98] sm:$0xff] %v9045_v0 }
  0x77   : > { %575 = vst [vmem:[#allocation2 + $0xa0] sm:$0xff] %v9045_v0 }
  0x78   : > { %576 = vst [vmem:[#allocation2 + $0xa8] sm:$0xff] %v9045_v0 }
  0x79   : > { %577 = vst [vmem:[#allocation2 + $0xb0] sm:$0xff] %v9045_v0 }
  0x7a   : > { %578 = vst [vmem:[#allocation2 + $0xb8] sm:$0xff] %v9045_v0 }
  0x7b   : > { %579 = vst [vmem:[#allocation2 + $0xc0] sm:$0xff] %v9045_v0 }
  0x7c   : > { %580 = vst [vmem:[#allocation2 + $0xc8] sm:$0xff] %v9045_v0 }
  0x7d   : > { %581 = vst [vmem:[#allocation2 + $0xd0] sm:$0xff] %v9045_v0 }
  0x7e   : > { %582 = vst [vmem:[#allocation2 + $0xd8] sm:$0xff] %v9045_v0 }
  0x7f   : > { %583 = vst [vmem:[#allocation2 + $0xe0] sm:$0xff] %v9045_v0 }
  0x80   : > { %584 = vst [vmem:[#allocation2 + $0xe8] sm:$0xff] %v9045_v0 }
  0x81   : > { %585 = vst [vmem:[#allocation2 + $0xf0] sm:$0xff] %v9045_v0 }
  0x82   : > { %586 = vst [vmem:[#allocation2 + $0xf8] sm:$0xff] %v9045_v0 }
  0x83   : > { %587 = vst [vmem:[#allocation2 + $0x100] sm:$0xff] %v9045_v0 }
  0x84   : > { %588 = vst [vmem:[#allocation2 + $0x108] sm:$0xff] %v9045_v0 }
  0x85   : > { %589 = vst [vmem:[#allocation2 + $0x110] sm:$0xff] %v9045_v0 }
  0x86   : > { %590 = vst [vmem:[#allocation2 + $0x118] sm:$0xff] %v9045_v0 }
  0x87   : > { %591 = vst [vmem:[#allocation2 + $0x120] sm:$0xff] %v9045_v0 }
  0x88   : > { %592 = vst [vmem:[#allocation2 + $0x128] sm:$0xff] %v9045_v0 }
  0x89   : > { %593 = vst [vmem:[#allocation2 + $0x130] sm:$0xff] %v9045_v0 }
  0x8a   : > { %594 = vst [vmem:[#allocation2 + $0x138] sm:$0xff] %v9045_v0 }
  0x8b   : > { %595 = vst [vmem:[#allocation2 + $0x140] sm:$0xff] %v9045_v0 }
  0x8c PF: > { %s12968_s29 = sld [smem:[#allocation22_spill]] }
  0x92   : > { %p7656_p8 = scmp.ne.s32.totalorder %s12968_s29, 16 }
  0x94   : > { %599 = sbr.rel (%p7656_p8) target bundleno = 195 (0xc3), region = 104 }
  0x99   : > { %v9046_v1 = vmov 0.0  }
  0x9a   : > { %601 = vst [vmem:[#allocation2 + $0x290] sm:$0xff] %v9046_v1 }
  0x9b   : > { %602 = vst [vmem:[#allocation2 + $0x298] sm:$0xff] %v9046_v1 }
  0x9c   : > { %603 = vst [vmem:[#allocation2 + $0x2a0] sm:$0xff] %v9046_v1 }
  0x9d   : > { %604 = vst [vmem:[#allocation2 + $0x2a8] sm:$0xff] %v9046_v1 }
  0x9e   : > { %605 = vst [vmem:[#allocation2 + $0x2b0] sm:$0xff] %v9046_v1 }
  0x9f   : > { %606 = vst [vmem:[#allocation2 + $0x2b8] sm:$0xff] %v9046_v1 }
  0xa0   : > { %607 = vst [vmem:[#allocation2 + $0x2c0] sm:$0xff] %v9046_v1 }
  0xa1   : > { %608 = vst [vmem:[#allocation2 + $0x2c8] sm:$0xff] %v9046_v1 }
  0xa2   : > { %609 = vst [vmem:[#allocation2 + $0x2d0] sm:$0xff] %v9046_v1 }
  0xa3   : > { %610 = vst [vmem:[#allocation2 + $0x2d8] sm:$0xff] %v9046_v1 }
  0xa4   : > { %611 = vst [vmem:[#allocation2 + $0x2e0] sm:$0xff] %v9046_v1 }
  0xa5   : > { %612 = vst [vmem:[#allocation2 + $0x2e8] sm:$0xff] %v9046_v1 }
  0xa6   : > { %613 = vst [vmem:[#allocation2 + $0x2f0] sm:$0xff] %v9046_v1 }
  0xa7   : > { %614 = vst [vmem:[#allocation2 + $0x2f8] sm:$0xff] %v9046_v1 }
  0xa8   : > { %615 = vst [vmem:[#allocation2 + $0x300] sm:$0xff] %v9046_v1 }
  0xa9   : > { %616 = vst [vmem:[#allocation2 + $0x308] sm:$0xff] %v9046_v1 }
  0xaa   : > { %617 = vst [vmem:[#allocation2 + $0x310] sm:$0xff] %v9046_v1 }
  0xab   : > { %618 = vst [vmem:[#allocation2 + $0x318] sm:$0xff] %v9046_v1 }
  0xac   : > { %619 = vst [vmem:[#allocation2 + $0x320] sm:$0xff] %v9046_v1 }
  0xad   : > { %620 = vst [vmem:[#allocation2 + $0x328] sm:$0xff] %v9046_v1 }
  0xae   : > { %621 = vst [vmem:[#allocation2 + $0x330] sm:$0xff] %v9046_v1 }
  0xaf   : > { %622 = vst [vmem:[#allocation2 + $0x338] sm:$0xff] %v9046_v1 }
  0xb0   : > { %623 = vst [vmem:[#allocation2 + $0x340] sm:$0xff] %v9046_v1 }
  0xb1   : > { %624 = vst [vmem:[#allocation2 + $0x348] sm:$0xff] %v9046_v1 }
  0xb2   : > { %625 = vst [vmem:[#allocation2 + $0x350] sm:$0xff] %v9046_v1 }
  0xb3   : > { %626 = vst [vmem:[#allocation2 + $0x358] sm:$0xff] %v9046_v1 }
  0xb4   : > { %627 = vst [vmem:[#allocation2 + $0x360] sm:$0xff] %v9046_v1 }
  0xb5   : > { %628 = vst [vmem:[#allocation2 + $0x368] sm:$0xff] %v9046_v1 }
  0xb6   : > { %629 = vst [vmem:[#allocation2 + $0x370] sm:$0xff] %v9046_v1 }
  0xb7   : > { %630 = vst [vmem:[#allocation2 + $0x378] sm:$0xff] %v9046_v1 }
  0xb8   : > { %631 = vst [vmem:[#allocation2 + $0x380] sm:$0xff] %v9046_v1 }
  0xb9   : > { %632 = vst [vmem:[#allocation2 + $0x388] sm:$0xff] %v9046_v1 }
  0xba   : > { %633 = vst [vmem:[#allocation2 + $0x390] sm:$0xff] %v9046_v1 }
  0xbb   : > { %634 = vst [vmem:[#allocation2 + $0x398] sm:$0xff] %v9046_v1 }
  0xbc   : > { %635 = vst [vmem:[#allocation2 + $0x3a0] sm:$0xff] %v9046_v1 }
  0xbd   : > { %636 = vst [vmem:[#allocation2 + $0x3a8] sm:$0xff] %v9046_v1 }
  0xbe   : > { %637 = vst [vmem:[#allocation2 + $0x3b0] sm:$0xff] %v9046_v1 }
  0xbf   : > { %638 = vst [vmem:[#allocation2 + $0x3b8] sm:$0xff] %v9046_v1 }
  0xc0   : > { %639 = vst [vmem:[#allocation2 + $0x3c0] sm:$0xff] %v9046_v1 }
  0xc1   : > { %640 = vst [vmem:[#allocation2 + $0x3c8] sm:$0xff] %v9046_v1 }
  0xc2   : > { %641 = vst [vmem:[#allocation2 + $0x3d0] sm:$0xff] %v9046_v1 }
  0xc3 PF: > { %s12969_s0 = sld [smem:[#allocation22_spill]] }
  0xc9   : > { %p7657_p9 = scmp.ge.s32.totalorder %s12969_s0, 16 }
  0xca   : > { %s12970_s16 = sld [smem:[#allocation148_spill]] (!%p7657_p9) }
  0xcb   : > { %645 = sbr.rel (%p7657_p9) target bundleno = 473 (0x1d9), region = 108  ;;  %s12972_s24 = sld [smem:[#allocation22_spill]] (!%p7657_p9) }
  0xd0   : > { %v702_v2 = vld [vmem:[#allocation5 + $0x78] sm:$0xff]  ;;  %v9047_v3 = vmov 0   ;;  %s12971_s25 = smov %s12970_s16  ;;  %v701_v7 = vld [vmem:[#allocation5 + $0x70] sm:$0xff]  ;;  %v700_v8 = vld [vmem:[#allocation5 + $0x68] sm:$0xff] }
  0xd1   : > { %7940 = vset.pattern.permute.xlu2 %v9047_v3  ;;  %7939 = vset.pattern.permute.xlu1 %v9047_v3  ;;  %v982_v4 = vld [vmem:[%s12970_s16 + $0x20] sm:$0xff]  ;;  %v980_v5 = vld [vmem:[%s12971_s25 + $0x10] sm:$0xff]  ;;  %v699_v9 = vld [vmem:[#allocation5 + $0x60] sm:$0xff]  ;;  %s9318_s3 = sadd.s32 1, %s12972_s24 }
  0xd2   : > { %7938 = vset.pattern.permute.xlu0 %v9047_v3  ;;  %707 = vmatpush.msra.mxu0 %v702_v2  ;;  %v978_v6 = vld [vmem:[%s12971_s25] sm:$0xff]  ;;  %v983_v11 = vld [vmem:[%s12971_s25 + $0x28] sm:$0xff]  ;;  %v981_v12 = vld [vmem:[%s12971_s25 + $0x18] sm:$0xff]  ;;  %s1267_s5 = ssub.s32 0, %s9318_s3  ;;  %p1266_p10 = scmp.lt.s32.totalorder %s9318_s3, 0 }
  0xd3   : > { %7676 = vmatpush.msra.mxu1 %v702_v2  ;;  %7677 = vmatpush.msra.mxu2 %v702_v2  ;;  %v698_v10 = vld [vmem:[#allocation5 + $0x58] sm:$0xff]  ;;  %v979_v13 = vld [vmem:[%s12971_s25 + $0x8] sm:$0xff]  ;;  %v697_v14 = vld [vmem:[#allocation5 + $0x50] sm:$0xff]  ;;  %s7658_s7 = smin.u32 %s1267_s5, %s9318_s3 }
  0xd4   : > { %7678 = vmatpush.msra.mxu3 %v702_v2  ;;  %1041 = vperm.xlu2 %7940, %v982_v4   ;;  %v696_v15 = vld [vmem:[#allocation5 + $0x48] sm:$0xff]  ;;  %v695_v16 = vld [vmem:[#allocation5 + $0x40] sm:$0xff]  ;;  %v694_v17 = vld [vmem:[#allocation5 + $0x38] sm:$0xff]  ;;  %7944 = sdivrem.u32 %s7658_s7, 3 }
  0xd5   : > { %1031 = vperm.xlu1 %7939, %v980_v5   ;;  %1021 = vperm.xlu0 %7938, %v978_v6   ;;  %v986_v18 = vld [vmem:[%s12971_s25 + $0x40] sm:$0xff]  ;;  %v985_v19 = vld [vmem:[%s12971_s25 + $0x38] sm:$0xff]  ;;  %v984_v20 = vld [vmem:[%s12971_s25 + $0x30] sm:$0xff] }
  0xd6   : > { %708 = vmatpush.msra.mxu0 %v701_v7  ;;  %7679 = vmatpush.msra.mxu1 %v701_v7  ;;  %v693_v21 = vld [vmem:[#allocation5 + $0x30] sm:$0xff]  ;;  %v692_v22 = vld [vmem:[#allocation5 + $0x28] sm:$0xff]  ;;  %v691_v23 = vld [vmem:[#allocation5 + $0x20] sm:$0xff] }
  0xd7   : > { %7680 = vmatpush.msra.mxu2 %v701_v7  ;;  %7681 = vmatpush.msra.mxu3 %v701_v7  ;;  %v690_v24 = vld [vmem:[#allocation5 + $0x18] sm:$0xff]  ;;  %v989_v25 = vld [vmem:[%s12971_s25 + $0x58] sm:$0xff]  ;;  %v988_v26 = vld [vmem:[%s12971_s25 + $0x50] sm:$0xff] }
  0xd8   : > { %709 = vmatpush.msra.mxu0 %v700_v8  ;;  %7682 = vmatpush.msra.mxu1 %v700_v8  ;;  %v987_v27 = vld [vmem:[%s12971_s25 + $0x48] sm:$0xff]  ;;  %v689_v28 = vld [vmem:[#allocation5 + $0x10] sm:$0xff]  ;;  %v688_v29 = vld [vmem:[#allocation5 + $0x8] sm:$0xff] }
  0xd9   : > { %7683 = vmatpush.msra.mxu2 %v700_v8  ;;  %7684 = vmatpush.msra.mxu3 %v700_v8  ;;  %v687_v30 = vld [vmem:[#allocation5] sm:$0xff]  ;;  %v646_v31 = vld [vmem:[%s9252_s17] sm:$0xff]  ;;  %v665_v33 = vld [vmem:[%s9252_s17 + $0x98] sm:$0xff] }
  0xda   : > { %710 = vmatpush.msra.mxu0 %v699_v9  ;;  %7685 = vmatpush.msra.mxu1 %v699_v9  ;;  %v655_v32 = vld [vmem:[%s9252_s17 + $0x48] sm:$0xff]  ;;  %v676_v34 = vld [vmem:[%s9252_s17 + $0xf0] sm:$0xff]  ;;  %v666_v40 = vld [vmem:[%s9252_s17 + $0xa0] sm:$0xff] }
  0xdb   : > { %7686 = vmatpush.msra.mxu2 %v699_v9  ;;  %7687 = vmatpush.msra.mxu3 %v699_v9  ;;  %v992_v35 = vld [vmem:[%s12971_s25 + $0x70] sm:$0xff]  ;;  %v991_v36 = vld [vmem:[%s12971_s25 + $0x68] sm:$0xff]  ;;  %v990_v37 = vld [vmem:[%s12971_s25 + $0x60] sm:$0xff] }
  0xdc   : > { %711 = vmatpush.msra.mxu0 %v698_v10  ;;  %7688 = vmatpush.msra.mxu1 %v698_v10  ;;  %v647_v38 = vld [vmem:[%s9252_s17 + $0x8] sm:$0xff]  ;;  %v656_v39 = vld [vmem:[%s9252_s17 + $0x50] sm:$0xff]  ;;  %v677_v41 = vld [vmem:[%s9252_s17 + $0xf8] sm:$0xff] }
  0xdd   : > { %7689 = vmatpush.msra.mxu2 %v698_v10  ;;  %7690 = vmatpush.msra.mxu3 %v698_v10  ;;  %s7945_s0 = spop.drf %7944  ;;  %v995_v42 = vld [vmem:[%s12971_s25 + $0x88] sm:$0xff]  ;;  %v994_v43 = vld [vmem:[%s12971_s25 + $0x80] sm:$0xff]  ;;  %v993_v44 = vld [vmem:[%s12971_s25 + $0x78] sm:$0xff] }
  0xde   : > { %1046 = vperm.xlu2 %7940, %v983_v11   ;;  %1036 = vperm.xlu1 %7939, %v981_v12   ;;  %v648_v45 = vld [vmem:[%s9252_s17 + $0x10] sm:$0xff]  ;;  %v657_v46 = vld [vmem:[%s9252_s17 + $0x58] sm:$0xff]  ;;  %v667_v47 = vld [vmem:[%s9252_s17 + $0xa8] sm:$0xff] }
  0xdf   : > { %1026 = vperm.xlu0 %7938, %v979_v13   ;;  %712 = vmatpush.msra.mxu0 %v697_v14  ;;  %v678_v48 = vld [vmem:[%s9252_s17 + $0x100] sm:$0xff]  ;;  %v996_v51 = vld [vmem:[%s12971_s25 + $0x90] sm:$0xff]  ;;  %v679_v55 = vld [vmem:[%s9252_s17 + $0x108] sm:$0xff] }
  0xe0   : > { %7691 = vmatpush.msra.mxu1 %v697_v14  ;;  %7692 = vmatpush.msra.mxu2 %v697_v14  ;;  %v998_v49 = vld [vmem:[%s12971_s25 + $0xa0] sm:$0xff]  ;;  %v997_v50 = vld [vmem:[%s12971_s25 + $0x98] sm:$0xff]  ;;  %v668_v54 = vld [vmem:[%s9252_s17 + $0xb0] sm:$0xff] }
  0xe1   : > { %7693 = vmatpush.msra.mxu3 %v697_v14  ;;  %713 = vmatpush.msra.mxu0 %v696_v15  ;;  %v649_v52 = vld [vmem:[%s9252_s17 + $0x18] sm:$0xff]  ;;  %v658_v53 = vld [vmem:[%s9252_s17 + $0x60] sm:$0xff]  ;;  %v999_v58 = vld [vmem:[%s12971_s25 + $0xa8] sm:$0xff] }
  0xe2   : > { %7694 = vmatpush.msra.mxu1 %v696_v15  ;;  %7695 = vmatpush.msra.mxu2 %v696_v15  ;;  %v1001_v56 = vld [vmem:[%s12971_s25 + $0xb8] sm:$0xff]  ;;  %v1000_v57 = vld [vmem:[%s12971_s25 + $0xb0] sm:$0xff]  ;;  %v659_v60 = vld [vmem:[%s9252_s17 + $0x68] sm:$0xff] }
  0xe3   : > { %7696 = vmatpush.msra.mxu3 %v696_v15  ;;  %714 = vmatpush.msra.mxu0 %v695_v16  ;;  %v650_v59 = vld [vmem:[%s9252_s17 + $0x20] sm:$0xff]  ;;  %v669_v61 = vld [vmem:[%s9252_s17 + $0xb8] sm:$0xff]  ;;  %v680_v62 = vld [vmem:[%s9252_s17 + $0x110] sm:$0xff] }
  0xe4   : > { %7697 = vmatpush.msra.mxu1 %v695_v16  ;;  %7698 = vmatpush.msra.mxu2 %v695_v16  ;;  %v1004_v63 = vld [vmem:[%s12971_s25 + $0xd0] sm:$0xff]  ;;  %v1003_v0 = vld [vmem:[%s12971_s25 + $0xc8] sm:$0xff]  ;;  %v1002_v1 = vld [vmem:[%s12971_s25 + $0xc0] sm:$0xff] }
  0xe5   : > { %7699 = vmatpush.msra.mxu3 %v695_v16  ;;  %715 = vmatpush.msra.mxu0 %v694_v17  ;;  %v651_v2 = vld [vmem:[%s9252_s17 + $0x28] sm:$0xff]  ;;  %v660_v3 = vld [vmem:[%s9252_s17 + $0x70] sm:$0xff]  ;;  %v670_v4 = vld [vmem:[%s9252_s17 + $0xc0] sm:$0xff] }
  0xe6   : > { %7700 = vmatpush.msra.mxu1 %v694_v17  ;;  %7701 = vmatpush.msra.mxu2 %v694_v17  ;;  %v681_v5 = vld [vmem:[%s9252_s17 + $0x118] sm:$0xff]  ;;  %v1007_v6 = vld [vmem:[%s12971_s25 + $0xe8] sm:$0xff]  ;;  %v1006_v7 = vld [vmem:[%s12971_s25 + $0xe0] sm:$0xff] }
  0xe7   : > { %7702 = vmatpush.msra.mxu3 %v694_v17  ;;  %1061 = vperm.xlu2 %7940, %v986_v18   ;;  %v1005_v8 = vld [vmem:[%s12971_s25 + $0xd8] sm:$0xff]  ;;  %v652_v9 = vld [vmem:[%s9252_s17 + $0x30] sm:$0xff]  ;;  %v671_v11 = vld [vmem:[%s9252_s17 + $0xc8] sm:$0xff] }
  0xe8   : > { %1056 = vperm.xlu1 %7939, %v985_v19   ;;  %1051 = vperm.xlu0 %7938, %v984_v20   ;;  %v661_v10 = vld [vmem:[%s9252_s17 + $0x78] sm:$0xff]  ;;  %v682_v12 = vld [vmem:[%s9252_s17 + $0x120] sm:$0xff]  ;;  %v672_v18 = vld [vmem:[%s9252_s17 + $0xd0] sm:$0xff] }
  0xe9   : > { %716 = vmatpush.msra.mxu0 %v693_v21  ;;  %7703 = vmatpush.msra.mxu1 %v693_v21  ;;  %v1010_v13 = vld [vmem:[%s12971_s25 + $0x100] sm:$0xff]  ;;  %v1009_v14 = vld [vmem:[%s12971_s25 + $0xf8] sm:$0xff]  ;;  %v1008_v15 = vld [vmem:[%s12971_s25 + $0xf0] sm:$0xff] }
  0xea   : > { %7704 = vmatpush.msra.mxu2 %v693_v21  ;;  %7705 = vmatpush.msra.mxu3 %v693_v21  ;;  %v653_v16 = vld [vmem:[%s9252_s17 + $0x38] sm:$0xff]  ;;  %v662_v17 = vld [vmem:[%s9252_s17 + $0x80] sm:$0xff]  ;;  %v683_v20 = vld [vmem:[%s9252_s17 + $0x128] sm:$0xff] }
  0xeb   : > { %717 = vmatpush.msra.mxu0 %v692_v22  ;;  %7706 = vmatpush.msra.mxu1 %v692_v22  ;;  %v1013_v21 = vld [vmem:[%s12971_s25 + $0x118] sm:$0xff] }
  0xec   : > { %7707 = vmatpush.msra.mxu2 %v692_v22  ;;  %7708 = vmatpush.msra.mxu3 %v692_v22  ;;  %v1012_v22 = vld [vmem:[%s12971_s25 + $0x110] sm:$0xff] }
  0xed   : > { %718 = vmatpush.msra.mxu0 %v691_v23  ;;  %7709 = vmatpush.msra.mxu1 %v691_v23 }
  0xee   : > { %7710 = vmatpush.msra.mxu2 %v691_v23  ;;  %7711 = vmatpush.msra.mxu3 %v691_v23  ;;  %v1011_v23 = vld [vmem:[%s12971_s25 + $0x108] sm:$0xff] }
  0xef   : > { %719 = vmatpush.msra.mxu0 %v690_v24  ;;  %7712 = vmatpush.msra.mxu1 %v690_v24 }
  0xf0   : > { %7713 = vmatpush.msra.mxu2 %v690_v24  ;;  %7714 = vmatpush.msra.mxu3 %v690_v24  ;;  %v654_v24 = vld [vmem:[%s9252_s17 + $0x40] sm:$0xff] }
  0xf1   : > { %1076 = vperm.xlu2 %7940, %v989_v25   ;;  %1071 = vperm.xlu1 %7939, %v988_v26   ;;  %v663_v25 = vld [vmem:[%s9252_s17 + $0x88] sm:$0xff]  ;;  %v673_v26 = vld [vmem:[%s9252_s17 + $0xd8] sm:$0xff] }
  0xf2   : > { %1066 = vperm.xlu0 %7938, %v987_v27   ;;  %720 = vmatpush.msra.mxu0 %v689_v28  ;;  %v684_v27 = vld [vmem:[%s9252_s17 + $0x130] sm:$0xff] }
  0xf3   : > { %7715 = vmatpush.msra.mxu1 %v689_v28  ;;  %7716 = vmatpush.msra.mxu2 %v689_v28 }
  0xf4   : > { %7717 = vmatpush.msra.mxu3 %v689_v28  ;;  %721 = vmatpush.msra.mxu0 %v688_v29  ;;  %v1016_v28 = vld [vmem:[%s12971_s25 + $0x130] sm:$0xff] }
  0xf5   : > { %7718 = vmatpush.msra.mxu1 %v688_v29  ;;  %7719 = vmatpush.msra.mxu2 %v688_v29 }
  0xf6   : > { %7720 = vmatpush.msra.mxu3 %v688_v29  ;;  %722 = vmatpush.msra.mxu0 %v687_v30  ;;  %v1015_v29 = vld [vmem:[%s12971_s25 + $0x128] sm:$0xff] }
  0xf7   : > { %7721 = vmatpush.msra.mxu1 %v687_v30  ;;  %7722 = vmatpush.msra.mxu2 %v687_v30 }
  0xf8   : > { %7723 = vmatpush.msra.mxu3 %v687_v30  ;;  %723 = vmatmul.f32.vlgmr.msra.gmra.mxu0 %v646_v31  ;;  %v1014_v30 = vld [vmem:[%s12971_s25 + $0x120] sm:$0xff] }
  0xf9   : > { %750 = vmatmul.f32.vlgmr.msra.gmra.mxu1 %v655_v32  ;;  %780 = vmatmul.f32.vlgmr.msra.gmra.mxu2 %v665_v33  ;;  %v664_v32 = vld [vmem:[%s9252_s17 + $0x90] sm:$0xff]  ;;  %v674_v33 = vld [vmem:[%s9252_s17 + $0xe0] sm:$0xff] }
  0xfa   : > { %813 = vmatmul.f32.vlgmr.msra.gmra.mxu3 %v676_v34  ;;  %1091 = vperm.xlu2 %7940, %v992_v35   ;;  %v685_v34 = vld [vmem:[%s9252_s17 + $0x138] sm:$0xff]  ;;  %v1018_v35 = vld [vmem:[%s12971_s25 + $0x140] sm:$0xff] }
  0xfb   : > { %1086 = vperm.xlu1 %7939, %v991_v36   ;;  %1081 = vperm.xlu0 %7938, %v990_v37   ;;  %v1017_v36 = vld [vmem:[%s12971_s25 + $0x138] sm:$0xff] }
 0x100   : > { %726 = vmatmul.f32.gmra.mxu0 %v647_v38  ;;  %v675_v38 = vld [vmem:[%s9252_s17 + $0xe8] sm:$0xff] }
 0x101   : > { %753 = vmatmul.f32.gmra.mxu1 %v656_v39  ;;  %783 = vmatmul.f32.gmra.mxu2 %v666_v40  ;;  %v686_v39 = vld [vmem:[%s9252_s17 + $0x140] sm:$0xff]  ;;  %s7946_s17 = spop.drf %7944 }
 0x102   : > { %816 = vmatmul.f32.gmra.mxu3 %v677_v41  ;;  %1106 = vperm.xlu2 %7940, %v995_v42   ;;  %s1271_s12 = ssub.s32 0, %s7946_s17 }
 0x103   : > { %1101 = vperm.xlu1 %7939, %v994_v43   ;;  %1096 = vperm.xlu0 %7938, %v993_v44   ;;  %s13466_s12 = smov (!%p1266_p10, %s1271_s12), %s7946_s17 }
 0x104   : > { %p7660_p11 = scmp.lt.s32.totalorder %s13466_s12, 0  ;;  %s1277_s30 = sadd.s32 3, %s13466_s12 }
 0x106   : > { %s13468_s30 = smov (!%p7660_p11, %s1277_s30), %s13466_s12 }
 0x107   : > { %s1279_s3 = smul.u32 328, %s13468_s30 }
 0x108   : > { %729 = vmatmul.f32.gmra.mxu0 %v648_v45 }
 0x109   : > { %756 = vmatmul.f32.gmra.mxu1 %v657_v46  ;;  %786 = vmatmul.f32.gmra.mxu2 %v667_v47  ;;  %s9515_s29 = scalar_lea.vmem [#allocation2], %s1279_s3 }
 0x10a   : > { %819 = vmatmul.f32.gmra.mxu3 %v678_v48  ;;  %1121 = vperm.xlu2 %7940, %v998_v49  }
 0x10b   : > { %1116 = vperm.xlu1 %7939, %v997_v50   ;;  %1111 = vperm.xlu0 %7938, %v996_v51  }
 0x110   : > { %732 = vmatmul.f32.gmra.mxu0 %v649_v52 }
 0x111   : > { %759 = vmatmul.f32.gmra.mxu1 %v658_v53  ;;  %789 = vmatmul.f32.gmra.mxu2 %v668_v54  ;;  %v9490_v54 = vld [vmem:[#allocation7] ss:$0 sm:$0xff] }
 0x112   : > { %822 = vmatmul.f32.gmra.mxu3 %v679_v55  ;;  %1136 = vperm.xlu2 %7940, %v1001_v56  }
 0x113   : > { %1131 = vperm.xlu1 %7939, %v1000_v57   ;;  %1126 = vperm.xlu0 %7938, %v999_v58  }
 0x118   : > { %735 = vmatmul.f32.gmra.mxu0 %v650_v59 }
 0x119   : > { %762 = vmatmul.f32.gmra.mxu1 %v659_v60  ;;  %792 = vmatmul.f32.gmra.mxu2 %v669_v61  ;;  %v9499_v61 = vld [vmem:[#allocation8] ss:$0 sm:$0xff] }
 0x11a   : > { %825 = vmatmul.f32.gmra.mxu3 %v680_v62  ;;  %1151 = vperm.xlu2 %7940, %v1004_v63  }
 0x11b   : > { %1146 = vperm.xlu1 %7939, %v1003_v0   ;;  %1141 = vperm.xlu0 %7938, %v1002_v1   ;;  %v9502_v0 = vld [vmem:[#allocation10] ss:$0 sm:$0xff] }
 0x120   : > { %738 = vmatmul.f32.gmra.mxu0 %v651_v2 }
 0x121   : > { %765 = vmatmul.f32.gmra.mxu1 %v660_v3  ;;  %795 = vmatmul.f32.gmra.mxu2 %v670_v4 }
 0x122   : > { %828 = vmatmul.f32.gmra.mxu3 %v681_v5  ;;  %1166 = vperm.xlu2 %7940, %v1007_v6  }
 0x123   : > { %1161 = vperm.xlu1 %7939, %v1006_v7   ;;  %1156 = vperm.xlu0 %7938, %v1005_v8  }
 0x128   : > { %741 = vmatmul.f32.gmra.mxu0 %v652_v9 }
 0x129   : > { %768 = vmatmul.f32.gmra.mxu1 %v661_v10  ;;  %798 = vmatmul.f32.gmra.mxu2 %v671_v11 }
 0x12a   : > { %831 = vmatmul.f32.gmra.mxu3 %v682_v12  ;;  %1181 = vperm.xlu2 %7940, %v1010_v13  }
 0x12b   : > { %1176 = vperm.xlu1 %7939, %v1009_v14   ;;  %1171 = vperm.xlu0 %7938, %v1008_v15  }
 0x12e   : > { %v9425_v19 = vpop.permute.xlu2 %1041 }
 0x130   : > { %744 = vmatmul.f32.gmra.mxu0 %v653_v16 }
 0x131   : > { %771 = vmatmul.f32.gmra.mxu1 %v662_v17  ;;  %801 = vmatmul.f32.gmra.mxu2 %v672_v18 }
 0x132   : > { %834 = vmatmul.f32.gmra.mxu3 %v683_v20  ;;  %1196 = vperm.xlu2 %7940, %v1013_v21  }
 0x133   : > { %1191 = vperm.xlu1 %7939, %v1012_v22   ;;  %1186 = vperm.xlu0 %7938, %v1011_v23  }
 0x138   : > { %747 = vmatmul.f32.gmra.mxu0 %v654_v24  ;;  %v9450_v31 = vpop.permute.xlu2 %1046 }
 0x139   : > { %774 = vmatmul.f32.gmra.mxu1 %v663_v25  ;;  %804 = vmatmul.f32.gmra.mxu2 %v673_v26 }
 0x13a   : > { %837 = vmatmul.f32.gmra.mxu3 %v684_v27  ;;  %1211 = vperm.xlu2 %7940, %v1016_v28  }
 0x13b   : > { %1206 = vperm.xlu1 %7939, %v1015_v29   ;;  %1201 = vperm.xlu0 %7938, %v1014_v30  }
 0x141   : > { %777 = vmatmul.f32.gmra.mxu1 %v664_v32  ;;  %807 = vmatmul.f32.gmra.mxu2 %v674_v33  ;;  %v9461_v37 = vpop.permute.xlu2 %1061 }
 0x142   : > { %840 = vmatmul.f32.gmra.mxu3 %v685_v34 }
 0x143   : > { %1221 = vperm.xlu1 %7939, %v1018_v35   ;;  %1216 = vperm.xlu0 %7938, %v1017_v36  }
 0x147   : > { %v9465_v40 = vpop.permute.xlu1 %1031  ;;  %v1022_v41 = vpop.permute.xlu0 %1021 }
 0x149   : > { %810 = vmatmul.f32.gmra.mxu2 %v675_v38 }
 0x14a   : > { %843 = vmatmul.f32.gmra.mxu3 %v686_v39 }
 0x14b   : > { %v9467_v42 = vpop.permute.xlu2 %1076 }
 0x150   : > { %v9469_v43 = vpop.permute.xlu1 %1036 }
 0x151   : > { %v9471_v44 = vpop.permute.xlu0 %1026 }
 0x154   : > { %v9473_v45 = vpop.permute.xlu2 %1091 }
 0x15a   : > { %v9475_v46 = vpop.permute.xlu1 %1056  ;;  %v9477_v47 = vpop.permute.xlu0 %1051 }
 0x15c   : > { %v9479_v48 = vpop.permute.xlu2 %1106 }
 0x163   : > { %v9481_v49 = vpop.permute.xlu1 %1071 }
 0x164   : > { %v1067_v50 = vpop.permute.xlu0 %1066  ;;  %v9483_v51 = vpop.permute.xlu2 %1121 }
 0x16c   : > { %v9492_v55 = vpop.permute.xlu2 %1136 }
 0x16d   : > { %v9486_v52 = vpop.permute.xlu1 %1086  ;;  %v9488_v53 = vpop.permute.xlu0 %1081 }
 0x174   : > { %v9512_v17 = vpop.permute.xlu2 %1151 }
 0x175   : > { %v9494_v56 = vpop.permute.xlu1 %1101  ;;  %v9496_v57 = vpop.permute.xlu0 %1096 }
 0x176   : > { %v724_v58 = vpop.f32.mrf.mxu0  ;;  %v751_v59 = vpop.f32.mrf.mxu1 }
 0x177   : > { %v725_v60 = vadd.f32 %v9490_v54, %v724_v58  ;;  %v752_v62 = vadd.f32 %v9490_v54, %v751_v59 }
 0x179   : > { %v847_v63 = vmax.f32 %v725_v60, 0.0  ;;  %v856_v1 = vmax.f32 %v752_v62, 0.0 }
 0x17b   : > { %v892_v2 = vmul.f32 %v9499_v61, %v847_v63  ;;  %v901_v3 = vmul.f32 %v9499_v61, %v856_v1 }
 0x17c   : > { %v781_v4 = vpop.f32.mrf.mxu2  ;;  %v9535_v62 = vpop.permute.xlu2 %1166 }
 0x17d   : > { %v937_v5 = vadd.f32 %v9502_v0, %v892_v2  ;;  %v946_v6 = vadd.f32 %v9502_v0, %v901_v3  ;;  %v782_v7 = vadd.f32 %v9490_v54, %v781_v4  ;;  %v814_v8 = vpop.f32.mrf.mxu3  ;;  %v1117_v9 = vpop.permute.xlu1 %1116 }
 0x17e   : > { %v9509_v10 = vpop.permute.xlu0 %1111  ;;  %v727_v11 = vpop.f32.mrf.mxu0 }
 0x17f   : > { %v1224_v12 = vmul.f32 %v1022_v41, %v937_v5  ;;  %v1233_v13 = vmul.f32 %v1067_v50, %v946_v6  ;;  %v866_v14 = vmax.f32 %v782_v7, 0.0  ;;  %v728_v15 = vadd.f32 %v9490_v54, %v727_v11  ;;  %v754_v16 = vpop.f32.mrf.mxu1 }
 0x180   : > { %v755_v18 = vadd.f32 %v9490_v54, %v754_v16 }
 0x181   : > { %1281 = vst [vmem:[%s9515_s29] sm:$0xff] %v1224_v12  ;;  %v911_v20 = vmul.f32 %v9499_v61, %v866_v14  ;;  %v848_v21 = vmax.f32 %v728_v15, 0.0  ;;  %v815_v14 = vadd.f32 %v9490_v54, %v814_v8 }
 0x182   : > { %1290 = vst [vmem:[%s9515_s29 + $0x48] sm:$0xff] %v1233_v13  ;;  %v857_v22 = vmax.f32 %v755_v18, 0.0 }
 0x183   : > { %v956_v23 = vadd.f32 %v9502_v0, %v911_v20  ;;  %v893_v24 = vmul.f32 %v9499_v61, %v848_v21 }
 0x184   : > { %v902_v25 = vmul.f32 %v9499_v61, %v857_v22  ;;  %v784_v26 = vpop.f32.mrf.mxu2 }
 0x185   : > { %v1243_v27 = vmul.f32 %v1117_v9, %v956_v23  ;;  %v938_v28 = vadd.f32 %v9502_v0, %v893_v24  ;;  %v785_v29 = vadd.f32 %v9490_v54, %v784_v26  ;;  %v817_v30 = vpop.f32.mrf.mxu3  ;;  %v9525_v32 = vpop.permute.xlu1 %1131 }
 0x186   : > { %v947_v33 = vadd.f32 %v9502_v0, %v902_v25  ;;  %v1127_v34 = vpop.permute.xlu0 %1126  ;;  %v730_v35 = vpop.f32.mrf.mxu0  ;;  %v818_v20 = vadd.f32 %v9490_v54, %v817_v30 }
 0x187   : > { %1300 = vst [vmem:[%s9515_s29 + $0x98] sm:$0xff] %v1243_v27  ;;  %v1225_v36 = vmul.f32 %v9471_v44, %v938_v28  ;;  %v867_v38 = vmax.f32 %v785_v29, 0.0  ;;  %v731_v39 = vadd.f32 %v9490_v54, %v730_v35  ;;  %v757_v41 = vpop.f32.mrf.mxu1  ;;  %v877_v28 = vmax.f32 %v815_v14, 0.0  ;;  %v1182_v30 = vpop.permute.xlu2 %1181 }
 0x188   : > { %v1234_v50 = vmul.f32 %v9481_v49, %v947_v33  ;;  %v758_v58 = vadd.f32 %v9490_v54, %v757_v41  ;;  %v878_v29 = vmax.f32 %v818_v20, 0.0 }
 0x189   : > { %1282 = vst [vmem:[%s9515_s29 + $0x8] sm:$0xff] %v1225_v36  ;;  %v912_v59 = vmul.f32 %v9499_v61, %v867_v38  ;;  %v849_v60 = vmax.f32 %v731_v39, 0.0 }
 0x18a   : > { %1291 = vst [vmem:[%s9515_s29 + $0x50] sm:$0xff] %v1234_v50  ;;  %v858_v63 = vmax.f32 %v758_v58, 0.0 }
 0x18b   : > { %v957_v1 = vadd.f32 %v9502_v0, %v912_v59  ;;  %v894_v44 = vmul.f32 %v9499_v61, %v849_v60 }
 0x18c   : > { %v903_v2 = vmul.f32 %v9499_v61, %v858_v63  ;;  %v787_v3 = vpop.f32.mrf.mxu2 }
 0x18d   : > { %v1244_v49 = vmul.f32 %v9483_v51, %v957_v1  ;;  %v939_v4 = vadd.f32 %v9502_v0, %v894_v44  ;;  %v788_v5 = vadd.f32 %v9490_v54, %v787_v3  ;;  %v820_v6 = vpop.f32.mrf.mxu3  ;;  %v9544_v7 = vpop.permute.xlu1 %1146  ;;  %v922_v3 = vmul.f32 %v9499_v61, %v877_v28 }
 0x18e   : > { %v948_v9 = vadd.f32 %v9502_v0, %v903_v2  ;;  %v821_v11 = vadd.f32 %v9490_v54, %v820_v6  ;;  %v9548_v12 = vpop.permute.xlu0 %1141  ;;  %v733_v13 = vpop.f32.mrf.mxu0 }
 0x18f   : > { %1301 = vst [vmem:[%s9515_s29 + $0xa0] sm:$0xff] %v1244_v49  ;;  %v1226_v51 = vmul.f32 %v9465_v40, %v939_v4  ;;  %v868_v15 = vmax.f32 %v788_v5, 0.0  ;;  %v734_v16 = vadd.f32 %v9490_v54, %v733_v13  ;;  %v760_v18 = vpop.f32.mrf.mxu1  ;;  %v923_v49 = vmul.f32 %v9499_v61, %v878_v29 }
 0x190   : > { %v1235_v21 = vmul.f32 %v9467_v42, %v948_v9  ;;  %v879_v22 = vmax.f32 %v821_v11, 0.0  ;;  %v761_v23 = vadd.f32 %v9490_v54, %v760_v18 }
 0x191   : > { %1283 = vst [vmem:[%s9515_s29 + $0x10] sm:$0xff] %v1226_v51  ;;  %v913_v24 = vmul.f32 %v9499_v61, %v868_v15  ;;  %v850_v25 = vmax.f32 %v734_v16, 0.0  ;;  %v967_v16 = vadd.f32 %v9502_v0, %v922_v3 }
 0x192   : > { %1292 = vst [vmem:[%s9515_s29 + $0x58] sm:$0xff] %v1235_v21  ;;  %v924_v8 = vmul.f32 %v9499_v61, %v879_v22  ;;  %v859_v26 = vmax.f32 %v761_v23, 0.0 }
 0x193   : > { %v958_v40 = vadd.f32 %v9502_v0, %v913_v24  ;;  %v895_v27 = vmul.f32 %v9499_v61, %v850_v25 }
 0x194   : > { %v969_v42 = vadd.f32 %v9502_v0, %v924_v8  ;;  %v904_v33 = vmul.f32 %v9499_v61, %v859_v26  ;;  %v790_v35 = vpop.f32.mrf.mxu2 }
 0x195   : > { %v1245_v36 = vmul.f32 %v1127_v34, %v958_v40  ;;  %v940_v38 = vadd.f32 %v9502_v0, %v895_v27  ;;  %v791_v39 = vadd.f32 %v9490_v54, %v790_v35  ;;  %v823_v41 = vpop.f32.mrf.mxu3  ;;  %v9567_v50 = vpop.permute.xlu1 %1161 }
 0x196   : > { %v1256_v58 = vmul.f32 %v1182_v30, %v969_v42  ;;  %v949_v59 = vadd.f32 %v9502_v0, %v904_v33  ;;  %v9570_v60 = vpop.permute.xlu0 %1156  ;;  %v736_v63 = vpop.f32.mrf.mxu0  ;;  %v824_v9 = vadd.f32 %v9490_v54, %v823_v41 }
 0x197   : > { %1302 = vst [vmem:[%s9515_s29 + $0xa8] sm:$0xff] %v1245_v36  ;;  %v1227_v1 = vmul.f32 %v9469_v43, %v940_v38  ;;  %v869_v34 = vmax.f32 %v791_v39, 0.0  ;;  %v737_v44 = vadd.f32 %v9490_v54, %v736_v63  ;;  %v763_v2 = vpop.f32.mrf.mxu1 }
 0x198   : > { %1313 = vst [vmem:[%s9515_s29 + $0x100] sm:$0xff] %v1256_v58  ;;  %v1236_v4 = vmul.f32 %v9488_v53, %v949_v59  ;;  %v764_v5 = vadd.f32 %v9490_v54, %v763_v2  ;;  %v968_v53 = vadd.f32 %v9502_v0, %v923_v49  ;;  %v880_v20 = vmax.f32 %v824_v9, 0.0 }
 0x199   : > { %1284 = vst [vmem:[%s9515_s29 + $0x18] sm:$0xff] %v1227_v1  ;;  %v914_v6 = vmul.f32 %v9499_v61, %v869_v34  ;;  %v851_v11 = vmax.f32 %v737_v44, 0.0 }
 0x19a   : > { %1293 = vst [vmem:[%s9515_s29 + $0x60] sm:$0xff] %v1236_v4  ;;  %v860_v43 = vmax.f32 %v764_v5, 0.0  ;;  %v925_v38 = vmul.f32 %v9499_v61, %v880_v20 }
 0x19b   : > { %v959_v13 = vadd.f32 %v9502_v0, %v914_v6  ;;  %v896_v14 = vmul.f32 %v9499_v61, %v851_v11 }
 0x19c   : > { %v905_v51 = vmul.f32 %v9499_v61, %v860_v43  ;;  %v793_v15 = vpop.f32.mrf.mxu2  ;;  %v970_v5 = vadd.f32 %v9502_v0, %v925_v38 }
 0x19d   : > { %v1246_v18 = vmul.f32 %v9525_v32, %v959_v13  ;;  %v941_v21 = vadd.f32 %v9502_v0, %v896_v14  ;;  %v794_v22 = vadd.f32 %v9490_v54, %v793_v15  ;;  %v826_v23 = vpop.f32.mrf.mxu3  ;;  %v1177_v24 = vpop.permute.xlu1 %1176 }
 0x19e   : > { %v950_v25 = vadd.f32 %v9502_v0, %v905_v51  ;;  %v827_v8 = vadd.f32 %v9490_v54, %v826_v23  ;;  %v1255_v26 = vmul.f32 %v1177_v24, %v968_v53  ;;  %v1172_v40 = vpop.permute.xlu0 %1171  ;;  %v739_v27 = vpop.f32.mrf.mxu0 }
 0x19f   : > { %1303 = vst [vmem:[%s9515_s29 + $0xb0] sm:$0xff] %v1246_v18  ;;  %v1228_v32 = vmul.f32 %v9425_v19, %v941_v21  ;;  %v870_v28 = vmax.f32 %v794_v22, 0.0  ;;  %v1254_v29 = vmul.f32 %v1172_v40, %v967_v16  ;;  %v740_v30 = vadd.f32 %v9490_v54, %v739_v27  ;;  %v766_v42 = vpop.f32.mrf.mxu1  ;;  %v1197_v40 = vpop.permute.xlu2 %1196 }
 0x1a0   : > { %v1237_v33 = vmul.f32 %v9486_v52, %v950_v25  ;;  %v881_v35 = vmax.f32 %v827_v8, 0.0  ;;  %1312 = vst [vmem:[%s9515_s29 + $0xf8] sm:$0xff] %v1255_v26  ;;  %v767_v36 = vadd.f32 %v9490_v54, %v766_v42 }
 0x1a1   : > { %1285 = vst [vmem:[%s9515_s29 + $0x20] sm:$0xff] %v1228_v32  ;;  %v915_v39 = vmul.f32 %v9499_v61, %v870_v28  ;;  %v852_v41 = vmax.f32 %v740_v30, 0.0 }
 0x1a2   : > { %1294 = vst [vmem:[%s9515_s29 + $0x68] sm:$0xff] %v1237_v33  ;;  %v926_v19 = vmul.f32 %v9499_v61, %v881_v35  ;;  %v861_v58 = vmax.f32 %v767_v36, 0.0 }
 0x1a3   : > { %v960_v59 = vadd.f32 %v9502_v0, %v915_v39  ;;  %1311 = vst [vmem:[%s9515_s29 + $0xf0] sm:$0xff] %v1254_v29  ;;  %v897_v52 = vmul.f32 %v9499_v61, %v852_v41 }
 0x1a4   : > { %v906_v63 = vmul.f32 %v9499_v61, %v861_v58  ;;  %v796_v1 = vpop.f32.mrf.mxu2  ;;  %v971_v34 = vadd.f32 %v9502_v0, %v926_v19 }
 0x1a5   : > { %v1247_v44 = vmul.f32 %v9492_v55, %v960_v59  ;;  %v942_v2 = vadd.f32 %v9502_v0, %v897_v52  ;;  %v797_v3 = vadd.f32 %v9490_v54, %v796_v1  ;;  %v829_v49 = vpop.f32.mrf.mxu3  ;;  %v1192_v4 = vpop.permute.xlu1 %1191 }
 0x1a6   : > { %v951_v6 = vadd.f32 %v9502_v0, %v906_v63  ;;  %v830_v9 = vadd.f32 %v9490_v54, %v829_v49  ;;  %v1258_v11 = vmul.f32 %v1192_v4, %v971_v34  ;;  %v1187_v43 = vpop.permute.xlu0 %1186  ;;  %v742_v13 = vpop.f32.mrf.mxu0 }
 0x1a7   : > { %1304 = vst [vmem:[%s9515_s29 + $0xb8] sm:$0xff] %v1247_v44  ;;  %v1229_v55 = vmul.f32 %v9450_v31, %v942_v2  ;;  %v871_v14 = vmax.f32 %v797_v3, 0.0  ;;  %v1257_v51 = vmul.f32 %v1187_v43, %v970_v5  ;;  %v743_v15 = vadd.f32 %v9490_v54, %v742_v13  ;;  %v769_v53 = vpop.f32.mrf.mxu1 }
 0x1a8   : > { %v1238_v16 = vmul.f32 %v9473_v45, %v951_v6  ;;  %v882_v18 = vmax.f32 %v830_v9, 0.0  ;;  %1315 = vst [vmem:[%s9515_s29 + $0x110] sm:$0xff] %v1258_v11  ;;  %v770_v20 = vadd.f32 %v9490_v54, %v769_v53 }
 0x1a9   : > { %1286 = vst [vmem:[%s9515_s29 + $0x28] sm:$0xff] %v1229_v55  ;;  %v916_v21 = vmul.f32 %v9499_v61, %v871_v14  ;;  %v853_v22 = vmax.f32 %v743_v15, 0.0 }
 0x1aa   : > { %1295 = vst [vmem:[%s9515_s29 + $0x70] sm:$0xff] %v1238_v16  ;;  %v927_v23 = vmul.f32 %v9499_v61, %v882_v18  ;;  %v862_v31 = vmax.f32 %v770_v20, 0.0 }
 0x1ab   : > { %v961_v24 = vadd.f32 %v9502_v0, %v916_v21  ;;  %1314 = vst [vmem:[%s9515_s29 + $0x108] sm:$0xff] %v1257_v51  ;;  %v898_v25 = vmul.f32 %v9499_v61, %v853_v22 }
 0x1ac   : > { %v972_v45 = vadd.f32 %v9502_v0, %v927_v23  ;;  %v907_v8 = vmul.f32 %v9499_v61, %v862_v31  ;;  %v799_v26 = vpop.f32.mrf.mxu2 }
 0x1ad   : > { %v1248_v27 = vmul.f32 %v9548_v12, %v961_v24  ;;  %v943_v32 = vadd.f32 %v9502_v0, %v898_v25  ;;  %v800_v28 = vadd.f32 %v9490_v54, %v799_v26  ;;  %v832_v29 = vpop.f32.mrf.mxu3  ;;  %v1207_v25 = vpop.permute.xlu1 %1206 }
 0x1ae   : > { %v1259_v30 = vmul.f32 %v1197_v40, %v972_v45  ;;  %v952_v42 = vadd.f32 %v9502_v0, %v907_v8  ;;  %v833_v33 = vadd.f32 %v9490_v54, %v832_v29  ;;  %v745_v35 = vpop.f32.mrf.mxu0  ;;  %v1202_v49 = vpop.permute.xlu0 %1201 }
 0x1af   : > { %1305 = vst [vmem:[%s9515_s29 + $0xc0] sm:$0xff] %v1248_v27  ;;  %v1230_v36 = vmul.f32 %v9477_v47, %v943_v32  ;;  %v872_v38 = vmax.f32 %v800_v28, 0.0  ;;  %v746_v39 = vadd.f32 %v9490_v54, %v745_v35  ;;  %v772_v12 = vpop.f32.mrf.mxu1 }
 0x1b0   : > { %1316 = vst [vmem:[%s9515_s29 + $0x118] sm:$0xff] %v1259_v30  ;;  %v1239_v41 = vmul.f32 %v9496_v57, %v952_v42  ;;  %v883_v19 = vmax.f32 %v833_v33, 0.0  ;;  %v773_v58 = vadd.f32 %v9490_v54, %v772_v12 }
 0x1b1   : > { %1287 = vst [vmem:[%s9515_s29 + $0x30] sm:$0xff] %v1230_v36  ;;  %v917_v59 = vmul.f32 %v9499_v61, %v872_v38  ;;  %v854_v52 = vmax.f32 %v746_v39, 0.0 }
 0x1b2   : > { %1296 = vst [vmem:[%s9515_s29 + $0x78] sm:$0xff] %v1239_v41  ;;  %v928_v63 = vmul.f32 %v9499_v61, %v883_v19  ;;  %v863_v1 = vmax.f32 %v773_v58, 0.0  ;;  %v1212_v19 = vpop.permute.xlu2 %1211 }
 0x1b3   : > { %v962_v47 = vadd.f32 %v9502_v0, %v917_v59  ;;  %v899_v34 = vmul.f32 %v9499_v61, %v854_v52 }
 0x1b4   : > { %v973_v44 = vadd.f32 %v9502_v0, %v928_v63  ;;  %v908_v57 = vmul.f32 %v9499_v61, %v863_v1  ;;  %v802_v2 = vpop.f32.mrf.mxu2 }
 0x1b5   : > { %v1249_v3 = vmul.f32 %v9544_v7, %v962_v47  ;;  %v944_v4 = vadd.f32 %v9502_v0, %v899_v34  ;;  %v803_v5 = vadd.f32 %v9490_v54, %v802_v2  ;;  %v835_v6 = vpop.f32.mrf.mxu3 }
 0x1b6   : > { %v1260_v9 = vmul.f32 %v1202_v49, %v973_v44  ;;  %v953_v11 = vadd.f32 %v9502_v0, %v908_v57  ;;  %v836_v43 = vadd.f32 %v9490_v54, %v835_v6  ;;  %v748_v13 = vpop.f32.mrf.mxu0 }
 0x1b7   : > { %1306 = vst [vmem:[%s9515_s29 + $0xc8] sm:$0xff] %v1249_v3  ;;  %v1231_v55 = vmul.f32 %v9475_v46, %v944_v4  ;;  %v873_v14 = vmax.f32 %v803_v5, 0.0  ;;  %v749_v7 = vadd.f32 %v9490_v54, %v748_v13  ;;  %v775_v51 = vpop.f32.mrf.mxu1  ;;  %v1217_v5 = vpop.permute.xlu0 %1216 }
 0x1b8   : > { %1317 = vst [vmem:[%s9515_s29 + $0x120] sm:$0xff] %v1260_v9  ;;  %v1240_v15 = vmul.f32 %v9494_v56, %v953_v11  ;;  %v884_v53 = vmax.f32 %v836_v43, 0.0  ;;  %v776_v16 = vadd.f32 %v9490_v54, %v775_v51 }
 0x1b9   : > { %1288 = vst [vmem:[%s9515_s29 + $0x38] sm:$0xff] %v1231_v55  ;;  %v918_v18 = vmul.f32 %v9499_v61, %v873_v14  ;;  %v855_v20 = vmax.f32 %v749_v7, 0.0 }
 0x1ba   : > { %1297 = vst [vmem:[%s9515_s29 + $0x80] sm:$0xff] %v1240_v15  ;;  %v929_v21 = vmul.f32 %v9499_v61, %v884_v53  ;;  %v864_v22 = vmax.f32 %v776_v16, 0.0  ;;  %v1222_v15 = vpop.permute.xlu1 %1221 }
 0x1bb   : > { %v963_v46 = vadd.f32 %v9502_v0, %v918_v18  ;;  %v900_v23 = vmul.f32 %v9499_v61, %v855_v20 }
 0x1bc   : > { %v974_v31 = vadd.f32 %v9502_v0, %v929_v21  ;;  %v909_v56 = vmul.f32 %v9499_v61, %v864_v22  ;;  %v805_v24 = vpop.f32.mrf.mxu2 }
 0x1bd   : > { %v1250_v45 = vmul.f32 %v9512_v17, %v963_v46  ;;  %v945_v8 = vadd.f32 %v9502_v0, %v900_v23  ;;  %v806_v26 = vadd.f32 %v9490_v54, %v805_v24  ;;  %v838_v40 = vpop.f32.mrf.mxu3 }
 0x1be   : > { %v1261_v27 = vmul.f32 %v1207_v25, %v974_v31  ;;  %v954_v32 = vadd.f32 %v9502_v0, %v909_v56  ;;  %v839_v28 = vadd.f32 %v9490_v54, %v838_v40 }
 0x1bf   : > { %1307 = vst [vmem:[%s9515_s29 + $0xd0] sm:$0xff] %v1250_v45  ;;  %v1232_v29 = vmul.f32 %v9461_v37, %v945_v8  ;;  %v874_v30 = vmax.f32 %v806_v26, 0.0  ;;  %v778_v42 = vpop.f32.mrf.mxu1 }
 0x1c0   : > { %1318 = vst [vmem:[%s9515_s29 + $0x128] sm:$0xff] %v1261_v27  ;;  %v1241_v33 = vmul.f32 %v9479_v48, %v954_v32  ;;  %v885_v17 = vmax.f32 %v839_v28, 0.0  ;;  %v779_v35 = vadd.f32 %v9490_v54, %v778_v42 }
 0x1c1   : > { %1289 = vst [vmem:[%s9515_s29 + $0x40] sm:$0xff] %v1232_v29  ;;  %v919_v36 = vmul.f32 %v9499_v61, %v874_v30 }
 0x1c2   : > { %1298 = vst [vmem:[%s9515_s29 + $0x88] sm:$0xff] %v1241_v33  ;;  %v930_v38 = vmul.f32 %v9499_v61, %v885_v17  ;;  %v865_v39 = vmax.f32 %v779_v35, 0.0 }
 0x1c3   : > { %v964_v12 = vadd.f32 %v9502_v0, %v919_v36 }
 0x1c4   : > { %v975_v37 = vadd.f32 %v9502_v0, %v930_v38  ;;  %v910_v41 = vmul.f32 %v9499_v61, %v865_v39  ;;  %v808_v48 = vpop.f32.mrf.mxu2 }
 0x1c5   : > { %v1251_v58 = vmul.f32 %v9570_v60, %v964_v12  ;;  %v809_v59 = vadd.f32 %v9490_v54, %v808_v48  ;;  %v841_v52 = vpop.f32.mrf.mxu3 }
 0x1c6   : > { %v1262_v63 = vmul.f32 %v1212_v19, %v975_v37  ;;  %v955_v1 = vadd.f32 %v9502_v0, %v910_v41  ;;  %v842_v47 = vadd.f32 %v9490_v54, %v841_v52 }
 0x1c7   : > { %1308 = vst [vmem:[%s9515_s29 + $0xd8] sm:$0xff] %v1251_v58  ;;  %v875_v34 = vmax.f32 %v809_v59, 0.0 }
 0x1c8   : > { %1319 = vst [vmem:[%s9515_s29 + $0x130] sm:$0xff] %v1262_v63  ;;  %v1242_v44 = vmul.f32 %v9509_v10, %v955_v1  ;;  %v886_v57 = vmax.f32 %v842_v47, 0.0 }
 0x1c9   : > { %v920_v2 = vmul.f32 %v9499_v61, %v875_v34 }
 0x1ca   : > { %1299 = vst [vmem:[%s9515_s29 + $0x90] sm:$0xff] %v1242_v44  ;;  %v931_v60 = vmul.f32 %v9499_v61, %v886_v57 }
 0x1cb   : > { %v965_v3 = vadd.f32 %v9502_v0, %v920_v2 }
 0x1cc   : > { %v976_v49 = vadd.f32 %v9502_v0, %v931_v60  ;;  %v811_v4 = vpop.f32.mrf.mxu2 }
 0x1cd   : > { %v1252_v6 = vmul.f32 %v9567_v50, %v965_v3  ;;  %v812_v9 = vadd.f32 %v9490_v54, %v811_v4  ;;  %v844_v10 = vpop.f32.mrf.mxu3 }
 0x1ce   : > { %v1263_v11 = vmul.f32 %v1217_v5, %v976_v49  ;;  %v845_v43 = vadd.f32 %v9490_v54, %v844_v10 }
 0x1cf   : > { %1309 = vst [vmem:[%s9515_s29 + $0xe0] sm:$0xff] %v1252_v6  ;;  %v876_v13 = vmax.f32 %v812_v9, 0.0 }
 0x1d0   : > { %1320 = vst [vmem:[%s9515_s29 + $0x138] sm:$0xff] %v1263_v11  ;;  %v887_v55 = vmax.f32 %v845_v43, 0.0 }
 0x1d1   : > { %v921_v14 = vmul.f32 %v9499_v61, %v876_v13 }
 0x1d2   : > { %v932_v7 = vmul.f32 %v9499_v61, %v887_v55 }
 0x1d3   : > { %v966_v51 = vadd.f32 %v9502_v0, %v921_v14 }
 0x1d4   : > { %v977_v50 = vadd.f32 %v9502_v0, %v932_v7 }
 0x1d5   : > { %v1253_v53 = vmul.f32 %v9535_v62, %v966_v51 }
 0x1d6   : > { %v1264_v16 = vmul.f32 %v1222_v15, %v977_v50 }
 0x1d7   : > { %1310 = vst [vmem:[%s9515_s29 + $0xe8] sm:$0xff] %v1253_v53 }
 0x1d8   : > { %1321 = vst [vmem:[%s9515_s29 + $0x140] sm:$0xff] %v1264_v16 }
 0x1d9 PF: > { %s12973_s0 = sld [smem:[#allocation22_spill]] }
 0x1df   : > { %p7661_p12 = scmp.le.s32.totalorder %s12973_s0, 0 }
 0x1e1   : > { %1325 = sbr.rel (%p7661_p12) target bundleno = 2877 (0xb3d), region = 112 }
 0x1e6   : > { %v1560_v54 = vld [vmem:[#allocation11 + $0x1f8] sm:$0xff]  ;;  %s12974_s4 = sld [smem:[#allocation22_spill]]  ;;  %v1559_v61 = vld [vmem:[#allocation11 + $0x1f0] sm:$0xff]  ;;  %s1328_s28 = ssub.s32 0, %s9275_s6  ;;  %v1558_v20 = vld [vmem:[#allocation11 + $0x1e8] sm:$0xff]  ;;  %vm2055_vm0 = vcmask 1046528  }
 0x1e7   : > { %v9711_v18 = vld [vmem:[#allocation11 + $0x2f8] sm:$0xff]  ;;  %1593 = vmatpush.msra.mxu0 %v1560_v54  ;;  %7724 = vmatpush.msra.mxu3 %v1560_v54  ;;  %v9716_v62 = vld [vmem:[#allocation11 + $0x2f0] sm:$0xff]  ;;  %s7663_s16 = smin.u32 %s9275_s6, %s1328_s28  ;;  %v9726_v22 = vld [vmem:[#allocation11 + $0x2e8] sm:$0xff]  ;;  %p1327_p13 = scmp.lt.s32.totalorder %s9275_s6, 0  ;;  %vm3110_vm1 = vcmask 1045504   ;;  %vm7388_vm2 = vcmask 64512  }
 0x1e8   : > { %v9714_v0 = vld [vmem:[#allocation11 + $0x278] sm:$0xff]  ;;  %1873 = vmatpush.msra.mxu2 %v9711_v18  ;;  %v9721_v21 = vld [vmem:[#allocation11 + $0x270] sm:$0xff]  ;;  %7950 = sdivrem.u32 %s7663_s16, 3  ;;  %v9728_v46 = vld [vmem:[#allocation11 + $0x268] sm:$0xff]  ;;  %vm4440_vm3 = vcmask 1044480   ;;  %vm5104_vm4 = vcmask 1043456  }
 0x1e9   : > { %1733 = vmatpush.msra.mxu1 %v9714_v0  ;;  %1594 = vmatpush.msra.mxu0 %v1559_v61  ;;  %v1557_v23 = vld [vmem:[#allocation11 + $0x1e0] sm:$0xff]  ;;  %v1556_v24 = vld [vmem:[#allocation11 + $0x1d8] sm:$0xff]  ;;  %v1555_v8 = vld [vmem:[#allocation11 + $0x1d0] sm:$0xff]  ;;  %vm6406_vm5 = vcmask 1042432   ;;  %vm7056_vm6 = vcmask 1041408  }
 0x1ea   : > { %7725 = vmatpush.msra.mxu3 %v1559_v61  ;;  %1874 = vmatpush.msra.mxu2 %v9716_v62  ;;  %v9734_v31 = vld [vmem:[#allocation11 + $0x2e0] sm:$0xff]  ;;  %v9742_v25 = vld [vmem:[#allocation11 + $0x2d8] sm:$0xff]  ;;  %v9748_v26 = vld [vmem:[#allocation11 + $0x2d0] sm:$0xff] }
 0x1eb   : > { %1734 = vmatpush.msra.mxu1 %v9721_v21  ;;  %1595 = vmatpush.msra.mxu0 %v1558_v20  ;;  %v9736_v56 = vld [vmem:[#allocation11 + $0x260] sm:$0xff]  ;;  %v9744_v45 = vld [vmem:[#allocation11 + $0x258] sm:$0xff]  ;;  %v9750_v40 = vld [vmem:[#allocation11 + $0x250] sm:$0xff] }
 0x1ec   : > { %s9724_s24 = sadd.s32 1, %s12974_s4  ;;  %7726 = vmatpush.msra.mxu3 %v1558_v20  ;;  %s1384_s26 = ssub.s32 0, %s12974_s4  ;;  %1875 = vmatpush.msra.mxu2 %v9726_v22  ;;  %v1554_v27 = vld [vmem:[#allocation11 + $0x1c8] sm:$0xff]  ;;  %v1553_v29 = vld [vmem:[#allocation11 + $0x1c0] sm:$0xff]  ;;  %v1552_v33 = vld [vmem:[#allocation11 + $0x1b8] sm:$0xff] }
 0x1ed   : > { %s1441_s5 = ssub.s32 0, %s9724_s24  ;;  %1735 = vmatpush.msra.mxu1 %v9728_v46  ;;  %s7666_s21 = smin.u32 %s12974_s4, %s1384_s26  ;;  %1596 = vmatpush.msra.mxu0 %v1557_v23  ;;  %v9755_v32 = vld [vmem:[#allocation11 + $0x2c8] sm:$0xff]  ;;  %v9761_v30 = vld [vmem:[#allocation11 + $0x2c0] sm:$0xff]  ;;  %v9769_v17 = vld [vmem:[#allocation11 + $0x2b8] sm:$0xff] }
 0x1ee   : > { %s7669_s7 = smin.u32 %s1441_s5, %s9724_s24  ;;  %7727 = vmatpush.msra.mxu3 %v1557_v23  ;;  %1876 = vmatpush.msra.mxu2 %v9734_v31  ;;  %v9757_v28 = vld [vmem:[#allocation11 + $0x248] sm:$0xff]  ;;  %v9763_v42 = vld [vmem:[#allocation11 + $0x240] sm:$0xff]  ;;  %v9771_v35 = vld [vmem:[#allocation11 + $0x238] sm:$0xff]  ;;  %p1440_p2 = scmp.lt.s32.totalorder %s9724_s24, 0 }
 0x1ef   : > { %7953 = sdivrem.u32 %s7669_s7, 3  ;;  %1736 = vmatpush.msra.mxu1 %v9736_v56  ;;  %1597 = vmatpush.msra.mxu0 %v1556_v24  ;;  %v1551_v36 = vld [vmem:[#allocation11 + $0x1b0] sm:$0xff]  ;;  %v1550_v12 = vld [vmem:[#allocation11 + $0x1a8] sm:$0xff]  ;;  %v1549_v48 = vld [vmem:[#allocation11 + $0x1a0] sm:$0xff]  ;;  %p1383_p4 = scmp.lt.s32.totalorder %s12974_s4, 0 }
 0x1f0   : > { %7956 = sdivrem.u32 %s7666_s21, 3  ;;  %7728 = vmatpush.msra.mxu3 %v1556_v24  ;;  %1877 = vmatpush.msra.mxu2 %v9742_v25  ;;  %v9775_v38 = vld [vmem:[#allocation11 + $0x2b0] sm:$0xff]  ;;  %v9784_v37 = vld [vmem:[#allocation11 + $0x2a8] sm:$0xff]  ;;  %v9791_v19 = vld [vmem:[#allocation11 + $0x2a0] sm:$0xff] }
 0x1f1   : > { %1737 = vmatpush.msra.mxu1 %v9744_v45  ;;  %1598 = vmatpush.msra.mxu0 %v1555_v8  ;;  %s7951_s23 = spop.drf %7950  ;;  %v9777_v39 = vld [vmem:[#allocation11 + $0x230] sm:$0xff]  ;;  %v9786_v41 = vld [vmem:[#allocation11 + $0x228] sm:$0xff]  ;;  %v9793_v58 = vld [vmem:[#allocation11 + $0x220] sm:$0xff] }
 0x1f2   : > { %7729 = vmatpush.msra.mxu3 %v1555_v8  ;;  %1878 = vmatpush.msra.mxu2 %v9748_v26  ;;  %s7952_s2 = spop.drf %7950  ;;  %v1548_v59 = vld [vmem:[#allocation11 + $0x198] sm:$0xff]  ;;  %v1547_v1 = vld [vmem:[#allocation11 + $0x190] sm:$0xff]  ;;  %v1546_v44 = vld [vmem:[#allocation11 + $0x188] sm:$0xff] }
 0x1f3   : > { %1738 = vmatpush.msra.mxu1 %v9750_v40  ;;  %1599 = vmatpush.msra.mxu0 %v1554_v27  ;;  %s1332_s22 = ssub.s32 0, %s7952_s2  ;;  %v9800_v52 = vld [vmem:[#allocation11 + $0x298] sm:$0xff]  ;;  %v9808_v47 = vld [vmem:[#allocation11 + $0x290] sm:$0xff]  ;;  %v9816_v57 = vld [vmem:[#allocation11 + $0x288] sm:$0xff] }
 0x1f4   : > { %7730 = vmatpush.msra.mxu3 %v1554_v27  ;;  %1879 = vmatpush.msra.mxu2 %v9755_v32  ;;  %s13470_s22 = smov (!%p1327_p13, %s1332_s22), %s7952_s2  ;;  %v9802_v63 = vld [vmem:[#allocation11 + $0x218] sm:$0xff]  ;;  %v9810_v34 = vld [vmem:[#allocation11 + $0x210] sm:$0xff]  ;;  %v9818_v2 = vld [vmem:[#allocation11 + $0x208] sm:$0xff] }
 0x1f5   : > { %1739 = vmatpush.msra.mxu1 %v9757_v28  ;;  %1600 = vmatpush.msra.mxu0 %v1553_v29  ;;  %p7665_p0 = scmp.lt.s32.totalorder %s13470_s22, 0  ;;  %s1338_s12 = sadd.s32 3, %s13470_s22  ;;  %v1545_v60 = vld [vmem:[#allocation11 + $0x180] sm:$0xff]  ;;  %v2616_v4 = vld [vmem:[#allocation11 + $0x378] sm:$0xff]  ;;  %v2615_v13 = vld [vmem:[#allocation11 + $0x370] sm:$0xff] }
 0x1f6   : > { %7731 = vmatpush.msra.mxu3 %v1553_v29  ;;  %1880 = vmatpush.msra.mxu2 %v9761_v30  ;;  %v9823_v3 = vld [vmem:[#allocation11 + $0x280] sm:$0xff]  ;;  %v1527_v10 = vld [vmem:[#allocation11 + $0xf8] sm:$0xff]  ;;  %v1526_v55 = vld [vmem:[#allocation11 + $0xf0] sm:$0xff] }
 0x1f7   : > { %1740 = vmatpush.msra.mxu1 %v9763_v42  ;;  %1601 = vmatpush.msra.mxu0 %v1552_v33  ;;  %s13472_s12 = smov (!%p7665_p0, %s1338_s12), %s13470_s22  ;;  %v9832_v5 = vld [vmem:[#allocation11 + $0x200] sm:$0xff]  ;;  %v1543_v43 = vld [vmem:[#allocation11 + $0x178] sm:$0xff]  ;;  %v1542_v14 = vld [vmem:[#allocation11 + $0x170] sm:$0xff] }
 0x1f8   : > { %s7954_s17 = spop.drf %7953  ;;  %7732 = vmatpush.msra.mxu3 %v1552_v33  ;;  %1881 = vmatpush.msra.mxu2 %v9769_v17  ;;  %s1340_s0 = smul.u32 328, %s13472_s12  ;;  %v2614_v7 = vld [vmem:[#allocation11 + $0x368] sm:$0xff]  ;;  %v2613_v61 = vld [vmem:[#allocation11 + $0x360] sm:$0xff]  ;;  %v2612_v27 = vld [vmem:[#allocation11 + $0x358] sm:$0xff] }
 0x1f9   : > { %s7955_s6 = spop.drf %7953  ;;  %1741 = vmatpush.msra.mxu1 %v9771_v35  ;;  %1602 = vmatpush.msra.mxu0 %v1551_v36  ;;  %v1525_v51 = vld [vmem:[#allocation11 + $0xe8] sm:$0xff]  ;;  %v1524_v23 = vld [vmem:[#allocation11 + $0xe0] sm:$0xff] }
 0x1fa   : > { %7733 = vmatpush.msra.mxu3 %v1551_v36  ;;  %s1445_s30 = ssub.s32 0, %s7955_s6  ;;  %s7957_s3 = spop.drf %7956  ;;  %1882 = vmatpush.msra.mxu2 %v9775_v38  ;;  %v1541_v15 = vld [vmem:[#allocation11 + $0x168] sm:$0xff]  ;;  %v1539_v36 = vld [vmem:[#allocation11 + $0x158] sm:$0xff] }
 0x1fb   : > { %1742 = vmatpush.msra.mxu1 %v9777_v39  ;;  %s7958_s29 = spop.drf %7956  ;;  %1603 = vmatpush.msra.mxu0 %v1550_v12  ;;  %s13474_s30 = smov (!%p1440_p2, %s1445_s30), %s7955_s6 }
 0x1fc   : > { %7734 = vmatpush.msra.mxu3 %v1550_v12  ;;  %1883 = vmatpush.msra.mxu2 %v9784_v37  ;;  %s1388_s28 = ssub.s32 0, %s7958_s29  ;;  %p7671_p5 = scmp.lt.s32.totalorder %s13474_s30, 0 }
 0x1fd   : > { %1743 = vmatpush.msra.mxu1 %v9786_v41  ;;  %1604 = vmatpush.msra.mxu0 %v1549_v48  ;;  %s1451_s16 = sadd.s32 3, %s13474_s30  ;;  %s13476_s28 = smov (!%p1383_p4, %s1388_s28), %s7958_s29 }
 0x1fe   : > { %7735 = vmatpush.msra.mxu3 %v1549_v48  ;;  %1884 = vmatpush.msra.mxu2 %v9791_v19  ;;  %s13478_s16 = smov (!%p7671_p5, %s1451_s16), %s13474_s30  ;;  %p7668_p3 = scmp.lt.s32.totalorder %s13476_s28, 0 }
 0x1ff   : > { %1744 = vmatpush.msra.mxu1 %v9793_v58  ;;  %1605 = vmatpush.msra.mxu0 %v1548_v59  ;;  %s1394_s24 = sadd.s32 3, %s13476_s28  ;;  %s1453_s4 = smul.u32 328, %s13478_s16 }
 0x200   : > { %7736 = vmatpush.msra.mxu3 %v1548_v59  ;;  %1885 = vmatpush.msra.mxu2 %v9800_v52  ;;  %s13480_s24 = smov (!%p7668_p3, %s1394_s24), %s13476_s28  ;;  %s9829_s7 = scalar_lea.vmem [#allocation2], %s1340_s0  ;;  %v1522_v59 = vld [vmem:[#allocation11 + $0xd0] sm:$0xff] }
 0x201   : > { %1745 = vmatpush.msra.mxu1 %v9802_v63  ;;  %1606 = vmatpush.msra.mxu0 %v1547_v1  ;;  %s1396_s5 = smul.u32 328, %s13480_s24  ;;  %v1342_v49 = vld [vmem:[%s9829_s7] sm:$0xff]  ;;  %v1373_v6 = vld [vmem:[%s9829_s7 + $0xf8] sm:$0xff]  ;;  %s9836_s26 = scalar_lea.vmem [#allocation2], %s1453_s4  ;;  %v1343_v50 = vld [vmem:[%s9829_s7 + $0x8] sm:$0xff] }
 0x202   : > { %7737 = vmatpush.msra.mxu3 %v1547_v1  ;;  %1886 = vmatpush.msra.mxu2 %v9808_v47  ;;  %v1455_v9 = vld [vmem:[%s9836_s26] sm:$0xff]  ;;  %v1456_v16 = vld [vmem:[%s9836_s26 + $0x8] sm:$0xff]  ;;  %v1345_v24 = vld [vmem:[%s9829_s7 + $0x18] sm:$0xff] }
 0x203   : > { %1746 = vmatpush.msra.mxu1 %v9810_v34  ;;  %1607 = vmatpush.msra.mxu0 %v1546_v44  ;;  %s9839_s21 = scalar_lea.vmem [#allocation2], %s1396_s5  ;;  %v1374_v53 = vld [vmem:[%s9829_s7 + $0x100] sm:$0xff]  ;;  %v1375_v20 = vld [vmem:[%s9829_s7 + $0x108] sm:$0xff]  ;;  %v1458_v8 = vld [vmem:[%s9836_s26 + $0x18] sm:$0xff] }
 0x204   : > { %7738 = vmatpush.msra.mxu3 %v1546_v44  ;;  %1887 = vmatpush.msra.mxu2 %v9816_v57  ;;  %v1398_v11 = vld [vmem:[%s9839_s21] sm:$0xff]  ;;  %v1399_v54 = vld [vmem:[%s9839_s21 + $0x8] sm:$0xff]  ;;  %v1377_v29 = vld [vmem:[%s9829_s7 + $0x118] sm:$0xff] }
 0x205   : > { %1747 = vmatpush.msra.mxu1 %v9818_v2  ;;  %1608 = vmatpush.msra.mxu0 %v1545_v60  ;;  %v1402_v33 = vld [vmem:[%s9839_s21 + $0x20] sm:$0xff]  ;;  %v1403_v48 = vld [vmem:[%s9839_s21 + $0x28] sm:$0xff]  ;;  %v1405_v1 = vld [vmem:[%s9839_s21 + $0x38] sm:$0xff] }
 0x206   : > { %7739 = vmatpush.msra.mxu3 %v1545_v60  ;;  %1888 = vmatpush.msra.mxu2 %v9823_v3  ;;  %v1378_v12 = vld [vmem:[%s9829_s7 + $0x120] sm:$0xff]  ;;  %v1537_v44 = vld [vmem:[#allocation11 + $0x148] sm:$0xff]  ;;  %v1407_v60 = vld [vmem:[%s9839_s21 + $0x48] sm:$0xff] }
 0x207   : > { %1609 = vmatmul.f32.vlgmr.msra.gmra.mxu0 %v1342_v49  ;;  %1702 = vmatmul.f32.vlgmr.msra.gmra.mxu3 %v1373_v6  ;;  %v2609_v49 = vld [vmem:[#allocation11 + $0x340] sm:$0xff] }
 0x208   : > { %1889 = vmatmul.f32.vlgmr.msra.gmra.mxu2 %v1455_v9  ;;  %1748 = vmatpush.msra.mxu1 %v9832_v5  ;;  %v1536_v6 = vld [vmem:[#allocation11 + $0x140] sm:$0xff] }
 0x209   : > { %2649 = vmatpush.msrb.mxu2 %v2616_v4  ;;  %1749 = vmatmul.f32.vlgmr.msra.gmra.mxu1 %v1398_v11  ;;  %v1352_v4 = vld [vmem:[%s9829_s7 + $0x50] sm:$0xff]  ;;  %v1430_v11 = vld [vmem:[%s9839_s21 + $0x100] sm:$0xff] }
 0x20a   : > { %2320 = vmatpush.msrb.mxu0 %v1527_v10  ;;  %2460 = vmatpush.msrb.mxu1 %v1543_v43  ;;  %v1408_v9 = vld [vmem:[%s9839_s21 + $0x50] sm:$0xff]  ;;  %v1353_v10 = vld [vmem:[%s9829_s7 + $0x58] sm:$0xff] }
 0x20b   : > { %7740 = vmatpush.msrb.mxu3 %v9714_v0  ;;  %2650 = vmatpush.msrb.mxu2 %v2615_v13  ;;  %v1344_v0 = vld [vmem:[%s9829_s7 + $0x10] sm:$0xff]  ;;  %v1466_v43 = vld [vmem:[%s9836_s26 + $0x58] sm:$0xff] }
 0x20c   : > { %2321 = vmatpush.msrb.mxu0 %v1526_v55  ;;  %2461 = vmatpush.msrb.mxu1 %v1542_v14  ;;  %v1409_v13 = vld [vmem:[%s9839_s21 + $0x58] sm:$0xff]  ;;  %v2608_v55 = vld [vmem:[#allocation11 + $0x338] sm:$0xff] }
 0x20d   : > { %7741 = vmatpush.msrb.mxu3 %v9721_v21  ;;  %2651 = vmatpush.msrb.mxu2 %v2614_v7  ;;  %v1457_v21 = vld [vmem:[%s9836_s26 + $0x10] sm:$0xff]  ;;  %v1354_v14 = vld [vmem:[%s9829_s7 + $0x60] sm:$0xff]  ;;  %v1431_v7 = vld [vmem:[%s9839_s21 + $0x108] sm:$0xff] }
 0x20e   : > { %2322 = vmatpush.msrb.mxu0 %v1525_v51  ;;  %2462 = vmatpush.msrb.mxu1 %v1541_v15  ;;  %v1467_v51 = vld [vmem:[%s9836_s26 + $0x60] sm:$0xff] }
 0x20f   : > { %1612 = vmatmul.f32.gmra.mxu0 %v1343_v50  ;;  %7742 = vmatpush.msrb.mxu3 %v9728_v46  ;;  %v1400_v46 = vld [vmem:[%s9839_s21 + $0x10] sm:$0xff]  ;;  %v1519_v50 = vld [vmem:[#allocation11 + $0xb8] sm:$0xff] }
 0x210   : > { %1705 = vmatmul.f32.gmra.mxu3 %v1374_v53  ;;  %1892 = vmatmul.f32.gmra.mxu2 %v1456_v16  ;;  %v1535_v15 = vld [vmem:[#allocation11 + $0x138] sm:$0xff] }
 0x211   : > { %7743 = vmatpush.msrb.mxu3 %v9736_v56  ;;  %1752 = vmatmul.f32.gmra.mxu1 %v1399_v54  ;;  %v1540_v56 = vld [vmem:[#allocation11 + $0x160] sm:$0xff]  ;;  %v1410_v53 = vld [vmem:[%s9839_s21 + $0x60] sm:$0xff] }
 0x212   : > { %2652 = vmatpush.msrb.mxu2 %v2613_v61  ;;  %2323 = vmatpush.msrb.mxu0 %v1524_v23  ;;  %v1355_v16 = vld [vmem:[%s9829_s7 + $0x68] sm:$0xff]  ;;  %v1432_v54 = vld [vmem:[%s9839_s21 + $0x110] sm:$0xff] }
 0x213   : > { %7744 = vmatpush.msrb.mxu3 %v9744_v45  ;;  %2463 = vmatpush.msrb.mxu1 %v1540_v56  ;;  %v1376_v45 = vld [vmem:[%s9829_s7 + $0x110] sm:$0xff]  ;;  %v1468_v61 = vld [vmem:[%s9836_s26 + $0x68] sm:$0xff]  ;;  %v1518_v56 = vld [vmem:[#allocation11 + $0xb0] sm:$0xff] }
 0x214   : > { %2653 = vmatpush.msrb.mxu2 %v2612_v27  ;;  %v1469_v23 = vld [vmem:[%s9836_s26 + $0x70] sm:$0xff]  ;;  %v1470_v27 = vld [vmem:[%s9836_s26 + $0x78] sm:$0xff] }
 0x215   : > { %7745 = vmatpush.msrb.mxu3 %v9750_v40  ;;  %v1401_v40 = vld [vmem:[%s9839_s21 + $0x18] sm:$0xff]  ;;  %2464 = vmatpush.msrb.mxu1 %v1539_v36  ;;  %v1435_v36 = vld [vmem:[%s9839_s21 + $0x128] sm:$0xff] }
 0x217   : > { %1615 = vmatmul.f32.gmra.mxu0 %v1344_v0  ;;  %7746 = vmatpush.msrb.mxu3 %v9757_v28  ;;  %v1346_v28 = vld [vmem:[%s9829_s7 + $0x20] sm:$0xff]  ;;  %v1411_v0 = vld [vmem:[%s9839_s21 + $0x68] sm:$0xff] }
 0x218   : > { %1708 = vmatmul.f32.gmra.mxu3 %v1375_v20  ;;  %1895 = vmatmul.f32.gmra.mxu2 %v1457_v21  ;;  %v1356_v20 = vld [vmem:[%s9829_s7 + $0x70] sm:$0xff]  ;;  %v2607_v21 = vld [vmem:[#allocation11 + $0x330] sm:$0xff] }
 0x219   : > { %7747 = vmatpush.msrb.mxu3 %v9763_v42  ;;  %1755 = vmatmul.f32.gmra.mxu1 %v1400_v46  ;;  %v1459_v42 = vld [vmem:[%s9836_s26 + $0x20] sm:$0xff]  ;;  %v1433_v46 = vld [vmem:[%s9839_s21 + $0x118] sm:$0xff] }
 0x21b   : > { %7748 = vmatpush.msrb.mxu3 %v9771_v35  ;;  %v1523_v35 = vld [vmem:[#allocation11 + $0xd8] sm:$0xff] }
 0x21c   : > { %2324 = vmatpush.msrb.mxu0 %v1523_v35 }
 0x21d   : > { %7749 = vmatpush.msrb.mxu3 %v9777_v39  ;;  %v1347_v39 = vld [vmem:[%s9829_s7 + $0x28] sm:$0xff] }
 0x21e   : > { %2325 = vmatpush.msrb.mxu0 %v1522_v59  ;;  %v1359_v59 = vld [vmem:[%s9829_s7 + $0x88] sm:$0xff] }
 0x21f   : > { %1618 = vmatmul.f32.gmra.mxu0 %v1345_v24  ;;  %7750 = vmatpush.msrb.mxu3 %v9786_v41  ;;  %v1460_v41 = vld [vmem:[%s9836_s26 + $0x28] sm:$0xff]  ;;  %v1534_v24 = vld [vmem:[#allocation11 + $0x130] sm:$0xff] }
 0x220   : > { %1711 = vmatmul.f32.gmra.mxu3 %v1376_v45  ;;  %1898 = vmatmul.f32.gmra.mxu2 %v1458_v8  ;;  %v1412_v45 = vld [vmem:[%s9839_s21 + $0x70] sm:$0xff]  ;;  %v1357_v8 = vld [vmem:[%s9829_s7 + $0x78] sm:$0xff] }
 0x221   : > { %7751 = vmatpush.msrb.mxu3 %v9793_v58  ;;  %1758 = vmatmul.f32.gmra.mxu1 %v1401_v40  ;;  %v1461_v58 = vld [vmem:[%s9836_s26 + $0x30] sm:$0xff]  ;;  %v1434_v40 = vld [vmem:[%s9839_s21 + $0x120] sm:$0xff] }
 0x223   : > { %7752 = vmatpush.msrb.mxu3 %v9802_v63  ;;  %v1462_v63 = vld [vmem:[%s9836_s26 + $0x38] sm:$0xff] }
 0x225   : > { %7753 = vmatpush.msrb.mxu3 %v9810_v34  ;;  %v1463_v34 = vld [vmem:[%s9836_s26 + $0x40] sm:$0xff] }
 0x227   : > { %1621 = vmatmul.f32.gmra.mxu0 %v1346_v28  ;;  %7754 = vmatpush.msrb.mxu3 %v9818_v2  ;;  %v1406_v2 = vld [vmem:[%s9839_s21 + $0x40] sm:$0xff]  ;;  %v1413_v28 = vld [vmem:[%s9839_s21 + $0x78] sm:$0xff] }
 0x228   : > { %1714 = vmatmul.f32.gmra.mxu3 %v1377_v29  ;;  %1901 = vmatmul.f32.gmra.mxu2 %v1459_v42  ;;  %v1358_v42 = vld [vmem:[%s9829_s7 + $0x80] sm:$0xff] }
 0x229   : > { %7755 = vmatpush.msrb.mxu3 %v9832_v5  ;;  %1761 = vmatmul.f32.gmra.mxu1 %v1402_v33  ;;  %v1429_v5 = vld [vmem:[%s9839_s21 + $0xf8] sm:$0xff] }
 0x22a   : > { %v2606_v33 = vld [vmem:[#allocation11 + $0x328] sm:$0xff] }
 0x22b   : > { %7756 = vmatpush.msra.mxu3 %v9711_v18  ;;  %v2611_v18 = vld [vmem:[#allocation11 + $0x350] sm:$0xff] }
 0x22c   : > { %2654 = vmatpush.msrb.mxu2 %v2611_v18 }
 0x22d   : > { %7757 = vmatpush.msra.mxu3 %v9716_v62  ;;  %v1348_v62 = vld [vmem:[%s9829_s7 + $0x30] sm:$0xff] }
 0x22f   : > { %7758 = vmatpush.msra.mxu3 %v9726_v22  ;;  %1624 = vmatmul.f32.gmra.mxu0 %v1347_v39  ;;  %v1379_v22 = vld [vmem:[%s9829_s7 + $0x128] sm:$0xff]  ;;  %v1471_v39 = vld [vmem:[%s9836_s26 + $0x80] sm:$0xff] }
 0x230   : > { %1717 = vmatmul.f32.gmra.mxu3 %v1378_v12  ;;  %1904 = vmatmul.f32.gmra.mxu2 %v1460_v41  ;;  %v1517_v12 = vld [vmem:[#allocation11 + $0xa8] sm:$0xff] }
 0x231   : > { %7759 = vmatpush.msra.mxu3 %v9734_v31  ;;  %1764 = vmatmul.f32.gmra.mxu1 %v1403_v48  ;;  %v1404_v31 = vld [vmem:[%s9839_s21 + $0x30] sm:$0xff]  ;;  %v1414_v48 = vld [vmem:[%s9839_s21 + $0x80] sm:$0xff] }
 0x232   : > { %v1533_v41 = vld [vmem:[#allocation11 + $0x128] sm:$0xff] }
 0x233   : > { %7760 = vmatpush.msra.mxu3 %v9742_v25  ;;  %v1538_v25 = vld [vmem:[#allocation11 + $0x150] sm:$0xff] }
 0x234   : > { %2465 = vmatpush.msrb.mxu1 %v1538_v25  ;;  %v1511_v25 = vld [vmem:[#allocation11 + $0x78] sm:$0xff] }
 0x235   : > { %7761 = vmatpush.msra.mxu3 %v9748_v26  ;;  %v1349_v26 = vld [vmem:[%s9829_s7 + $0x38] sm:$0xff] }
 0x236   : > { %2466 = vmatpush.msrb.mxu1 %v1537_v44  ;;  %v1360_v44 = vld [vmem:[%s9829_s7 + $0x90] sm:$0xff] }
 0x237   : > { %1627 = vmatmul.f32.gmra.mxu0 %v1348_v62  ;;  %7762 = vmatpush.msra.mxu3 %v9755_v32  ;;  %v1380_v32 = vld [vmem:[%s9829_s7 + $0x130] sm:$0xff] }
 0x238   : > { %1720 = vmatmul.f32.gmra.mxu3 %v1379_v22  ;;  %1907 = vmatmul.f32.gmra.mxu2 %v1461_v58 }
 0x239   : > { %7763 = vmatpush.msra.mxu3 %v9761_v30  ;;  %1767 = vmatmul.f32.gmra.mxu1 %v1404_v31  ;;  %v2610_v30 = vld [vmem:[#allocation11 + $0x348] sm:$0xff] }
 0x23a   : > { %2655 = vmatpush.msrb.mxu2 %v2610_v30  ;;  %2467 = vmatpush.msrb.mxu1 %v1536_v6 }
 0x23b   : > { %7764 = vmatpush.msra.mxu3 %v9769_v17  ;;  %v1350_v17 = vld [vmem:[%s9829_s7 + $0x40] sm:$0xff] }
 0x23c   : > { %2656 = vmatpush.msrb.mxu2 %v2609_v49  ;;  %2468 = vmatpush.msrb.mxu1 %v1535_v15  ;;  %v1474_v15 = vld [vmem:[%s9836_s26 + $0x98] sm:$0xff] }
 0x23d   : > { %7765 = vmatpush.msra.mxu3 %v9775_v38  ;;  %v1381_v38 = vld [vmem:[%s9829_s7 + $0x138] sm:$0xff] }
 0x23e   : > { %2657 = vmatpush.msrb.mxu2 %v2608_v55  ;;  %2469 = vmatpush.msrb.mxu1 %v1534_v24  ;;  %v1362_v24 = vld [vmem:[%s9829_s7 + $0xa0] sm:$0xff] }
 0x23f   : > { %1630 = vmatmul.f32.gmra.mxu0 %v1349_v26  ;;  %7766 = vmatpush.msra.mxu3 %v9784_v37  ;;  %v1521_v37 = vld [vmem:[#allocation11 + $0xc8] sm:$0xff] }
 0x240   : > { %1723 = vmatmul.f32.gmra.mxu3 %v1380_v32  ;;  %1910 = vmatmul.f32.gmra.mxu2 %v1462_v63  ;;  %v1436_v32 = vld [vmem:[%s9839_s21 + $0x130] sm:$0xff]  ;;  %v1472_v63 = vld [vmem:[%s9836_s26 + $0x88] sm:$0xff] }
 0x241   : > { %1770 = vmatmul.f32.gmra.mxu1 %v1405_v1  ;;  %7767 = vmatpush.msra.mxu3 %v9791_v19  ;;  %v1351_v19 = vld [vmem:[%s9829_s7 + $0x48] sm:$0xff] }
 0x242   : > { %2326 = vmatpush.msrb.mxu0 %v1521_v37  ;;  %2658 = vmatpush.msrb.mxu2 %v2607_v21  ;;  %v1415_v1 = vld [vmem:[%s9839_s21 + $0x88] sm:$0xff] }
 0x243   : > { %7768 = vmatpush.msra.mxu3 %v9800_v52  ;;  %v1382_v52 = vld [vmem:[%s9829_s7 + $0x140] sm:$0xff]  ;;  %2470 = vmatpush.msrb.mxu1 %v1533_v41 }
 0x244   : > { %2659 = vmatpush.msrb.mxu2 %v2606_v33  ;;  %v1418_v33 = vld [vmem:[%s9839_s21 + $0xa0] sm:$0xff] }
 0x245   : > { %7769 = vmatpush.msra.mxu3 %v9808_v47  ;;  %v1464_v47 = vld [vmem:[%s9836_s26 + $0x48] sm:$0xff] }
 0x247   : > { %1633 = vmatmul.f32.gmra.mxu0 %v1350_v17  ;;  %7770 = vmatpush.msra.mxu3 %v9816_v57  ;;  %v1465_v57 = vld [vmem:[%s9836_s26 + $0x50] sm:$0xff] }
 0x248   : > { %1726 = vmatmul.f32.gmra.mxu3 %v1381_v38  ;;  %1913 = vmatmul.f32.gmra.mxu2 %v1463_v34 }
 0x249   : > { %1773 = vmatmul.f32.gmra.mxu1 %v1406_v2  ;;  %7771 = vmatpush.msra.mxu3 %v9823_v3  ;;  %v1520_v3 = vld [vmem:[#allocation11 + $0xc0] sm:$0xff]  ;;  %v1510_v2 = vld [vmem:[#allocation11 + $0x70] sm:$0xff] }
 0x24a   : > { %2327 = vmatpush.msrb.mxu0 %v1520_v3  ;;  %v1416_v3 = vld [vmem:[%s9839_s21 + $0x90] sm:$0xff] }
 0x24c   : > { %2328 = vmatpush.msrb.mxu0 %v1519_v50  ;;  %v1438_v50 = vld [vmem:[%s9839_s21 + $0x140] sm:$0xff] }
 0x24e   : > { %2329 = vmatpush.msrb.mxu0 %v1518_v56 }
 0x24f   : > { %1636 = vmatmul.f32.gmra.mxu0 %v1351_v19  ;;  %v2605_v19 = vld [vmem:[#allocation11 + $0x320] sm:$0xff] }
 0x250   : > { %1729 = vmatmul.f32.gmra.mxu3 %v1382_v52  ;;  %1916 = vmatmul.f32.gmra.mxu2 %v1464_v47  ;;  %v1437_v47 = vld [vmem:[%s9839_s21 + $0x138] sm:$0xff] }
 0x251   : > { %1776 = vmatmul.f32.gmra.mxu1 %v1407_v60  ;;  %2330 = vmatpush.msrb.mxu0 %v1517_v12  ;;  %v1473_v60 = vld [vmem:[%s9836_s26 + $0x90] sm:$0xff] }
 0x252   : > { %2660 = vmatpush.msrb.mxu2 %v2605_v19  ;;  %v1503_v19 = vld [vmem:[#allocation11 + $0x38] sm:$0xff] }
 0x257   : > { %1639 = vmatmul.f32.gmra.mxu0 %v1352_v4  ;;  %v1516_v4 = vld [vmem:[#allocation11 + $0xa0] sm:$0xff] }
 0x258   : > { %1842 = vmatmul.f32.vlgmr.msrb.gmra.mxu3 %v1429_v5  ;;  %1919 = vmatmul.f32.gmra.mxu2 %v1465_v57  ;;  %v1532_v5 = vld [vmem:[#allocation11 + $0x120] sm:$0xff]  ;;  %v1509_v57 = vld [vmem:[#allocation11 + $0x68] sm:$0xff] }
 0x259   : > { %1779 = vmatmul.f32.gmra.mxu1 %v1408_v9  ;;  %2180 = vmatpush.msrb.mxu3 %v1511_v25 }
 0x25a   : > { %2331 = vmatpush.msrb.mxu0 %v1516_v4  ;;  %2471 = vmatpush.msrb.mxu1 %v1532_v5  ;;  %v1488_v4 = vld [vmem:[%s9836_s26 + $0x108] sm:$0xff] }
 0x25b   : > { %2181 = vmatpush.msrb.mxu3 %v1510_v2  ;;  %v1364_v2 = vld [vmem:[%s9829_s7 + $0xb0] sm:$0xff] }
 0x25d   : > { %2182 = vmatpush.msrb.mxu3 %v1509_v57  ;;  %v1420_v57 = vld [vmem:[%s9839_s21 + $0xb0] sm:$0xff] }
 0x25f   : > { %1642 = vmatmul.f32.gmra.mxu0 %v1353_v10 }
 0x260   : > { %1845 = vmatmul.f32.gmra.mxu3 %v1430_v11  ;;  %1922 = vmatmul.f32.gmra.mxu2 %v1466_v43 }
 0x261   : > { %1782 = vmatmul.f32.gmra.mxu1 %v1409_v13 }
 0x267   : > { %1645 = vmatmul.f32.gmra.mxu0 %v1354_v14  ;;  %v1361_v14 = vld [vmem:[%s9829_s7 + $0x98] sm:$0xff] }
 0x268   : > { %1848 = vmatmul.f32.gmra.mxu3 %v1431_v7  ;;  %1925 = vmatmul.f32.gmra.mxu2 %v1467_v51  ;;  %v1508_v7 = vld [vmem:[#allocation11 + $0x60] sm:$0xff] }
 0x269   : > { %1785 = vmatmul.f32.gmra.mxu1 %v1410_v53  ;;  %2183 = vmatpush.msrb.mxu3 %v1508_v7  ;;  %v1502_v7 = vld [vmem:[#allocation11 + $0x30] sm:$0xff] }
 0x26f   : > { %1648 = vmatmul.f32.gmra.mxu0 %v1355_v16  ;;  %v1417_v16 = vld [vmem:[%s9839_s21 + $0x98] sm:$0xff] }
 0x270   : > { %1851 = vmatmul.f32.gmra.mxu3 %v1432_v54  ;;  %1928 = vmatmul.f32.gmra.mxu2 %v1468_v61  ;;  %v1507_v61 = vld [vmem:[#allocation11 + $0x58] sm:$0xff] }
 0x271   : > { %1788 = vmatmul.f32.gmra.mxu1 %v1411_v0  ;;  %v2604_v0 = vld [vmem:[#allocation11 + $0x318] sm:$0xff]  ;;  %2184 = vmatpush.msrb.mxu3 %v1507_v61  ;;  %v1421_v61 = vld [vmem:[%s9839_s21 + $0xb8] sm:$0xff] }
 0x272   : > { %2661 = vmatpush.msrb.mxu2 %v2604_v0 }
 0x277   : > { %1651 = vmatmul.f32.gmra.mxu0 %v1356_v20 }
 0x278   : > { %1854 = vmatmul.f32.gmra.mxu3 %v1433_v46  ;;  %1931 = vmatmul.f32.gmra.mxu2 %v1469_v23 }
 0x279   : > { %1791 = vmatmul.f32.gmra.mxu1 %v1412_v45  ;;  %v1515_v45 = vld [vmem:[#allocation11 + $0x98] sm:$0xff] }
 0x27a   : > { %2332 = vmatpush.msrb.mxu0 %v1515_v45 }
 0x27f   : > { %1654 = vmatmul.f32.gmra.mxu0 %v1357_v8  ;;  %v1531_v8 = vld [vmem:[#allocation11 + $0x118] sm:$0xff] }
 0x280   : > { %1857 = vmatmul.f32.gmra.mxu3 %v1434_v40  ;;  %1934 = vmatmul.f32.gmra.mxu2 %v1470_v27  ;;  %v1475_v27 = vld [vmem:[%s9836_s26 + $0xa0] sm:$0xff] }
 0x281   : > { %1794 = vmatmul.f32.gmra.mxu1 %v1413_v28  ;;  %v1486_v28 = vld [vmem:[%s9836_s26 + $0xf8] sm:$0xff] }
 0x282   : > { %2472 = vmatpush.msrb.mxu1 %v1531_v8  ;;  %v1366_v8 = vld [vmem:[%s9829_s7 + $0xc0] sm:$0xff] }
 0x284   : > { %v1610_v29 = vpop.f32.mrf.mxu0 }
 0x286   : > { %v1750_v35 = vpop.f32.mrf.mxu1 }
 0x287   : > { %1657 = vmatmul.f32.gmra.mxu0 %v1358_v42  ;;  %v1751_v18 = vadd.f32 %v1750_v35, %v1610_v29  ;;  %v1506_v42 = vld [vmem:[#allocation11 + $0x50] sm:$0xff] }
 0x288   : > { %1860 = vmatmul.f32.gmra.mxu3 %v1435_v36  ;;  %1937 = vmatmul.f32.gmra.mxu2 %v1471_v39 }
 0x289   : > { %1797 = vmatmul.f32.gmra.mxu1 %v1414_v48  ;;  %2185 = vmatpush.msrb.mxu3 %v1506_v42  ;;  %v1479_v42 = vld [vmem:[%s9836_s26 + $0xc0] sm:$0xff] }
 0x28a   : > { %v9939_v62 = vpop.f32.mrf.mxu3 }
 0x28b   : > { %v1890_v22 = vpop.f32.mrf.mxu2 }
 0x28c   : > { %v1891_v58 = vadd.f32 %v1890_v22, %v1751_v18  ;;  %v1613_v31 = vpop.f32.mrf.mxu0  ;;  %v1363_v18 = vld [vmem:[%s9829_s7 + $0xa8] sm:$0xff]  ;;  %v1505_v22 = vld [vmem:[#allocation11 + $0x48] sm:$0xff] }
 0x28d   : > { %2186 = vmatpush.msrb.mxu3 %v1505_v22 }
 0x28e   : > { %v1753_v26 = vpop.f32.mrf.mxu1  ;;  %v2056_v6 = vrot.slane %v1891_v58, 1 }
 0x28f   : > { %1660 = vmatmul.f32.gmra.mxu0 %v1359_v59  ;;  %v1754_v30 = vadd.f32 %v1753_v26, %v1613_v31  ;;  %v1476_v31 = vld [vmem:[%s9836_s26 + $0xa8] sm:$0xff]  ;;  %v1487_v59 = vld [vmem:[%s9836_s26 + $0x100] sm:$0xff] }
 0x290   : > { %1863 = vmatmul.f32.gmra.mxu3 %v1436_v32  ;;  %1940 = vmatmul.f32.gmra.mxu2 %v1472_v63  ;;  %v1504_v26 = vld [vmem:[#allocation11 + $0x40] sm:$0xff] }
 0x291   : > { %1800 = vmatmul.f32.gmra.mxu1 %v1415_v1  ;;  %v1419_v32 = vld [vmem:[%s9839_s21 + $0xa8] sm:$0xff]  ;;  %2187 = vmatpush.msrb.mxu3 %v1504_v26  ;;  %v2603_v1 = vld [vmem:[#allocation11 + $0x310] sm:$0xff] }
 0x292   : > { %2662 = vmatpush.msrb.mxu2 %v2603_v1 }
 0x293   : > { %v9945_v17 = vpop.f32.mrf.mxu3  ;;  %v1893_v38 = vpop.f32.mrf.mxu2  ;;  %2188 = vmatpush.msrb.mxu3 %v1503_v19 }
 0x294   : > { %v1894_v34 = vadd.f32 %v1893_v38, %v1754_v30  ;;  %v1616_v37 = vpop.f32.mrf.mxu0 }
 0x295   : > { %2189 = vmatpush.msrb.mxu3 %v1502_v7  ;;  %v1496_v7 = vld [vmem:[#allocation11] sm:$0xff] }
 0x296   : > { %v1756_v52 = vpop.f32.mrf.mxu1  ;;  %v2057_v49 = vrot.slane %v1894_v34, 1 }
 0x297   : > { %1663 = vmatmul.f32.gmra.mxu0 %v1360_v44  ;;  %v1757_v9 = vadd.f32 %v1756_v52, %v1616_v37  ;;  %v1514_v52 = vld [vmem:[#allocation11 + $0x90] sm:$0xff] }
 0x298   : > { %1866 = vmatmul.f32.gmra.mxu3 %v1437_v47  ;;  %1943 = vmatmul.f32.gmra.mxu2 %v1473_v60  ;;  %v9954_v55 = vsel %vm2055_vm0, %v2056_v6, %v2057_v49  ;;  %v1530_v47 = vld [vmem:[#allocation11 + $0x110] sm:$0xff] }
 0x299   : > { %1803 = vmatmul.f32.gmra.mxu1 %v1416_v3  ;;  %2333 = vmatpush.msrb.mxu0 %v1514_v52 }
 0x29a   : > { %2473 = vmatpush.msrb.mxu1 %v1530_v47 }
 0x29b   : > { %v9951_v10 = vpop.f32.mrf.mxu3  ;;  %v1896_v11 = vpop.f32.mrf.mxu2 }
 0x29c   : > { %v1897_v43 = vadd.f32 %v1896_v11, %v1757_v9  ;;  %v1619_v13 = vpop.f32.mrf.mxu0 }
 0x29e   : > { %v1759_v51 = vpop.f32.mrf.mxu1  ;;  %v2059_v53 = vrot.slane %v1897_v43, 1 }
 0x29f   : > { %1666 = vmatmul.f32.gmra.mxu0 %v1361_v14  ;;  %v1760_v54 = vadd.f32 %v1759_v51, %v1619_v13  ;;  %v1365_v14 = vld [vmem:[%s9829_s7 + $0xb8] sm:$0xff] }
 0x2a0   : > { %1869 = vmatmul.f32.gmra.mxu3 %v1438_v50  ;;  %1946 = vmatmul.f32.gmra.mxu2 %v1474_v15  ;;  %v9963_v56 = vsel %vm2055_vm0, %v2057_v49, %v2059_v53  ;;  %v1477_v49 = vld [vmem:[%s9836_s26 + $0xb0] sm:$0xff]  ;;  %v1478_v50 = vld [vmem:[%s9836_s26 + $0xb8] sm:$0xff] }
 0x2a1   : > { %1806 = vmatmul.f32.gmra.mxu1 %v1417_v16  ;;  %v1489_v15 = vld [vmem:[%s9836_s26 + $0x110] sm:$0xff] }
 0x2a2   : > { %v1501_v16 = vld [vmem:[#allocation11 + $0x28] sm:$0xff] }
 0x2a3   : > { %v9960_v20 = vpop.f32.mrf.mxu3  ;;  %v1899_v21 = vpop.f32.mrf.mxu2  ;;  %2190 = vmatpush.msrb.mxu3 %v1501_v16 }
 0x2a4   : > { %v1900_v46 = vadd.f32 %v1899_v21, %v1760_v54  ;;  %v1622_v23 = vpop.f32.mrf.mxu0  ;;  %v2602_v54 = vld [vmem:[#allocation11 + $0x308] sm:$0xff] }
 0x2a5   : > { %2663 = vmatpush.msrb.mxu2 %v2602_v54 }
 0x2a6   : > { %v1762_v40 = vpop.f32.mrf.mxu1  ;;  %v2061_v29 = vrot.slane %v1900_v46, 1 }
 0x2a7   : > { %1669 = vmatmul.f32.gmra.mxu0 %v1362_v24  ;;  %v1763_v35 = vadd.f32 %v1762_v40, %v1622_v23  ;;  %v1500_v40 = vld [vmem:[#allocation11 + $0x20] sm:$0xff] }
 0x2a8   : > { %1949 = vmatmul.f32.gmra.mxu2 %v1475_v27  ;;  %1982 = vmatmul.f32.vlgmr.msra.gmra.mxu3 %v1486_v28  ;;  %v9972_v48 = vsel %vm2055_vm0, %v2059_v53, %v2061_v29  ;;  %v1513_v27 = vld [vmem:[#allocation11 + $0x88] sm:$0xff] }
 0x2a9   : > { %1809 = vmatmul.f32.gmra.mxu1 %v1418_v33  ;;  %v1529_v28 = vld [vmem:[#allocation11 + $0x108] sm:$0xff]  ;;  %2191 = vmatpush.msrb.mxu3 %v1500_v40 }
 0x2aa   : > { %v1490_v33 = vld [vmem:[%s9836_s26 + $0x118] sm:$0xff]  ;;  %2334 = vmatpush.msrb.mxu0 %v1513_v27  ;;  %2474 = vmatpush.msrb.mxu1 %v1529_v28  ;;  %v3308_v27 = vld [vmem:[#allocation11 + $0x578] sm:$0xff] }
 0x2ab   : > { %v9969_v36 = vpop.f32.mrf.mxu3  ;;  %v1902_v39 = vpop.f32.mrf.mxu2  ;;  %v10053_v28 = vld [vmem:[%s9839_s21 + $0xd8] sm:$0xff] }
 0x2ac   : > { %v1903_v12 = vadd.f32 %v1902_v39, %v1763_v35  ;;  %v1625_v41 = vpop.f32.mrf.mxu0  ;;  %v1422_v39 = vld [vmem:[%s9839_s21 + $0xc0] sm:$0xff] }
 0x2ae   : > { %v1765_v58 = vpop.f32.mrf.mxu1  ;;  %v2063_v25 = vrot.slane %v1903_v12, 1 }
 0x2af   : > { %1672 = vmatmul.f32.gmra.mxu0 %v1363_v18  ;;  %v1766_v63 = vadd.f32 %v1765_v58, %v1625_v41  ;;  %v1499_v41 = vld [vmem:[#allocation11 + $0x18] sm:$0xff] }
 0x2b0   : > { %1952 = vmatmul.f32.gmra.mxu2 %v1476_v31  ;;  %1985 = vmatmul.f32.gmra.mxu3 %v1487_v59  ;;  %v9981_v44 = vsel %vm2055_vm0, %v2061_v29, %v2063_v25 }
 0x2b1   : > { %1812 = vmatmul.f32.gmra.mxu1 %v1419_v32  ;;  %2192 = vmatpush.msrb.mxu3 %v1499_v41  ;;  %v1480_v32 = vld [vmem:[%s9836_s26 + $0xc8] sm:$0xff]  ;;  %v10062_v41 = vld [vmem:[%s9829_s7 + $0xe0] sm:$0xff] }
 0x2b3   : > { %v9978_v30 = vpop.f32.mrf.mxu3  ;;  %v1905_v38 = vpop.f32.mrf.mxu2 }
 0x2b4   : > { %v1906_v34 = vadd.f32 %v1905_v38, %v1766_v63  ;;  %v1628_v37 = vpop.f32.mrf.mxu0  ;;  %v1491_v63 = vld [vmem:[%s9836_s26 + $0x120] sm:$0xff] }
 0x2b5   : > { %v1498_v38 = vld [vmem:[#allocation11 + $0x10] sm:$0xff] }
 0x2b6   : > { %v1768_v60 = vpop.f32.mrf.mxu1  ;;  %v2065_v5 = vrot.slane %v1906_v34, 1  ;;  %v2601_v34 = vld [vmem:[#allocation11 + $0x300] sm:$0xff]  ;;  %2193 = vmatpush.msrb.mxu3 %v1498_v38 }
 0x2b7   : > { %1675 = vmatmul.f32.gmra.mxu0 %v1364_v2  ;;  %v1769_v3 = vadd.f32 %v1768_v60, %v1628_v37  ;;  %v10017_v37 = vld [vmem:[%s9839_s21 + $0xc8] sm:$0xff]  ;;  %2664 = vmatpush.msrb.mxu2 %v2601_v34 }
 0x2b8   : > { %1955 = vmatmul.f32.gmra.mxu2 %v1477_v49  ;;  %1988 = vmatmul.f32.gmra.mxu3 %v1488_v4  ;;  %v9990_v13 = vsel %vm2055_vm0, %v2063_v25, %v2065_v5  ;;  %v10011_v25 = vld [vmem:[%s9829_s7 + $0xc8] sm:$0xff]  ;;  %v10026_v4 = vld [vmem:[%s9829_s7 + $0xd0] sm:$0xff] }
 0x2b9   : > { %1815 = vmatmul.f32.gmra.mxu1 %v1420_v57  ;;  %v1512_v57 = vld [vmem:[#allocation11 + $0x80] sm:$0xff]  ;;  %3463 = vmatpush.msra.mxu2 %v3308_v27 }
 0x2ba   : > { %2335 = vmatpush.msrb.mxu0 %v1512_v57 }
 0x2bb   : > { %v9987_v6 = vpop.f32.mrf.mxu3  ;;  %v1908_v9 = vpop.f32.mrf.mxu2 }
 0x2bc   : > { %v1909_v11 = vadd.f32 %v1908_v9, %v1769_v3  ;;  %v1631_v43 = vpop.f32.mrf.mxu0  ;;  %v1528_v3 = vld [vmem:[#allocation11 + $0x100] sm:$0xff] }
 0x2bd   : > { %2475 = vmatpush.msrb.mxu1 %v1528_v3  ;;  %v10084_v3 = vld [vmem:[%s9836_s26 + $0xe8] sm:$0xff] }
 0x2be   : > { %v1771_v51 = vpop.f32.mrf.mxu1  ;;  %v2067_v53 = vrot.slane %v1909_v11, 1  ;;  %v10030_v11 = vld [vmem:[%s9836_s26 + $0xd0] sm:$0xff]  ;;  %12975 = vst [vmem:[#allocation24_spill] sm:$0xff] %v10084_v3 }
 0x2bf   : > { %1678 = vmatmul.f32.gmra.mxu0 %v1365_v14  ;;  %v1772_v0 = vadd.f32 %v1771_v51, %v1631_v43  ;;  %v1492_v43 = vld [vmem:[%s9836_s26 + $0x128] sm:$0xff]  ;;  %v10035_v51 = vld [vmem:[%s9839_s21 + $0xd0] sm:$0xff] }
 0x2c0   : > { %1958 = vmatmul.f32.gmra.mxu2 %v1478_v50  ;;  %1991 = vmatmul.f32.gmra.mxu3 %v1489_v15  ;;  %v9999_v45 = vsel %vm2055_vm0, %v2065_v5, %v2067_v53  ;;  %v1497_v5 = vld [vmem:[#allocation11 + $0x8] sm:$0xff] }
 0x2c1   : > { %1818 = vmatmul.f32.gmra.mxu1 %v1421_v61  ;;  %2194 = vmatpush.msrb.mxu3 %v1497_v5  ;;  %v10080_v5 = vld [vmem:[%s9829_s7 + $0xe8] sm:$0xff] }
 0x2c3   : > { %v9996_v21 = vpop.f32.mrf.mxu3  ;;  %v1911_v46 = vpop.f32.mrf.mxu2  ;;  %2195 = vmatpush.msrb.mxu3 %v1496_v7 }
 0x2c4   : > { %v1912_v23 = vadd.f32 %v1911_v46, %v1772_v0  ;;  %v1634_v24 = vpop.f32.mrf.mxu0  ;;  %v10044_v0 = vld [vmem:[%s9829_s7 + $0xd8] sm:$0xff]  ;;  %v2632_v46 = vld [vmem:[#allocation11 + $0x3f8] sm:$0xff] }
 0x2c5   : > { %2789 = vmatpush.msra.mxu3 %v2632_v46 }
 0x2c6   : > { %v1774_v29 = vpop.f32.mrf.mxu1  ;;  %v2069_v35 = vrot.slane %v1912_v23, 1 }
 0x2c7   : > { %1681 = vmatmul.f32.gmra.mxu0 %v1366_v8  ;;  %v1775_v12 = vadd.f32 %v1774_v29, %v1634_v24  ;;  %v10048_v24 = vld [vmem:[%s9836_s26 + $0xd8] sm:$0xff]  ;;  %v1493_v8 = vld [vmem:[%s9836_s26 + $0x130] sm:$0xff] }
 0x2c8   : > { %1961 = vmatmul.f32.gmra.mxu2 %v1479_v42  ;;  %1994 = vmatmul.f32.gmra.mxu3 %v1490_v33  ;;  %v10008_v59 = vsel %vm2055_vm0, %v2067_v53, %v2069_v35 }
 0x2c9   : > { %1821 = vmatmul.f32.gmra.mxu1 %v1422_v39 }
 0x2cb   : > { %v10005_v18 = vpop.f32.mrf.mxu3  ;;  %v1914_v22 = vpop.f32.mrf.mxu2 }
 0x2cc   : > { %v1915_v58 = vadd.f32 %v1914_v22, %v1775_v12  ;;  %v1637_v31 = vpop.f32.mrf.mxu0  ;;  %v2648_v22 = vld [vmem:[#allocation11 + $0x478] sm:$0xff] }
 0x2cd   : > { %2929 = vmatpush.msra.mxu0 %v2648_v22  ;;  %v3291_v22 = vld [vmem:[#allocation11 + $0x4f0] sm:$0xff] }
 0x2ce   : > { %v1777_v26 = vpop.f32.mrf.mxu1  ;;  %v2071_v1 = vrot.slane %v1915_v58, 1  ;;  %v3292_v58 = vld [vmem:[#allocation11 + $0x4f8] sm:$0xff] }
 0x2cf   : > { %1684 = vmatmul.f32.gmra.mxu0 %v10011_v25  ;;  %v1778_v2 = vadd.f32 %v1777_v26, %v1637_v31  ;;  %v10066_v26 = vld [vmem:[%s9836_s26 + $0xe0] sm:$0xff]  ;;  %3325 = vmatpush.msra.mxu1 %v3292_v58  ;;  %v10107_v58 = vld [vmem:[%s9839_s21 + $0xf0] sm:$0xff] }
 0x2d0   : > { %1964 = vmatmul.f32.gmra.mxu2 %v1480_v32  ;;  %1997 = vmatmul.f32.gmra.mxu3 %v1491_v63  ;;  %v10023_v49 = vsel %vm2055_vm0, %v2069_v35, %v2071_v1  ;;  %v1494_v32 = vld [vmem:[%s9836_s26 + $0x138] sm:$0xff]  ;;  %12979 = vst [vmem:[#allocation28_spill] sm:$0xff] %v10107_v58 }
 0x2d1   : > { %1824 = vmatmul.f32.gmra.mxu1 %v10017_v37 }
 0x2d2   : > { %3326 = vmatpush.msra.mxu1 %v3291_v22  ;;  %v7963_v22 = vld [vmem:[%s9839_s21 + $0x8] sm:$0xff] }
 0x2d3   : > { %v10020_v19 = vpop.f32.mrf.mxu3  ;;  %v1917_v52 = vpop.f32.mrf.mxu2 }
 0x2d4   : > { %v1918_v47 = vadd.f32 %v1917_v52, %v1778_v2  ;;  %v1640_v60 = vpop.f32.mrf.mxu0 }
 0x2d6   : > { %v1780_v9 = vpop.f32.mrf.mxu1  ;;  %v2073_v14 = vrot.slane %v1918_v47, 1 }
 0x2d7   : > { %1687 = vmatmul.f32.gmra.mxu0 %v10026_v4  ;;  %v1781_v50 = vadd.f32 %v1780_v9, %v1640_v60  ;;  %v1495_v9 = vld [vmem:[%s9836_s26 + $0x140] sm:$0xff] }
 0x2d8   : > { %1967 = vmatmul.f32.gmra.mxu2 %v10030_v11  ;;  %2000 = vmatmul.f32.gmra.mxu3 %v1492_v43  ;;  %v10041_v61 = vsel %vm2055_vm0, %v2071_v1, %v2073_v14  ;;  %v10071_v1 = vld [vmem:[%s9839_s21 + $0xe0] sm:$0xff] }
 0x2d9   : > { %1827 = vmatmul.f32.gmra.mxu1 %v10035_v51 }
 0x2db   : > { %v10038_v15 = vpop.f32.mrf.mxu3  ;;  %v1920_v53 = vpop.f32.mrf.mxu2 }
 0x2dc   : > { %v1921_v16 = vadd.f32 %v1920_v53, %v1781_v50  ;;  %v1643_v54 = vpop.f32.mrf.mxu0 }
 0x2de   : > { %v1783_v23 = vpop.f32.mrf.mxu1  ;;  %v2075_v40 = vrot.slane %v1921_v16, 1 }
 0x2df   : > { %1690 = vmatmul.f32.gmra.mxu0 %v10044_v0  ;;  %v1784_v29 = vadd.f32 %v1783_v23, %v1643_v54  ;;  %v10098_v23 = vld [vmem:[%s9829_s7 + $0xf0] sm:$0xff] }
 0x2e0   : > { %1970 = vmatmul.f32.gmra.mxu2 %v10048_v24  ;;  %2003 = vmatmul.f32.gmra.mxu3 %v1493_v8  ;;  %v10059_v12 = vsel %vm2055_vm0, %v2073_v14, %v2075_v40  ;;  %v10089_v14 = vld [vmem:[%s9839_s21 + $0xe8] sm:$0xff]  ;;  %12977 = vst [vmem:[#allocation26_spill] sm:$0xff] %v10098_v23  ;;  %v2631_v8 = vld [vmem:[#allocation11 + $0x3f0] sm:$0xff] }
 0x2e1   : > { %1830 = vmatmul.f32.gmra.mxu1 %v10053_v28  ;;  %12976 = vst [vmem:[#allocation25_spill] sm:$0xff] %v10089_v14  ;;  %2790 = vmatpush.msra.mxu3 %v2631_v8 }
 0x2e3   : > { %v10056_v42 = vpop.f32.mrf.mxu3  ;;  %v1923_v33 = vpop.f32.mrf.mxu2 }
 0x2e4   : > { %v1924_v35 = vadd.f32 %v1923_v33, %v1784_v29  ;;  %v1646_v39 = vpop.f32.mrf.mxu0  ;;  %v10102_v29 = vld [vmem:[%s9836_s26 + $0xf0] sm:$0xff] }
 0x2e5   : > { %12978 = vst [vmem:[#allocation27_spill] sm:$0xff] %v10102_v29 }
 0x2e6   : > { %v1786_v31 = vpop.f32.mrf.mxu1  ;;  %v2077_v63 = vrot.slane %v1924_v35, 1  ;;  %v7959_v35 = vld [vmem:[%s9829_s7] sm:$0xff] }
 0x2e7   : > { %1693 = vmatmul.f32.gmra.mxu0 %v10062_v41  ;;  %v1787_v38 = vadd.f32 %v1786_v31, %v1646_v39  ;;  %v2647_v39 = vld [vmem:[#allocation11 + $0x470] sm:$0xff] }
 0x2e8   : > { %1973 = vmatmul.f32.gmra.mxu2 %v10066_v26  ;;  %2006 = vmatmul.f32.gmra.mxu3 %v1494_v32  ;;  %v10077_v60 = vsel %vm2055_vm0, %v2075_v40, %v2077_v63  ;;  %v3307_v40 = vld [vmem:[#allocation11 + $0x570] sm:$0xff] }
 0x2e9   : > { %1833 = vmatmul.f32.gmra.mxu1 %v10071_v1  ;;  %3464 = vmatpush.msra.mxu2 %v3307_v40 }
 0x2ea   : > { %2930 = vmatpush.msra.mxu0 %v2647_v39 }
 0x2eb   : > { %v10074_v34 = vpop.f32.mrf.mxu3  ;;  %v1926_v2 = vpop.f32.mrf.mxu2 }
 0x2ec   : > { %v1927_v52 = vadd.f32 %v1926_v2, %v1787_v38  ;;  %v1649_v47 = vpop.f32.mrf.mxu0 }
 0x2ee   : > { %v1789_v57 = vpop.f32.mrf.mxu1  ;;  %v2079_v43 = vrot.slane %v1927_v52, 1 }
 0x2ef   : > { %1696 = vmatmul.f32.gmra.mxu0 %v10080_v5  ;;  %v1790_v7 = vadd.f32 %v1789_v57, %v1649_v47  ;;  %v7960_v57 = vld [vmem:[%s9839_s21] sm:$0xff] }
 0x2f0   : > { %1976 = vmatmul.f32.gmra.mxu2 %v10084_v3  ;;  %2009 = vmatmul.f32.gmra.mxu3 %v1495_v9  ;;  %v10095_v46 = vsel %vm2055_vm0, %v2077_v63, %v2079_v43  ;;  %v7973_v3 = vld [vmem:[%s9829_s7 + $0x28] sm:$0xff] }
 0x2f1   : > { %1836 = vmatmul.f32.gmra.mxu1 %v10089_v14  ;;  %v7979_v14 = vld [vmem:[%s9829_s7 + $0x38] sm:$0xff] }
 0x2f3   : > { %v10092_v50 = vpop.f32.mrf.mxu3  ;;  %v1929_v53 = vpop.f32.mrf.mxu2 }
 0x2f4   : > { %v1930_v16 = vadd.f32 %v1929_v53, %v1790_v7  ;;  %v1652_v54 = vpop.f32.mrf.mxu0  ;;  %v7961_v7 = vld [vmem:[%s9829_s7 + $0x8] sm:$0xff] }
 0x2f6   : > { %v1792_v27 = vpop.f32.mrf.mxu1  ;;  %v2081_v33 = vrot.slane %v1930_v16, 1  ;;  %v7962_v16 = vld [vmem:[%s9836_s26] sm:$0xff] }
 0x2f7   : > { %1699 = vmatmul.f32.gmra.mxu0 %v10098_v23  ;;  %v1793_v31 = vadd.f32 %v1792_v27, %v1652_v54  ;;  %v7978_v23 = vld [vmem:[%s9839_s21 + $0x30] sm:$0xff] }
 0x2f8   : > { %1979 = vmatmul.f32.gmra.mxu2 %v10102_v29  ;;  %2196 = vmatmul.f32.vlgmr.msrb.gmra.mxu3 %v7959_v35  ;;  %v10113_v52 = vsel %vm2055_vm0, %v2079_v43, %v2081_v33  ;;  %v7966_v29 = vld [vmem:[%s9839_s21 + $0x10] sm:$0xff] }
 0x2f9   : > { %1839 = vmatmul.f32.gmra.mxu1 %v10107_v58 }
 0x2fb   : > { %v10110_v32 = vpop.f32.mrf.mxu3  ;;  %v1932_v63 = vpop.f32.mrf.mxu2 }
 0x2fc   : > { %v1933_v38 = vadd.f32 %v1932_v63, %v1793_v31  ;;  %v1655_v2 = vpop.f32.mrf.mxu0  ;;  %v7964_v63 = vld [vmem:[%s9829_s7 + $0x10] sm:$0xff] }
 0x2fe   : > { %v1795_v47 = vpop.f32.mrf.mxu1  ;;  %v2083_v9 = vrot.slane %v1933_v38, 1  ;;  %v3306_v38 = vld [vmem:[#allocation11 + $0x568] sm:$0xff] }
 0x2ff   : > { %2336 = vmatmul.f32.vlgmr.msrb.gmra.mxu0 %v7960_v57  ;;  %v1796_v53 = vadd.f32 %v1795_v47, %v1655_v2  ;;  %3465 = vmatpush.msra.mxu2 %v3306_v38  ;;  %v7965_v47 = vld [vmem:[%s9836_s26 + $0x8] sm:$0xff]  ;;  %v7968_v38 = vld [vmem:[%s9836_s26 + $0x10] sm:$0xff] }
 0x300   : > { %2199 = vmatmul.f32.gmra.mxu3 %v7961_v7  ;;  %2665 = vmatmul.f32.vlgmr.msrb.gmra.mxu2 %v7959_v35  ;;  %v10121_v43 = vsel %vm2055_vm0, %v2081_v33, %v2083_v9  ;;  %v2630_v35 = vld [vmem:[#allocation11 + $0x3e8] sm:$0xff] }
 0x301   : > { %2476 = vmatmul.f32.vlgmr.msrb.gmra.mxu1 %v7962_v16  ;;  %2791 = vmatpush.msra.mxu3 %v2630_v35 }
 0x303   : > { %v10118_v54 = vpop.f32.mrf.mxu3  ;;  %v1935_v8 = vpop.f32.mrf.mxu2 }
 0x304   : > { %v1936_v40 = vadd.f32 %v1935_v8, %v1796_v53  ;;  %v1658_v27 = vpop.f32.mrf.mxu0 }
 0x306   : > { %v1798_v39 = vpop.f32.mrf.mxu1  ;;  %v2085_v31 = vrot.slane %v1936_v40, 1  ;;  %v2646_v40 = vld [vmem:[#allocation11 + $0x468] sm:$0xff] }
 0x307   : > { %2339 = vmatmul.f32.gmra.mxu0 %v7963_v22  ;;  %v1799_v2 = vadd.f32 %v1798_v39, %v1658_v27  ;;  %v7967_v27 = vld [vmem:[%s9829_s7 + $0x18] sm:$0xff] }
 0x308   : > { %2202 = vmatmul.f32.gmra.mxu3 %v7964_v63  ;;  %2668 = vmatmul.f32.gmra.mxu2 %v7961_v7  ;;  %v10129_v8 = vsel %vm2055_vm0, %v2083_v9, %v2085_v31  ;;  %v3290_v7 = vld [vmem:[#allocation11 + $0x4e8] sm:$0xff] }
 0x309   : > { %2479 = vmatmul.f32.gmra.mxu1 %v7965_v47  ;;  %12980 = vst [vmem:[#allocation29_spill] sm:$0xff] %v10129_v8  ;;  %2931 = vmatpush.msra.mxu0 %v2646_v40  ;;  %v7970_v8 = vld [vmem:[%s9829_s7 + $0x20] sm:$0xff] }
 0x30a   : > { %3327 = vmatpush.msra.mxu1 %v3290_v7  ;;  %v7969_v7 = vld [vmem:[%s9839_s21 + $0x18] sm:$0xff] }
 0x30b   : > { %v10126_v57 = vpop.f32.mrf.mxu3  ;;  %v1938_v33 = vpop.f32.mrf.mxu2 }
 0x30c   : > { %v1939_v53 = vadd.f32 %v1938_v33, %v1799_v2  ;;  %v1661_v16 = vpop.f32.mrf.mxu0 }
 0x30e   : > { %v1801_v22 = vpop.f32.mrf.mxu1  ;;  %v2087_v35 = vrot.slane %v1939_v53, 1 }
 0x30f   : > { %2342 = vmatmul.f32.gmra.mxu0 %v7966_v29  ;;  %v1802_v39 = vadd.f32 %v1801_v22, %v1661_v16  ;;  %v7971_v16 = vld [vmem:[%s9836_s26 + $0x18] sm:$0xff] }
 0x310   : > { %2205 = vmatmul.f32.gmra.mxu3 %v7967_v27  ;;  %2671 = vmatmul.f32.gmra.mxu2 %v7964_v63  ;;  %v10137_v58 = vsel %vm2055_vm0, %v2085_v31, %v2087_v35 }
 0x311   : > { %2482 = vmatmul.f32.gmra.mxu1 %v7968_v38  ;;  %12981 = vst [vmem:[#allocation30_spill] sm:$0xff] %v10137_v58 }
 0x313   : > { %v10134_v2 = vpop.f32.mrf.mxu3  ;;  %v1941_v9 = vpop.f32.mrf.mxu2 }
 0x314   : > { %v1942_v47 = vadd.f32 %v1941_v9, %v1802_v39  ;;  %v1664_v33 = vpop.f32.mrf.mxu0  ;;  %v2629_v9 = vld [vmem:[#allocation11 + $0x3e0] sm:$0xff] }
 0x315   : > { %2792 = vmatpush.msra.mxu3 %v2629_v9 }
 0x316   : > { %v1804_v29 = vpop.f32.mrf.mxu1  ;;  %v2089_v53 = vrot.slane %v1942_v47, 1  ;;  %v7972_v47 = vld [vmem:[%s9839_s21 + $0x20] sm:$0xff] }
 0x317   : > { %2345 = vmatmul.f32.gmra.mxu0 %v7969_v7  ;;  %v1805_v63 = vadd.f32 %v1804_v29, %v1664_v33  ;;  %v3305_v7 = vld [vmem:[#allocation11 + $0x560] sm:$0xff]  ;;  %v7974_v29 = vld [vmem:[%s9836_s26 + $0x20] sm:$0xff] }
 0x318   : > { %2208 = vmatmul.f32.gmra.mxu3 %v7970_v8  ;;  %2674 = vmatmul.f32.gmra.mxu2 %v7967_v27  ;;  %v10145_v31 = vsel %vm2055_vm0, %v2087_v35, %v2089_v53 }
 0x319   : > { %2485 = vmatmul.f32.gmra.mxu1 %v7971_v16  ;;  %12982 = vst [vmem:[#allocation31_spill] sm:$0xff] %v10145_v31  ;;  %3466 = vmatpush.msra.mxu2 %v3305_v7  ;;  %v3289_v16 = vld [vmem:[#allocation11 + $0x4e0] sm:$0xff]  ;;  %v1844_v7 = vadd.f32 %v10038_v15, %v9939_v62  ;;  %v2628_v62 = vld [vmem:[#allocation11 + $0x3d8] sm:$0xff]  ;;  %v1847_v15 = vadd.f32 %v10056_v42, %v9945_v17 }
 0x31a   : > { %3328 = vmatpush.msra.mxu1 %v3289_v16  ;;  %2793 = vmatpush.msra.mxu3 %v2628_v62 }
 0x31b   : > { %v10142_v40 = vpop.f32.mrf.mxu3  ;;  %v1944_v22 = vpop.f32.mrf.mxu2 }
 0x31c   : > { %v1945_v39 = vadd.f32 %v1944_v22, %v1805_v63  ;;  %v1667_v38 = vpop.f32.mrf.mxu0  ;;  %v2645_v63 = vld [vmem:[#allocation11 + $0x460] sm:$0xff] }
 0x31d   : > { %2932 = vmatpush.msra.mxu0 %v2645_v63  ;;  %v7977_v63 = vld [vmem:[%s9836_s26 + $0x28] sm:$0xff] }
 0x31e   : > { %v1807_v58 = vpop.f32.mrf.mxu1  ;;  %v2091_v27 = vrot.slane %v1945_v39, 1 }
 0x31f   : > { %2348 = vmatmul.f32.gmra.mxu0 %v7972_v47  ;;  %v1808_v33 = vadd.f32 %v1807_v58, %v1667_v38  ;;  %v7976_v38 = vld [vmem:[%s9829_s7 + $0x30] sm:$0xff] }
 0x320   : > { %2211 = vmatmul.f32.gmra.mxu3 %v7973_v3  ;;  %2677 = vmatmul.f32.gmra.mxu2 %v7970_v8  ;;  %v10153_v39 = vsel %vm2055_vm0, %v2089_v53, %v2091_v27  ;;  %v7975_v8 = vld [vmem:[%s9839_s21 + $0x28] sm:$0xff] }
 0x321   : > { %2488 = vmatmul.f32.gmra.mxu1 %v7974_v29  ;;  %12983 = vst [vmem:[#allocation32_spill] sm:$0xff] %v10153_v39 }
 0x323   : > { %v10150_v35 = vpop.f32.mrf.mxu3  ;;  %v1947_v22 = vpop.f32.mrf.mxu2 }
 0x324   : > { %v1948_v47 = vadd.f32 %v1947_v22, %v1808_v33  ;;  %v1670_v9 = vpop.f32.mrf.mxu0 }
 0x326   : > { %v1810_v31 = vpop.f32.mrf.mxu1  ;;  %v2093_v58 = vrot.slane %v1948_v47, 1 }
 0x327   : > { %2351 = vmatmul.f32.gmra.mxu0 %v7975_v8  ;;  %v1811_v29 = vadd.f32 %v1810_v31, %v1670_v9  ;;  %v7980_v9 = vld [vmem:[%s9836_s26 + $0x30] sm:$0xff] }
 0x328   : > { %2214 = vmatmul.f32.gmra.mxu3 %v7976_v38  ;;  %2680 = vmatmul.f32.gmra.mxu2 %v7973_v3  ;;  %v10163_v8 = vsel %vm2055_vm0, %v2091_v27, %v2093_v58 }
 0x329   : > { %2491 = vmatmul.f32.gmra.mxu1 %v7977_v63  ;;  %12984 = vst [vmem:[#allocation33_spill] sm:$0xff] %v10163_v8  ;;  %v7981_v8 = vld [vmem:[%s9839_s21 + $0x38] sm:$0xff] }
 0x32b   : > { %v1950_v33 = vpop.f32.mrf.mxu2  ;;  %v1983_v16 = vpop.f32.mrf.mxu3 }
 0x32c   : > { %v1951_v53 = vadd.f32 %v1950_v33, %v1811_v29  ;;  %v10160_v22 = vadd.f32 %v1983_v16, %v1844_v7  ;;  %v1673_v39 = vpop.f32.mrf.mxu0  ;;  %v3304_v7 = vld [vmem:[#allocation11 + $0x558] sm:$0xff] }
 0x32d   : > { %3467 = vmatpush.msra.mxu2 %v3304_v7 }
 0x32e   : > { %v1813_v47 = vpop.f32.mrf.mxu1  ;;  %v2095_v3 = vrot.slane %v1951_v53, 1  ;;  %v3288_v53 = vld [vmem:[#allocation11 + $0x4d8] sm:$0xff] }
 0x32f   : > { %2354 = vmatmul.f32.gmra.mxu0 %v7978_v23  ;;  %v1814_v31 = vadd.f32 %v1813_v47, %v1673_v39  ;;  %3329 = vmatpush.msra.mxu1 %v3288_v53  ;;  %v7982_v39 = vld [vmem:[%s9829_s7 + $0x40] sm:$0xff]  ;;  %v1850_v47 = vadd.f32 %v10074_v34, %v9951_v10  ;;  %v1853_v53 = vadd.f32 %v10092_v50, %v9960_v20 }
 0x330   : > { %2217 = vmatmul.f32.gmra.mxu3 %v7979_v14  ;;  %2683 = vmatmul.f32.gmra.mxu2 %v7976_v38  ;;  %v10171_v16 = vsel %vm2055_vm0, %v2093_v58, %v2095_v3  ;;  %v2644_v38 = vld [vmem:[#allocation11 + $0x458] sm:$0xff]  ;;  %v12923_v58 = vrot.slane %v10160_v22, 1 }
 0x331   : > { %2494 = vmatmul.f32.gmra.mxu1 %v7980_v9  ;;  %2933 = vmatpush.msra.mxu0 %v2644_v38  ;;  %v7984_v34 = vld [vmem:[%s9839_s21 + $0x40] sm:$0xff]  ;;  %v7985_v38 = vld [vmem:[%s9829_s7 + $0x48] sm:$0xff] }
 0x333   : > { %v1953_v27 = vpop.f32.mrf.mxu2  ;;  %v1986_v29 = vpop.f32.mrf.mxu3 }
 0x334   : > { %v1954_v63 = vadd.f32 %v1953_v27, %v1814_v31  ;;  %v1987_v23 = vadd.f32 %v1986_v29, %v1847_v15  ;;  %v1676_v33 = vpop.f32.mrf.mxu0  ;;  %v7983_v31 = vld [vmem:[%s9836_s26 + $0x38] sm:$0xff] }
 0x336   : > { %v1816_v62 = vpop.f32.mrf.mxu1  ;;  %v2097_v17 = vrot.slane %v1954_v63, 1  ;;  %v2119_v42 = vrot.slane %v1987_v23, 1 }
 0x337   : > { %2357 = vmatmul.f32.gmra.mxu0 %v7981_v8  ;;  %v1817_v15 = vadd.f32 %v1816_v62, %v1676_v33 }
 0x338   : > { %2220 = vmatmul.f32.gmra.mxu3 %v7982_v39  ;;  %2686 = vmatmul.f32.gmra.mxu2 %v7979_v14  ;;  %v10180_v63 = vsel %vm2055_vm0, %v2095_v3, %v2097_v17  ;;  %v10185_v14 = vsel %vm2055_vm0, %v12923_v58, %v2119_v42  ;;  %v7986_v3 = vld [vmem:[%s9836_s26 + $0x40] sm:$0xff]  ;;  %v7987_v58 = vld [vmem:[%s9839_s21 + $0x48] sm:$0xff] }
 0x339   : > { %2497 = vmatmul.f32.gmra.mxu1 %v7983_v31 }
 0x33b   : > { %v1956_v9 = vpop.f32.mrf.mxu2  ;;  %v1989_v7 = vpop.f32.mrf.mxu3 }
 0x33c   : > { %v1957_v8 = vadd.f32 %v1956_v9, %v1817_v15  ;;  %v1990_v27 = vadd.f32 %v1989_v7, %v1850_v47  ;;  %v1679_v29 = vpop.f32.mrf.mxu0 }
 0x33e   : > { %v1819_v10 = vpop.f32.mrf.mxu1  ;;  %v2099_v23 = vrot.slane %v1957_v8, 1  ;;  %v2121_v33 = vrot.slane %v1990_v27, 1 }
 0x33f   : > { %2360 = vmatmul.f32.gmra.mxu0 %v7984_v34  ;;  %v1820_v62 = vadd.f32 %v1819_v10, %v1679_v29  ;;  %v7988_v29 = vld [vmem:[%s9829_s7 + $0x50] sm:$0xff]  ;;  %v3303_v10 = vld [vmem:[#allocation11 + $0x550] sm:$0xff] }
 0x340   : > { %2223 = vmatmul.f32.gmra.mxu3 %v7985_v38  ;;  %2689 = vmatmul.f32.gmra.mxu2 %v7982_v39  ;;  %v10193_v34 = vsel %vm2055_vm0, %v2097_v17, %v2099_v23  ;;  %v10196_v8 = vsel %vm2055_vm0, %v2119_v42, %v2121_v33  ;;  %v2627_v39 = vld [vmem:[#allocation11 + $0x3d0] sm:$0xff]  ;;  %v1856_v17 = vadd.f32 %v10110_v32, %v9969_v36  ;;  %v7990_v36 = vld [vmem:[%s9839_s21 + $0x50] sm:$0xff] }
 0x341   : > { %2500 = vmatmul.f32.gmra.mxu1 %v7986_v3  ;;  %2794 = vmatpush.msra.mxu3 %v2627_v39  ;;  %v3287_v39 = vld [vmem:[#allocation11 + $0x4d0] sm:$0xff] }
 0x342   : > { %3468 = vmatpush.msra.mxu2 %v3303_v10  ;;  %3330 = vmatpush.msra.mxu1 %v3287_v39 }
 0x343   : > { %v1959_v47 = vpop.f32.mrf.mxu2  ;;  %v1992_v15 = vpop.f32.mrf.mxu3 }
 0x344   : > { %v1960_v31 = vadd.f32 %v1959_v47, %v1820_v62  ;;  %v1993_v9 = vadd.f32 %v1992_v15, %v1853_v53  ;;  %v1682_v7 = vpop.f32.mrf.mxu0  ;;  %v7989_v62 = vld [vmem:[%s9836_s26 + $0x48] sm:$0xff] }
 0x346   : > { %v1822_v27 = vpop.f32.mrf.mxu1  ;;  %v2101_v20 = vrot.slane %v1960_v31, 1  ;;  %v2123_v50 = vrot.slane %v1993_v9, 1  ;;  %v2643_v9 = vld [vmem:[#allocation11 + $0x450] sm:$0xff] }
 0x347   : > { %2363 = vmatmul.f32.gmra.mxu0 %v7987_v58  ;;  %v1823_v53 = vadd.f32 %v1822_v27, %v1682_v7  ;;  %v7991_v27 = vld [vmem:[%s9829_s7 + $0x58] sm:$0xff] }
 0x348   : > { %2226 = vmatmul.f32.gmra.mxu3 %v7988_v29  ;;  %2692 = vmatmul.f32.gmra.mxu2 %v7985_v38  ;;  %v10204_v31 = vsel %vm2055_vm0, %v2099_v23, %v2101_v20  ;;  %v10207_v38 = vsel %vm2055_vm0, %v2121_v33, %v2123_v50  ;;  %v1859_v23 = vadd.f32 %v10118_v54, %v9978_v30  ;;  %v7992_v33 = vld [vmem:[%s9836_s26 + $0x50] sm:$0xff] }
 0x349   : > { %2503 = vmatmul.f32.gmra.mxu1 %v7989_v62  ;;  %2934 = vmatpush.msra.mxu0 %v2643_v9  ;;  %v7993_v9 = vld [vmem:[%s9839_s21 + $0x58] sm:$0xff] }
 0x34b   : > { %v1962_v42 = vpop.f32.mrf.mxu2  ;;  %v1995_v3 = vpop.f32.mrf.mxu3 }
 0x34c   : > { %v1963_v47 = vadd.f32 %v1962_v42, %v1823_v53  ;;  %v1996_v58 = vadd.f32 %v1995_v3, %v1856_v17  ;;  %v1685_v15 = vpop.f32.mrf.mxu0 }
 0x34e   : > { %v1825_v10 = vpop.f32.mrf.mxu1  ;;  %v2103_v32 = vrot.slane %v1963_v47, 1  ;;  %v2125_v7 = vrot.slane %v1996_v58, 1 }
 0x34f   : > { %2366 = vmatmul.f32.gmra.mxu0 %v7990_v36  ;;  %v1826_v17 = vadd.f32 %v1825_v10, %v1685_v15  ;;  %v7994_v15 = vld [vmem:[%s9829_s7 + $0x60] sm:$0xff]  ;;  %v2626_v10 = vld [vmem:[#allocation11 + $0x3c8] sm:$0xff]  ;;  %v1862_v36 = vadd.f32 %v10126_v57, %v9987_v6 }
 0x350   : > { %2229 = vmatmul.f32.gmra.mxu3 %v7991_v27  ;;  %2695 = vmatmul.f32.gmra.mxu2 %v7988_v29  ;;  %v10215_v47 = vsel %vm2055_vm0, %v2101_v20, %v2103_v32  ;;  %v10218_v58 = vsel %vm2055_vm0, %v2123_v50, %v2125_v7  ;;  %v7995_v20 = vld [vmem:[%s9836_s26 + $0x58] sm:$0xff] }
 0x351   : > { %2506 = vmatmul.f32.gmra.mxu1 %v7992_v33  ;;  %2795 = vmatpush.msra.mxu3 %v2626_v10  ;;  %v7996_v10 = vld [vmem:[%s9839_s21 + $0x60] sm:$0xff] }
 0x353   : > { %v1965_v53 = vpop.f32.mrf.mxu2  ;;  %v1998_v62 = vpop.f32.mrf.mxu3 }
 0x354   : > { %v1966_v42 = vadd.f32 %v1965_v53, %v1826_v17  ;;  %v1999_v3 = vadd.f32 %v1998_v62, %v1859_v23  ;;  %v1688_v39 = vpop.f32.mrf.mxu0 }
 0x356   : > { %v1828_v29 = vpop.f32.mrf.mxu1  ;;  %v2105_v30 = vrot.slane %v1966_v42, 1  ;;  %v2127_v54 = vrot.slane %v1999_v3, 1  ;;  %v3302_v3 = vld [vmem:[#allocation11 + $0x548] sm:$0xff] }
 0x357   : > { %2369 = vmatmul.f32.gmra.mxu0 %v7993_v9  ;;  %v1829_v23 = vadd.f32 %v1828_v29, %v1688_v39  ;;  %3469 = vmatpush.msra.mxu2 %v3302_v3  ;;  %v7997_v39 = vld [vmem:[%s9829_s7 + $0x68] sm:$0xff]  ;;  %v2642_v29 = vld [vmem:[#allocation11 + $0x448] sm:$0xff] }
 0x358   : > { %2232 = vmatmul.f32.gmra.mxu3 %v7994_v15  ;;  %2698 = vmatmul.f32.gmra.mxu2 %v7991_v27  ;;  %v10226_v42 = vsel %vm2055_vm0, %v2103_v32, %v2105_v30  ;;  %v10229_v27 = vsel %vm2055_vm0, %v2125_v7, %v2127_v54  ;;  %v1865_v32 = vadd.f32 %v10134_v2, %v9996_v21 }
 0x359   : > { %2509 = vmatmul.f32.gmra.mxu1 %v7995_v20  ;;  %2935 = vmatpush.msra.mxu0 %v2642_v29  ;;  %v10243_v29 = vld [vmem:[%s9839_s21 + $0x68] sm:$0xff] }
 0x35a   : > { %12985 = vst [vmem:[#allocation34_spill] sm:$0xff] %v10243_v29 }
 0x35b   : > { %v1968_v50 = vpop.f32.mrf.mxu2  ;;  %v2001_v17 = vpop.f32.mrf.mxu3 }
 0x35c   : > { %v1969_v33 = vadd.f32 %v1968_v50, %v1829_v23  ;;  %v2002_v53 = vadd.f32 %v2001_v17, %v1862_v36  ;;  %v1691_v62 = vpop.f32.mrf.mxu0  ;;  %v3286_v36 = vld [vmem:[#allocation11 + $0x4c8] sm:$0xff]  ;;  %v7998_v23 = vld [vmem:[%s9836_s26 + $0x60] sm:$0xff] }
 0x35d   : > { %3331 = vmatpush.msra.mxu1 %v3286_v36 }
 0x35e   : > { %v1831_v9 = vpop.f32.mrf.mxu1  ;;  %v2107_v6 = vrot.slane %v1969_v33, 1  ;;  %v2129_v57 = vrot.slane %v2002_v53, 1 }
 0x35f   : > { %2372 = vmatmul.f32.gmra.mxu0 %v7996_v10  ;;  %v1832_v7 = vadd.f32 %v1831_v9, %v1691_v62  ;;  %v8000_v62 = vld [vmem:[%s9829_s7 + $0x70] sm:$0xff]  ;;  %v1868_v9 = vadd.f32 %v10142_v40, %v10005_v18 }
 0x360   : > { %2235 = vmatmul.f32.gmra.mxu3 %v7997_v39  ;;  %2701 = vmatmul.f32.gmra.mxu2 %v7994_v15  ;;  %v10237_v15 = vsel %vm2055_vm0, %v2105_v30, %v2107_v6  ;;  %v10240_v3 = vsel %vm2055_vm0, %v2127_v54, %v2129_v57  ;;  %v8001_v30 = vld [vmem:[%s9836_s26 + $0x68] sm:$0xff] }
 0x361   : > { %2512 = vmatmul.f32.gmra.mxu1 %v7998_v23 }
 0x363   : > { %v1971_v20 = vpop.f32.mrf.mxu2  ;;  %v2004_v50 = vpop.f32.mrf.mxu3 }
 0x364   : > { %v1972_v17 = vadd.f32 %v1971_v20, %v1832_v7  ;;  %v2005_v33 = vadd.f32 %v2004_v50, %v1865_v32  ;;  %v1694_v53 = vpop.f32.mrf.mxu0 }
 0x366   : > { %v1834_v10 = vpop.f32.mrf.mxu1  ;;  %v2109_v21 = vrot.slane %v1972_v17, 1  ;;  %v2131_v2 = vrot.slane %v2005_v33, 1 }
 0x367   : > { %2375 = vmatmul.f32.gmra.mxu0 %v10243_v29  ;;  %v1835_v36 = vadd.f32 %v1834_v10, %v1694_v53  ;;  %v10257_v29 = vld [vmem:[%s9839_s21 + $0x70] sm:$0xff]  ;;  %v8003_v53 = vld [vmem:[%s9829_s7 + $0x78] sm:$0xff] }
 0x368   : > { %2238 = vmatmul.f32.gmra.mxu3 %v8000_v62  ;;  %2704 = vmatmul.f32.gmra.mxu2 %v7997_v39  ;;  %v10251_v50 = vsel %vm2055_vm0, %v2107_v6, %v2109_v21  ;;  %v10254_v17 = vsel %vm2055_vm0, %v2129_v57, %v2131_v2  ;;  %v2625_v39 = vld [vmem:[#allocation11 + $0x3c0] sm:$0xff]  ;;  %v1871_v6 = vadd.f32 %v10150_v35, %v10020_v19 }
 0x369   : > { %2515 = vmatmul.f32.gmra.mxu1 %v8001_v30  ;;  %2796 = vmatpush.msra.mxu3 %v2625_v39  ;;  %v3301_v10 = vld [vmem:[#allocation11 + $0x540] sm:$0xff] }
 0x36a   : > { %3470 = vmatpush.msra.mxu2 %v3301_v10 }
 0x36b   : > { %v1974_v54 = vpop.f32.mrf.mxu2  ;;  %v2007_v32 = vpop.f32.mrf.mxu3 }
 0x36c   : > { %v1975_v7 = vadd.f32 %v1974_v54, %v1835_v36  ;;  %v2008_v23 = vadd.f32 %v2007_v32, %v1868_v9  ;;  %v1697_v20 = vpop.f32.mrf.mxu0  ;;  %v10264_v9 = vld [vmem:[%s9836_s26 + $0x70] sm:$0xff] }
 0x36e   : > { %v1837_v33 = vpop.f32.mrf.mxu1  ;;  %v2111_v18 = vrot.slane %v1975_v7, 1  ;;  %v2133_v40 = vrot.slane %v2008_v23, 1  ;;  %v3285_v23 = vld [vmem:[#allocation11 + $0x4c0] sm:$0xff] }
 0x36f   : > { %2378 = vmatmul.f32.gmra.mxu0 %v10257_v29  ;;  %v1838_v57 = vadd.f32 %v1837_v33, %v1697_v20  ;;  %3332 = vmatpush.msra.mxu1 %v3285_v23  ;;  %v10276_v20 = vld [vmem:[%s9839_s21 + $0x78] sm:$0xff] }
 0x370   : > { %2241 = vmatmul.f32.gmra.mxu3 %v8003_v53  ;;  %2707 = vmatmul.f32.gmra.mxu2 %v8000_v62  ;;  %v2641_v62 = vld [vmem:[#allocation11 + $0x440] sm:$0xff]  ;;  %v10270_v39 = vsel %vm2055_vm0, %v2109_v21, %v2111_v18  ;;  %v10273_v19 = vsel %vm2055_vm0, %v2131_v2, %v2133_v40 }
 0x371   : > { %2518 = vmatmul.f32.gmra.mxu1 %v10264_v9  ;;  %2936 = vmatpush.msra.mxu0 %v2641_v62 }
 0x373   : > { %v1977_v36 = vpop.f32.mrf.mxu2  ;;  %v2010_v30 = vpop.f32.mrf.mxu3 }
 0x374   : > { %v1978_v54 = vadd.f32 %v1977_v36, %v1838_v57  ;;  %v10267_v32 = vadd.f32 %v2010_v30, %v1871_v6  ;;  %v1700_v7 = vpop.f32.mrf.mxu0  ;;  %v8006_v6 = vld [vmem:[%s9829_s7 + $0x80] sm:$0xff]  ;;  %v10282_v57 = vld [vmem:[%s9836_s26 + $0x78] sm:$0xff] }
 0x376   : > { %v1840_v35 = vpop.f32.mrf.mxu1  ;;  %v2113_v33 = vrot.slane %v1978_v54, 1  ;;  %v12925_v10 = vrot.slane %v10267_v32, 1 }
 0x377   : > { %2381 = vmatmul.f32.gmra.mxu0 %v10276_v20  ;;  %v1841_v21 = vadd.f32 %v1840_v35, %v1700_v7  ;;  %v10301_v35 = vld [vmem:[%s9839_s21 + $0x80] sm:$0xff] }
 0x378   : > { %2244 = vmatmul.f32.gmra.mxu3 %v8006_v6  ;;  %2710 = vmatmul.f32.gmra.mxu2 %v8003_v53  ;;  %v10291_v23 = vsel %vm2055_vm0, %v2111_v18, %v2113_v33  ;;  %v10296_v53 = vsel %vm2055_vm0, %v2133_v40, %v12925_v10  ;;  %v2624_v18 = vld [vmem:[#allocation11 + $0x3b8] sm:$0xff] }
 0x379   : > { %2521 = vmatmul.f32.gmra.mxu1 %v10282_v57  ;;  %2797 = vmatpush.msra.mxu3 %v2624_v18  ;;  %v2640_v18 = vld [vmem:[#allocation11 + $0x438] sm:$0xff] }
 0x37a   : > { %2937 = vmatpush.msra.mxu0 %v2640_v18  ;;  %v8015_v18 = vld [vmem:[%s9829_s7 + $0x98] sm:$0xff] }
 0x37b   : > { %v1980_v2 = vpop.f32.mrf.mxu2  ;;  %v2197_v36 = vpop.f32.mrf.mxu3 }
 0x37c   : > { %v1981_v30 = vadd.f32 %v1980_v2, %v1841_v21  ;;  %v10286_v62 = vadd.f32 %v2197_v36, %v9954_v55  ;;  %v10288_v54 = vpop.f32.mrf.mxu0  ;;  %v8009_v2 = vld [vmem:[%s9829_s7 + $0x88] sm:$0xff]  ;;  %v10306_v55 = vld [vmem:[%s9836_s26 + $0x80] sm:$0xff] }
 0x37d   : > { %12987 = vst [vmem:[#allocation36_spill] sm:$0xff] %v10288_v54 }
 0x37e   : > { %12986 = vst [vmem:[#allocation35_spill] sm:$0xff] %v10286_v62  ;;  %v10298_v7 = vpop.f32.mrf.mxu1  ;;  %v2115_v21 = vrot.slane %v1981_v30, 1  ;;  %v3300_v30 = vld [vmem:[#allocation11 + $0x538] sm:$0xff] }
 0x37f   : > { %12988 = vst [vmem:[#allocation37_spill] sm:$0xff] %v10298_v7  ;;  %2384 = vmatmul.f32.gmra.mxu0 %v10301_v35  ;;  %3471 = vmatpush.msra.mxu2 %v3300_v30 }
 0x380   : > { %2247 = vmatmul.f32.gmra.mxu3 %v8009_v2  ;;  %2713 = vmatmul.f32.gmra.mxu2 %v8006_v6  ;;  %12989 = vst [vmem:[#allocation38_spill] sm:$0xff] %v10306_v55  ;;  %v10317_v54 = vsel %vm2055_vm0, %v2113_v33, %v2115_v21  ;;  %v12993_v6 = vrot.slane %v10160_v22, 1  ;;  %v3284_v33 = vld [vmem:[#allocation11 + $0x4b8] sm:$0xff] }
 0x381   : > { %2524 = vmatmul.f32.gmra.mxu1 %v10306_v55  ;;  %v10332_v22 = vld [vmem:[%s9836_s26 + $0x88] sm:$0xff] }
 0x382   : > { %v10322_v62 = vsel %vm2055_vm0, %v2115_v21, %v12993_v6  ;;  %3333 = vmatpush.msra.mxu1 %v3284_v33  ;;  %v10350_v33 = vld [vmem:[%s9836_s26 + $0x90] sm:$0xff] }
 0x383   : > { %v2200_v36 = vpop.f32.mrf.mxu3  ;;  %v10309_v40 = vpop.f32.mrf.mxu2  ;;  %12998 = vst [vmem:[#allocation46_spill] sm:$0xff] %v10350_v33 }
 0x384   : > { %12990 = vst [vmem:[#allocation39_spill] sm:$0xff] %v10309_v40  ;;  %v10312_v10 = vadd.f32 %v2200_v36, %v9963_v56  ;;  %v10314_v7 = vpop.f32.mrf.mxu0  ;;  %v10327_v40 = vld [vmem:[%s9839_s21 + $0x88] sm:$0xff]  ;;  %v8012_v56 = vld [vmem:[%s9829_s7 + $0x90] sm:$0xff] }
 0x385   : > { %12992 = vst [vmem:[#allocation41_spill] sm:$0xff] %v10314_v7 }
 0x386   : > { %12991 = vst [vmem:[#allocation40_spill] sm:$0xff] %v10312_v10  ;;  %v10324_v55 = vpop.f32.mrf.mxu1  ;;  %v2623_v10 = vld [vmem:[#allocation11 + $0x3b0] sm:$0xff] }
 0x387   : > { %12994 = vst [vmem:[#allocation42_spill] sm:$0xff] %v10324_v55  ;;  %2387 = vmatmul.f32.gmra.mxu0 %v10327_v40  ;;  %v10345_v55 = vld [vmem:[%s9839_s21 + $0x90] sm:$0xff]  ;;  %2798 = vmatpush.msra.mxu3 %v2623_v10  ;;  %v10381_v10 = vld [vmem:[%s9839_s21 + $0xa0] sm:$0xff] }
 0x388   : > { %2250 = vmatmul.f32.gmra.mxu3 %v8012_v56  ;;  %2716 = vmatmul.f32.gmra.mxu2 %v8009_v2  ;;  %13008 = vst [vmem:[#allocation56_spill] sm:$0xff] %v10381_v10 }
 0x389   : > { %2527 = vmatmul.f32.gmra.mxu1 %v10332_v22 }
 0x38b   : > { %v2203_v21 = vpop.f32.mrf.mxu3  ;;  %v10335_v36 = vpop.f32.mrf.mxu2 }
 0x38c   : > { %v10338_v30 = vadd.f32 %v2203_v21, %v9972_v48  ;;  %v10340_v6 = vpop.f32.mrf.mxu0 }
 0x38d   : > { %12996 = vst [vmem:[#allocation44_spill] sm:$0xff] %v10340_v6 }
 0x38e   : > { %12995 = vst [vmem:[#allocation43_spill] sm:$0xff] %v10338_v30  ;;  %v10342_v2 = vpop.f32.mrf.mxu1  ;;  %v10363_v30 = vld [vmem:[%s9839_s21 + $0x98] sm:$0xff] }
 0x38f   : > { %12997 = vst [vmem:[#allocation45_spill] sm:$0xff] %v10342_v2  ;;  %2390 = vmatmul.f32.gmra.mxu0 %v10345_v55 }
 0x390   : > { %2253 = vmatmul.f32.gmra.mxu3 %v8015_v18  ;;  %2719 = vmatmul.f32.gmra.mxu2 %v8012_v56  ;;  %13003 = vst [vmem:[#allocation51_spill] sm:$0xff] %v10363_v30  ;;  %v8018_v56 = vld [vmem:[%s9829_s7 + $0xa0] sm:$0xff] }
 0x391   : > { %2530 = vmatmul.f32.gmra.mxu1 %v10350_v33  ;;  %v3299_v33 = vld [vmem:[#allocation11 + $0x530] sm:$0xff] }
 0x392   : > { %3472 = vmatpush.msra.mxu2 %v3299_v33  ;;  %v8021_v33 = vld [vmem:[%s9829_s7 + $0xa8] sm:$0xff] }
 0x393   : > { %v2206_v7 = vpop.f32.mrf.mxu3  ;;  %v10353_v48 = vpop.f32.mrf.mxu2 }
 0x394   : > { %12999 = vst [vmem:[#allocation47_spill] sm:$0xff] %v10353_v48  ;;  %v10356_v21 = vadd.f32 %v2206_v7, %v9981_v44  ;;  %v10358_v6 = vpop.f32.mrf.mxu0  ;;  %v10368_v48 = vld [vmem:[%s9836_s26 + $0x98] sm:$0xff] }
 0x395   : > { %13001 = vst [vmem:[#allocation49_spill] sm:$0xff] %v10358_v6 }
 0x396   : > { %13000 = vst [vmem:[#allocation48_spill] sm:$0xff] %v10356_v21  ;;  %v10360_v2 = vpop.f32.mrf.mxu1  ;;  %v2639_v21 = vld [vmem:[#allocation11 + $0x430] sm:$0xff] }
 0x397   : > { %13002 = vst [vmem:[#allocation50_spill] sm:$0xff] %v10360_v2  ;;  %2393 = vmatmul.f32.gmra.mxu0 %v10363_v30 }
 0x398   : > { %2256 = vmatmul.f32.gmra.mxu3 %v8018_v56  ;;  %2722 = vmatmul.f32.gmra.mxu2 %v8015_v18  ;;  %13004 = vst [vmem:[#allocation52_spill] sm:$0xff] %v10368_v48  ;;  %v3283_v18 = vld [vmem:[#allocation11 + $0x4b0] sm:$0xff] }
 0x399   : > { %2533 = vmatmul.f32.gmra.mxu1 %v10368_v48  ;;  %2938 = vmatpush.msra.mxu0 %v2639_v21  ;;  %v8025_v21 = vld [vmem:[%s9836_s26 + $0xa8] sm:$0xff] }
 0x39a   : > { %3334 = vmatpush.msra.mxu1 %v3283_v18  ;;  %v8024_v18 = vld [vmem:[%s9829_s7 + $0xb0] sm:$0xff] }
 0x39b   : > { %v2209_v44 = vpop.f32.mrf.mxu3  ;;  %v10371_v7 = vpop.f32.mrf.mxu2 }
 0x39c   : > { %v10374_v2 = vadd.f32 %v2209_v44, %v9990_v13  ;;  %v10376_v6 = vpop.f32.mrf.mxu0  ;;  %v8022_v13 = vld [vmem:[%s9836_s26 + $0xa0] sm:$0xff] }
 0x39d   : > { %13006 = vst [vmem:[#allocation54_spill] sm:$0xff] %v10376_v6 }
 0x39e   : > { %13005 = vst [vmem:[#allocation53_spill] sm:$0xff] %v10374_v2  ;;  %v10378_v30 = vpop.f32.mrf.mxu1 }
 0x39f   : > { %13007 = vst [vmem:[#allocation55_spill] sm:$0xff] %v10378_v30  ;;  %2396 = vmatmul.f32.gmra.mxu0 %v10381_v10  ;;  %v8023_v10 = vld [vmem:[%s9839_s21 + $0xa8] sm:$0xff] }
 0x3a0   : > { %2259 = vmatmul.f32.gmra.mxu3 %v8021_v33  ;;  %2725 = vmatmul.f32.gmra.mxu2 %v8018_v56 }
 0x3a1   : > { %2536 = vmatmul.f32.gmra.mxu1 %v8022_v13 }
 0x3a3   : > { %v2212_v44 = vpop.f32.mrf.mxu3  ;;  %v10386_v6 = vpop.f32.mrf.mxu2 }
 0x3a4   : > { %13009 = vst [vmem:[#allocation57_spill] sm:$0xff] %v10386_v6  ;;  %v10389_v2 = vadd.f32 %v2212_v44, %v9999_v45  ;;  %v10391_v30 = vpop.f32.mrf.mxu0  ;;  %v2622_v44 = vld [vmem:[#allocation11 + $0x3a8] sm:$0xff] }
 0x3a5   : > { %13011 = vst [vmem:[#allocation59_spill] sm:$0xff] %v10391_v30  ;;  %2799 = vmatpush.msra.mxu3 %v2622_v44 }
 0x3a6   : > { %13010 = vst [vmem:[#allocation58_spill] sm:$0xff] %v10389_v2  ;;  %v10393_v48 = vpop.f32.mrf.mxu1 }
 0x3a7   : > { %13012 = vst [vmem:[#allocation60_spill] sm:$0xff] %v10393_v48  ;;  %2399 = vmatmul.f32.gmra.mxu0 %v8023_v10  ;;  %v3298_v48 = vld [vmem:[#allocation11 + $0x528] sm:$0xff] }
 0x3a8   : > { %2262 = vmatmul.f32.gmra.mxu3 %v8024_v18  ;;  %2728 = vmatmul.f32.gmra.mxu2 %v8021_v33  ;;  %v8026_v10 = vld [vmem:[%s9839_s21 + $0xb0] sm:$0xff]  ;;  %v8027_v33 = vld [vmem:[%s9829_s7 + $0xb8] sm:$0xff] }
 0x3a9   : > { %2539 = vmatmul.f32.gmra.mxu1 %v8025_v21  ;;  %3473 = vmatpush.msra.mxu2 %v3298_v48  ;;  %v2638_v21 = vld [vmem:[#allocation11 + $0x428] sm:$0xff] }
 0x3aa   : > { %2939 = vmatpush.msra.mxu0 %v2638_v21  ;;  %v8031_v21 = vld [vmem:[%s9836_s26 + $0xb8] sm:$0xff] }
 0x3ab   : > { %v2215_v56 = vpop.f32.mrf.mxu3  ;;  %v10398_v13 = vpop.f32.mrf.mxu2 }
 0x3ac   : > { %v10401_v6 = vadd.f32 %v2215_v56, %v10008_v59  ;;  %v10403_v45 = vpop.f32.mrf.mxu0  ;;  %v3282_v59 = vld [vmem:[#allocation11 + $0x4a8] sm:$0xff] }
 0x3ad   : > { %13014 = vst [vmem:[#allocation62_spill] sm:$0xff] %v10403_v45  ;;  %3335 = vmatpush.msra.mxu1 %v3282_v59  ;;  %v8028_v56 = vld [vmem:[%s9836_s26 + $0xb0] sm:$0xff] }
 0x3ae   : > { %13013 = vst [vmem:[#allocation61_spill] sm:$0xff] %v10401_v6  ;;  %v10405_v30 = vpop.f32.mrf.mxu1  ;;  %v8029_v6 = vld [vmem:[%s9839_s21 + $0xb8] sm:$0xff] }
 0x3af   : > { %13015 = vst [vmem:[#allocation63_spill] sm:$0xff] %v10405_v30  ;;  %2402 = vmatmul.f32.gmra.mxu0 %v8026_v10 }
 0x3b0   : > { %2265 = vmatmul.f32.gmra.mxu3 %v8027_v33  ;;  %2731 = vmatmul.f32.gmra.mxu2 %v8024_v18  ;;  %v8030_v18 = vld [vmem:[%s9829_s7 + $0xc0] sm:$0xff] }
 0x3b1   : > { %2542 = vmatmul.f32.gmra.mxu1 %v8028_v56 }
 0x3b3   : > { %v2218_v45 = vpop.f32.mrf.mxu3  ;;  %v10410_v44 = vpop.f32.mrf.mxu2 }
 0x3b4   : > { %v10413_v30 = vadd.f32 %v2218_v45, %v10023_v49  ;;  %v10415_v10 = vpop.f32.mrf.mxu0 }
 0x3b5   : > { %13017 = vst [vmem:[#allocation65_spill] sm:$0xff] %v10415_v10  ;;  %v8032_v10 = vld [vmem:[%s9839_s21 + $0xc0] sm:$0xff] }
 0x3b6   : > { %13016 = vst [vmem:[#allocation64_spill] sm:$0xff] %v10413_v30  ;;  %v10417_v48 = vpop.f32.mrf.mxu1 }
 0x3b7   : > { %13018 = vst [vmem:[#allocation66_spill] sm:$0xff] %v10417_v48  ;;  %2405 = vmatmul.f32.gmra.mxu0 %v8029_v6  ;;  %v2621_v6 = vld [vmem:[#allocation11 + $0x3a0] sm:$0xff] }
 0x3b8   : > { %2268 = vmatmul.f32.gmra.mxu3 %v8030_v18  ;;  %2734 = vmatmul.f32.gmra.mxu2 %v8027_v33  ;;  %v8033_v33 = vld [vmem:[%s9836_s26 + $0xc0] sm:$0xff] }
 0x3b9   : > { %2545 = vmatmul.f32.gmra.mxu1 %v8031_v21  ;;  %2800 = vmatpush.msra.mxu3 %v2621_v6  ;;  %v3297_v21 = vld [vmem:[#allocation11 + $0x520] sm:$0xff] }
 0x3ba   : > { %3474 = vmatpush.msra.mxu2 %v3297_v21  ;;  %v8035_v6 = vld [vmem:[%s9836_s26 + $0xc8] sm:$0xff] }
 0x3bb   : > { %v2221_v59 = vpop.f32.mrf.mxu3  ;;  %v10422_v56 = vpop.f32.mrf.mxu2 }
 0x3bc   : > { %v10425_v2 = vadd.f32 %v2221_v59, %v10041_v61  ;;  %v10427_v49 = vpop.f32.mrf.mxu0 }
 0x3be   : > { %v10429_v45 = vpop.f32.mrf.mxu1 }
 0x3bf   : > { %13019 = vst [vmem:[#allocation67_spill] sm:$0xff] %v10429_v45  ;;  %2408 = vmatmul.f32.gmra.mxu0 %v8032_v10  ;;  %v2637_v10 = vld [vmem:[#allocation11 + $0x420] sm:$0xff] }
 0x3c0   : > { %2271 = vmatmul.f32.gmra.mxu3 %v10011_v25  ;;  %2737 = vmatmul.f32.gmra.mxu2 %v8030_v18  ;;  %v3281_v45 = vld [vmem:[#allocation11 + $0x4a0] sm:$0xff] }
 0x3c1   : > { %2548 = vmatmul.f32.gmra.mxu1 %v8033_v33  ;;  %v8034_v18 = vld [vmem:[%s9829_s7 + $0xc8] sm:$0xff]  ;;  %2940 = vmatpush.msra.mxu0 %v2637_v10 }
 0x3c2   : > { %3336 = vmatpush.msra.mxu1 %v3281_v45 }
 0x3c3   : > { %v2224_v48 = vpop.f32.mrf.mxu3  ;;  %v10434_v30 = vpop.f32.mrf.mxu2 }
 0x3c4   : > { %v10437_v61 = vadd.f32 %v2224_v48, %v10059_v12  ;;  %v10439_v59 = vpop.f32.mrf.mxu0 }
 0x3c5   : > { %13020 = vst [vmem:[#allocation68_spill] sm:$0xff] %v10439_v59 }
 0x3c6   : > { %v10441_v25 = vpop.f32.mrf.mxu1 }
 0x3c7   : > { %2411 = vmatmul.f32.gmra.mxu0 %v10017_v37 }
 0x3c8   : > { %2274 = vmatmul.f32.gmra.mxu3 %v10026_v4  ;;  %2740 = vmatmul.f32.gmra.mxu2 %v8034_v18  ;;  %v2620_v18 = vld [vmem:[#allocation11 + $0x398] sm:$0xff] }
 0x3c9   : > { %2551 = vmatmul.f32.gmra.mxu1 %v8035_v6  ;;  %2801 = vmatpush.msra.mxu3 %v2620_v18  ;;  %v3296_v6 = vld [vmem:[#allocation11 + $0x518] sm:$0xff] }
 0x3ca   : > { %3475 = vmatpush.msra.mxu2 %v3296_v6 }
 0x3cb   : > { %v2227_v33 = vpop.f32.mrf.mxu3  ;;  %v10447_v21 = vpop.f32.mrf.mxu2 }
 0x3cc   : > { %v10450_v12 = vadd.f32 %v2227_v33, %v10077_v60  ;;  %v10452_v48 = vpop.f32.mrf.mxu0 }
 0x3ce   : > { %v10454_v59 = vpop.f32.mrf.mxu1 }
 0x3cf   : > { %2414 = vmatmul.f32.gmra.mxu0 %v10035_v51 }
 0x3d0   : > { %2277 = vmatmul.f32.gmra.mxu3 %v10044_v0  ;;  %2743 = vmatmul.f32.gmra.mxu2 %v10026_v4  ;;  %v2636_v4 = vld [vmem:[#allocation11 + $0x418] sm:$0xff] }
 0x3d1   : > { %2554 = vmatmul.f32.gmra.mxu1 %v10030_v11  ;;  %v3280_v11 = vld [vmem:[#allocation11 + $0x498] sm:$0xff]  ;;  %2941 = vmatpush.msra.mxu0 %v2636_v4 }
 0x3d2   : > { %3337 = vmatpush.msra.mxu1 %v3280_v11  ;;  %v13027_v11 = vld [vmem:[#allocation25_spill] sm:$0xff] }
 0x3d3   : > { %v2230_v37 = vpop.f32.mrf.mxu3  ;;  %v10460_v45 = vpop.f32.mrf.mxu2 }
 0x3d4   : > { %v10463_v10 = vadd.f32 %v2230_v37, %v10095_v46  ;;  %v10465_v60 = vpop.f32.mrf.mxu0 }
 0x3d6   : > { %v10467_v33 = vpop.f32.mrf.mxu1 }
 0x3d7   : > { %2417 = vmatmul.f32.gmra.mxu0 %v10053_v28 }
 0x3d8   : > { %2280 = vmatmul.f32.gmra.mxu3 %v10062_v41  ;;  %2746 = vmatmul.f32.gmra.mxu2 %v10044_v0 }
 0x3d9   : > { %2557 = vmatmul.f32.gmra.mxu1 %v10048_v24 }
 0x3db   : > { %v2233_v51 = vpop.f32.mrf.mxu3  ;;  %v10473_v46 = vpop.f32.mrf.mxu2 }
 0x3dc   : > { %v10476_v37 = vadd.f32 %v2233_v51, %v10113_v52  ;;  %v10478_v18 = vpop.f32.mrf.mxu0 }
 0x3dd   : > { %13022 = vst [vmem:[#allocation70_spill] sm:$0xff] %v10478_v18  ;;  %v8037_v18 = vld [vmem:[%s9839_s21 + $0xf8] sm:$0xff] }
 0x3de   : > { %13021 = vst [vmem:[#allocation69_spill] sm:$0xff] %v10476_v37  ;;  %v10480_v28 = vpop.f32.mrf.mxu1 }
 0x3df   : > { %13023 = vst [vmem:[#allocation71_spill] sm:$0xff] %v10480_v28  ;;  %2420 = vmatmul.f32.gmra.mxu0 %v10071_v1  ;;  %v13028_v1 = vld [vmem:[#allocation26_spill] sm:$0xff] }
 0x3e0   : > { %2283 = vmatmul.f32.gmra.mxu3 %v10080_v5  ;;  %2749 = vmatmul.f32.gmra.mxu2 %v10062_v41  ;;  %v2619_v41 = vld [vmem:[#allocation11 + $0x390] sm:$0xff] }
 0x3e1   : > { %2560 = vmatmul.f32.gmra.mxu1 %v10066_v26  ;;  %2802 = vmatpush.msra.mxu3 %v2619_v41  ;;  %v13029_v26 = vld [vmem:[#allocation24_spill] sm:$0xff]  ;;  %v2635_v41 = vld [vmem:[#allocation11 + $0x410] sm:$0xff] }
 0x3e2   : > { %2942 = vmatpush.msra.mxu0 %v2635_v41  ;;  %v8039_v41 = vld [vmem:[%s9836_s26 + $0xf8] sm:$0xff] }
 0x3e3   : > { %v2236_v0 = vpop.f32.mrf.mxu3  ;;  %v10486_v24 = vpop.f32.mrf.mxu2 }
 0x3e4   : > { %v10489_v6 = vadd.f32 %v2236_v0, %v10121_v43  ;;  %v10491_v52 = vpop.f32.mrf.mxu0  ;;  %v13030_v43 = vld [vmem:[#allocation29_spill] sm:$0xff] }
 0x3e5   : > { %13025 = vst [vmem:[#allocation73_spill] sm:$0xff] %v10491_v52 }
 0x3e6   : > { %13024 = vst [vmem:[#allocation72_spill] sm:$0xff] %v10489_v6  ;;  %v10493_v4 = vpop.f32.mrf.mxu1  ;;  %v3295_v6 = vld [vmem:[#allocation11 + $0x510] sm:$0xff] }
 0x3e7   : > { %13026 = vst [vmem:[#allocation74_spill] sm:$0xff] %v10493_v4  ;;  %2423 = vmatmul.f32.gmra.mxu0 %v13027_v11  ;;  %3476 = vmatpush.msra.mxu2 %v3295_v6  ;;  %v13034_v4 = vld [vmem:[#allocation28_spill] sm:$0xff]  ;;  %v13037_v6 = vld [vmem:[#allocation30_spill] sm:$0xff] }
 0x3e8   : > { %2286 = vmatmul.f32.gmra.mxu3 %v13028_v1  ;;  %2752 = vmatmul.f32.gmra.mxu2 %v10080_v5  ;;  %v8036_v5 = vld [vmem:[%s9829_s7 + $0xf8] sm:$0xff] }
 0x3e9   : > { %2563 = vmatmul.f32.gmra.mxu1 %v13029_v26  ;;  %v3279_v26 = vld [vmem:[#allocation11 + $0x490] sm:$0xff] }
 0x3ea   : > { %3338 = vmatpush.msra.mxu1 %v3279_v26 }
 0x3eb   : > { %v2239_v51 = vpop.f32.mrf.mxu3  ;;  %v10499_v28 = vpop.f32.mrf.mxu2 }
 0x3ec   : > { %v10502_v0 = vadd.f32 %v2239_v51, %v13030_v43  ;;  %v10504_v52 = vpop.f32.mrf.mxu0  ;;  %v13035_v51 = vld [vmem:[#allocation27_spill] sm:$0xff] }
 0x3ed   : > { %13032 = vst [vmem:[#allocation26_spill] sm:$0xff] %v10504_v52 }
 0x3ee   : > { %13031 = vst [vmem:[#allocation25_spill] sm:$0xff] %v10502_v0  ;;  %v10506_v11 = vpop.f32.mrf.mxu1 }
 0x3ef   : > { %13033 = vst [vmem:[#allocation24_spill] sm:$0xff] %v10506_v11  ;;  %2426 = vmatmul.f32.gmra.mxu0 %v13034_v4 }
 0x3f0   : > { %2289 = vmatmul.f32.gmra.mxu3 %v8036_v5  ;;  %2755 = vmatmul.f32.gmra.mxu2 %v13028_v1  ;;  %v8038_v1 = vld [vmem:[%s9829_s7 + $0x100] sm:$0xff] }
 0x3f1   : > { %2566 = vmatmul.f32.gmra.mxu1 %v13035_v51 }
 0x3f3   : > { %v2242_v43 = vpop.f32.mrf.mxu3  ;;  %v10512_v52 = vpop.f32.mrf.mxu2 }
 0x3f4   : > { %13036 = vst [vmem:[#allocation29_spill] sm:$0xff] %v10512_v52  ;;  %v10515_v0 = vadd.f32 %v2242_v43, %v13037_v6  ;;  %v10517_v4 = vpop.f32.mrf.mxu0  ;;  %v13042_v52 = vld [vmem:[#allocation31_spill] sm:$0xff] }
 0x3f5   : > { %13039 = vst [vmem:[#allocation27_spill] sm:$0xff] %v10517_v4  ;;  %v2618_v4 = vld [vmem:[#allocation11 + $0x388] sm:$0xff] }
 0x3f6   : > { %13038 = vst [vmem:[#allocation28_spill] sm:$0xff] %v10515_v0  ;;  %v10519_v11 = vpop.f32.mrf.mxu1  ;;  %2803 = vmatpush.msra.mxu3 %v2618_v4  ;;  %v3278_v4 = vld [vmem:[#allocation11 + $0x488] sm:$0xff] }
 0x3f7   : > { %13040 = vst [vmem:[#allocation30_spill] sm:$0xff] %v10519_v11  ;;  %2429 = vmatmul.f32.gmra.mxu0 %v8037_v18  ;;  %v8040_v11 = vld [vmem:[%s9839_s21 + $0x100] sm:$0xff]  ;;  %v8041_v18 = vld [vmem:[%s9829_s7 + $0x108] sm:$0xff]  ;;  %3339 = vmatpush.msra.mxu1 %v3278_v4  ;;  %v8046_v4 = vld [vmem:[%s9839_s21 + $0x110] sm:$0xff] }
 0x3f8   : > { %2292 = vmatmul.f32.gmra.mxu3 %v8038_v1  ;;  %2758 = vmatmul.f32.gmra.mxu2 %v8036_v5  ;;  %v3294_v5 = vld [vmem:[#allocation11 + $0x508] sm:$0xff] }
 0x3f9   : > { %2569 = vmatmul.f32.gmra.mxu1 %v8039_v41  ;;  %3477 = vmatpush.msra.mxu2 %v3294_v5  ;;  %v8042_v41 = vld [vmem:[%s9836_s26 + $0x100] sm:$0xff]  ;;  %v8043_v5 = vld [vmem:[%s9839_s21 + $0x108] sm:$0xff] }
 0x3fb   : > { %v2245_v26 = vpop.f32.mrf.mxu3  ;;  %v10524_v51 = vpop.f32.mrf.mxu2 }
 0x3fc   : > { %13041 = vst [vmem:[#allocation75_spill] sm:$0xff] %v10524_v51  ;;  %v10527_v43 = vadd.f32 %v2245_v26, %v13042_v52  ;;  %v10529_v6 = vpop.f32.mrf.mxu0 }
 0x3fd   : > { %13044 = vst [vmem:[#allocation76_spill] sm:$0xff] %v10529_v6  ;;  %v13047_v6 = vld [vmem:[#allocation32_spill] sm:$0xff] }
 0x3fe   : > { %13043 = vst [vmem:[#allocation31_spill] sm:$0xff] %v10527_v43  ;;  %v10531_v0 = vpop.f32.mrf.mxu1 }
 0x3ff   : > { %13045 = vst [vmem:[#allocation77_spill] sm:$0xff] %v10531_v0  ;;  %2432 = vmatmul.f32.gmra.mxu0 %v8040_v11  ;;  %v2634_v11 = vld [vmem:[#allocation11 + $0x408] sm:$0xff] }
 0x400   : > { %2295 = vmatmul.f32.gmra.mxu3 %v8041_v18  ;;  %2761 = vmatmul.f32.gmra.mxu2 %v8038_v1 }
 0x401   : > { %2572 = vmatmul.f32.gmra.mxu1 %v8042_v41  ;;  %2943 = vmatpush.msra.mxu0 %v2634_v11  ;;  %v8044_v41 = vld [vmem:[%s9829_s7 + $0x110] sm:$0xff] }
 0x403   : > { %v2248_v52 = vpop.f32.mrf.mxu3  ;;  %v10536_v26 = vpop.f32.mrf.mxu2 }
 0x404   : > { %13046 = vst [vmem:[#allocation78_spill] sm:$0xff] %v10536_v26  ;;  %v10539_v43 = vadd.f32 %v2248_v52, %v13047_v6  ;;  %v10541_v0 = vpop.f32.mrf.mxu0  ;;  %v8045_v26 = vld [vmem:[%s9836_s26 + $0x108] sm:$0xff] }
 0x405   : > { %13049 = vst [vmem:[#allocation79_spill] sm:$0xff] %v10541_v0  ;;  %v13051_v0 = vld [vmem:[#allocation33_spill] sm:$0xff] }
 0x406   : > { %13048 = vst [vmem:[#allocation32_spill] sm:$0xff] %v10539_v43  ;;  %v10543_v1 = vpop.f32.mrf.mxu1 }
 0x407   : > { %13050 = vst [vmem:[#allocation80_spill] sm:$0xff] %v10543_v1  ;;  %2435 = vmatmul.f32.gmra.mxu0 %v8043_v5  ;;  %v8047_v5 = vld [vmem:[%s9829_s7 + $0x118] sm:$0xff] }
 0x408   : > { %2298 = vmatmul.f32.gmra.mxu3 %v8044_v41  ;;  %2764 = vmatmul.f32.gmra.mxu2 %v8041_v18  ;;  %v8048_v18 = vld [vmem:[%s9836_s26 + $0x110] sm:$0xff] }
 0x409   : > { %2575 = vmatmul.f32.gmra.mxu1 %v8045_v26  ;;  %v2617_v26 = vld [vmem:[#allocation11 + $0x380] sm:$0xff] }
 0x40a   : > { %2804 = vmatpush.msra.mxu3 %v2617_v26 }
 0x40b   : > { %v2251_v6 = vpop.f32.mrf.mxu3  ;;  %v10548_v52 = vpop.f32.mrf.mxu2 }
 0x40c   : > { %v10551_v43 = vadd.f32 %v2251_v6, %v13051_v0  ;;  %v10553_v51 = vpop.f32.mrf.mxu0 }
 0x40d   : > { %13053 = vst [vmem:[#allocation81_spill] sm:$0xff] %v10553_v51  ;;  %v8049_v51 = vld [vmem:[%s9839_s21 + $0x118] sm:$0xff] }
 0x40e   : > { %13052 = vst [vmem:[#allocation33_spill] sm:$0xff] %v10551_v43  ;;  %v10555_v11 = vpop.f32.mrf.mxu1  ;;  %v3277_v43 = vld [vmem:[#allocation11 + $0x480] sm:$0xff] }
 0x40f   : > { %13054 = vst [vmem:[#allocation82_spill] sm:$0xff] %v10555_v11  ;;  %2438 = vmatmul.f32.gmra.mxu0 %v8046_v4  ;;  %v3293_v11 = vld [vmem:[#allocation11 + $0x500] sm:$0xff]  ;;  %3340 = vmatpush.msra.mxu1 %v3277_v43  ;;  %v8054_v43 = vld [vmem:[%s9836_s26 + $0x120] sm:$0xff] }
 0x410   : > { %2301 = vmatmul.f32.gmra.mxu3 %v8047_v5  ;;  %2767 = vmatmul.f32.gmra.mxu2 %v8044_v41  ;;  %v8050_v41 = vld [vmem:[%s9829_s7 + $0x120] sm:$0xff] }
 0x411   : > { %2578 = vmatmul.f32.gmra.mxu1 %v8048_v18  ;;  %3478 = vmatpush.msra.mxu2 %v3293_v11  ;;  %v2633_v18 = vld [vmem:[#allocation11 + $0x400] sm:$0xff] }
 0x412   : > { %2944 = vmatpush.msra.mxu0 %v2633_v18 }
 0x413   : > { %v2254_v1 = vpop.f32.mrf.mxu3  ;;  %v10560_v37 = vpop.f32.mrf.mxu2 }
 0x414   : > { %v10563_v0 = vadd.f32 %v2254_v1, %v10171_v16  ;;  %v10565_v6 = vpop.f32.mrf.mxu0  ;;  %v8051_v16 = vld [vmem:[%s9836_s26 + $0x118] sm:$0xff] }
 0x415   : > { %13055 = vst [vmem:[#allocation83_spill] sm:$0xff] %v10565_v6  ;;  %v8052_v6 = vld [vmem:[%s9839_s21 + $0x120] sm:$0xff] }
 0x416   : > { %v10567_v4 = vpop.f32.mrf.mxu1 }
 0x417   : > { %13056 = vst [vmem:[#allocation84_spill] sm:$0xff] %v10567_v4  ;;  %2441 = vmatmul.f32.gmra.mxu0 %v8049_v51 }
 0x418   : > { %2304 = vmatmul.f32.gmra.mxu3 %v8050_v41  ;;  %2770 = vmatmul.f32.gmra.mxu2 %v8047_v5  ;;  %v8053_v5 = vld [vmem:[%s9829_s7 + $0x128] sm:$0xff] }
 0x419   : > { %2581 = vmatmul.f32.gmra.mxu1 %v8051_v16 }
 0x41b   : > { %v2257_v1 = vpop.f32.mrf.mxu3  ;;  %v10572_v26 = vpop.f32.mrf.mxu2 }
 0x41c   : > { %v10575_v11 = vadd.f32 %v2257_v1, %v10180_v63  ;;  %v10577_v4 = vpop.f32.mrf.mxu0 }
 0x41d   : > { %13058 = vst [vmem:[#allocation86_spill] sm:$0xff] %v10577_v4  ;;  %v3324_v4 = vld [vmem:[#allocation11 + $0x5f8] sm:$0xff] }
 0x41e   : > { %13057 = vst [vmem:[#allocation85_spill] sm:$0xff] %v10575_v11  ;;  %v10579_v51 = vpop.f32.mrf.mxu1  ;;  %3601 = vmatpush.msrb.mxu3 %v3324_v4  ;;  %v3970_v4 = vld [vmem:[#allocation11 + $0x6f8] sm:$0xff] }
 0x41f   : > { %13059 = vst [vmem:[#allocation87_spill] sm:$0xff] %v10579_v51  ;;  %2444 = vmatmul.f32.gmra.mxu0 %v8052_v6  ;;  %v8055_v51 = vld [vmem:[%s9839_s21 + $0x128] sm:$0xff]  ;;  %v8056_v6 = vld [vmem:[%s9829_s7 + $0x130] sm:$0xff]  ;;  %4125 = vmatpush.msrb.mxu1 %v3970_v4  ;;  %v8061_v4 = vld [vmem:[%s9839_s21 + $0x138] sm:$0xff] }
 0x420   : > { %2307 = vmatmul.f32.gmra.mxu3 %v8053_v5  ;;  %2773 = vmatmul.f32.gmra.mxu2 %v8050_v41  ;;  %v3986_v41 = vld [vmem:[#allocation11 + $0x778] sm:$0xff] }
 0x421   : > { %2584 = vmatmul.f32.gmra.mxu1 %v8054_v43  ;;  %4263 = vmatpush.msrb.mxu2 %v3986_v41  ;;  %v8057_v43 = vld [vmem:[%s9836_s26 + $0x128] sm:$0xff]  ;;  %v8058_v41 = vld [vmem:[%s9839_s21 + $0x130] sm:$0xff] }
 0x423   : > { %v2260_v18 = vpop.f32.mrf.mxu3  ;;  %v10584_v16 = vpop.f32.mrf.mxu2 }
 0x424   : > { %v10587_v63 = vadd.f32 %v2260_v18, %v10193_v34  ;;  %v10589_v1 = vpop.f32.mrf.mxu0 }
 0x425   : > { %13061 = vst [vmem:[#allocation89_spill] sm:$0xff] %v10589_v1 }
 0x426   : > { %13060 = vst [vmem:[#allocation88_spill] sm:$0xff] %v10587_v63  ;;  %v10591_v11 = vpop.f32.mrf.mxu1  ;;  %v8060_v63 = vld [vmem:[%s9836_s26 + $0x130] sm:$0xff] }
 0x427   : > { %13062 = vst [vmem:[#allocation90_spill] sm:$0xff] %v10591_v11  ;;  %2447 = vmatmul.f32.gmra.mxu0 %v8055_v51  ;;  %v3954_v51 = vld [vmem:[#allocation11 + $0x678] sm:$0xff] }
 0x428   : > { %2310 = vmatmul.f32.gmra.mxu3 %v8056_v6  ;;  %2776 = vmatmul.f32.gmra.mxu2 %v8053_v5 }
 0x429   : > { %2587 = vmatmul.f32.gmra.mxu1 %v8057_v43  ;;  %3987 = vmatpush.msrb.mxu0 %v3954_v51  ;;  %v8059_v43 = vld [vmem:[%s9829_s7 + $0x138] sm:$0xff] }
 0x42b   : > { %v2263_v34 = vpop.f32.mrf.mxu3  ;;  %v10596_v18 = vpop.f32.mrf.mxu2 }
 0x42c   : > { %v10599_v1 = vadd.f32 %v2263_v34, %v10204_v31  ;;  %v10601_v11 = vpop.f32.mrf.mxu0 }
 0x42d   : > { %13064 = vst [vmem:[#allocation92_spill] sm:$0xff] %v10601_v11 }
 0x42e   : > { %13063 = vst [vmem:[#allocation91_spill] sm:$0xff] %v10599_v1  ;;  %v10603_v5 = vpop.f32.mrf.mxu1 }
 0x42f   : > { %13065 = vst [vmem:[#allocation93_spill] sm:$0xff] %v10603_v5  ;;  %2450 = vmatmul.f32.gmra.mxu0 %v8058_v41  ;;  %v8062_v41 = vld [vmem:[%s9829_s7 + $0x140] sm:$0xff] }
 0x430   : > { %2313 = vmatmul.f32.gmra.mxu3 %v8059_v43  ;;  %2779 = vmatmul.f32.gmra.mxu2 %v8056_v6  ;;  %v8063_v6 = vld [vmem:[%s9836_s26 + $0x138] sm:$0xff] }
 0x431   : > { %2590 = vmatmul.f32.gmra.mxu1 %v8060_v63 }
 0x433   : > { %v2266_v31 = vpop.f32.mrf.mxu3  ;;  %v10608_v34 = vpop.f32.mrf.mxu2 }
 0x434   : > { %13066 = vst [vmem:[#allocation94_spill] sm:$0xff] %v10608_v34  ;;  %v10611_v11 = vadd.f32 %v2266_v31, %v10215_v47  ;;  %v10613_v1 = vpop.f32.mrf.mxu0  ;;  %v3323_v31 = vld [vmem:[#allocation11 + $0x5f0] sm:$0xff] }
 0x435   : > { %13068 = vst [vmem:[#allocation96_spill] sm:$0xff] %v10613_v1  ;;  %3602 = vmatpush.msrb.mxu3 %v3323_v31 }
 0x436   : > { %13067 = vst [vmem:[#allocation95_spill] sm:$0xff] %v10611_v11  ;;  %v10615_v51 = vpop.f32.mrf.mxu1 }
 0x437   : > { %13069 = vst [vmem:[#allocation97_spill] sm:$0xff] %v10615_v51  ;;  %2453 = vmatmul.f32.gmra.mxu0 %v8061_v4  ;;  %v3985_v51 = vld [vmem:[#allocation11 + $0x770] sm:$0xff] }
 0x438   : > { %2316 = vmatmul.f32.gmra.mxu3 %v8062_v41  ;;  %2782 = vmatmul.f32.gmra.mxu2 %v8059_v43  ;;  %v8064_v4 = vld [vmem:[%s9839_s21 + $0x140] sm:$0xff] }
 0x439   : > { %2593 = vmatmul.f32.gmra.mxu1 %v8063_v6  ;;  %4264 = vmatpush.msrb.mxu2 %v3985_v51  ;;  %v8065_v43 = vld [vmem:[%s9839_s21] sm:$0xff] }
 0x43a   : > { %v3953_v6 = vld [vmem:[#allocation11 + $0x670] sm:$0xff] }
 0x43b   : > { %v2269_v63 = vpop.f32.mrf.mxu3  ;;  %v10620_v5 = vpop.f32.mrf.mxu2  ;;  %3988 = vmatpush.msrb.mxu0 %v3953_v6  ;;  %v8069_v6 = vld [vmem:[%s9829_s7] sm:$0xff] }
 0x43c   : > { %v10623_v34 = vadd.f32 %v2269_v63, %v10226_v42  ;;  %v10625_v47 = vpop.f32.mrf.mxu0  ;;  %v3969_v42 = vld [vmem:[#allocation11 + $0x6f0] sm:$0xff] }
 0x43d   : > { %13071 = vst [vmem:[#allocation99_spill] sm:$0xff] %v10625_v47  ;;  %4126 = vmatpush.msrb.mxu1 %v3969_v42  ;;  %v8066_v63 = vld [vmem:[%s9836_s26 + $0x140] sm:$0xff] }
 0x43e   : > { %13070 = vst [vmem:[#allocation98_spill] sm:$0xff] %v10623_v34  ;;  %v10627_v1 = vpop.f32.mrf.mxu1  ;;  %v8068_v34 = vld [vmem:[%s9839_s21 + $0x8] sm:$0xff] }
 0x43f   : > { %13072 = vst [vmem:[#allocation100_spill] sm:$0xff] %v10627_v1  ;;  %2456 = vmatmul.f32.gmra.mxu0 %v8064_v4 }
 0x440   : > { %2785 = vmatmul.f32.gmra.mxu2 %v8062_v41  ;;  %2805 = vmatmul.f32.vlgmr.msra.gmra.mxu3 %v8065_v43  ;;  %v8067_v41 = vld [vmem:[%s9836_s26] sm:$0xff] }
 0x441   : > { %2596 = vmatmul.f32.gmra.mxu1 %v8066_v63 }
 0x443   : > { %v2272_v47 = vpop.f32.mrf.mxu3  ;;  %v10632_v31 = vpop.f32.mrf.mxu2 }
 0x444   : > { %v10635_v1 = vadd.f32 %v2272_v47, %v10237_v15  ;;  %v10637_v4 = vpop.f32.mrf.mxu0 }
 0x445   : > { %13074 = vst [vmem:[#allocation102_spill] sm:$0xff] %v10637_v4  ;;  %v8070_v4 = vld [vmem:[%s9836_s26 + $0x8] sm:$0xff] }
 0x446   : > { %13073 = vst [vmem:[#allocation101_spill] sm:$0xff] %v10635_v1  ;;  %v10639_v51 = vpop.f32.mrf.mxu1  ;;  %v8073_v1 = vld [vmem:[%s9836_s26 + $0x10] sm:$0xff] }
 0x447   : > { %13075 = vst [vmem:[#allocation103_spill] sm:$0xff] %v10639_v51  ;;  %2945 = vmatmul.f32.vlgmr.msra.gmra.mxu0 %v8067_v41  ;;  %v8071_v51 = vld [vmem:[%s9839_s21 + $0x10] sm:$0xff] }
 0x448   : > { %2808 = vmatmul.f32.gmra.mxu3 %v8068_v34  ;;  %3479 = vmatmul.f32.vlgmr.msra.gmra.mxu2 %v8065_v43  ;;  %v3322_v43 = vld [vmem:[#allocation11 + $0x5e8] sm:$0xff] }
 0x449   : > { %3341 = vmatmul.f32.vlgmr.msra.gmra.mxu1 %v8069_v6  ;;  %v3984_v41 = vld [vmem:[#allocation11 + $0x768] sm:$0xff]  ;;  %3603 = vmatpush.msrb.mxu3 %v3322_v43  ;;  %v8072_v6 = vld [vmem:[%s9829_s7 + $0x8] sm:$0xff] }
 0x44a   : > { %4265 = vmatpush.msrb.mxu2 %v3984_v41  ;;  %v8074_v43 = vld [vmem:[%s9839_s21 + $0x18] sm:$0xff]  ;;  %v8075_v41 = vld [vmem:[%s9829_s7 + $0x10] sm:$0xff] }
 0x44b   : > { %v2275_v42 = vpop.f32.mrf.mxu3  ;;  %v10644_v63 = vpop.f32.mrf.mxu2 }
 0x44c   : > { %v10647_v11 = vadd.f32 %v2275_v42, %v10251_v50  ;;  %v10649_v15 = vpop.f32.mrf.mxu0 }
 0x44d   : > { %13077 = vst [vmem:[#allocation105_spill] sm:$0xff] %v10649_v15 }
 0x44e   : > { %13076 = vst [vmem:[#allocation104_spill] sm:$0xff] %v10647_v11  ;;  %v10651_v47 = vpop.f32.mrf.mxu1  ;;  %v3968_v11 = vld [vmem:[#allocation11 + $0x6e8] sm:$0xff] }
 0x44f   : > { %13078 = vst [vmem:[#allocation106_spill] sm:$0xff] %v10651_v47  ;;  %2948 = vmatmul.f32.gmra.mxu0 %v8070_v4  ;;  %v3952_v4 = vld [vmem:[#allocation11 + $0x668] sm:$0xff]  ;;  %4127 = vmatpush.msrb.mxu1 %v3968_v11  ;;  %v8077_v11 = vld [vmem:[%s9839_s21 + $0x20] sm:$0xff] }
 0x450   : > { %2811 = vmatmul.f32.gmra.mxu3 %v8071_v51  ;;  %3481 = vmatmul.f32.gmra.mxu2 %v8068_v34 }
 0x451   : > { %3343 = vmatmul.f32.gmra.mxu1 %v8072_v6  ;;  %3989 = vmatpush.msrb.mxu0 %v3952_v4 }
 0x453   : > { %v2278_v50 = vpop.f32.mrf.mxu3  ;;  %v10656_v42 = vpop.f32.mrf.mxu2 }
 0x454   : > { %v10659_v15 = vadd.f32 %v2278_v50, %v10270_v39  ;;  %v10661_v47 = vpop.f32.mrf.mxu0 }
 0x455   : > { %13079 = vst [vmem:[#allocation107_spill] sm:$0xff] %v10661_v47 }
 0x456   : > { %v10663_v34 = vpop.f32.mrf.mxu1 }
 0x457   : > { %13080 = vst [vmem:[#allocation108_spill] sm:$0xff] %v10663_v34  ;;  %2951 = vmatmul.f32.gmra.mxu0 %v8073_v1  ;;  %v8076_v1 = vld [vmem:[%s9836_s26 + $0x18] sm:$0xff] }
 0x458   : > { %2814 = vmatmul.f32.gmra.mxu3 %v8074_v43  ;;  %3483 = vmatmul.f32.gmra.mxu2 %v8071_v51  ;;  %v8078_v51 = vld [vmem:[%s9829_s7 + $0x18] sm:$0xff] }
 0x459   : > { %3345 = vmatmul.f32.gmra.mxu1 %v8075_v41 }
 0x45b   : > { %v2281_v39 = vpop.f32.mrf.mxu3  ;;  %v10668_v6 = vpop.f32.mrf.mxu2 }
 0x45c   : > { %v10671_v50 = vadd.f32 %v2281_v39, %v10291_v23  ;;  %v10673_v47 = vpop.f32.mrf.mxu0 }
 0x45d   : > { %13082 = vst [vmem:[#allocation110_spill] sm:$0xff] %v10673_v47  ;;  %v3321_v47 = vld [vmem:[#allocation11 + $0x5e0] sm:$0xff] }
 0x45e   : > { %13081 = vst [vmem:[#allocation109_spill] sm:$0xff] %v10671_v50  ;;  %v10675_v34 = vpop.f32.mrf.mxu1  ;;  %3604 = vmatpush.msrb.mxu3 %v3321_v47 }
 0x45f   : > { %13083 = vst [vmem:[#allocation111_spill] sm:$0xff] %v10675_v34  ;;  %2954 = vmatmul.f32.gmra.mxu0 %v8076_v1  ;;  %v3983_v34 = vld [vmem:[#allocation11 + $0x760] sm:$0xff]  ;;  %v8079_v1 = vld [vmem:[%s9836_s26 + $0x20] sm:$0xff] }
 0x460   : > { %2817 = vmatmul.f32.gmra.mxu3 %v8077_v11  ;;  %3486 = vmatmul.f32.gmra.mxu2 %v8074_v43  ;;  %v8080_v43 = vld [vmem:[%s9839_s21 + $0x28] sm:$0xff] }
 0x461   : > { %3348 = vmatmul.f32.gmra.mxu1 %v8078_v51  ;;  %4266 = vmatpush.msrb.mxu2 %v3983_v34  ;;  %v8081_v51 = vld [vmem:[%s9829_s7 + $0x20] sm:$0xff] }
 0x463   : > { %v2284_v4 = vpop.f32.mrf.mxu3  ;;  %v10680_v41 = vpop.f32.mrf.mxu2 }
 0x464   : > { %v10683_v23 = vadd.f32 %v2284_v4, %v10317_v54  ;;  %v10685_v39 = vpop.f32.mrf.mxu0  ;;  %v3951_v54 = vld [vmem:[#allocation11 + $0x660] sm:$0xff] }
 0x465   : > { %13085 = vst [vmem:[#allocation113_spill] sm:$0xff] %v10685_v39  ;;  %v3967_v4 = vld [vmem:[#allocation11 + $0x6e0] sm:$0xff]  ;;  %3990 = vmatpush.msrb.mxu0 %v3951_v54 }
 0x466   : > { %13084 = vst [vmem:[#allocation112_spill] sm:$0xff] %v10683_v23  ;;  %v10687_v50 = vpop.f32.mrf.mxu1  ;;  %4128 = vmatpush.msrb.mxu1 %v3967_v4 }
 0x467   : > { %13086 = vst [vmem:[#allocation114_spill] sm:$0xff] %v10687_v50  ;;  %2957 = vmatmul.f32.gmra.mxu0 %v8079_v1  ;;  %v8083_v50 = vld [vmem:[%s9839_s21 + $0x30] sm:$0xff] }
 0x468   : > { %2820 = vmatmul.f32.gmra.mxu3 %v8080_v43  ;;  %3489 = vmatmul.f32.gmra.mxu2 %v8077_v11  ;;  %v8082_v11 = vld [vmem:[%s9836_s26 + $0x28] sm:$0xff] }
 0x469   : > { %3351 = vmatmul.f32.gmra.mxu1 %v8081_v51  ;;  %v8084_v51 = vld [vmem:[%s9829_s7 + $0x28] sm:$0xff] }
 0x46b   : > { %v2287_v23 = vpop.f32.mrf.mxu3  ;;  %v10692_v39 = vpop.f32.mrf.mxu2 }
 0x46c   : > { %13087 = vst [vmem:[#allocation115_spill] sm:$0xff] %v10692_v39  ;;  %v10695_v47 = vadd.f32 %v2287_v23, %v10322_v62  ;;  %v10697_v1 = vpop.f32.mrf.mxu0 }
 0x46d   : > { %13089 = vst [vmem:[#allocation117_spill] sm:$0xff] %v10697_v1  ;;  %v8085_v1 = vld [vmem:[%s9836_s26 + $0x30] sm:$0xff] }
 0x46e   : > { %13088 = vst [vmem:[#allocation116_spill] sm:$0xff] %v10695_v47  ;;  %v10699_v34 = vpop.f32.mrf.mxu1 }
 0x46f   : > { %13090 = vst [vmem:[#allocation118_spill] sm:$0xff] %v10699_v34  ;;  %2960 = vmatmul.f32.gmra.mxu0 %v8082_v11  ;;  %v8086_v34 = vld [vmem:[%s9839_s21 + $0x38] sm:$0xff]  ;;  %v3320_v11 = vld [vmem:[#allocation11 + $0x5d8] sm:$0xff] }
 0x470   : > { %2823 = vmatmul.f32.gmra.mxu3 %v8083_v50  ;;  %3492 = vmatmul.f32.gmra.mxu2 %v8080_v43  ;;  %v8087_v43 = vld [vmem:[%s9829_s7 + $0x30] sm:$0xff] }
 0x471   : > { %3354 = vmatmul.f32.gmra.mxu1 %v8084_v51  ;;  %3605 = vmatpush.msrb.mxu3 %v3320_v11  ;;  %v3982_v51 = vld [vmem:[#allocation11 + $0x758] sm:$0xff] }
 0x472   : > { %4267 = vmatpush.msrb.mxu2 %v3982_v51  ;;  %v8089_v11 = vld [vmem:[%s9839_s21 + $0x40] sm:$0xff] }
 0x473   : > { %v2290_v39 = vpop.f32.mrf.mxu3  ;;  %v10704_v54 = vpop.f32.mrf.mxu2 }
 0x474   : > { %v10707_v4 = vadd.f32 %v2290_v39, %v10185_v14  ;;  %v10709_v62 = vpop.f32.mrf.mxu0 }
 0x475   : > { %13092 = vst [vmem:[#allocation120_spill] sm:$0xff] %v10709_v62  ;;  %v3966_v62 = vld [vmem:[#allocation11 + $0x6d8] sm:$0xff] }
 0x476   : > { %13091 = vst [vmem:[#allocation119_spill] sm:$0xff] %v10707_v4  ;;  %v10711_v23 = vpop.f32.mrf.mxu1  ;;  %v8088_v4 = vld [vmem:[%s9836_s26 + $0x38] sm:$0xff]  ;;  %4129 = vmatpush.msrb.mxu1 %v3966_v62  ;;  %v8092_v62 = vld [vmem:[%s9839_s21 + $0x48] sm:$0xff] }
 0x477   : > { %13093 = vst [vmem:[#allocation121_spill] sm:$0xff] %v10711_v23  ;;  %2963 = vmatmul.f32.gmra.mxu0 %v8085_v1  ;;  %v3950_v1 = vld [vmem:[#allocation11 + $0x658] sm:$0xff] }
 0x478   : > { %2826 = vmatmul.f32.gmra.mxu3 %v8086_v34  ;;  %3495 = vmatmul.f32.gmra.mxu2 %v8083_v50 }
 0x479   : > { %3357 = vmatmul.f32.gmra.mxu1 %v8087_v43  ;;  %3991 = vmatpush.msrb.mxu0 %v3950_v1  ;;  %v8090_v43 = vld [vmem:[%s9829_s7 + $0x38] sm:$0xff] }
 0x47b   : > { %v2293_v47 = vpop.f32.mrf.mxu3  ;;  %v10716_v14 = vpop.f32.mrf.mxu2 }
 0x47c   : > { %v10719_v39 = vadd.f32 %v2293_v47, %v10196_v8  ;;  %v10721_v23 = vpop.f32.mrf.mxu0 }
 0x47d   : > { %13094 = vst [vmem:[#allocation122_spill] sm:$0xff] %v10721_v23 }
 0x47e   : > { %v10723_v50 = vpop.f32.mrf.mxu1 }
 0x47f   : > { %13095 = vst [vmem:[#allocation123_spill] sm:$0xff] %v10723_v50  ;;  %2966 = vmatmul.f32.gmra.mxu0 %v8088_v4  ;;  %v8091_v4 = vld [vmem:[%s9836_s26 + $0x40] sm:$0xff] }
 0x480   : > { %2829 = vmatmul.f32.gmra.mxu3 %v8089_v11  ;;  %3498 = vmatmul.f32.gmra.mxu2 %v8086_v34  ;;  %v8093_v34 = vld [vmem:[%s9829_s7 + $0x40] sm:$0xff] }
 0x481   : > { %3360 = vmatmul.f32.gmra.mxu1 %v8090_v43 }
 0x483   : > { %v2296_v8 = vpop.f32.mrf.mxu3  ;;  %v10728_v47 = vpop.f32.mrf.mxu2 }
 0x484   : > { %v10731_v51 = vadd.f32 %v2296_v8, %v10207_v38  ;;  %v10733_v23 = vpop.f32.mrf.mxu0 }
 0x485   : > { %13097 = vst [vmem:[#allocation125_spill] sm:$0xff] %v10733_v23  ;;  %v3319_v23 = vld [vmem:[#allocation11 + $0x5d0] sm:$0xff] }
 0x486   : > { %13096 = vst [vmem:[#allocation124_spill] sm:$0xff] %v10731_v51  ;;  %v10735_v50 = vpop.f32.mrf.mxu1  ;;  %3606 = vmatpush.msrb.mxu3 %v3319_v23  ;;  %v3965_v23 = vld [vmem:[#allocation11 + $0x6d0] sm:$0xff] }
 0x487   : > { %13098 = vst [vmem:[#allocation126_spill] sm:$0xff] %v10735_v50  ;;  %2969 = vmatmul.f32.gmra.mxu0 %v8091_v4  ;;  %v8094_v50 = vld [vmem:[%s9836_s26 + $0x48] sm:$0xff]  ;;  %v8095_v4 = vld [vmem:[%s9839_s21 + $0x50] sm:$0xff]  ;;  %4130 = vmatpush.msrb.mxu1 %v3965_v23  ;;  %v8100_v23 = vld [vmem:[%s9836_s26 + $0x58] sm:$0xff] }
 0x488   : > { %2832 = vmatmul.f32.gmra.mxu3 %v8092_v62  ;;  %3501 = vmatmul.f32.gmra.mxu2 %v8089_v11  ;;  %v3981_v11 = vld [vmem:[#allocation11 + $0x750] sm:$0xff] }
 0x489   : > { %3363 = vmatmul.f32.gmra.mxu1 %v8093_v34  ;;  %4268 = vmatpush.msrb.mxu2 %v3981_v11  ;;  %v8096_v34 = vld [vmem:[%s9829_s7 + $0x48] sm:$0xff]  ;;  %v8097_v11 = vld [vmem:[%s9836_s26 + $0x50] sm:$0xff] }
 0x48b   : > { %v2299_v1 = vpop.f32.mrf.mxu3  ;;  %v10740_v43 = vpop.f32.mrf.mxu2 }
 0x48c   : > { %v10743_v38 = vadd.f32 %v2299_v1, %v10218_v58  ;;  %v10745_v8 = vpop.f32.mrf.mxu0 }
 0x48d   : > { %13100 = vst [vmem:[#allocation128_spill] sm:$0xff] %v10745_v8 }
 0x48e   : > { %13099 = vst [vmem:[#allocation127_spill] sm:$0xff] %v10743_v38  ;;  %v10747_v51 = vpop.f32.mrf.mxu1  ;;  %v8098_v38 = vld [vmem:[%s9839_s21 + $0x58] sm:$0xff] }
 0x48f   : > { %13101 = vst [vmem:[#allocation129_spill] sm:$0xff] %v10747_v51  ;;  %2972 = vmatmul.f32.gmra.mxu0 %v8094_v50  ;;  %v3949_v50 = vld [vmem:[#allocation11 + $0x650] sm:$0xff] }
 0x490   : > { %2835 = vmatmul.f32.gmra.mxu3 %v8095_v4  ;;  %3504 = vmatmul.f32.gmra.mxu2 %v8092_v62 }
 0x491   : > { %3366 = vmatmul.f32.gmra.mxu1 %v8096_v34  ;;  %3992 = vmatpush.msrb.mxu0 %v3949_v50  ;;  %v8099_v34 = vld [vmem:[%s9829_s7 + $0x50] sm:$0xff] }
 0x493   : > { %v2302_v58 = vpop.f32.mrf.mxu3  ;;  %v10752_v1 = vpop.f32.mrf.mxu2 }
 0x494   : > { %v10755_v8 = vadd.f32 %v2302_v58, %v10229_v27  ;;  %v10757_v51 = vpop.f32.mrf.mxu0 }
 0x495   : > { %13103 = vst [vmem:[#allocation131_spill] sm:$0xff] %v10757_v51 }
 0x496   : > { %13102 = vst [vmem:[#allocation130_spill] sm:$0xff] %v10755_v8  ;;  %v10759_v62 = vpop.f32.mrf.mxu1 }
 0x497   : > { %13104 = vst [vmem:[#allocation132_spill] sm:$0xff] %v10759_v62  ;;  %2975 = vmatmul.f32.gmra.mxu0 %v8097_v11  ;;  %v8101_v11 = vld [vmem:[%s9839_s21 + $0x60] sm:$0xff]  ;;  %v3318_v62 = vld [vmem:[#allocation11 + $0x5c8] sm:$0xff] }
 0x498   : > { %2838 = vmatmul.f32.gmra.mxu3 %v8098_v38  ;;  %3507 = vmatmul.f32.gmra.mxu2 %v8095_v4  ;;  %v8102_v4 = vld [vmem:[%s9829_s7 + $0x58] sm:$0xff] }
 0x499   : > { %3369 = vmatmul.f32.gmra.mxu1 %v8099_v34  ;;  %3607 = vmatpush.msrb.mxu3 %v3318_v62  ;;  %v3948_v62 = vld [vmem:[#allocation11 + $0x648] sm:$0xff] }
 0x49a   : > { %3993 = vmatpush.msrb.mxu0 %v3948_v62  ;;  %v8107_v62 = vld [vmem:[%s9829_s7 + $0x68] sm:$0xff] }
 0x49b   : > { %v2305_v27 = vpop.f32.mrf.mxu3  ;;  %v10764_v58 = vpop.f32.mrf.mxu2 }
 0x49c   : > { %13105 = vst [vmem:[#allocation133_spill] sm:$0xff] %v10764_v58  ;;  %v10767_v51 = vadd.f32 %v2305_v27, %v10240_v3  ;;  %v10769_v8 = vpop.f32.mrf.mxu0 }
 0x49d   : > { %13106 = vst [vmem:[#allocation134_spill] sm:$0xff] %v10769_v8 }
 0x49e   : > { %v10771_v50 = vpop.f32.mrf.mxu1 }
 0x49f   : > { %13107 = vst [vmem:[#allocation135_spill] sm:$0xff] %v10771_v50  ;;  %2978 = vmatmul.f32.gmra.mxu0 %v8100_v23  ;;  %v3980_v50 = vld [vmem:[#allocation11 + $0x748] sm:$0xff]  ;;  %v8103_v23 = vld [vmem:[%s9836_s26 + $0x60] sm:$0xff] }
 0x4a0   : > { %2841 = vmatmul.f32.gmra.mxu3 %v8101_v11  ;;  %3510 = vmatmul.f32.gmra.mxu2 %v8098_v38  ;;  %v13110_v38 = vld [vmem:[#allocation34_spill] sm:$0xff] }
 0x4a1   : > { %3372 = vmatmul.f32.gmra.mxu1 %v8102_v4  ;;  %4269 = vmatpush.msrb.mxu2 %v3980_v50  ;;  %v3964_v4 = vld [vmem:[#allocation11 + $0x6c8] sm:$0xff] }
 0x4a2   : > { %4131 = vmatpush.msrb.mxu1 %v3964_v4 }
 0x4a3   : > { %v2308_v34 = vpop.f32.mrf.mxu3  ;;  %v10776_v58 = vpop.f32.mrf.mxu2 }
 0x4a4   : > { %v10779_v3 = vadd.f32 %v2308_v34, %v10254_v17  ;;  %v10781_v27 = vpop.f32.mrf.mxu0  ;;  %v8104_v17 = vld [vmem:[%s9829_s7 + $0x60] sm:$0xff] }
 0x4a5   : > { %13108 = vst [vmem:[#allocation136_spill] sm:$0xff] %v10781_v27 }
 0x4a6   : > { %v10783_v8 = vpop.f32.mrf.mxu1 }
 0x4a7   : > { %13109 = vst [vmem:[#allocation137_spill] sm:$0xff] %v10783_v8  ;;  %2981 = vmatmul.f32.gmra.mxu0 %v8103_v23 }
 0x4a8   : > { %2844 = vmatmul.f32.gmra.mxu3 %v13110_v38  ;;  %3513 = vmatmul.f32.gmra.mxu2 %v8101_v11  ;;  %v8105_v38 = vld [vmem:[%s9836_s26 + $0x68] sm:$0xff] }
 0x4a9   : > { %3375 = vmatmul.f32.gmra.mxu1 %v8104_v17  ;;  %v8106_v11 = vld [vmem:[%s9839_s21 + $0x68] sm:$0xff] }
 0x4ab   : > { %v2311_v34 = vpop.f32.mrf.mxu3  ;;  %v10788_v27 = vpop.f32.mrf.mxu2 }
 0x4ac   : > { %v10791_v50 = vadd.f32 %v2311_v34, %v10273_v19  ;;  %v10793_v8 = vpop.f32.mrf.mxu0 }
 0x4ad   : > { %13112 = vst [vmem:[#allocation138_spill] sm:$0xff] %v10793_v8 }
 0x4ae   : > { %13111 = vst [vmem:[#allocation34_spill] sm:$0xff] %v10791_v50  ;;  %v10795_v23 = vpop.f32.mrf.mxu1 }
 0x4af   : > { %13113 = vst [vmem:[#allocation139_spill] sm:$0xff] %v10795_v23  ;;  %2984 = vmatmul.f32.gmra.mxu0 %v8105_v38  ;;  %v12931_v38 = vmov 0.0   ;;  %v13117_v23 = vrot.slane %v10267_v32, 1 }
 0x4b0   : > { %2847 = vmatmul.f32.gmra.mxu3 %v10257_v29  ;;  %3516 = vmatmul.f32.gmra.mxu2 %v8106_v11  ;;  %v2137_v29 = vrot.slane %v12931_v38, 1  ;;  %v8108_v11 = vld [vmem:[%s9839_s21 + $0x70] sm:$0xff] }
 0x4b1   : > { %3378 = vmatmul.f32.gmra.mxu1 %v8107_v62  ;;  %v8109_v62 = vld [vmem:[%s9829_s7 + $0x70] sm:$0xff] }
 0x4b2   : > { %v3947_v38 = vld [vmem:[#allocation11 + $0x640] sm:$0xff] }
 0x4b3   : > { %v2314_v4 = vpop.f32.mrf.mxu3  ;;  %v10801_v17 = vpop.f32.mrf.mxu2  ;;  %3994 = vmatpush.msrb.mxu0 %v3947_v38  ;;  %v13124_v38 = vld [vmem:[#allocation39_spill] sm:$0xff] }
 0x4b4   : > { %v10804_v19 = vadd.f32 %v2314_v4, %v10296_v53  ;;  %v10806_v34 = vpop.f32.mrf.mxu0  ;;  %v2138_v53 = vsel %vm2055_vm0, %v13117_v23, %v2137_v29  ;;  %v8110_v23 = vld [vmem:[%s9829_s7 + $0x78] sm:$0xff] }
 0x4b5   : > { %13115 = vst [vmem:[#allocation141_spill] sm:$0xff] %v10806_v34 }
 0x4b6   : > { %13114 = vst [vmem:[#allocation140_spill] sm:$0xff] %v10804_v19  ;;  %v10808_v8 = vpop.f32.mrf.mxu1  ;;  %v3979_v19 = vld [vmem:[#allocation11 + $0x740] sm:$0xff] }
 0x4b7   : > { %13116 = vst [vmem:[#allocation142_spill] sm:$0xff] %v10808_v8  ;;  %2987 = vmatmul.f32.gmra.mxu0 %v10264_v9  ;;  %v3317_v8 = vld [vmem:[#allocation11 + $0x5c0] sm:$0xff]  ;;  %4270 = vmatpush.msrb.mxu2 %v3979_v19 }
 0x4b8   : > { %2850 = vmatmul.f32.gmra.mxu3 %v10276_v20  ;;  %3519 = vmatmul.f32.gmra.mxu2 %v8108_v11  ;;  %v3963_v11 = vld [vmem:[#allocation11 + $0x6c0] sm:$0xff] }
 0x4b9   : > { %3381 = vmatmul.f32.gmra.mxu1 %v8109_v62  ;;  %3608 = vmatpush.msrb.mxu3 %v3317_v8 }
 0x4ba   : > { %4132 = vmatpush.msrb.mxu1 %v3963_v11 }
 0x4bb   : > { %v2317_v4 = vpop.f32.mrf.mxu3  ;;  %v10818_v34 = vpop.f32.mrf.mxu2 }
 0x4bc   : > { %13118 = vst [vmem:[#allocation143_spill] sm:$0xff] %v10818_v34  ;;  %v10820_v9 = vadd.f32 %v2317_v4, %v2138_v53  ;;  %v10822_v50 = vpop.f32.mrf.mxu0  ;;  %v13123_v53 = vld [vmem:[#allocation38_spill] sm:$0xff] }
 0x4bd   : > { %13120 = vst [vmem:[#allocation145_spill] sm:$0xff] %v10822_v50 }
 0x4be   : > { %13119 = vst [vmem:[#allocation144_spill] sm:$0xff] %v10820_v9  ;;  %v10824_v32 = vpop.f32.mrf.mxu1 }
 0x4bf   : > { %13121 = vst [vmem:[#allocation146_spill] sm:$0xff] %v10824_v32  ;;  %2990 = vmatmul.f32.gmra.mxu0 %v10282_v57  ;;  %v8111_v57 = vld [vmem:[%s9829_s7 + $0x80] sm:$0xff] }
 0x4c0   : > { %2853 = vmatmul.f32.gmra.mxu3 %v10301_v35  ;;  %3522 = vmatmul.f32.gmra.mxu2 %v10276_v20  ;;  %v3316_v20 = vld [vmem:[#allocation11 + $0x5b8] sm:$0xff] }
 0x4c1   : > { %3384 = vmatmul.f32.gmra.mxu1 %v8110_v23  ;;  %3609 = vmatpush.msrb.mxu3 %v3316_v20  ;;  %v3946_v20 = vld [vmem:[#allocation11 + $0x638] sm:$0xff] }
 0x4c2   : > { %3995 = vmatpush.msrb.mxu0 %v3946_v20 }
 0x4c3   : > { %v10830_v29 = vpop.f32.mrf.mxu2  ;;  %v2806_v62 = vpop.f32.mrf.mxu3 }
 0x4c4   : > { %13122 = vst [vmem:[#allocation147_spill] sm:$0xff] %v10830_v29  ;;  %v2946_v8 = vpop.f32.mrf.mxu0  ;;  %v2807_v4 = vadd.f32 %v2806_v62, %v13124_v38  ;;  %v13125_v29 = vld [vmem:[#allocation35_spill] sm:$0xff] }
 0x4c6   : > { %v3342_v19 = vpop.f32.mrf.mxu1  ;;  %v2947_v50 = vadd.f32 %v2946_v8, %v2807_v4  ;;  %v8112_v4 = vld [vmem:[%s9829_s7 + $0x88] sm:$0xff] }
 0x4c7   : > { %2993 = vmatmul.f32.gmra.mxu0 %v13123_v53  ;;  %v3978_v19 = vld [vmem:[#allocation11 + $0x738] sm:$0xff]  ;;  %v13126_v53 = vld [vmem:[#allocation36_spill] sm:$0xff] }
 0x4c8   : > { %2856 = vmatmul.f32.gmra.mxu3 %v10327_v40  ;;  %3525 = vmatmul.f32.gmra.mxu2 %v10301_v35  ;;  %v2338_v34 = vadd.f32 %v13126_v53, %v13125_v29  ;;  %v3111_v35 = vrot.slane %v2947_v50, 2  ;;  %v13129_v50 = vld [vmem:[#allocation47_spill] sm:$0xff] }
 0x4c9   : > { %3387 = vmatmul.f32.gmra.mxu1 %v8111_v57  ;;  %4271 = vmatpush.msrb.mxu2 %v3978_v19 }
 0x4cb   : > { %v2809_v11 = vpop.f32.mrf.mxu3  ;;  %v3480_v32 = vpop.f32.mrf.mxu2 }
 0x4cc   : > { %v2810_v23 = vadd.f32 %v2809_v11, %v10335_v36  ;;  %v2949_v9 = vpop.f32.mrf.mxu0  ;;  %v13127_v36 = vld [vmem:[#allocation37_spill] sm:$0xff] }
 0x4cd   : > { %v2478_v32 = vadd.f32 %v13127_v36, %v2338_v34  ;;  %v13133_v36 = vld [vmem:[#allocation51_spill] sm:$0xff] }
 0x4ce   : > { %v2950_v62 = vadd.f32 %v2949_v9, %v2810_v23  ;;  %v3344_v38 = vpop.f32.mrf.mxu1 }
 0x4cf   : > { %2996 = vmatmul.f32.gmra.mxu0 %v10332_v22  ;;  %v3962_v22 = vld [vmem:[#allocation11 + $0x6b8] sm:$0xff] }
 0x4d0   : > { %v3112_v57 = vrot.slane %v2950_v62, 2  ;;  %2859 = vmatmul.f32.gmra.mxu3 %v10345_v55  ;;  %3528 = vmatmul.f32.gmra.mxu2 %v10327_v40  ;;  %v13130_v55 = vld [vmem:[#allocation40_spill] sm:$0xff]  ;;  %v13131_v40 = vld [vmem:[#allocation41_spill] sm:$0xff]  ;;  %v13132_v38 = vld [vmem:[#allocation46_spill] sm:$0xff] }
 0x4d1   : > { %3390 = vmatmul.f32.gmra.mxu1 %v8112_v4  ;;  %v2341_v34 = vadd.f32 %v13131_v40, %v13130_v55  ;;  %v13136_v40 = vld [vmem:[#allocation43_spill] sm:$0xff] }
 0x4d2   : > { %v3113_v8 = vsel %vm3110_vm1, %v3111_v35, %v3112_v57  ;;  %4133 = vmatpush.msrb.mxu1 %v3962_v22 }
 0x4d3   : > { %v10846_v29 = vadd.f32 %v3113_v8, %v2478_v32  ;;  %v2812_v9 = vpop.f32.mrf.mxu3  ;;  %v3482_v11 = vpop.f32.mrf.mxu2  ;;  %v8113_v32 = vld [vmem:[%s9839_s21 + $0x90] sm:$0xff]  ;;  %v13134_v8 = vld [vmem:[#allocation42_spill] sm:$0xff] }
 0x4d4   : > { %v2813_v23 = vadd.f32 %v2812_v9, %v13129_v50  ;;  %v2952_v19 = vpop.f32.mrf.mxu0  ;;  %v2481_v4 = vadd.f32 %v13134_v8, %v2341_v34  ;;  %v8114_v11 = vld [vmem:[%s9829_s7 + $0x90] sm:$0xff] }
 0x4d5   : > { %13128 = vst [vmem:[#allocation38_spill] sm:$0xff] %v10846_v29  ;;  %v13139_v8 = vld [vmem:[#allocation56_spill] sm:$0xff]  ;;  %v13145_v29 = vld [vmem:[#allocation50_spill] sm:$0xff] }
 0x4d6   : > { %v2953_v53 = vadd.f32 %v2952_v19, %v2813_v23  ;;  %v3346_v62 = vpop.f32.mrf.mxu1 }
 0x4d7   : > { %2999 = vmatmul.f32.gmra.mxu0 %v13132_v38 }
 0x4d8   : > { %v3114_v35 = vrot.slane %v2953_v53, 2  ;;  %2862 = vmatmul.f32.gmra.mxu3 %v13133_v36  ;;  %3531 = vmatmul.f32.gmra.mxu2 %v8113_v32  ;;  %v13137_v53 = vld [vmem:[#allocation44_spill] sm:$0xff] }
 0x4d9   : > { %3393 = vmatmul.f32.gmra.mxu1 %v8114_v11  ;;  %v2344_v38 = vadd.f32 %v13137_v53, %v13136_v40  ;;  %v13138_v32 = vld [vmem:[#allocation52_spill] sm:$0xff]  ;;  %v13142_v40 = vld [vmem:[#allocation57_spill] sm:$0xff] }
 0x4da   : > { %v3115_v9 = vsel %vm3110_vm1, %v3112_v57, %v3114_v35 }
 0x4db   : > { %v10857_v20 = vadd.f32 %v3115_v9, %v2481_v4  ;;  %v2815_v22 = vpop.f32.mrf.mxu3  ;;  %v3484_v50 = vpop.f32.mrf.mxu2  ;;  %v8115_v4 = vld [vmem:[%s9839_s21 + $0x98] sm:$0xff] }
 0x4dc   : > { %v2816_v23 = vadd.f32 %v2815_v22, %v10371_v7  ;;  %v10860_v19 = vadd.f32 %v3484_v50, %v3346_v62  ;;  %v2955_v55 = vpop.f32.mrf.mxu0  ;;  %v13140_v9 = vld [vmem:[#allocation45_spill] sm:$0xff] }
 0x4dd   : > { %13135 = vst [vmem:[#allocation39_spill] sm:$0xff] %v10857_v20  ;;  %v2484_v11 = vadd.f32 %v13140_v9, %v2344_v38  ;;  %v8116_v7 = vld [vmem:[%s9829_s7 + $0x98] sm:$0xff]  ;;  %v8117_v9 = vld [vmem:[%s9836_s26 + $0xa0] sm:$0xff] }
 0x4de   : > { %v2956_v36 = vadd.f32 %v2955_v55, %v2816_v23  ;;  %v3349_v34 = vpop.f32.mrf.mxu1  ;;  %v3315_v23 = vld [vmem:[#allocation11 + $0x5b0] sm:$0xff] }
 0x4df   : > { %3002 = vmatmul.f32.gmra.mxu0 %v13138_v32  ;;  %v3977_v55 = vld [vmem:[#allocation11 + $0x730] sm:$0xff]  ;;  %3610 = vmatpush.msrb.mxu3 %v3315_v23 }
 0x4e0   : > { %v3116_v57 = vrot.slane %v2956_v36, 2  ;;  %2865 = vmatmul.f32.gmra.mxu3 %v13139_v8  ;;  %3534 = vmatmul.f32.gmra.mxu2 %v8115_v4  ;;  %v13144_v38 = vld [vmem:[#allocation49_spill] sm:$0xff] }
 0x4e1   : > { %3396 = vmatmul.f32.gmra.mxu1 %v8116_v7  ;;  %4272 = vmatpush.msrb.mxu2 %v3977_v55  ;;  %v8118_v7 = vld [vmem:[%s9839_s21 + $0xa8] sm:$0xff] }
 0x4e2   : > { %v3117_v20 = vsel %vm3110_vm1, %v3114_v35, %v3116_v57  ;;  %v13143_v35 = vld [vmem:[#allocation48_spill] sm:$0xff] }
 0x4e3   : > { %v10870_v62 = vadd.f32 %v3117_v20, %v2484_v11  ;;  %v2818_v22 = vpop.f32.mrf.mxu3  ;;  %v3487_v50 = vpop.f32.mrf.mxu2  ;;  %v2347_v8 = vadd.f32 %v13144_v38, %v13143_v35 }
 0x4e4   : > { %v2819_v53 = vadd.f32 %v2818_v22, %v13142_v40  ;;  %v10873_v36 = vadd.f32 %v3487_v50, %v3349_v34  ;;  %v2958_v32 = vpop.f32.mrf.mxu0  ;;  %v8120_v50 = vld [vmem:[%s9829_s7 + $0xa0] sm:$0xff] }
 0x4e5   : > { %13141 = vst [vmem:[#allocation35_spill] sm:$0xff] %v10870_v62  ;;  %v8119_v62 = vld [vmem:[%s9839_s21 + $0xa0] sm:$0xff]  ;;  %v2487_v22 = vadd.f32 %v13145_v29, %v2347_v8 }
 0x4e6   : > { %v2959_v4 = vadd.f32 %v2958_v32, %v2819_v53  ;;  %v3352_v20 = vpop.f32.mrf.mxu1  ;;  %v3945_v53 = vld [vmem:[#allocation11 + $0x630] sm:$0xff] }
 0x4e7   : > { %3005 = vmatmul.f32.gmra.mxu0 %v8117_v9  ;;  %v3961_v32 = vld [vmem:[#allocation11 + $0x6b0] sm:$0xff] }
 0x4e8   : > { %v3118_v11 = vrot.slane %v2959_v4, 2  ;;  %2868 = vmatmul.f32.gmra.mxu3 %v8118_v7  ;;  %3537 = vmatmul.f32.gmra.mxu2 %v8119_v62  ;;  %v13147_v29 = vld [vmem:[#allocation53_spill] sm:$0xff] }
 0x4e9   : > { %3399 = vmatmul.f32.gmra.mxu1 %v8120_v50  ;;  %3996 = vmatpush.msrb.mxu0 %v3945_v53  ;;  %v8122_v50 = vld [vmem:[%s9839_s21 + $0xb0] sm:$0xff] }
 0x4ea   : > { %v3119_v34 = vsel %vm3110_vm1, %v3116_v57, %v3118_v11  ;;  %4134 = vmatpush.msrb.mxu1 %v3961_v32  ;;  %v13148_v57 = vld [vmem:[#allocation54_spill] sm:$0xff] }
 0x4eb   : > { %v10883_v23 = vadd.f32 %v3119_v34, %v2487_v22  ;;  %v2821_v55 = vpop.f32.mrf.mxu3  ;;  %v3490_v40 = vpop.f32.mrf.mxu2  ;;  %v2350_v8 = vadd.f32 %v13148_v57, %v13147_v29  ;;  %v8121_v22 = vld [vmem:[%s9836_s26 + $0xa8] sm:$0xff]  ;;  %v3314_v57 = vld [vmem:[#allocation11 + $0x5a8] sm:$0xff] }
 0x4ec   : > { %v2822_v35 = vadd.f32 %v2821_v55, %v10398_v13  ;;  %v10886_v38 = vadd.f32 %v3490_v40, %v3352_v20  ;;  %v2961_v62 = vpop.f32.mrf.mxu0  ;;  %v8123_v55 = vld [vmem:[%s9829_s7 + $0xa8] sm:$0xff]  ;;  %3611 = vmatpush.msrb.mxu3 %v3314_v57  ;;  %v3960_v57 = vld [vmem:[#allocation11 + $0x6a8] sm:$0xff] }
 0x4ed   : > { %13146 = vst [vmem:[#allocation36_spill] sm:$0xff] %v10883_v23  ;;  %v13149_v23 = vld [vmem:[#allocation55_spill] sm:$0xff]  ;;  %4135 = vmatpush.msrb.mxu1 %v3960_v57 }
 0x4ee   : > { %v2962_v4 = vadd.f32 %v2961_v62, %v2822_v35  ;;  %v3355_v9 = vpop.f32.mrf.mxu1  ;;  %v2490_v13 = vadd.f32 %v13149_v23, %v2350_v8  ;;  %v8124_v8 = vld [vmem:[%s9836_s26 + $0xb0] sm:$0xff] }
 0x4ef   : > { %3008 = vmatmul.f32.gmra.mxu0 %v8121_v22 }
 0x4f0   : > { %v3120_v34 = vrot.slane %v2962_v4, 2  ;;  %2871 = vmatmul.f32.gmra.mxu3 %v8122_v50  ;;  %3540 = vmatmul.f32.gmra.mxu2 %v8118_v7  ;;  %v13151_v7 = vld [vmem:[#allocation58_spill] sm:$0xff]  ;;  %v13152_v4 = vld [vmem:[#allocation59_spill] sm:$0xff] }
 0x4f1   : > { %3402 = vmatmul.f32.gmra.mxu1 %v8123_v55  ;;  %v2353_v22 = vadd.f32 %v13152_v4, %v13151_v7 }
 0x4f2   : > { %v3121_v20 = vsel %vm3110_vm1, %v3118_v11, %v3120_v34 }
 0x4f3   : > { %v10895_v40 = vadd.f32 %v3121_v20, %v2490_v13  ;;  %v2824_v53 = vpop.f32.mrf.mxu3  ;;  %v3493_v32 = vpop.f32.mrf.mxu2  ;;  %v8125_v13 = vld [vmem:[%s9839_s21 + $0xb8] sm:$0xff] }
 0x4f4   : > { %v2825_v35 = vadd.f32 %v2824_v53, %v10410_v44  ;;  %v10898_v62 = vadd.f32 %v3493_v32, %v3355_v9  ;;  %v2964_v29 = vpop.f32.mrf.mxu0  ;;  %v13153_v20 = vld [vmem:[#allocation60_spill] sm:$0xff] }
 0x4f5   : > { %13150 = vst [vmem:[#allocation37_spill] sm:$0xff] %v10895_v40  ;;  %v2493_v40 = vadd.f32 %v13153_v20, %v2353_v22  ;;  %v8126_v9 = vld [vmem:[%s9829_s7 + $0xb0] sm:$0xff]  ;;  %v13157_v22 = vld [vmem:[#allocation62_spill] sm:$0xff] }
 0x4f6   : > { %v2965_v23 = vadd.f32 %v2964_v29, %v2825_v35  ;;  %v3358_v11 = vpop.f32.mrf.mxu1  ;;  %v3976_v35 = vld [vmem:[#allocation11 + $0x728] sm:$0xff] }
 0x4f7   : > { %3011 = vmatmul.f32.gmra.mxu0 %v8124_v8  ;;  %v3944_v29 = vld [vmem:[#allocation11 + $0x628] sm:$0xff]  ;;  %4273 = vmatpush.msrb.mxu2 %v3976_v35 }
 0x4f8   : > { %v3122_v55 = vrot.slane %v2965_v23, 2  ;;  %2874 = vmatmul.f32.gmra.mxu3 %v8125_v13  ;;  %3543 = vmatmul.f32.gmra.mxu2 %v8122_v50 }
 0x4f9   : > { %3405 = vmatmul.f32.gmra.mxu1 %v8126_v9  ;;  %3997 = vmatpush.msrb.mxu0 %v3944_v29 }
 0x4fa   : > { %v3123_v44 = vsel %vm3110_vm1, %v3120_v34, %v3122_v55  ;;  %v13156_v34 = vld [vmem:[#allocation61_spill] sm:$0xff] }
 0x4fb   : > { %v10907_v53 = vadd.f32 %v3123_v44, %v2493_v40  ;;  %v2827_v32 = vpop.f32.mrf.mxu3  ;;  %v3496_v7 = vpop.f32.mrf.mxu2  ;;  %v2356_v8 = vadd.f32 %v13157_v22, %v13156_v34  ;;  %v8127_v44 = vld [vmem:[%s9836_s26 + $0xb8] sm:$0xff] }
 0x4fc   : > { %v2828_v4 = vadd.f32 %v2827_v32, %v10422_v56  ;;  %v10910_v23 = vadd.f32 %v3496_v7, %v3358_v11  ;;  %v2967_v50 = vpop.f32.mrf.mxu0  ;;  %v13158_v56 = vld [vmem:[#allocation63_spill] sm:$0xff]  ;;  %v8129_v7 = vld [vmem:[%s9829_s7 + $0xb8] sm:$0xff] }
 0x4fd   : > { %13154 = vst [vmem:[#allocation47_spill] sm:$0xff] %v10907_v53  ;;  %v8128_v53 = vld [vmem:[%s9839_s21 + $0xc0] sm:$0xff]  ;;  %v2496_v11 = vadd.f32 %v13158_v56, %v2356_v8  ;;  %v13159_v22 = vld [vmem:[#allocation64_spill] sm:$0xff] }
 0x4fe   : > { %13155 = vst [vmem:[#allocation40_spill] sm:$0xff] %v10910_v23  ;;  %v2968_v40 = vadd.f32 %v2967_v50, %v2828_v4  ;;  %v3361_v20 = vpop.f32.mrf.mxu1  ;;  %v8130_v56 = vld [vmem:[%s9836_s26 + $0xc0] sm:$0xff]  ;;  %v8131_v23 = vld [vmem:[%s9839_s21 + $0xc8] sm:$0xff] }
 0x4ff   : > { %3014 = vmatmul.f32.gmra.mxu0 %v8127_v44 }
 0x500   : > { %v3124_v9 = vrot.slane %v2968_v40, 2  ;;  %2877 = vmatmul.f32.gmra.mxu3 %v8128_v53  ;;  %3546 = vmatmul.f32.gmra.mxu2 %v8125_v13  ;;  %v13160_v40 = vld [vmem:[#allocation65_spill] sm:$0xff] }
 0x501   : > { %3408 = vmatmul.f32.gmra.mxu1 %v8129_v7  ;;  %v2359_v13 = vadd.f32 %v13160_v40, %v13159_v22 }
 0x502   : > { %v3125_v32 = vsel %vm3110_vm1, %v3122_v55, %v3124_v9 }
 0x503   : > { %v10919_v35 = vadd.f32 %v3125_v32, %v2496_v11  ;;  %v2830_v29 = vpop.f32.mrf.mxu3  ;;  %v3499_v57 = vpop.f32.mrf.mxu2  ;;  %v13161_v11 = vld [vmem:[#allocation66_spill] sm:$0xff] }
 0x504   : > { %v2831_v4 = vadd.f32 %v2830_v29, %v10434_v30  ;;  %v10922_v50 = vadd.f32 %v3499_v57, %v3361_v20  ;;  %v2970_v34 = vpop.f32.mrf.mxu0  ;;  %v2499_v32 = vadd.f32 %v13161_v11, %v2359_v13  ;;  %v8132_v30 = vld [vmem:[%s9829_s7 + $0xc0] sm:$0xff] }
 0x506   : > { %v2971_v44 = vadd.f32 %v2970_v34, %v2831_v4  ;;  %v3364_v8 = vpop.f32.mrf.mxu1  ;;  %v3313_v4 = vld [vmem:[#allocation11 + $0x5a0] sm:$0xff] }
 0x507   : > { %3017 = vmatmul.f32.gmra.mxu0 %v8130_v56  ;;  %v3975_v34 = vld [vmem:[#allocation11 + $0x720] sm:$0xff]  ;;  %3612 = vmatpush.msrb.mxu3 %v3313_v4 }
 0x508   : > { %v3126_v55 = vrot.slane %v2971_v44, 2  ;;  %2880 = vmatmul.f32.gmra.mxu3 %v8131_v23  ;;  %3549 = vmatmul.f32.gmra.mxu2 %v8128_v53  ;;  %v8133_v56 = vld [vmem:[%s9836_s26 + $0xc8] sm:$0xff] }
 0x509   : > { %3411 = vmatmul.f32.gmra.mxu1 %v8132_v30  ;;  %4274 = vmatpush.msrb.mxu2 %v3975_v34  ;;  %v3959_v4 = vld [vmem:[#allocation11 + $0x6a0] sm:$0xff] }
 0x50a   : > { %v3127_v7 = vsel %vm3110_vm1, %v3124_v9, %v3126_v55  ;;  %v2362_v9 = vadd.f32 %v10427_v49, %v10425_v2  ;;  %v3943_v49 = vld [vmem:[#allocation11 + $0x620] sm:$0xff]  ;;  %4136 = vmatpush.msrb.mxu1 %v3959_v4 }
 0x50b   : > { %v10931_v20 = vadd.f32 %v3127_v7, %v2499_v32  ;;  %v2833_v29 = vpop.f32.mrf.mxu3  ;;  %v3502_v57 = vpop.f32.mrf.mxu2  ;;  %v8134_v32 = vld [vmem:[%s9839_s21 + $0xd0] sm:$0xff]  ;;  %3998 = vmatpush.msrb.mxu0 %v3943_v49 }
 0x50c   : > { %v2834_v22 = vadd.f32 %v2833_v29, %v10447_v21  ;;  %v10934_v40 = vadd.f32 %v3502_v57, %v3364_v8  ;;  %v2973_v53 = vpop.f32.mrf.mxu0  ;;  %v13162_v7 = vld [vmem:[#allocation67_spill] sm:$0xff] }
 0x50d   : > { %v2502_v30 = vadd.f32 %v13162_v7, %v2362_v9  ;;  %v8135_v8 = vld [vmem:[%s9829_s7 + $0xc8] sm:$0xff] }
 0x50e   : > { %v2974_v13 = vadd.f32 %v2973_v53, %v2834_v22  ;;  %v3367_v44 = vpop.f32.mrf.mxu1 }
 0x50f   : > { %3020 = vmatmul.f32.gmra.mxu0 %v8133_v56  ;;  %v8136_v56 = vld [vmem:[%s9836_s26 + $0xd0] sm:$0xff] }
 0x510   : > { %v3128_v11 = vrot.slane %v2974_v13, 2  ;;  %2883 = vmatmul.f32.gmra.mxu3 %v8134_v32  ;;  %3552 = vmatmul.f32.gmra.mxu2 %v8131_v23 }
 0x511   : > { %3414 = vmatmul.f32.gmra.mxu1 %v8135_v8 }
 0x512   : > { %v3129_v21 = vsel %vm3110_vm1, %v3126_v55, %v3128_v11  ;;  %v13163_v55 = vld [vmem:[#allocation68_spill] sm:$0xff] }
 0x513   : > { %v10943_v29 = vadd.f32 %v3129_v21, %v2502_v30  ;;  %v2836_v57 = vpop.f32.mrf.mxu3  ;;  %v3505_v2 = vpop.f32.mrf.mxu2  ;;  %v2365_v53 = vadd.f32 %v13163_v55, %v10437_v61  ;;  %v8137_v30 = vld [vmem:[%s9839_s21 + $0xd8] sm:$0xff]  ;;  %v8138_v21 = vld [vmem:[%s9829_s7 + $0xd0] sm:$0xff] }
 0x514   : > { %v2837_v34 = vadd.f32 %v2836_v57, %v10460_v45  ;;  %v10946_v22 = vadd.f32 %v3505_v2, %v3367_v44  ;;  %v2976_v23 = vpop.f32.mrf.mxu0 }
 0x515   : > { %v2505_v45 = vadd.f32 %v10441_v25, %v2365_v53  ;;  %v8140_v53 = vld [vmem:[%s9839_s21 + $0xe0] sm:$0xff] }
 0x516   : > { %v2977_v9 = vadd.f32 %v2976_v23, %v2837_v34  ;;  %v3370_v13 = vpop.f32.mrf.mxu1  ;;  %v3312_v34 = vld [vmem:[#allocation11 + $0x598] sm:$0xff]  ;;  %v8139_v23 = vld [vmem:[%s9836_s26 + $0xd8] sm:$0xff] }
 0x517   : > { %3023 = vmatmul.f32.gmra.mxu0 %v8136_v56  ;;  %3613 = vmatpush.msrb.mxu3 %v3312_v34 }
 0x518   : > { %v3130_v7 = vrot.slane %v2977_v9, 2  ;;  %2886 = vmatmul.f32.gmra.mxu3 %v8137_v30  ;;  %3555 = vmatmul.f32.gmra.mxu2 %v8134_v32  ;;  %v2368_v32 = vadd.f32 %v10452_v48, %v10450_v12  ;;  %v3974_v48 = vld [vmem:[#allocation11 + $0x718] sm:$0xff] }
 0x519   : > { %3417 = vmatmul.f32.gmra.mxu1 %v8138_v21  ;;  %v3958_v21 = vld [vmem:[#allocation11 + $0x698] sm:$0xff]  ;;  %4275 = vmatpush.msrb.mxu2 %v3974_v48 }
 0x51a   : > { %v3131_v44 = vsel %vm3110_vm1, %v3128_v11, %v3130_v7  ;;  %v2508_v9 = vadd.f32 %v10454_v59, %v2368_v32  ;;  %v2371_v59 = vadd.f32 %v10465_v60, %v10463_v10  ;;  %4137 = vmatpush.msrb.mxu1 %v3958_v21  ;;  %v8143_v32 = vld [vmem:[%s9839_s21 + $0xe8] sm:$0xff]  ;;  %v8146_v21 = vld [vmem:[%s9839_s21 + $0xf0] sm:$0xff] }
 0x51b   : > { %v10955_v8 = vadd.f32 %v3131_v44, %v2505_v45  ;;  %v2839_v57 = vpop.f32.mrf.mxu3  ;;  %v3508_v61 = vpop.f32.mrf.mxu2  ;;  %v3942_v44 = vld [vmem:[#allocation11 + $0x618] sm:$0xff] }
 0x51c   : > { %v2840_v2 = vadd.f32 %v2839_v57, %v10473_v46  ;;  %v10958_v49 = vadd.f32 %v3508_v61, %v3370_v13  ;;  %v2979_v4 = vpop.f32.mrf.mxu0  ;;  %v8141_v13 = vld [vmem:[%s9829_s7 + $0xd8] sm:$0xff]  ;;  %3999 = vmatpush.msrb.mxu0 %v3942_v44  ;;  %v8145_v44 = vld [vmem:[%s9836_s26 + $0xe8] sm:$0xff] }
 0x51e   : > { %v2980_v25 = vadd.f32 %v2979_v4, %v2840_v2  ;;  %v3373_v11 = vpop.f32.mrf.mxu1  ;;  %v8142_v4 = vld [vmem:[%s9836_s26 + $0xe0] sm:$0xff] }
 0x51f   : > { %3026 = vmatmul.f32.gmra.mxu0 %v8139_v23 }
 0x520   : > { %v3132_v55 = vrot.slane %v2980_v25, 2  ;;  %2889 = vmatmul.f32.gmra.mxu3 %v8140_v53  ;;  %3558 = vmatmul.f32.gmra.mxu2 %v8137_v30 }
 0x521   : > { %3420 = vmatmul.f32.gmra.mxu1 %v8141_v13 }
 0x522   : > { %v3133_v46 = vsel %vm3110_vm1, %v3130_v7, %v3132_v55 }
 0x523   : > { %v10967_v56 = vadd.f32 %v3133_v46, %v2508_v9  ;;  %v2842_v45 = vpop.f32.mrf.mxu3  ;;  %v3511_v12 = vpop.f32.mrf.mxu2 }
 0x524   : > { %v2843_v57 = vadd.f32 %v2842_v45, %v10486_v24  ;;  %v10970_v61 = vadd.f32 %v3511_v12, %v3373_v11  ;;  %v2982_v30 = vpop.f32.mrf.mxu0  ;;  %v2511_v24 = vadd.f32 %v10467_v33, %v2371_v59  ;;  %v8144_v11 = vld [vmem:[%s9829_s7 + $0xe0] sm:$0xff] }
 0x525   : > { %v13164_v45 = vld [vmem:[#allocation69_spill] sm:$0xff]  ;;  %v13165_v12 = vld [vmem:[#allocation70_spill] sm:$0xff] }
 0x526   : > { %v2983_v7 = vadd.f32 %v2982_v30, %v2843_v57  ;;  %v3376_v2 = vpop.f32.mrf.mxu1  ;;  %v13166_v57 = vld [vmem:[#allocation71_spill] sm:$0xff] }
 0x527   : > { %3029 = vmatmul.f32.gmra.mxu0 %v8142_v4 }
 0x528   : > { %v3134_v34 = vrot.slane %v2983_v7, 2  ;;  %2892 = vmatmul.f32.gmra.mxu3 %v8143_v32  ;;  %3561 = vmatmul.f32.gmra.mxu2 %v8140_v53  ;;  %v2374_v53 = vadd.f32 %v13165_v12, %v13164_v45 }
 0x529   : > { %3423 = vmatmul.f32.gmra.mxu1 %v8144_v11 }
 0x52a   : > { %v3135_v25 = vsel %vm3110_vm1, %v3132_v55, %v3134_v34  ;;  %v2514_v30 = vadd.f32 %v13166_v57, %v2374_v53  ;;  %v8148_v53 = vld [vmem:[%s9836_s26 + $0xf0] sm:$0xff]  ;;  %v13170_v57 = vld [vmem:[#allocation74_spill] sm:$0xff] }
 0x52b   : > { %v10979_v23 = vadd.f32 %v3135_v25, %v2511_v24  ;;  %v2845_v10 = vpop.f32.mrf.mxu3  ;;  %v3514_v60 = vpop.f32.mrf.mxu2  ;;  %v3311_v24 = vld [vmem:[#allocation11 + $0x590] sm:$0xff] }
 0x52c   : > { %v2846_v9 = vadd.f32 %v2845_v10, %v10499_v28  ;;  %v10982_v46 = vadd.f32 %v3514_v60, %v3376_v2  ;;  %v2985_v13 = vpop.f32.mrf.mxu0  ;;  %v8147_v28 = vld [vmem:[%s9829_s7 + $0xe8] sm:$0xff]  ;;  %v13167_v25 = vld [vmem:[#allocation29_spill] sm:$0xff]  ;;  %3614 = vmatpush.msrb.mxu3 %v3311_v24 }
 0x52d   : > { %v3941_v24 = vld [vmem:[#allocation11 + $0x610] sm:$0xff] }
 0x52e   : > { %v2986_v48 = vadd.f32 %v2985_v13, %v2846_v9  ;;  %v3379_v33 = vpop.f32.mrf.mxu1  ;;  %v13168_v9 = vld [vmem:[#allocation72_spill] sm:$0xff]  ;;  %v13169_v13 = vld [vmem:[#allocation73_spill] sm:$0xff]  ;;  %4000 = vmatpush.msrb.mxu0 %v3941_v24 }
 0x52f   : > { %3032 = vmatmul.f32.gmra.mxu0 %v8145_v44  ;;  %v8149_v44 = vld [vmem:[%s9839_s21 + $0xf8] sm:$0xff] }
 0x530   : > { %v3136_v55 = vrot.slane %v2986_v48, 2  ;;  %2895 = vmatmul.f32.gmra.mxu3 %v8146_v21  ;;  %3564 = vmatmul.f32.gmra.mxu2 %v8143_v32  ;;  %v3973_v32 = vld [vmem:[#allocation11 + $0x710] sm:$0xff] }
 0x531   : > { %3426 = vmatmul.f32.gmra.mxu1 %v8147_v28  ;;  %4276 = vmatpush.msrb.mxu2 %v3973_v32 }
 0x532   : > { %v3137_v59 = vsel %vm3110_vm1, %v3134_v34, %v3136_v55  ;;  %v2377_v34 = vadd.f32 %v13169_v13, %v13168_v9  ;;  %v13173_v9 = vld [vmem:[#allocation25_spill] sm:$0xff] }
 0x533   : > { %v10991_v7 = vadd.f32 %v3137_v59, %v2514_v30  ;;  %v2848_v2 = vpop.f32.mrf.mxu3  ;;  %v3517_v4 = vpop.f32.mrf.mxu2  ;;  %v8150_v59 = vld [vmem:[%s9829_s7 + $0xf0] sm:$0xff] }
 0x534   : > { %v2849_v11 = vadd.f32 %v2848_v2, %v13167_v25  ;;  %v10994_v10 = vadd.f32 %v3517_v4, %v3379_v33  ;;  %v2988_v60 = vpop.f32.mrf.mxu0  ;;  %v2517_v30 = vadd.f32 %v13170_v57, %v2377_v34  ;;  %v3957_v25 = vld [vmem:[#allocation11 + $0x690] sm:$0xff] }
 0x535   : > { %4138 = vmatpush.msrb.mxu1 %v3957_v25 }
 0x536   : > { %v2989_v45 = vadd.f32 %v2988_v60, %v2849_v11  ;;  %v3382_v12 = vpop.f32.mrf.mxu1  ;;  %v13172_v11 = vld [vmem:[#allocation75_spill] sm:$0xff] }
 0x537   : > { %3035 = vmatmul.f32.gmra.mxu0 %v8148_v53  ;;  %v8151_v53 = vld [vmem:[%s9836_s26 + $0xf8] sm:$0xff] }
 0x538   : > { %v3138_v48 = vrot.slane %v2989_v45, 2  ;;  %2898 = vmatmul.f32.gmra.mxu3 %v8149_v44  ;;  %3567 = vmatmul.f32.gmra.mxu2 %v8146_v21 }
 0x539   : > { %3429 = vmatmul.f32.gmra.mxu1 %v8150_v59 }
 0x53a   : > { %v3139_v33 = vsel %vm3110_vm1, %v3136_v55, %v3138_v48  ;;  %v13174_v55 = vld [vmem:[#allocation26_spill] sm:$0xff] }
 0x53b   : > { %v11003_v28 = vadd.f32 %v3139_v33, %v2517_v30  ;;  %v2851_v2 = vpop.f32.mrf.mxu3  ;;  %v3520_v4 = vpop.f32.mrf.mxu2  ;;  %v2380_v13 = vadd.f32 %v13174_v55, %v13173_v9  ;;  %v8152_v30 = vld [vmem:[%s9839_s21 + $0x100] sm:$0xff]  ;;  %v13175_v33 = vld [vmem:[#allocation24_spill] sm:$0xff] }
 0x53c   : > { %v2852_v60 = vadd.f32 %v2851_v2, %v13172_v11  ;;  %v11006_v32 = vadd.f32 %v3520_v4, %v3382_v12  ;;  %v2991_v21 = vpop.f32.mrf.mxu0  ;;  %v8153_v2 = vld [vmem:[%s9829_s7 + $0xf8] sm:$0xff]  ;;  %v13177_v11 = vld [vmem:[#allocation78_spill] sm:$0xff] }
 0x53d   : > { %13171 = vst [vmem:[#allocation41_spill] sm:$0xff] %v11003_v28  ;;  %v2520_v59 = vadd.f32 %v13175_v33, %v2380_v13  ;;  %v13178_v55 = vld [vmem:[#allocation28_spill] sm:$0xff]  ;;  %v8154_v33 = vld [vmem:[%s9836_s26 + $0x100] sm:$0xff]  ;;  %v8155_v28 = vld [vmem:[%s9839_s21 + $0x108] sm:$0xff] }
 0x53e   : > { %v2992_v34 = vadd.f32 %v2991_v21, %v2852_v60  ;;  %v3385_v45 = vpop.f32.mrf.mxu1 }
 0x53f   : > { %3038 = vmatmul.f32.gmra.mxu0 %v8151_v53 }
 0x540   : > { %v3140_v57 = vrot.slane %v2992_v34, 2  ;;  %2901 = vmatmul.f32.gmra.mxu3 %v8152_v30  ;;  %3570 = vmatmul.f32.gmra.mxu2 %v8149_v44  ;;  %v13179_v34 = vld [vmem:[#allocation27_spill] sm:$0xff] }
 0x541   : > { %3432 = vmatmul.f32.gmra.mxu1 %v8153_v2  ;;  %v2383_v44 = vadd.f32 %v13179_v34, %v13178_v55 }
 0x542   : > { %v3141_v12 = vsel %vm3110_vm1, %v3138_v48, %v3140_v57 }
 0x543   : > { %v11015_v4 = vadd.f32 %v3141_v12, %v2520_v59  ;;  %v2854_v24 = vpop.f32.mrf.mxu3  ;;  %v3523_v25 = vpop.f32.mrf.mxu2  ;;  %v13180_v59 = vld [vmem:[#allocation30_spill] sm:$0xff] }
 0x544   : > { %v2855_v60 = vadd.f32 %v2854_v24, %v13177_v11  ;;  %v11018_v21 = vadd.f32 %v3523_v25, %v3385_v45  ;;  %v2994_v9 = vpop.f32.mrf.mxu0  ;;  %v2523_v12 = vadd.f32 %v13180_v59, %v2383_v44  ;;  %v3310_v11 = vld [vmem:[#allocation11 + $0x588] sm:$0xff]  ;;  %v13182_v44 = vld [vmem:[#allocation31_spill] sm:$0xff] }
 0x545   : > { %13176 = vst [vmem:[#allocation46_spill] sm:$0xff] %v11015_v4  ;;  %v8156_v4 = vld [vmem:[%s9829_s7 + $0x100] sm:$0xff]  ;;  %3615 = vmatpush.msrb.mxu3 %v3310_v11 }
 0x546   : > { %v2995_v53 = vadd.f32 %v2994_v9, %v2855_v60  ;;  %v3388_v13 = vpop.f32.mrf.mxu1  ;;  %v3972_v60 = vld [vmem:[#allocation11 + $0x708] sm:$0xff] }
 0x547   : > { %3041 = vmatmul.f32.gmra.mxu0 %v8154_v33  ;;  %4277 = vmatpush.msrb.mxu2 %v3972_v60 }
 0x548   : > { %v3142_v48 = vrot.slane %v2995_v53, 2  ;;  %2904 = vmatmul.f32.gmra.mxu3 %v8155_v28  ;;  %3573 = vmatmul.f32.gmra.mxu2 %v8152_v30  ;;  %v3940_v30 = vld [vmem:[#allocation11 + $0x608] sm:$0xff] }
 0x549   : > { %3435 = vmatmul.f32.gmra.mxu1 %v8156_v4  ;;  %v13183_v4 = vld [vmem:[#allocation76_spill] sm:$0xff]  ;;  %4001 = vmatpush.msrb.mxu0 %v3940_v30 }
 0x54a   : > { %v3143_v2 = vsel %vm3110_vm1, %v3140_v57, %v3142_v48  ;;  %v3956_v57 = vld [vmem:[#allocation11 + $0x688] sm:$0xff]  ;;  %v2386_v53 = vadd.f32 %v13183_v4, %v13182_v44  ;;  %v13186_v4 = vld [vmem:[#allocation79_spill] sm:$0xff] }
 0x54b   : > { %v11027_v45 = vadd.f32 %v3143_v2, %v2523_v12  ;;  %v2857_v24 = vpop.f32.mrf.mxu3  ;;  %v3526_v25 = vpop.f32.mrf.mxu2  ;;  %4139 = vmatpush.msrb.mxu1 %v3956_v57  ;;  %v8157_v12 = vld [vmem:[%s9836_s26 + $0x108] sm:$0xff]  ;;  %v13185_v44 = vld [vmem:[#allocation32_spill] sm:$0xff] }
 0x54c   : > { %v2858_v9 = vadd.f32 %v2857_v24, %v10548_v52  ;;  %v11030_v55 = vadd.f32 %v3526_v25, %v3388_v13  ;;  %v2997_v34 = vpop.f32.mrf.mxu0  ;;  %v13184_v52 = vld [vmem:[#allocation77_spill] sm:$0xff]  ;;  %v8159_v25 = vld [vmem:[%s9829_s7 + $0x108] sm:$0xff] }
 0x54d   : > { %13181 = vst [vmem:[#allocation51_spill] sm:$0xff] %v11027_v45  ;;  %v8158_v45 = vld [vmem:[%s9839_s21 + $0x110] sm:$0xff]  ;;  %v2526_v13 = vadd.f32 %v13184_v52, %v2386_v53  ;;  %v8161_v52 = vld [vmem:[%s9839_s21 + $0x118] sm:$0xff] }
 0x54e   : > { %v2998_v33 = vadd.f32 %v2997_v34, %v2858_v9  ;;  %v3391_v59 = vpop.f32.mrf.mxu1 }
 0x54f   : > { %3044 = vmatmul.f32.gmra.mxu0 %v8157_v12  ;;  %v8160_v12 = vld [vmem:[%s9836_s26 + $0x110] sm:$0xff] }
 0x550   : > { %v3144_v2 = vrot.slane %v2998_v33, 2  ;;  %2907 = vmatmul.f32.gmra.mxu3 %v8158_v45  ;;  %3576 = vmatmul.f32.gmra.mxu2 %v8155_v28  ;;  %v2389_v28 = vadd.f32 %v13186_v4, %v13185_v44 }
 0x551   : > { %3438 = vmatmul.f32.gmra.mxu1 %v8159_v25 }
 0x552   : > { %v3145_v24 = vsel %vm3110_vm1, %v3142_v48, %v3144_v2 }
 0x553   : > { %v11039_v11 = vadd.f32 %v3145_v24, %v2526_v13  ;;  %v2860_v60 = vpop.f32.mrf.mxu3  ;;  %v3529_v9 = vpop.f32.mrf.mxu2  ;;  %v13187_v13 = vld [vmem:[#allocation80_spill] sm:$0xff] }
 0x554   : > { %v2861_v34 = vadd.f32 %v2860_v60, %v10560_v37  ;;  %v11042_v30 = vadd.f32 %v3529_v9, %v3391_v59  ;;  %v3000_v57 = vpop.f32.mrf.mxu0  ;;  %v2529_v24 = vadd.f32 %v13187_v13, %v2389_v28  ;;  %v8162_v37 = vld [vmem:[%s9829_s7 + $0x110] sm:$0xff]  ;;  %v13189_v28 = vld [vmem:[#allocation33_spill] sm:$0xff] }
 0x556   : > { %v3001_v33 = vadd.f32 %v3000_v57, %v2861_v34  ;;  %v3394_v53 = vpop.f32.mrf.mxu1  ;;  %v3309_v34 = vld [vmem:[#allocation11 + $0x580] sm:$0xff] }
 0x557   : > { %3047 = vmatmul.f32.gmra.mxu0 %v8160_v12  ;;  %3616 = vmatpush.msrb.mxu3 %v3309_v34 }
 0x558   : > { %v3146_v48 = vrot.slane %v3001_v33, 2  ;;  %2910 = vmatmul.f32.gmra.mxu3 %v8161_v52  ;;  %3579 = vmatmul.f32.gmra.mxu2 %v8158_v45  ;;  %v3971_v45 = vld [vmem:[#allocation11 + $0x700] sm:$0xff]  ;;  %v13190_v33 = vld [vmem:[#allocation81_spill] sm:$0xff] }
 0x559   : > { %3441 = vmatmul.f32.gmra.mxu1 %v8162_v37  ;;  %4278 = vmatpush.msrb.mxu2 %v3971_v45  ;;  %v8164_v37 = vld [vmem:[%s9839_s21 + $0x120] sm:$0xff] }
 0x55a   : > { %v3147_v25 = vsel %vm3110_vm1, %v3144_v2, %v3146_v48  ;;  %v2392_v2 = vadd.f32 %v13190_v33, %v13189_v28 }
 0x55b   : > { %v11051_v59 = vadd.f32 %v3147_v25, %v2529_v24  ;;  %v2863_v60 = vpop.f32.mrf.mxu3  ;;  %v3532_v9 = vpop.f32.mrf.mxu2  ;;  %v8163_v24 = vld [vmem:[%s9836_s26 + $0x118] sm:$0xff] }
 0x55c   : > { %v2864_v57 = vadd.f32 %v2863_v60, %v10572_v26  ;;  %v11054_v44 = vadd.f32 %v3532_v9, %v3394_v53  ;;  %v3003_v4 = vpop.f32.mrf.mxu0  ;;  %v8165_v60 = vld [vmem:[%s9829_s7 + $0x118] sm:$0xff] }
 0x55d   : > { %13188 = vst [vmem:[#allocation42_spill] sm:$0xff] %v11051_v59  ;;  %v13191_v59 = vld [vmem:[#allocation82_spill] sm:$0xff] }
 0x55e   : > { %v3004_v12 = vadd.f32 %v3003_v4, %v2864_v57  ;;  %v3397_v13 = vpop.f32.mrf.mxu1  ;;  %v2532_v26 = vadd.f32 %v13191_v59, %v2392_v2  ;;  %v3939_v57 = vld [vmem:[#allocation11 + $0x600] sm:$0xff] }
 0x55f   : > { %3050 = vmatmul.f32.gmra.mxu0 %v8163_v24  ;;  %v3955_v4 = vld [vmem:[#allocation11 + $0x680] sm:$0xff]  ;;  %v8166_v24 = vld [vmem:[%s9836_s26 + $0x120] sm:$0xff] }
 0x560   : > { %v3148_v25 = vrot.slane %v3004_v12, 2  ;;  %2913 = vmatmul.f32.gmra.mxu3 %v8164_v37  ;;  %3582 = vmatmul.f32.gmra.mxu2 %v8161_v52 }
 0x561   : > { %3444 = vmatmul.f32.gmra.mxu1 %v8165_v60  ;;  %4002 = vmatpush.msrb.mxu0 %v3939_v57  ;;  %v13194_v60 = vld [vmem:[#allocation84_spill] sm:$0xff] }
 0x562   : > { %v3149_v53 = vsel %vm3110_vm1, %v3146_v48, %v3148_v25  ;;  %4140 = vmatpush.msrb.mxu1 %v3955_v4  ;;  %v13193_v48 = vld [vmem:[#allocation83_spill] sm:$0xff] }
 0x563   : > { %v11063_v9 = vadd.f32 %v3149_v53, %v2532_v26  ;;  %v2866_v34 = vpop.f32.mrf.mxu3  ;;  %v3535_v45 = vpop.f32.mrf.mxu2  ;;  %v2395_v59 = vadd.f32 %v13193_v48, %v10563_v0  ;;  %v8167_v53 = vld [vmem:[%s9839_s21 + $0x128] sm:$0xff]  ;;  %v13197_v48 = vld [vmem:[#allocation85_spill] sm:$0xff] }
 0x564   : > { %v2867_v28 = vadd.f32 %v2866_v34, %v10584_v16  ;;  %v11066_v33 = vadd.f32 %v3535_v45, %v3397_v13  ;;  %v3006_v52 = vpop.f32.mrf.mxu0  ;;  %v8168_v34 = vld [vmem:[%s9829_s7 + $0x120] sm:$0xff] }
 0x565   : > { %13192 = vst [vmem:[#allocation43_spill] sm:$0xff] %v11063_v9  ;;  %v2535_v16 = vadd.f32 %v13194_v60, %v2395_v59  ;;  %v8169_v60 = vld [vmem:[%s9836_s26 + $0x128] sm:$0xff]  ;;  %v8170_v9 = vld [vmem:[%s9839_s21 + $0x130] sm:$0xff] }
 0x566   : > { %v3007_v2 = vadd.f32 %v3006_v52, %v2867_v28  ;;  %v3400_v12 = vpop.f32.mrf.mxu1 }
 0x567   : > { %3053 = vmatmul.f32.gmra.mxu0 %v8166_v24 }
 0x568   : > { %v3150_v26 = vrot.slane %v3007_v2, 2  ;;  %2916 = vmatmul.f32.gmra.mxu3 %v8167_v53  ;;  %3585 = vmatmul.f32.gmra.mxu2 %v8164_v37  ;;  %v13198_v2 = vld [vmem:[#allocation86_spill] sm:$0xff] }
 0x569   : > { %3447 = vmatmul.f32.gmra.mxu1 %v8168_v34  ;;  %v2398_v37 = vadd.f32 %v13198_v2, %v13197_v48 }
 0x56a   : > { %v3151_v13 = vsel %vm3110_vm1, %v3148_v25, %v3150_v26 }
 0x56b   : > { %v11075_v45 = vadd.f32 %v3151_v13, %v2535_v16  ;;  %v2869_v57 = vpop.f32.mrf.mxu3  ;;  %v3538_v0 = vpop.f32.mrf.mxu2  ;;  %v13199_v16 = vld [vmem:[#allocation87_spill] sm:$0xff] }
 0x56c   : > { %v2870_v4 = vadd.f32 %v2869_v57, %v10596_v18  ;;  %v11078_v28 = vadd.f32 %v3538_v0, %v3400_v12  ;;  %v3009_v52 = vpop.f32.mrf.mxu0  ;;  %v2538_v13 = vadd.f32 %v13199_v16, %v2398_v37  ;;  %v4618_v0 = vld [vmem:[#allocation11 + $0x7f8] sm:$0xff]  ;;  %v13202_v37 = vld [vmem:[#allocation88_spill] sm:$0xff] }
 0x56d   : > { %13195 = vst [vmem:[#allocation44_spill] sm:$0xff] %v11075_v45  ;;  %v8171_v45 = vld [vmem:[%s9829_s7 + $0x128] sm:$0xff]  ;;  %4651 = vmatpush.msra.mxu3 %v4618_v0  ;;  %v8174_v0 = vld [vmem:[%s9829_s7 + $0x130] sm:$0xff] }
 0x56e   : > { %13196 = vst [vmem:[#allocation52_spill] sm:$0xff] %v11078_v28  ;;  %v3010_v24 = vadd.f32 %v3009_v52, %v2870_v4  ;;  %v3403_v59 = vpop.f32.mrf.mxu1  ;;  %v5282_v4 = vld [vmem:[#allocation11 + $0x978] sm:$0xff]  ;;  %v8173_v28 = vld [vmem:[%s9839_s21 + $0x138] sm:$0xff] }
 0x56f   : > { %3056 = vmatmul.f32.gmra.mxu0 %v8169_v60  ;;  %v13201_v52 = vld [vmem:[#allocation94_spill] sm:$0xff]  ;;  %5315 = vmatpush.msra.mxu2 %v5282_v4 }
 0x570   : > { %v3152_v25 = vrot.slane %v3010_v24, 2  ;;  %2919 = vmatmul.f32.gmra.mxu3 %v8170_v9  ;;  %3588 = vmatmul.f32.gmra.mxu2 %v8167_v53  ;;  %v4634_v53 = vld [vmem:[#allocation11 + $0x878] sm:$0xff] }
 0x571   : > { %3450 = vmatmul.f32.gmra.mxu1 %v8171_v45  ;;  %v13203_v45 = vld [vmem:[#allocation89_spill] sm:$0xff]  ;;  %4789 = vmatpush.msra.mxu0 %v4634_v53 }
 0x572   : > { %v3153_v34 = vsel %vm3110_vm1, %v3150_v26, %v3152_v25  ;;  %v4650_v26 = vld [vmem:[#allocation11 + $0x8f8] sm:$0xff]  ;;  %v2401_v60 = vadd.f32 %v13203_v45, %v13202_v37  ;;  %v13207_v45 = vld [vmem:[#allocation92_spill] sm:$0xff] }
 0x573   : > { %v11087_v18 = vadd.f32 %v3153_v34, %v2538_v13  ;;  %v2872_v12 = vpop.f32.mrf.mxu3  ;;  %v3541_v57 = vpop.f32.mrf.mxu2  ;;  %4927 = vmatpush.msra.mxu1 %v4650_v26  ;;  %v8172_v34 = vld [vmem:[%s9836_s26 + $0x130] sm:$0xff] }
 0x574   : > { %v2873_v48 = vadd.f32 %v2872_v12, %v13201_v52  ;;  %v11090_v2 = vadd.f32 %v3541_v57, %v3403_v59  ;;  %v3012_v24 = vpop.f32.mrf.mxu0  ;;  %v13204_v59 = vld [vmem:[#allocation90_spill] sm:$0xff]  ;;  %v13206_v37 = vld [vmem:[#allocation91_spill] sm:$0xff] }
 0x575   : > { %13200 = vst [vmem:[#allocation56_spill] sm:$0xff] %v11087_v18  ;;  %v2541_v12 = vadd.f32 %v13204_v59, %v2401_v60  ;;  %v8176_v59 = vld [vmem:[%s9839_s21 + $0x140] sm:$0xff] }
 0x576   : > { %v3013_v16 = vadd.f32 %v3012_v24, %v2873_v48  ;;  %v3406_v13 = vpop.f32.mrf.mxu1 }
 0x577   : > { %3059 = vmatmul.f32.gmra.mxu0 %v8172_v34  ;;  %v8175_v34 = vld [vmem:[%s9836_s26 + $0x138] sm:$0xff] }
 0x578   : > { %v3154_v18 = vrot.slane %v3013_v16, 2  ;;  %2922 = vmatmul.f32.gmra.mxu3 %v8173_v28  ;;  %3591 = vmatmul.f32.gmra.mxu2 %v8170_v9  ;;  %v2404_v9 = vadd.f32 %v13207_v45, %v13206_v37  ;;  %v4617_v45 = vld [vmem:[#allocation11 + $0x7f0] sm:$0xff] }
 0x579   : > { %3453 = vmatmul.f32.gmra.mxu1 %v8174_v0  ;;  %4652 = vmatpush.msra.mxu3 %v4617_v45  ;;  %v4649_v45 = vld [vmem:[#allocation11 + $0x8f0] sm:$0xff] }
 0x57a   : > { %v3155_v57 = vsel %vm3110_vm1, %v3152_v25, %v3154_v18  ;;  %4928 = vmatpush.msra.mxu1 %v4649_v45 }
 0x57b   : > { %v11099_v4 = vadd.f32 %v3155_v57, %v2541_v12  ;;  %v2875_v52 = vpop.f32.mrf.mxu3  ;;  %v3544_v48 = vpop.f32.mrf.mxu2  ;;  %v13208_v12 = vld [vmem:[#allocation93_spill] sm:$0xff] }
 0x57c   : > { %v2876_v24 = vadd.f32 %v2875_v52, %v10620_v5  ;;  %v11102_v53 = vadd.f32 %v3544_v48, %v3406_v13  ;;  %v3015_v26 = vpop.f32.mrf.mxu0  ;;  %v2544_v57 = vadd.f32 %v13208_v12, %v2404_v9  ;;  %v8177_v5 = vld [vmem:[%s9829_s7 + $0x138] sm:$0xff]  ;;  %v8178_v12 = vld [vmem:[%s9836_s26 + $0x140] sm:$0xff] }
 0x57d   : > { %13205 = vst [vmem:[#allocation45_spill] sm:$0xff] %v11099_v4  ;;  %v8185_v4 = vld [vmem:[%s9836_s26 + $0x10] sm:$0xff] }
 0x57e   : > { %v3016_v16 = vadd.f32 %v3015_v26, %v2876_v24  ;;  %v3409_v60 = vpop.f32.mrf.mxu1 }
 0x57f   : > { %3062 = vmatmul.f32.gmra.mxu0 %v8175_v34 }
 0x580   : > { %v3156_v25 = vrot.slane %v3016_v16, 2  ;;  %2925 = vmatmul.f32.gmra.mxu3 %v8176_v59  ;;  %3594 = vmatmul.f32.gmra.mxu2 %v8173_v28  ;;  %v13210_v28 = vld [vmem:[#allocation95_spill] sm:$0xff]  ;;  %v13211_v16 = vld [vmem:[#allocation96_spill] sm:$0xff] }
 0x581   : > { %3456 = vmatmul.f32.gmra.mxu1 %v8177_v5  ;;  %v2407_v34 = vadd.f32 %v13211_v16, %v13210_v28 }
 0x582   : > { %v3157_v0 = vsel %vm3110_vm1, %v3154_v18, %v3156_v25 }
 0x583   : > { %v11111_v13 = vadd.f32 %v3157_v0, %v2544_v57  ;;  %v2878_v52 = vpop.f32.mrf.mxu3  ;;  %v3547_v48 = vpop.f32.mrf.mxu2  ;;  %v8179_v57 = vld [vmem:[%s9836_s26] sm:$0xff] }
 0x584   : > { %v2879_v24 = vadd.f32 %v2878_v52, %v10632_v31  ;;  %v11114_v26 = vadd.f32 %v3547_v48, %v3409_v60  ;;  %v3018_v37 = vpop.f32.mrf.mxu0  ;;  %v13212_v0 = vld [vmem:[#allocation97_spill] sm:$0xff] }
 0x585   : > { %13209 = vst [vmem:[#allocation57_spill] sm:$0xff] %v11111_v13  ;;  %v2547_v13 = vadd.f32 %v13212_v0, %v2407_v34  ;;  %v8180_v60 = vld [vmem:[%s9829_s7 + $0x140] sm:$0xff]  ;;  %v13215_v34 = vld [vmem:[#allocation99_spill] sm:$0xff] }
 0x586   : > { %v3019_v9 = vadd.f32 %v3018_v37, %v2879_v24  ;;  %v3412_v18 = vpop.f32.mrf.mxu1  ;;  %v5281_v24 = vld [vmem:[#allocation11 + $0x970] sm:$0xff] }
 0x587   : > { %3065 = vmatmul.f32.gmra.mxu0 %v8178_v12  ;;  %v4633_v37 = vld [vmem:[#allocation11 + $0x870] sm:$0xff]  ;;  %5316 = vmatpush.msra.mxu2 %v5281_v24 }
 0x588   : > { %v3158_v5 = vrot.slane %v3019_v9, 2  ;;  %3597 = vmatmul.f32.gmra.mxu2 %v8176_v59  ;;  %3617 = vmatmul.f32.vlgmr.msrb.gmra.mxu3 %v8179_v57 }
 0x589   : > { %3459 = vmatmul.f32.gmra.mxu1 %v8180_v60  ;;  %4790 = vmatpush.msra.mxu0 %v4633_v37 }
 0x58a   : > { %v3159_v31 = vsel %vm3110_vm1, %v3156_v25, %v3158_v5  ;;  %v13214_v25 = vld [vmem:[#allocation98_spill] sm:$0xff] }
 0x58b   : > { %v11123_v52 = vadd.f32 %v3159_v31, %v2547_v13  ;;  %v2881_v48 = vpop.f32.mrf.mxu3  ;;  %v3550_v28 = vpop.f32.mrf.mxu2  ;;  %v2410_v12 = vadd.f32 %v13215_v34, %v13214_v25  ;;  %v8181_v31 = vld [vmem:[%s9829_s7] sm:$0xff] }
 0x58c   : > { %v2882_v16 = vadd.f32 %v2881_v48, %v10644_v63  ;;  %v11126_v59 = vadd.f32 %v3550_v28, %v3412_v18  ;;  %v3021_v9 = vpop.f32.mrf.mxu0  ;;  %v13216_v63 = vld [vmem:[#allocation100_spill] sm:$0xff]  ;;  %v8183_v28 = vld [vmem:[%s9839_s21] sm:$0xff] }
 0x58d   : > { %13213 = vst [vmem:[#allocation48_spill] sm:$0xff] %v11123_v52  ;;  %v8182_v52 = vld [vmem:[%s9836_s26 + $0x8] sm:$0xff]  ;;  %v2550_v18 = vadd.f32 %v13216_v63, %v2410_v12  ;;  %v13218_v34 = vld [vmem:[#allocation101_spill] sm:$0xff] }
 0x58e   : > { %v3022_v13 = vadd.f32 %v3021_v9, %v2882_v16  ;;  %v3415_v0 = vpop.f32.mrf.mxu1  ;;  %v8184_v63 = vld [vmem:[%s9829_s7 + $0x8] sm:$0xff] }
 0x58f   : > { %4003 = vmatmul.f32.vlgmr.msrb.gmra.mxu0 %v8181_v31 }
 0x590   : > { %v3160_v60 = vrot.slane %v3022_v13, 2  ;;  %3619 = vmatmul.f32.gmra.mxu3 %v8182_v52  ;;  %4279 = vmatmul.f32.vlgmr.msrb.gmra.mxu2 %v8179_v57  ;;  %v13219_v13 = vld [vmem:[#allocation102_spill] sm:$0xff] }
 0x591   : > { %4141 = vmatmul.f32.vlgmr.msrb.gmra.mxu1 %v8183_v28  ;;  %v2413_v57 = vadd.f32 %v13219_v13, %v13218_v34 }
 0x592   : > { %v3161_v48 = vsel %vm3110_vm1, %v3158_v5, %v3160_v60 }
 0x593   : > { %v11135_v24 = vadd.f32 %v3161_v48, %v2550_v18  ;;  %v2884_v37 = vpop.f32.mrf.mxu3  ;;  %v3553_v45 = vpop.f32.mrf.mxu2  ;;  %v13220_v18 = vld [vmem:[#allocation103_spill] sm:$0xff] }
 0x594   : > { %v2885_v16 = vadd.f32 %v2884_v37, %v10656_v42  ;;  %v11138_v9 = vadd.f32 %v3553_v45, %v3415_v0  ;;  %v3024_v25 = vpop.f32.mrf.mxu0  ;;  %v2553_v48 = vadd.f32 %v13220_v18, %v2413_v57  ;;  %v8186_v42 = vld [vmem:[%s9839_s21 + $0x8] sm:$0xff]  ;;  %v13222_v57 = vld [vmem:[#allocation104_spill] sm:$0xff] }
 0x595   : > { %13217 = vst [vmem:[#allocation49_spill] sm:$0xff] %v11135_v24 }
 0x596   : > { %v3025_v31 = vadd.f32 %v3024_v25, %v2885_v16  ;;  %v3418_v12 = vpop.f32.mrf.mxu1  ;;  %v4616_v16 = vld [vmem:[#allocation11 + $0x7e8] sm:$0xff] }
 0x597   : > { %4005 = vmatmul.f32.gmra.mxu0 %v8184_v63  ;;  %v5280_v25 = vld [vmem:[#allocation11 + $0x968] sm:$0xff]  ;;  %4653 = vmatpush.msra.mxu3 %v4616_v16 }
 0x598   : > { %v3162_v5 = vrot.slane %v3025_v31, 2  ;;  %3621 = vmatmul.f32.gmra.mxu3 %v8185_v4  ;;  %4281 = vmatmul.f32.gmra.mxu2 %v8182_v52 }
 0x599   : > { %4143 = vmatmul.f32.gmra.mxu1 %v8186_v42  ;;  %5317 = vmatpush.msra.mxu2 %v5280_v25  ;;  %v8188_v42 = vld [vmem:[%s9836_s26 + $0x18] sm:$0xff] }
 0x59a   : > { %v3163_v28 = vsel %vm3110_vm1, %v3160_v60, %v3162_v5  ;;  %v13223_v60 = vld [vmem:[#allocation105_spill] sm:$0xff] }
 0x59b   : > { %v11147_v0 = vadd.f32 %v3163_v28, %v2553_v48  ;;  %v2887_v37 = vpop.f32.mrf.mxu3  ;;  %v3556_v45 = vpop.f32.mrf.mxu2  ;;  %v2416_v31 = vadd.f32 %v13223_v60, %v13222_v57  ;;  %v8187_v48 = vld [vmem:[%s9829_s7 + $0x10] sm:$0xff] }
 0x59c   : > { %v2888_v34 = vadd.f32 %v2887_v37, %v10668_v6  ;;  %v11150_v13 = vadd.f32 %v3556_v45, %v3418_v12  ;;  %v3027_v52 = vpop.f32.mrf.mxu0  ;;  %v8189_v12 = vld [vmem:[%s9839_s21 + $0x10] sm:$0xff] }
 0x59d   : > { %13221 = vst [vmem:[#allocation50_spill] sm:$0xff] %v11147_v0  ;;  %v13224_v0 = vld [vmem:[#allocation106_spill] sm:$0xff]  ;;  %v4632_v25 = vld [vmem:[#allocation11 + $0x868] sm:$0xff] }
 0x59e   : > { %v3028_v63 = vadd.f32 %v3027_v52, %v2888_v34  ;;  %v3421_v18 = vpop.f32.mrf.mxu1  ;;  %v2556_v24 = vadd.f32 %v13224_v0, %v2416_v31  ;;  %v4648_v34 = vld [vmem:[#allocation11 + $0x8e8] sm:$0xff]  ;;  %4791 = vmatpush.msra.mxu0 %v4632_v25  ;;  %v13229_v25 = vld [vmem:[#allocation115_spill] sm:$0xff] }
 0x59f   : > { %4007 = vmatmul.f32.gmra.mxu0 %v8187_v48  ;;  %4929 = vmatpush.msra.mxu1 %v4648_v34  ;;  %v8191_v48 = vld [vmem:[%s9836_s26 + $0x20] sm:$0xff] }
 0x5a0   : > { %v3164_v28 = vrot.slane %v3028_v63, 2  ;;  %3624 = vmatmul.f32.gmra.mxu3 %v8188_v42  ;;  %4283 = vmatmul.f32.gmra.mxu2 %v8185_v4 }
 0x5a1   : > { %4145 = vmatmul.f32.gmra.mxu1 %v8189_v12  ;;  %v8192_v12 = vld [vmem:[%s9839_s21 + $0x18] sm:$0xff] }
 0x5a2   : > { %v3165_v6 = vsel %vm3110_vm1, %v3162_v5, %v3164_v28  ;;  %v13226_v5 = vld [vmem:[#allocation107_spill] sm:$0xff] }
 0x5a3   : > { %v11159_v37 = vadd.f32 %v3165_v6, %v2556_v24  ;;  %v2890_v45 = vpop.f32.mrf.mxu3  ;;  %v3559_v16 = vpop.f32.mrf.mxu2  ;;  %v2419_v0 = vadd.f32 %v13226_v5, %v10659_v15  ;;  %v8190_v24 = vld [vmem:[%s9829_s7 + $0x18] sm:$0xff]  ;;  %v4615_v5 = vld [vmem:[#allocation11 + $0x7e0] sm:$0xff] }
 0x5a4   : > { %v2891_v52 = vadd.f32 %v2890_v45, %v10680_v41  ;;  %v11162_v57 = vadd.f32 %v3559_v16, %v3421_v18  ;;  %v3030_v4 = vpop.f32.mrf.mxu0  ;;  %v13227_v6 = vld [vmem:[#allocation108_spill] sm:$0xff]  ;;  %4654 = vmatpush.msra.mxu3 %v4615_v5 }
 0x5a5   : > { %13225 = vst [vmem:[#allocation53_spill] sm:$0xff] %v11159_v37  ;;  %v2559_v41 = vadd.f32 %v13227_v6, %v2419_v0  ;;  %v8193_v6 = vld [vmem:[%s9829_s7 + $0x20] sm:$0xff]  ;;  %v4647_v5 = vld [vmem:[#allocation11 + $0x8e0] sm:$0xff]  ;;  %v8200_v37 = vld [vmem:[%s9836_s26 + $0x38] sm:$0xff] }
 0x5a6   : > { %v3031_v60 = vadd.f32 %v3030_v4, %v2891_v52  ;;  %v3424_v31 = vpop.f32.mrf.mxu1  ;;  %4930 = vmatpush.msra.mxu1 %v4647_v5 }
 0x5a7   : > { %4010 = vmatmul.f32.gmra.mxu0 %v8190_v24 }
 0x5a8   : > { %v3166_v63 = vrot.slane %v3031_v60, 2  ;;  %3627 = vmatmul.f32.gmra.mxu3 %v8191_v48  ;;  %4286 = vmatmul.f32.gmra.mxu2 %v8188_v42  ;;  %v13230_v42 = vld [vmem:[#allocation109_spill] sm:$0xff]  ;;  %v13231_v60 = vld [vmem:[#allocation110_spill] sm:$0xff] }
 0x5a9   : > { %4148 = vmatmul.f32.gmra.mxu1 %v8192_v12  ;;  %v2422_v24 = vadd.f32 %v13231_v60, %v13230_v42 }
 0x5aa   : > { %v3167_v18 = vsel %vm3110_vm1, %v3164_v28, %v3166_v63 }
 0x5ab   : > { %v11171_v45 = vadd.f32 %v3167_v18, %v2559_v41  ;;  %v2893_v16 = vpop.f32.mrf.mxu3  ;;  %v3562_v15 = vpop.f32.mrf.mxu2  ;;  %v8194_v41 = vld [vmem:[%s9836_s26 + $0x28] sm:$0xff] }
 0x5ac   : > { %v2894_v34 = vadd.f32 %v2893_v16, %v13229_v25  ;;  %v11174_v52 = vadd.f32 %v3562_v15, %v3424_v31  ;;  %v3033_v4 = vpop.f32.mrf.mxu0  ;;  %v13232_v18 = vld [vmem:[#allocation111_spill] sm:$0xff]  ;;  %v8195_v31 = vld [vmem:[%s9839_s21 + $0x20] sm:$0xff] }
 0x5ad   : > { %13228 = vst [vmem:[#allocation54_spill] sm:$0xff] %v11171_v45  ;;  %v2562_v45 = vadd.f32 %v13232_v18, %v2422_v24  ;;  %v13235_v24 = vld [vmem:[#allocation113_spill] sm:$0xff] }
 0x5ae   : > { %v3034_v0 = vadd.f32 %v3033_v4, %v2894_v34  ;;  %v3427_v28 = vpop.f32.mrf.mxu1  ;;  %v5279_v34 = vld [vmem:[#allocation11 + $0x960] sm:$0xff] }
 0x5af   : > { %4013 = vmatmul.f32.gmra.mxu0 %v8193_v6  ;;  %v4631_v4 = vld [vmem:[#allocation11 + $0x860] sm:$0xff]  ;;  %5318 = vmatpush.msra.mxu2 %v5279_v34 }
 0x5b0   : > { %v3168_v12 = vrot.slane %v3034_v0, 2  ;;  %3630 = vmatmul.f32.gmra.mxu3 %v8194_v41  ;;  %4289 = vmatmul.f32.gmra.mxu2 %v8191_v48 }
 0x5b1   : > { %4151 = vmatmul.f32.gmra.mxu1 %v8195_v31  ;;  %4792 = vmatpush.msra.mxu0 %v4631_v4 }
 0x5b2   : > { %v3169_v16 = vsel %vm3110_vm1, %v3166_v63, %v3168_v12  ;;  %v13234_v63 = vld [vmem:[#allocation112_spill] sm:$0xff] }
 0x5b3   : > { %v11183_v15 = vadd.f32 %v3169_v16, %v2562_v45  ;;  %v2896_v25 = vpop.f32.mrf.mxu3  ;;  %v3565_v42 = vpop.f32.mrf.mxu2  ;;  %v2425_v6 = vadd.f32 %v13235_v24, %v13234_v63  ;;  %v8196_v16 = vld [vmem:[%s9829_s7 + $0x28] sm:$0xff]  ;;  %v13238_v24 = vld [vmem:[#allocation116_spill] sm:$0xff] }
 0x5b4   : > { %v2897_v60 = vadd.f32 %v2896_v25, %v10704_v54  ;;  %v11186_v0 = vadd.f32 %v3565_v42, %v3427_v28  ;;  %v3036_v48 = vpop.f32.mrf.mxu0  ;;  %v13236_v54 = vld [vmem:[#allocation114_spill] sm:$0xff] }
 0x5b5   : > { %13233 = vst [vmem:[#allocation55_spill] sm:$0xff] %v11183_v15  ;;  %v8197_v15 = vld [vmem:[%s9836_s26 + $0x30] sm:$0xff]  ;;  %v2565_v28 = vadd.f32 %v13236_v54, %v2425_v6  ;;  %v8198_v42 = vld [vmem:[%s9839_s21 + $0x28] sm:$0xff] }
 0x5b6   : > { %v3037_v45 = vadd.f32 %v3036_v48, %v2897_v60  ;;  %v3430_v18 = vpop.f32.mrf.mxu1  ;;  %v8199_v54 = vld [vmem:[%s9829_s7 + $0x30] sm:$0xff] }
 0x5b7   : > { %4016 = vmatmul.f32.gmra.mxu0 %v8196_v16 }
 0x5b8   : > { %v3170_v31 = vrot.slane %v3037_v45, 2  ;;  %3633 = vmatmul.f32.gmra.mxu3 %v8197_v15  ;;  %4292 = vmatmul.f32.gmra.mxu2 %v8194_v41  ;;  %v13239_v45 = vld [vmem:[#allocation117_spill] sm:$0xff] }
 0x5b9   : > { %4154 = vmatmul.f32.gmra.mxu1 %v8198_v42  ;;  %v2428_v41 = vadd.f32 %v13239_v45, %v13238_v24 }
 0x5ba   : > { %v3171_v25 = vsel %vm3110_vm1, %v3168_v12, %v3170_v31 }
 0x5bb   : > { %v11195_v34 = vadd.f32 %v3171_v25, %v2565_v28  ;;  %v2899_v4 = vpop.f32.mrf.mxu3  ;;  %v3568_v5 = vpop.f32.mrf.mxu2  ;;  %v13240_v28 = vld [vmem:[#allocation118_spill] sm:$0xff] }
 0x5bc   : > { %v2900_v60 = vadd.f32 %v2899_v4, %v10716_v14  ;;  %v11198_v48 = vadd.f32 %v3568_v5, %v3430_v18  ;;  %v3039_v63 = vpop.f32.mrf.mxu0  ;;  %v2568_v25 = vadd.f32 %v13240_v28, %v2428_v41  ;;  %v8201_v14 = vld [vmem:[%s9839_s21 + $0x30] sm:$0xff] }
 0x5bd   : > { %13237 = vst [vmem:[#allocation58_spill] sm:$0xff] %v11195_v34  ;;  %v13242_v41 = vld [vmem:[#allocation119_spill] sm:$0xff] }
 0x5be   : > { %v3040_v16 = vadd.f32 %v3039_v63, %v2900_v60  ;;  %v3433_v6 = vpop.f32.mrf.mxu1  ;;  %v4614_v60 = vld [vmem:[#allocation11 + $0x7d8] sm:$0xff] }
 0x5bf   : > { %4019 = vmatmul.f32.gmra.mxu0 %v8199_v54  ;;  %v5278_v63 = vld [vmem:[#allocation11 + $0x958] sm:$0xff]  ;;  %4655 = vmatpush.msra.mxu3 %v4614_v60 }
 0x5c0   : > { %v3172_v12 = vrot.slane %v3040_v16, 2  ;;  %3636 = vmatmul.f32.gmra.mxu3 %v8200_v37  ;;  %4295 = vmatmul.f32.gmra.mxu2 %v8197_v15 }
 0x5c1   : > { %4157 = vmatmul.f32.gmra.mxu1 %v8201_v14  ;;  %5319 = vmatpush.msra.mxu2 %v5278_v63  ;;  %v8203_v14 = vld [vmem:[%s9836_s26 + $0x40] sm:$0xff] }
 0x5c2   : > { %v3173_v42 = vsel %vm3110_vm1, %v3170_v31, %v3172_v12  ;;  %v13243_v31 = vld [vmem:[#allocation120_spill] sm:$0xff]  ;;  %v4630_v63 = vld [vmem:[#allocation11 + $0x858] sm:$0xff] }
 0x5c3   : > { %v11207_v18 = vadd.f32 %v3173_v42, %v2568_v25  ;;  %v2902_v4 = vpop.f32.mrf.mxu3  ;;  %v3571_v5 = vpop.f32.mrf.mxu2  ;;  %v2431_v16 = vadd.f32 %v13243_v31, %v13242_v41  ;;  %v8202_v25 = vld [vmem:[%s9829_s7 + $0x38] sm:$0xff]  ;;  %4793 = vmatpush.msra.mxu0 %v4630_v63 }
 0x5c4   : > { %v2903_v24 = vadd.f32 %v2902_v4, %v10728_v47  ;;  %v11210_v45 = vadd.f32 %v3571_v5, %v3433_v6  ;;  %v3042_v15 = vpop.f32.mrf.mxu0  ;;  %v8204_v6 = vld [vmem:[%s9839_s21 + $0x38] sm:$0xff] }
 0x5c5   : > { %13241 = vst [vmem:[#allocation59_spill] sm:$0xff] %v11207_v18  ;;  %v13244_v18 = vld [vmem:[#allocation121_spill] sm:$0xff] }
 0x5c6   : > { %v3043_v54 = vadd.f32 %v3042_v15, %v2903_v24  ;;  %v3436_v28 = vpop.f32.mrf.mxu1  ;;  %v2571_v34 = vadd.f32 %v13244_v18, %v2431_v16  ;;  %v4646_v24 = vld [vmem:[#allocation11 + $0x8d8] sm:$0xff] }
 0x5c7   : > { %4022 = vmatmul.f32.gmra.mxu0 %v8202_v25  ;;  %4931 = vmatpush.msra.mxu1 %v4646_v24  ;;  %v8206_v25 = vld [vmem:[%s9836_s26 + $0x48] sm:$0xff] }
 0x5c8   : > { %v3174_v42 = vrot.slane %v3043_v54, 2  ;;  %3639 = vmatmul.f32.gmra.mxu3 %v8203_v14  ;;  %4298 = vmatmul.f32.gmra.mxu2 %v8200_v37 }
 0x5c9   : > { %4160 = vmatmul.f32.gmra.mxu1 %v8204_v6  ;;  %v8207_v6 = vld [vmem:[%s9839_s21 + $0x40] sm:$0xff] }
 0x5ca   : > { %v3175_v47 = vsel %vm3110_vm1, %v3172_v12, %v3174_v42  ;;  %v13246_v12 = vld [vmem:[#allocation122_spill] sm:$0xff] }
 0x5cb   : > { %v11219_v4 = vadd.f32 %v3175_v47, %v2571_v34  ;;  %v2905_v5 = vpop.f32.mrf.mxu3  ;;  %v3574_v60 = vpop.f32.mrf.mxu2  ;;  %v2434_v18 = vadd.f32 %v13246_v12, %v10719_v39  ;;  %v8205_v34 = vld [vmem:[%s9829_s7 + $0x40] sm:$0xff]  ;;  %v13247_v47 = vld [vmem:[#allocation123_spill] sm:$0xff] }
 0x5cc   : > { %v2906_v15 = vadd.f32 %v2905_v5, %v10740_v43  ;;  %v11222_v41 = vadd.f32 %v3574_v60, %v3436_v28  ;;  %v3045_v37 = vpop.f32.mrf.mxu0  ;;  %v13250_v12 = vld [vmem:[#allocation125_spill] sm:$0xff] }
 0x5cd   : > { %13245 = vst [vmem:[#allocation60_spill] sm:$0xff] %v11219_v4  ;;  %v2574_v43 = vadd.f32 %v13247_v47, %v2434_v18  ;;  %v8209_v47 = vld [vmem:[%s9836_s26 + $0x50] sm:$0xff]  ;;  %v8212_v4 = vld [vmem:[%s9836_s26 + $0x58] sm:$0xff] }
 0x5ce   : > { %v3046_v31 = vadd.f32 %v3045_v37, %v2906_v15  ;;  %v3439_v16 = vpop.f32.mrf.mxu1  ;;  %v13249_v37 = vld [vmem:[#allocation124_spill] sm:$0xff] }
 0x5cf   : > { %4025 = vmatmul.f32.gmra.mxu0 %v8205_v34  ;;  %v8208_v34 = vld [vmem:[%s9829_s7 + $0x48] sm:$0xff] }
 0x5d0   : > { %v3176_v54 = vrot.slane %v3046_v31, 2  ;;  %3642 = vmatmul.f32.gmra.mxu3 %v8206_v25  ;;  %4301 = vmatmul.f32.gmra.mxu2 %v8203_v14  ;;  %v2437_v14 = vadd.f32 %v13250_v12, %v13249_v37 }
 0x5d1   : > { %4163 = vmatmul.f32.gmra.mxu1 %v8207_v6 }
 0x5d2   : > { %v3177_v28 = vsel %vm3110_vm1, %v3174_v42, %v3176_v54 }
 0x5d3   : > { %v11231_v5 = vadd.f32 %v3177_v28, %v2574_v43  ;;  %v2908_v60 = vpop.f32.mrf.mxu3  ;;  %v3577_v39 = vpop.f32.mrf.mxu2  ;;  %v13251_v43 = vld [vmem:[#allocation126_spill] sm:$0xff] }
 0x5d4   : > { %v2909_v63 = vadd.f32 %v2908_v60, %v10752_v1  ;;  %v11234_v24 = vadd.f32 %v3577_v39, %v3439_v16  ;;  %v3048_v15 = vpop.f32.mrf.mxu0  ;;  %v2577_v28 = vadd.f32 %v13251_v43, %v2437_v14  ;;  %v4613_v39 = vld [vmem:[#allocation11 + $0x7d0] sm:$0xff]  ;;  %v13254_v14 = vld [vmem:[#allocation127_spill] sm:$0xff] }
 0x5d5   : > { %13248 = vst [vmem:[#allocation61_spill] sm:$0xff] %v11231_v5  ;;  %v8210_v5 = vld [vmem:[%s9839_s21 + $0x48] sm:$0xff]  ;;  %4656 = vmatpush.msra.mxu3 %v4613_v39  ;;  %v8213_v39 = vld [vmem:[%s9839_s21 + $0x50] sm:$0xff] }
 0x5d6   : > { %v3049_v31 = vadd.f32 %v3048_v15, %v2909_v63  ;;  %v3442_v18 = vpop.f32.mrf.mxu1  ;;  %v5277_v63 = vld [vmem:[#allocation11 + $0x950] sm:$0xff] }
 0x5d7   : > { %4028 = vmatmul.f32.gmra.mxu0 %v8208_v34  ;;  %v13253_v15 = vld [vmem:[#allocation133_spill] sm:$0xff]  ;;  %5320 = vmatpush.msra.mxu2 %v5277_v63 }
 0x5d8   : > { %v3178_v42 = vrot.slane %v3049_v31, 2  ;;  %3645 = vmatmul.f32.gmra.mxu3 %v8209_v47  ;;  %4304 = vmatmul.f32.gmra.mxu2 %v8206_v25  ;;  %v4629_v25 = vld [vmem:[#allocation11 + $0x850] sm:$0xff] }
 0x5d9   : > { %4166 = vmatmul.f32.gmra.mxu1 %v8210_v5  ;;  %v13255_v5 = vld [vmem:[#allocation128_spill] sm:$0xff]  ;;  %4794 = vmatpush.msra.mxu0 %v4629_v25 }
 0x5da   : > { %v3179_v6 = vsel %vm3110_vm1, %v3176_v54, %v3178_v42  ;;  %v4645_v54 = vld [vmem:[#allocation11 + $0x8d0] sm:$0xff]  ;;  %v2440_v34 = vadd.f32 %v13255_v5, %v13254_v14  ;;  %v13259_v5 = vld [vmem:[#allocation131_spill] sm:$0xff] }
 0x5db   : > { %v11243_v1 = vadd.f32 %v3179_v6, %v2577_v28  ;;  %v2911_v16 = vpop.f32.mrf.mxu3  ;;  %v3580_v60 = vpop.f32.mrf.mxu2  ;;  %4932 = vmatpush.msra.mxu1 %v4645_v54  ;;  %v8211_v6 = vld [vmem:[%s9829_s7 + $0x50] sm:$0xff]  ;;  %v13258_v14 = vld [vmem:[#allocation130_spill] sm:$0xff] }
 0x5dc   : > { %v2912_v37 = vadd.f32 %v2911_v16, %v13253_v15  ;;  %v11246_v12 = vadd.f32 %v3580_v60, %v3442_v18  ;;  %v3051_v31 = vpop.f32.mrf.mxu0  ;;  %v13256_v18 = vld [vmem:[#allocation129_spill] sm:$0xff] }
 0x5dd   : > { %13252 = vst [vmem:[#allocation62_spill] sm:$0xff] %v11243_v1  ;;  %v2580_v16 = vadd.f32 %v13256_v18, %v2440_v34  ;;  %v8215_v18 = vld [vmem:[%s9836_s26 + $0x60] sm:$0xff] }
 0x5de   : > { %v3052_v43 = vadd.f32 %v3051_v31, %v2912_v37  ;;  %v3445_v28 = vpop.f32.mrf.mxu1 }
 0x5df   : > { %4031 = vmatmul.f32.gmra.mxu0 %v8211_v6  ;;  %v8214_v6 = vld [vmem:[%s9829_s7 + $0x58] sm:$0xff] }
 0x5e0   : > { %v3180_v1 = vrot.slane %v3052_v43, 2  ;;  %3648 = vmatmul.f32.gmra.mxu3 %v8212_v4  ;;  %4307 = vmatmul.f32.gmra.mxu2 %v8209_v47  ;;  %v2443_v47 = vadd.f32 %v13259_v5, %v13258_v14  ;;  %v13262_v5 = vld [vmem:[#allocation134_spill] sm:$0xff] }
 0x5e1   : > { %4169 = vmatmul.f32.gmra.mxu1 %v8213_v39 }
 0x5e2   : > { %v3181_v60 = vsel %vm3110_vm1, %v3178_v42, %v3180_v1 }
 0x5e3   : > { %v11255_v63 = vadd.f32 %v3181_v60, %v2580_v16  ;;  %v2914_v15 = vpop.f32.mrf.mxu3  ;;  %v3583_v37 = vpop.f32.mrf.mxu2  ;;  %v13260_v16 = vld [vmem:[#allocation132_spill] sm:$0xff] }
 0x5e4   : > { %v2915_v31 = vadd.f32 %v2914_v15, %v10776_v58  ;;  %v11258_v25 = vadd.f32 %v3583_v37, %v3445_v28  ;;  %v3054_v54 = vpop.f32.mrf.mxu0  ;;  %v2583_v60 = vadd.f32 %v13260_v16, %v2443_v47  ;;  %v8216_v58 = vld [vmem:[%s9839_s21 + $0x58] sm:$0xff]  ;;  %v8217_v16 = vld [vmem:[%s9829_s7 + $0x60] sm:$0xff] }
 0x5e5   : > { %13257 = vst [vmem:[#allocation63_spill] sm:$0xff] %v11255_v63  ;;  %v5276_v47 = vld [vmem:[#allocation11 + $0x948] sm:$0xff] }
 0x5e6   : > { %v3055_v43 = vadd.f32 %v3054_v54, %v2915_v31  ;;  %v3448_v34 = vpop.f32.mrf.mxu1  ;;  %5321 = vmatpush.msra.mxu2 %v5276_v47  ;;  %v13265_v47 = vld [vmem:[#allocation136_spill] sm:$0xff] }
 0x5e7   : > { %4034 = vmatmul.f32.gmra.mxu0 %v8214_v6 }
 0x5e8   : > { %v3182_v42 = vrot.slane %v3055_v43, 2  ;;  %3651 = vmatmul.f32.gmra.mxu3 %v8215_v18  ;;  %4310 = vmatmul.f32.gmra.mxu2 %v8212_v4  ;;  %v2446_v4 = vadd.f32 %v13262_v5, %v10767_v51  ;;  %v4612_v43 = vld [vmem:[#allocation11 + $0x7c8] sm:$0xff] }
 0x5e9   : > { %4172 = vmatmul.f32.gmra.mxu1 %v8216_v58  ;;  %4657 = vmatpush.msra.mxu3 %v4612_v43 }
 0x5ea   : > { %v3183_v39 = vsel %vm3110_vm1, %v3180_v1, %v3182_v42 }
 0x5eb   : > { %v11267_v28 = vadd.f32 %v3183_v39, %v2583_v60  ;;  %v2917_v15 = vpop.f32.mrf.mxu3  ;;  %v3586_v37 = vpop.f32.mrf.mxu2  ;;  %v4628_v60 = vld [vmem:[#allocation11 + $0x848] sm:$0xff] }
 0x5ec   : > { %v2918_v31 = vadd.f32 %v2917_v15, %v10788_v27  ;;  %v11270_v54 = vadd.f32 %v3586_v37, %v3448_v34  ;;  %v3057_v14 = vpop.f32.mrf.mxu0  ;;  %v4644_v39 = vld [vmem:[#allocation11 + $0x8c8] sm:$0xff]  ;;  %v13263_v27 = vld [vmem:[#allocation135_spill] sm:$0xff]  ;;  %4795 = vmatpush.msra.mxu0 %v4628_v60  ;;  %v8219_v15 = vld [vmem:[%s9839_s21 + $0x60] sm:$0xff] }
 0x5ed   : > { %13261 = vst [vmem:[#allocation64_spill] sm:$0xff] %v11267_v28  ;;  %v8218_v28 = vld [vmem:[%s9836_s26 + $0x68] sm:$0xff]  ;;  %v2586_v34 = vadd.f32 %v13263_v27, %v2446_v4  ;;  %4933 = vmatpush.msra.mxu1 %v4644_v39  ;;  %v2449_v4 = vadd.f32 %v13265_v47, %v10779_v3  ;;  %v8221_v39 = vld [vmem:[%s9836_s26 + $0x70] sm:$0xff]  ;;  %v13266_v27 = vld [vmem:[#allocation137_spill] sm:$0xff] }
 0x5ee   : > { %v3058_v6 = vadd.f32 %v3057_v14, %v2918_v31  ;;  %v3451_v1 = vpop.f32.mrf.mxu1  ;;  %v8220_v60 = vld [vmem:[%s9829_s7 + $0x68] sm:$0xff] }
 0x5ef   : > { %4037 = vmatmul.f32.gmra.mxu0 %v8217_v16  ;;  %v13270_v47 = vld [vmem:[#allocation34_spill] sm:$0xff] }
 0x5f0   : > { %v3184_v58 = vrot.slane %v3058_v6, 2  ;;  %3654 = vmatmul.f32.gmra.mxu3 %v8218_v28  ;;  %4313 = vmatmul.f32.gmra.mxu2 %v8215_v18 }
 0x5f1   : > { %4175 = vmatmul.f32.gmra.mxu1 %v8219_v15 }
 0x5f2   : > { %v3185_v51 = vsel %vm3110_vm1, %v3182_v42, %v3184_v58 }
 0x5f3   : > { %v11279_v37 = vadd.f32 %v3185_v51, %v2586_v34  ;;  %v2920_v31 = vpop.f32.mrf.mxu3  ;;  %v3589_v14 = vpop.f32.mrf.mxu2  ;;  %v2589_v34 = vadd.f32 %v13266_v27, %v2449_v4  ;;  %v4611_v4 = vld [vmem:[#allocation11 + $0x7c0] sm:$0xff] }
 0x5f4   : > { %v2921_v5 = vadd.f32 %v2920_v31, %v10801_v17  ;;  %v11282_v43 = vadd.f32 %v3589_v14, %v3451_v1  ;;  %v3060_v18 = vpop.f32.mrf.mxu0  ;;  %v8222_v17 = vld [vmem:[%s9839_s21 + $0x68] sm:$0xff]  ;;  %4658 = vmatpush.msra.mxu3 %v4611_v4 }
 0x5f5   : > { %13264 = vst [vmem:[#allocation65_spill] sm:$0xff] %v11279_v37  ;;  %v13268_v31 = vld [vmem:[#allocation143_spill] sm:$0xff] }
 0x5f6   : > { %v3061_v6 = vadd.f32 %v3060_v18, %v2921_v5  ;;  %v3454_v16 = vpop.f32.mrf.mxu1 }
 0x5f7   : > { %4040 = vmatmul.f32.gmra.mxu0 %v8220_v60 }
 0x5f8   : > { %v3186_v42 = vrot.slane %v3061_v6, 2  ;;  %3657 = vmatmul.f32.gmra.mxu3 %v8221_v39  ;;  %4316 = vmatmul.f32.gmra.mxu2 %v8218_v28  ;;  %v13271_v6 = vld [vmem:[#allocation138_spill] sm:$0xff] }
 0x5f9   : > { %4178 = vmatmul.f32.gmra.mxu1 %v8222_v17  ;;  %v2452_v28 = vadd.f32 %v13271_v6, %v13270_v47  ;;  %v13274_v47 = vld [vmem:[#allocation147_spill] sm:$0xff] }
 0x5fa   : > { %v3187_v51 = vsel %vm3110_vm1, %v3184_v58, %v3186_v42  ;;  %v8223_v58 = vld [vmem:[%s9829_s7 + $0x70] sm:$0xff] }
 0x5fb   : > { %v11291_v1 = vadd.f32 %v3187_v51, %v2589_v34  ;;  %v2923_v15 = vpop.f32.mrf.mxu3  ;;  %v3592_v3 = vpop.f32.mrf.mxu2  ;;  %v8224_v34 = vld [vmem:[%s9836_s26 + $0x78] sm:$0xff]  ;;  %v5275_v51 = vld [vmem:[#allocation11 + $0x940] sm:$0xff] }
 0x5fc   : > { %v2924_v14 = vadd.f32 %v2923_v15, %v13268_v31  ;;  %v11294_v5 = vadd.f32 %v3592_v3, %v3454_v16  ;;  %v3063_v18 = vpop.f32.mrf.mxu0  ;;  %5322 = vmatpush.msra.mxu2 %v5275_v51  ;;  %v8225_v3 = vld [vmem:[%s9839_s21 + $0x70] sm:$0xff] }
 0x5fd   : > { %13267 = vst [vmem:[#allocation66_spill] sm:$0xff] %v11291_v1  ;;  %v13272_v1 = vld [vmem:[#allocation139_spill] sm:$0xff] }
 0x5fe   : > { %13269 = vst [vmem:[#allocation67_spill] sm:$0xff] %v11294_v5  ;;  %v3064_v60 = vadd.f32 %v3063_v18, %v2924_v14  ;;  %v3457_v27 = vpop.f32.mrf.mxu1  ;;  %v2592_v15 = vadd.f32 %v13272_v1, %v2452_v28  ;;  %v13278_v1 = vld [vmem:[#allocation144_spill] sm:$0xff]  ;;  %v13279_v28 = vld [vmem:[#allocation145_spill] sm:$0xff]  ;;  %v13280_v5 = vmov 0.0  }
 0x5ff   : > { %4043 = vmatmul.f32.gmra.mxu0 %v8223_v58  ;;  %v13277_v58 = vld [vmem:[#allocation141_spill] sm:$0xff]  ;;  %v2458_v51 = vadd.f32 %v13279_v28, %v13278_v1  ;;  %v11313_v63 = vrot.slane %v13280_v5, 2 }
 0x600   : > { %v3188_v17 = vrot.slane %v3064_v60, 2  ;;  %3660 = vmatmul.f32.gmra.mxu3 %v8224_v34  ;;  %4319 = vmatmul.f32.gmra.mxu2 %v8221_v39  ;;  %v13276_v39 = vld [vmem:[#allocation140_spill] sm:$0xff] }
 0x601   : > { %4181 = vmatmul.f32.gmra.mxu1 %v8225_v3  ;;  %v2455_v37 = vadd.f32 %v13277_v58, %v13276_v39  ;;  %v4627_v39 = vld [vmem:[#allocation11 + $0x840] sm:$0xff] }
 0x602   : > { %v3189_v16 = vsel %vm3110_vm1, %v3186_v42, %v3188_v17  ;;  %v4643_v58 = vld [vmem:[#allocation11 + $0x8c0] sm:$0xff]  ;;  %4796 = vmatpush.msra.mxu0 %v4627_v39  ;;  %v4610_v39 = vld [vmem:[#allocation11 + $0x7b8] sm:$0xff] }
 0x603   : > { %v11303_v31 = vadd.f32 %v3189_v16, %v2592_v15  ;;  %v2926_v14 = vpop.f32.mrf.mxu3  ;;  %v3595_v18 = vpop.f32.mrf.mxu2  ;;  %v8226_v16 = vld [vmem:[%s9829_s7 + $0x78] sm:$0xff]  ;;  %4934 = vmatpush.msra.mxu1 %v4643_v58  ;;  %4659 = vmatpush.msra.mxu3 %v4610_v39  ;;  %v4626_v39 = vld [vmem:[#allocation11 + $0x838] sm:$0xff] }
 0x604   : > { %v2927_v6 = vadd.f32 %v2926_v14, %v13274_v47  ;;  %v11306_v60 = vadd.f32 %v3595_v18, %v3457_v27  ;;  %v3066_v4 = vpop.f32.mrf.mxu0  ;;  %v13281_v27 = vld [vmem:[#allocation142_spill] sm:$0xff]  ;;  %4797 = vmatpush.msra.mxu0 %v4626_v39 }
 0x605   : > { %13273 = vst [vmem:[#allocation68_spill] sm:$0xff] %v11303_v31  ;;  %v8227_v31 = vld [vmem:[%s9836_s26 + $0x80] sm:$0xff]  ;;  %v2595_v14 = vadd.f32 %v13281_v27, %v2455_v37 }
 0x606   : > { %13275 = vst [vmem:[#allocation69_spill] sm:$0xff] %v11306_v60  ;;  %v3067_v42 = vadd.f32 %v3066_v4, %v2927_v6  ;;  %v3460_v15 = vpop.f32.mrf.mxu1  ;;  %v13282_v18 = vld [vmem:[#allocation146_spill] sm:$0xff]  ;;  %v8228_v4 = vld [vmem:[%s9839_s21 + $0x78] sm:$0xff] }
 0x607   : > { %4046 = vmatmul.f32.gmra.mxu0 %v8226_v16  ;;  %v2598_v47 = vadd.f32 %v13282_v18, %v2458_v51  ;;  %v8229_v60 = vld [vmem:[%s9829_s7 + $0x80] sm:$0xff] }
 0x608   : > { %v3190_v3 = vrot.slane %v3067_v42, 2  ;;  %3663 = vmatmul.f32.gmra.mxu3 %v8227_v31  ;;  %4322 = vmatmul.f32.gmra.mxu2 %v8224_v34 }
 0x609   : > { %4184 = vmatmul.f32.gmra.mxu1 %v8228_v4 }
 0x60a   : > { %v3191_v1 = vsel %vm3110_vm1, %v3188_v17, %v3190_v3  ;;  %v3193_v6 = vsel %vm3110_vm1, %v3190_v3, %v11313_v63  ;;  %v8230_v3 = vld [vmem:[%s9836_s26 + $0x88] sm:$0xff] }
 0x60b   : > { %v3274_v28 = vadd.f32 %v3191_v1, %v2595_v14  ;;  %v3275_v42 = vadd.f32 %v3193_v6, %v2598_v47  ;;  %v3598_v34 = vpop.f32.mrf.mxu2  ;;  %v3618_v16 = vpop.f32.mrf.mxu3  ;;  %v11330_v14 = vrot.slane %v13280_v5, 4  ;;  %v11333_v47 = vrot.slane %v13280_v5, 3 }
 0x60c   : > { %v11323_v37 = vadd.f32 %v3598_v34, %v3460_v15  ;;  %v4004_v51 = vpop.f32.mrf.mxu0  ;;  %v8231_v15 = vld [vmem:[%s9839_s21 + $0x80] sm:$0xff]  ;;  %v11344_v34 = vrot.slane %v13280_v5, 6 }
 0x60d   : > { %v3936_v27 = vadd.f32 %v3274_v28, %v11313_v63  ;;  %v3937_v17 = vadd.f32 %v3275_v42, %v11313_v63  ;;  %13283 = vst [vmem:[#allocation70_spill] sm:$0xff] %v11330_v14  ;;  %v8232_v51 = vld [vmem:[%s9829_s7 + $0x88] sm:$0xff] }
 0x60e   : > { %v4142_v18 = vpop.f32.mrf.mxu1  ;;  %13284 = vst [vmem:[#allocation71_spill] sm:$0xff] %v11333_v47 }
 0x60f   : > { %4049 = vmatmul.f32.gmra.mxu0 %v8229_v60  ;;  %v4600_v6 = vadd.f32 %v11333_v47, %v3936_v27  ;;  %v4601_v60 = vadd.f32 %v11333_v47, %v3937_v17  ;;  %13286 = vst [vmem:[#allocation72_spill] sm:$0xff] %v11344_v34  ;;  %v8233_v17 = vld [vmem:[%s9836_s26 + $0x90] sm:$0xff]  ;;  %v8236_v47 = vld [vmem:[%s9836_s26 + $0x98] sm:$0xff] }
 0x610   : > { %3666 = vmatmul.f32.gmra.mxu3 %v8230_v3  ;;  %4325 = vmatmul.f32.gmra.mxu2 %v8227_v31  ;;  %v11339_v31 = vrot.slane %v13280_v5, 5  ;;  %v8234_v5 = vld [vmem:[%s9839_s21 + $0x88] sm:$0xff] }
 0x611   : > { %4187 = vmatmul.f32.gmra.mxu1 %v8231_v15  ;;  %v5264_v28 = vadd.f32 %v11330_v14, %v4600_v6  ;;  %v5265_v42 = vadd.f32 %v11330_v14, %v4601_v60  ;;  %v5274_v15 = vld [vmem:[#allocation11 + $0x938] sm:$0xff] }
 0x612   : > { %13285 = vst [vmem:[#allocation29_spill] sm:$0xff] %v11339_v31  ;;  %5323 = vmatpush.msra.mxu2 %v5274_v15 }
 0x613   : > { %v3620_v58 = vpop.f32.mrf.mxu3  ;;  %v4280_v1 = vpop.f32.mrf.mxu2  ;;  %v5910_v18 = vadd.f32 %v5264_v28, %v11330_v14  ;;  %v5911_v27 = vadd.f32 %v5265_v42, %v11330_v14  ;;  %v7947_v42 = vld [vmem:[#allocation13] ss:$0 sm:$0xff]  ;;  %v8235_v14 = vld [vmem:[%s9829_s7 + $0x90] sm:$0xff] }
 0x614   : > { %v4006_v4 = vpop.f32.mrf.mxu0  ;;  %v4642_v58 = vld [vmem:[#allocation11 + $0x8b8] sm:$0xff] }
 0x615   : > { %v6560_v1 = vadd.f32 %v11339_v31, %v5910_v18  ;;  %v6561_v6 = vadd.f32 %v11339_v31, %v5911_v27  ;;  %4935 = vmatpush.msra.mxu1 %v4642_v58 }
 0x616   : > { %v4144_v16 = vpop.f32.mrf.mxu1 }
 0x617   : > { %4052 = vmatmul.f32.gmra.mxu0 %v8232_v51  ;;  %v7210_v28 = vadd.f32 %v11344_v34, %v6560_v1  ;;  %v7949_v1 = vld [vmem:[#allocation16] ss:$0 sm:$0xff] }
 0x618   : > { %3669 = vmatmul.f32.gmra.mxu3 %v8233_v17  ;;  %4328 = vmatmul.f32.gmra.mxu2 %v8230_v3  ;;  %v7211_v3 = vadd.f32 %v11344_v34, %v6561_v6 }
 0x619   : > { %4190 = vmatmul.f32.gmra.mxu1 %v8234_v5  ;;  %v7255_v18 = vadd.f32 %v7947_v42, %v7210_v28 }
 0x61a   : > { %v7256_v27 = vadd.f32 %v7947_v42, %v7211_v3 }
 0x61b   : > { %v3622_v60 = vpop.f32.mrf.mxu3  ;;  %v4282_v4 = vpop.f32.mrf.mxu2  ;;  %v7296_v15 = vmax.f32 %v7255_v18, 0.0 }
 0x61c   : > { %v3623_v16 = vadd.f32 %v3622_v60, %v10860_v19  ;;  %v4008_v51 = vpop.f32.mrf.mxu0  ;;  %v7297_v5 = vmax.f32 %v7256_v27, 0.0  ;;  %v7948_v4 = vld [vmem:[#allocation14] ss:$0 sm:$0xff] }
 0x61d   : > { %v7341_v39 = vmul.f32 %v7948_v4, %v7296_v15  ;;  %v8237_v19 = vld [vmem:[%s9839_s21 + $0x90] sm:$0xff] }
 0x61e   : > { %v4146_v31 = vpop.f32.mrf.mxu1  ;;  %v7342_v58 = vmul.f32 %v7948_v4, %v7297_v5  ;;  %v8239_v4 = vld [vmem:[%s9836_s26 + $0xa0] sm:$0xff] }
 0x61f   : > { %4055 = vmatmul.f32.gmra.mxu0 %v8235_v14  ;;  %v4147_v6 = vadd.f32 %v4146_v31, %v4008_v51  ;;  %v7386_v3 = vadd.f32 %v7949_v1, %v7341_v39  ;;  %v8238_v51 = vld [vmem:[%s9829_s7 + $0x98] sm:$0xff]  ;;  %v13287_v39 = vld [vmem:[#allocation38_spill] sm:$0xff] }
 0x620   : > { %3672 = vmatmul.f32.gmra.mxu3 %v8236_v47  ;;  %4331 = vmatmul.f32.gmra.mxu2 %v8233_v17  ;;  %v7387_v14 = vadd.f32 %v7949_v1, %v7342_v58  ;;  %v3778_v17 = vrot.slane %v3623_v16, 2  ;;  %v4609_v58 = vld [vmem:[#allocation11 + $0x7b0] sm:$0xff] }
 0x621   : > { %4193 = vmatmul.f32.gmra.mxu1 %v8237_v19  ;;  %7428 = vst.msk [vmem:[%s9285_s11 + $0x138] sm:$0xff] %vm7388_vm2, %v7386_v3  ;;  %v5273_v1 = vld [vmem:[#allocation11 + $0x930] sm:$0xff]  ;;  %4660 = vmatpush.msra.mxu3 %v4609_v58  ;;  %v13288_v58 = vld [vmem:[#allocation39_spill] sm:$0xff] }
 0x622   : > { %7429 = vst.msk [vmem:[%s9285_s11 + $0x140] sm:$0xff] %vm7388_vm2, %v7387_v14  ;;  %v8240_v19 = vld [vmem:[%s9839_s21 + $0x98] sm:$0xff]  ;;  %5324 = vmatpush.msra.mxu2 %v5273_v1 }
 0x623   : > { %v3625_v60 = vpop.f32.mrf.mxu3  ;;  %v4284_v28 = vpop.f32.mrf.mxu2 }
 0x624   : > { %v3626_v42 = vadd.f32 %v3625_v60, %v10873_v36  ;;  %v4285_v18 = vadd.f32 %v4284_v28, %v4147_v6  ;;  %v4011_v27 = vpop.f32.mrf.mxu0 }
 0x626   : > { %v3779_v15 = vrot.slane %v3626_v42, 2  ;;  %v4149_v31 = vpop.f32.mrf.mxu1  ;;  %v4441_v42 = vrot.slane %v4285_v18, 3  ;;  %v4641_v18 = vld [vmem:[#allocation11 + $0x8b0] sm:$0xff] }
 0x627   : > { %4058 = vmatmul.f32.gmra.mxu0 %v8238_v51  ;;  %v4150_v6 = vadd.f32 %v4149_v31, %v4011_v27  ;;  %4936 = vmatpush.msra.mxu1 %v4641_v18 }
 0x628   : > { %v3780_v5 = vsel %vm3110_vm1, %v3778_v17, %v3779_v15  ;;  %3675 = vmatmul.f32.gmra.mxu3 %v8239_v4  ;;  %4334 = vmatmul.f32.gmra.mxu2 %v8236_v47 }
 0x629   : > { %v3897_v36 = vadd.f32 %v3780_v5, %v13287_v39  ;;  %4196 = vmatmul.f32.gmra.mxu1 %v8240_v19  ;;  %v8241_v5 = vld [vmem:[%s9829_s7 + $0xa0] sm:$0xff]  ;;  %v8242_v39 = vld [vmem:[%s9836_s26 + $0xa8] sm:$0xff] }
 0x62b   : > { %v3628_v16 = vpop.f32.mrf.mxu3  ;;  %v4287_v60 = vpop.f32.mrf.mxu2 }
 0x62c   : > { %v3629_v28 = vadd.f32 %v3628_v16, %v10886_v38  ;;  %v4288_v3 = vadd.f32 %v4287_v60, %v4150_v6  ;;  %v4014_v14 = vpop.f32.mrf.mxu0  ;;  %v4625_v6 = vld [vmem:[#allocation11 + $0x830] sm:$0xff] }
 0x62d   : > { %v8243_v16 = vld [vmem:[%s9839_s21 + $0xa0] sm:$0xff]  ;;  %4798 = vmatpush.msra.mxu0 %v4625_v6 }
 0x62e   : > { %v3781_v47 = vrot.slane %v3629_v28, 2  ;;  %v4442_v17 = vrot.slane %v4288_v3, 3  ;;  %v4152_v51 = vpop.f32.mrf.mxu1 }
 0x62f   : > { %4061 = vmatmul.f32.gmra.mxu0 %v8241_v5  ;;  %v4153_v19 = vadd.f32 %v4152_v51, %v4014_v14  ;;  %v8245_v51 = vld [vmem:[%s9836_s26 + $0xb0] sm:$0xff] }
 0x630   : > { %v3782_v27 = vsel %vm3110_vm1, %v3779_v15, %v3781_v47  ;;  %v4443_v31 = vsel %vm4440_vm3, %v4441_v42, %v4442_v17  ;;  %3678 = vmatmul.f32.gmra.mxu3 %v8242_v39  ;;  %4337 = vmatmul.f32.gmra.mxu2 %v8239_v4 }
 0x631   : > { %v3898_v1 = vadd.f32 %v3782_v27, %v13288_v58  ;;  %v11375_v38 = vadd.f32 %v4443_v31, %v3897_v36  ;;  %4199 = vmatmul.f32.gmra.mxu1 %v8243_v16  ;;  %v8244_v27 = vld [vmem:[%s9829_s7 + $0xa8] sm:$0xff] }
 0x632   : > { %v13290_v58 = vld [vmem:[#allocation35_spill] sm:$0xff] }
 0x633   : > { %13289 = vst [vmem:[#allocation73_spill] sm:$0xff] %v11375_v38  ;;  %v3631_v60 = vpop.f32.mrf.mxu3  ;;  %v4290_v28 = vpop.f32.mrf.mxu2  ;;  %v8247_v38 = vld [vmem:[%s9829_s7 + $0xb0] sm:$0xff] }
 0x634   : > { %v3632_v15 = vadd.f32 %v3631_v60, %v10898_v62  ;;  %v4291_v3 = vadd.f32 %v4290_v28, %v4153_v19  ;;  %v4017_v4 = vpop.f32.mrf.mxu0  ;;  %v8246_v19 = vld [vmem:[%s9839_s21 + $0xa8] sm:$0xff]  ;;  %v13291_v28 = vld [vmem:[#allocation40_spill] sm:$0xff] }
 0x636   : > { %v3783_v42 = vrot.slane %v3632_v15, 2  ;;  %v4444_v5 = vrot.slane %v4291_v3, 3  ;;  %v4155_v36 = vpop.f32.mrf.mxu1 }
 0x637   : > { %4064 = vmatmul.f32.gmra.mxu0 %v8244_v27  ;;  %v4156_v62 = vadd.f32 %v4155_v36, %v4017_v4  ;;  %v13292_v4 = vld [vmem:[#allocation36_spill] sm:$0xff] }
 0x638   : > { %v3784_v31 = vsel %vm3110_vm1, %v3781_v47, %v3783_v42  ;;  %v4445_v14 = vsel %vm4440_vm3, %v4442_v17, %v4444_v5  ;;  %3681 = vmatmul.f32.gmra.mxu3 %v8245_v51  ;;  %4340 = vmatmul.f32.gmra.mxu2 %v8242_v39 }
 0x639   : > { %v3899_v6 = vadd.f32 %v3784_v31, %v13290_v58  ;;  %v11384_v18 = vadd.f32 %v4445_v14, %v3898_v1  ;;  %4202 = vmatmul.f32.gmra.mxu1 %v8246_v19  ;;  %v8248_v31 = vld [vmem:[%s9836_s26 + $0xb8] sm:$0xff] }
 0x63a   : > { %v4608_v58 = vld [vmem:[#allocation11 + $0x7a8] sm:$0xff] }
 0x63b   : > { %v3634_v16 = vpop.f32.mrf.mxu3  ;;  %v4293_v60 = vpop.f32.mrf.mxu2  ;;  %v4624_v19 = vld [vmem:[#allocation11 + $0x828] sm:$0xff]  ;;  %4661 = vmatpush.msra.mxu3 %v4608_v58 }
 0x63c   : > { %v3635_v15 = vadd.f32 %v3634_v16, %v13291_v28  ;;  %v4294_v3 = vadd.f32 %v4293_v60, %v4156_v62  ;;  %v4020_v47 = vpop.f32.mrf.mxu0  ;;  %v5272_v62 = vld [vmem:[#allocation11 + $0x928] sm:$0xff]  ;;  %4799 = vmatpush.msra.mxu0 %v4624_v19 }
 0x63d   : > { %v8249_v60 = vld [vmem:[%s9839_s21 + $0xb0] sm:$0xff]  ;;  %5325 = vmatpush.msra.mxu2 %v5272_v62  ;;  %v13293_v58 = vld [vmem:[#allocation37_spill] sm:$0xff] }
 0x63e   : > { %v3785_v27 = vrot.slane %v3635_v15, 2  ;;  %v4446_v17 = vrot.slane %v4294_v3, 3  ;;  %v4158_v34 = vpop.f32.mrf.mxu1 }
 0x63f   : > { %4067 = vmatmul.f32.gmra.mxu0 %v8247_v38  ;;  %v4159_v16 = vadd.f32 %v4158_v34, %v4020_v47  ;;  %v4640_v38 = vld [vmem:[#allocation11 + $0x8a8] sm:$0xff] }
 0x640   : > { %v3786_v39 = vsel %vm3110_vm1, %v3783_v42, %v3785_v27  ;;  %v4447_v1 = vsel %vm4440_vm3, %v4444_v5, %v4446_v17  ;;  %3684 = vmatmul.f32.gmra.mxu3 %v8248_v31  ;;  %4343 = vmatmul.f32.gmra.mxu2 %v8245_v51  ;;  %v8250_v34 = vld [vmem:[%s9829_s7 + $0xb8] sm:$0xff] }
 0x641   : > { %v3900_v36 = vadd.f32 %v3786_v39, %v13292_v4  ;;  %v11393_v14 = vadd.f32 %v4447_v1, %v3899_v6  ;;  %4205 = vmatmul.f32.gmra.mxu1 %v8249_v60  ;;  %v8251_v4 = vld [vmem:[%s9836_s26 + $0xc0] sm:$0xff] }
 0x642   : > { %4937 = vmatpush.msra.mxu1 %v4640_v38 }
 0x643   : > { %v3637_v42 = vpop.f32.mrf.mxu3  ;;  %v4296_v28 = vpop.f32.mrf.mxu2 }
 0x644   : > { %v3638_v5 = vadd.f32 %v3637_v42, %v10922_v50  ;;  %v4297_v51 = vadd.f32 %v4296_v28, %v4159_v16  ;;  %v4023_v6 = vpop.f32.mrf.mxu0  ;;  %v8252_v16 = vld [vmem:[%s9839_s21 + $0xb8] sm:$0xff] }
 0x646   : > { %v3787_v15 = vrot.slane %v3638_v5, 2  ;;  %v4448_v3 = vrot.slane %v4297_v51, 3  ;;  %v4161_v39 = vpop.f32.mrf.mxu1 }
 0x647   : > { %4070 = vmatmul.f32.gmra.mxu0 %v8250_v34  ;;  %v4162_v19 = vadd.f32 %v4161_v39, %v4023_v6  ;;  %v8253_v34 = vld [vmem:[%s9829_s7 + $0xc0] sm:$0xff]  ;;  %v13294_v6 = vld [vmem:[#allocation47_spill] sm:$0xff] }
 0x648   : > { %v3788_v47 = vsel %vm3110_vm1, %v3785_v27, %v3787_v15  ;;  %v4449_v1 = vsel %vm4440_vm3, %v4446_v17, %v4448_v3  ;;  %3687 = vmatmul.f32.gmra.mxu3 %v8251_v4  ;;  %4346 = vmatmul.f32.gmra.mxu2 %v8248_v31 }
 0x649   : > { %v3901_v62 = vadd.f32 %v3788_v47, %v13293_v58  ;;  %v11402_v50 = vadd.f32 %v4449_v1, %v3900_v36  ;;  %4208 = vmatmul.f32.gmra.mxu1 %v8252_v16  ;;  %v8254_v47 = vld [vmem:[%s9836_s26 + $0xc8] sm:$0xff] }
 0x64a   : > { %v5271_v16 = vld [vmem:[#allocation11 + $0x920] sm:$0xff] }
 0x64b   : > { %v3640_v60 = vpop.f32.mrf.mxu3  ;;  %v4299_v38 = vpop.f32.mrf.mxu2  ;;  %5326 = vmatpush.msra.mxu2 %v5271_v16 }
 0x64c   : > { %v3641_v42 = vadd.f32 %v3640_v60, %v10934_v40  ;;  %v4300_v28 = vadd.f32 %v4299_v38, %v4162_v19  ;;  %v4026_v27 = vpop.f32.mrf.mxu0  ;;  %v4607_v40 = vld [vmem:[#allocation11 + $0x7a0] sm:$0xff]  ;;  %v8255_v19 = vld [vmem:[%s9839_s21 + $0xc0] sm:$0xff] }
 0x64d   : > { %4662 = vmatpush.msra.mxu3 %v4607_v40  ;;  %v4639_v40 = vld [vmem:[#allocation11 + $0x8a0] sm:$0xff] }
 0x64e   : > { %v3789_v17 = vrot.slane %v3641_v42, 2  ;;  %v4450_v5 = vrot.slane %v4300_v28, 3  ;;  %v4164_v51 = vpop.f32.mrf.mxu1  ;;  %4938 = vmatpush.msra.mxu1 %v4639_v40 }
 0x64f   : > { %4073 = vmatmul.f32.gmra.mxu0 %v8253_v34  ;;  %v4165_v58 = vadd.f32 %v4164_v51, %v4026_v27  ;;  %v8256_v34 = vld [vmem:[%s9829_s7 + $0xc8] sm:$0xff] }
 0x650   : > { %v3790_v31 = vsel %vm3110_vm1, %v3787_v15, %v3789_v17  ;;  %v4451_v36 = vsel %vm4440_vm3, %v4448_v3, %v4450_v5  ;;  %3690 = vmatmul.f32.gmra.mxu3 %v8254_v47  ;;  %4349 = vmatmul.f32.gmra.mxu2 %v8251_v4 }
 0x651   : > { %v3902_v39 = vadd.f32 %v3790_v31, %v13294_v6  ;;  %v11411_v1 = vadd.f32 %v4451_v36, %v3901_v62  ;;  %4211 = vmatmul.f32.gmra.mxu1 %v8255_v19  ;;  %v8257_v31 = vld [vmem:[%s9836_s26 + $0xd0] sm:$0xff]  ;;  %v8258_v19 = vld [vmem:[%s9839_s21 + $0xc8] sm:$0xff] }
 0x653   : > { %v3643_v60 = vpop.f32.mrf.mxu3  ;;  %v4302_v38 = vpop.f32.mrf.mxu2 }
 0x654   : > { %v3644_v15 = vadd.f32 %v3643_v60, %v10946_v22  ;;  %v4303_v3 = vadd.f32 %v4302_v38, %v4165_v58  ;;  %v4029_v42 = vpop.f32.mrf.mxu0  ;;  %v4623_v22 = vld [vmem:[#allocation11 + $0x820] sm:$0xff] }
 0x655   : > { %4800 = vmatpush.msra.mxu0 %v4623_v22 }
 0x656   : > { %v3791_v4 = vrot.slane %v3644_v15, 2  ;;  %v4452_v28 = vrot.slane %v4303_v3, 3  ;;  %v4167_v62 = vpop.f32.mrf.mxu1  ;;  %v8259_v15 = vld [vmem:[%s9829_s7 + $0xd0] sm:$0xff] }
 0x657   : > { %4076 = vmatmul.f32.gmra.mxu0 %v8256_v34  ;;  %v4168_v58 = vadd.f32 %v4167_v62, %v4029_v42  ;;  %v8260_v62 = vld [vmem:[%s9836_s26 + $0xd8] sm:$0xff] }
 0x658   : > { %v3792_v27 = vsel %vm3110_vm1, %v3789_v17, %v3791_v4  ;;  %v4453_v51 = vsel %vm4440_vm3, %v4450_v5, %v4452_v28  ;;  %3693 = vmatmul.f32.gmra.mxu3 %v8257_v31  ;;  %4352 = vmatmul.f32.gmra.mxu2 %v8254_v47 }
 0x659   : > { %v3903_v36 = vadd.f32 %v3792_v27, %v10919_v35  ;;  %v11420_v6 = vadd.f32 %v4453_v51, %v3902_v39  ;;  %4214 = vmatmul.f32.gmra.mxu1 %v8258_v19  ;;  %v8261_v51 = vld [vmem:[%s9839_s21 + $0xd0] sm:$0xff] }
 0x65b   : > { %v3646_v16 = vpop.f32.mrf.mxu3  ;;  %v4305_v60 = vpop.f32.mrf.mxu2 }
 0x65c   : > { %v3647_v17 = vadd.f32 %v3646_v16, %v10958_v49  ;;  %v4306_v5 = vadd.f32 %v4305_v60, %v4168_v58  ;;  %v4032_v47 = vpop.f32.mrf.mxu0 }
 0x65e   : > { %v3793_v38 = vrot.slane %v3647_v17, 2  ;;  %v4454_v35 = vrot.slane %v4306_v5, 3  ;;  %v4170_v39 = vpop.f32.mrf.mxu1  ;;  %v8262_v17 = vld [vmem:[%s9829_s7 + $0xd8] sm:$0xff] }
 0x65f   : > { %4079 = vmatmul.f32.gmra.mxu0 %v8259_v15  ;;  %v4171_v49 = vadd.f32 %v4170_v39, %v4032_v47  ;;  %v5270_v39 = vld [vmem:[#allocation11 + $0x918] sm:$0xff] }
 0x660   : > { %v3794_v3 = vsel %vm3110_vm1, %v3791_v4, %v3793_v38  ;;  %v4455_v42 = vsel %vm4440_vm3, %v4452_v28, %v4454_v35  ;;  %3696 = vmatmul.f32.gmra.mxu3 %v8260_v62  ;;  %4355 = vmatmul.f32.gmra.mxu2 %v8257_v31 }
 0x661   : > { %v3904_v34 = vadd.f32 %v3794_v3, %v10931_v20  ;;  %v11429_v27 = vadd.f32 %v4455_v42, %v3903_v36  ;;  %4217 = vmatmul.f32.gmra.mxu1 %v8261_v51  ;;  %v8263_v36 = vld [vmem:[%s9836_s26 + $0xe0] sm:$0xff]  ;;  %v8264_v3 = vld [vmem:[%s9839_s21 + $0xd8] sm:$0xff]  ;;  %5327 = vmatpush.msra.mxu2 %v5270_v39 }
 0x662   : > { %v4622_v42 = vld [vmem:[#allocation11 + $0x818] sm:$0xff] }
 0x663   : > { %v3649_v22 = vpop.f32.mrf.mxu3  ;;  %v4308_v40 = vpop.f32.mrf.mxu2  ;;  %4801 = vmatpush.msra.mxu0 %v4622_v42 }
 0x664   : > { %v3650_v58 = vadd.f32 %v3649_v22, %v10970_v61  ;;  %v4309_v19 = vadd.f32 %v4308_v40, %v4171_v49  ;;  %v4035_v4 = vpop.f32.mrf.mxu0  ;;  %v4606_v61 = vld [vmem:[#allocation11 + $0x798] sm:$0xff] }
 0x665   : > { %4663 = vmatpush.msra.mxu3 %v4606_v61  ;;  %v4638_v49 = vld [vmem:[#allocation11 + $0x898] sm:$0xff] }
 0x666   : > { %v3795_v28 = vrot.slane %v3650_v58, 2  ;;  %v4456_v16 = vrot.slane %v4309_v19, 3  ;;  %v4173_v60 = vpop.f32.mrf.mxu1  ;;  %4939 = vmatpush.msra.mxu1 %v4638_v49  ;;  %v8265_v58 = vld [vmem:[%s9829_s7 + $0xe0] sm:$0xff] }
 0x667   : > { %4082 = vmatmul.f32.gmra.mxu0 %v8262_v17  ;;  %v4174_v15 = vadd.f32 %v4173_v60, %v4035_v4  ;;  %v8266_v60 = vld [vmem:[%s9836_s26 + $0xe8] sm:$0xff] }
 0x668   : > { %v3796_v20 = vsel %vm3110_vm1, %v3793_v38, %v3795_v28  ;;  %v4457_v31 = vsel %vm4440_vm3, %v4454_v35, %v4456_v16  ;;  %3699 = vmatmul.f32.gmra.mxu3 %v8263_v36  ;;  %4358 = vmatmul.f32.gmra.mxu2 %v8260_v62 }
 0x669   : > { %v3905_v5 = vadd.f32 %v3796_v20, %v10943_v29  ;;  %v11438_v47 = vadd.f32 %v4457_v31, %v3904_v34  ;;  %4220 = vmatmul.f32.gmra.mxu1 %v8264_v3  ;;  %v8267_v31 = vld [vmem:[%s9839_s21 + $0xe0] sm:$0xff] }
 0x66b   : > { %v3652_v38 = vpop.f32.mrf.mxu3  ;;  %v4311_v51 = vpop.f32.mrf.mxu2 }
 0x66c   : > { %v3653_v35 = vadd.f32 %v3652_v38, %v10982_v46  ;;  %v4312_v62 = vadd.f32 %v4311_v51, %v4174_v15  ;;  %v4038_v29 = vpop.f32.mrf.mxu0  ;;  %v8268_v38 = vld [vmem:[%s9829_s7 + $0xe8] sm:$0xff] }
 0x66e   : > { %v3797_v34 = vrot.slane %v3653_v35, 2  ;;  %v4458_v22 = vrot.slane %v4312_v62, 3  ;;  %v4176_v40 = vpop.f32.mrf.mxu1 }
 0x66f   : > { %4085 = vmatmul.f32.gmra.mxu0 %v8265_v58  ;;  %v4177_v20 = vadd.f32 %v4176_v40, %v4038_v29  ;;  %v8270_v29 = vld [vmem:[%s9839_s21 + $0xe8] sm:$0xff] }
 0x670   : > { %v3798_v19 = vsel %vm3110_vm1, %v3795_v28, %v3797_v34  ;;  %v4459_v4 = vsel %vm4440_vm3, %v4456_v16, %v4458_v22  ;;  %3702 = vmatmul.f32.gmra.mxu3 %v8266_v60  ;;  %4361 = vmatmul.f32.gmra.mxu2 %v8263_v36 }
 0x671   : > { %v3906_v17 = vadd.f32 %v3798_v19, %v10955_v8  ;;  %v11447_v46 = vadd.f32 %v4459_v4, %v3905_v5  ;;  %4223 = vmatmul.f32.gmra.mxu1 %v8267_v31  ;;  %v8269_v5 = vld [vmem:[%s9836_s26 + $0xf0] sm:$0xff] }
 0x672   : > { %v8271_v31 = vld [vmem:[%s9829_s7 + $0xf0] sm:$0xff] }
 0x673   : > { %v3655_v61 = vpop.f32.mrf.mxu3  ;;  %v4314_v39 = vpop.f32.mrf.mxu2 }
 0x674   : > { %v3656_v15 = vadd.f32 %v3655_v61, %v10994_v10  ;;  %v4315_v3 = vadd.f32 %v4314_v39, %v4177_v20  ;;  %v4041_v28 = vpop.f32.mrf.mxu0  ;;  %v4605_v10 = vld [vmem:[#allocation11 + $0x790] sm:$0xff] }
 0x675   : > { %4664 = vmatpush.msra.mxu3 %v4605_v10  ;;  %v8272_v61 = vld [vmem:[%s9836_s26 + $0xf8] sm:$0xff] }
 0x676   : > { %v3799_v16 = vrot.slane %v3656_v15, 2  ;;  %v4460_v42 = vrot.slane %v4315_v3, 3  ;;  %v4179_v49 = vpop.f32.mrf.mxu1  ;;  %v4621_v3 = vld [vmem:[#allocation11 + $0x810] sm:$0xff] }
 0x677   : > { %4088 = vmatmul.f32.gmra.mxu0 %v8268_v38  ;;  %v4180_v62 = vadd.f32 %v4179_v49, %v4041_v28  ;;  %v4637_v28 = vld [vmem:[#allocation11 + $0x890] sm:$0xff]  ;;  %v8273_v38 = vld [vmem:[%s9839_s21 + $0xf0] sm:$0xff] }
 0x678   : > { %v3800_v8 = vsel %vm3110_vm1, %v3797_v34, %v3799_v16  ;;  %v4461_v36 = vsel %vm4440_vm3, %v4458_v22, %v4460_v42  ;;  %3705 = vmatmul.f32.gmra.mxu3 %v8269_v5  ;;  %4364 = vmatmul.f32.gmra.mxu2 %v8266_v60 }
 0x679   : > { %v3907_v51 = vadd.f32 %v3800_v8, %v10967_v56  ;;  %v11456_v35 = vadd.f32 %v4461_v36, %v3906_v17  ;;  %4226 = vmatmul.f32.gmra.mxu1 %v8270_v29  ;;  %4802 = vmatpush.msra.mxu0 %v4621_v3 }
 0x67a   : > { %4940 = vmatpush.msra.mxu1 %v4637_v28  ;;  %v8277_v28 = vld [vmem:[%s9829_s7 + $0x100] sm:$0xff] }
 0x67b   : > { %v3658_v40 = vpop.f32.mrf.mxu3  ;;  %v4317_v58 = vpop.f32.mrf.mxu2 }
 0x67c   : > { %v3659_v34 = vadd.f32 %v3658_v40, %v11006_v32  ;;  %v4318_v19 = vadd.f32 %v4317_v58, %v4180_v62  ;;  %v4044_v22 = vpop.f32.mrf.mxu0  ;;  %v5269_v32 = vld [vmem:[#allocation11 + $0x910] sm:$0xff] }
 0x67d   : > { %5328 = vmatpush.msra.mxu2 %v5269_v32  ;;  %v8274_v62 = vld [vmem:[%s9829_s7 + $0xf8] sm:$0xff]  ;;  %v8275_v58 = vld [vmem:[%s9836_s26 + $0x100] sm:$0xff] }
 0x67e   : > { %v3801_v4 = vrot.slane %v3659_v34, 2  ;;  %v4462_v60 = vrot.slane %v4318_v19, 3  ;;  %v4182_v20 = vpop.f32.mrf.mxu1 }
 0x67f   : > { %4091 = vmatmul.f32.gmra.mxu0 %v8271_v31  ;;  %v4183_v49 = vadd.f32 %v4182_v20, %v4044_v22  ;;  %v8276_v22 = vld [vmem:[%s9839_s21 + $0xf8] sm:$0xff] }
 0x680   : > { %v3802_v56 = vsel %vm3110_vm1, %v3799_v16, %v3801_v4  ;;  %v4463_v17 = vsel %vm4440_vm3, %v4460_v42, %v4462_v60  ;;  %3708 = vmatmul.f32.gmra.mxu3 %v8272_v61  ;;  %4367 = vmatmul.f32.gmra.mxu2 %v8269_v5 }
 0x681   : > { %v3908_v39 = vadd.f32 %v3802_v56, %v10979_v23  ;;  %v11465_v15 = vadd.f32 %v4463_v17, %v3907_v51  ;;  %4229 = vmatmul.f32.gmra.mxu1 %v8273_v38 }
 0x683   : > { %v3661_v8 = vpop.f32.mrf.mxu3  ;;  %v4320_v16 = vpop.f32.mrf.mxu2 }
 0x684   : > { %v3662_v42 = vadd.f32 %v3661_v8, %v11018_v21  ;;  %v4321_v36 = vadd.f32 %v4320_v16, %v4183_v49  ;;  %v4047_v23 = vpop.f32.mrf.mxu0  ;;  %v13295_v49 = vld [vmem:[#allocation41_spill] sm:$0xff] }
 0x685   : > { %v5268_v16 = vld [vmem:[#allocation11 + $0x908] sm:$0xff] }
 0x686   : > { %v3803_v5 = vrot.slane %v3662_v42, 2  ;;  %v4464_v51 = vrot.slane %v4321_v36, 3  ;;  %v4185_v10 = vpop.f32.mrf.mxu1  ;;  %v8279_v36 = vld [vmem:[%s9839_s21 + $0x100] sm:$0xff]  ;;  %5329 = vmatpush.msra.mxu2 %v5268_v16  ;;  %v8283_v16 = vld [vmem:[%s9829_s7 + $0x110] sm:$0xff] }
 0x687   : > { %4094 = vmatmul.f32.gmra.mxu0 %v8274_v62  ;;  %v4186_v21 = vadd.f32 %v4185_v10, %v4047_v23 }
 0x688   : > { %v3804_v29 = vsel %vm3110_vm1, %v3801_v4, %v3803_v5  ;;  %v4465_v40 = vsel %vm4440_vm3, %v4462_v60, %v4464_v51  ;;  %3711 = vmatmul.f32.gmra.mxu3 %v8275_v58  ;;  %4370 = vmatmul.f32.gmra.mxu2 %v8272_v61 }
 0x689   : > { %v3909_v34 = vadd.f32 %v3804_v29, %v10991_v7  ;;  %v11474_v19 = vadd.f32 %v4465_v40, %v3908_v39  ;;  %4232 = vmatmul.f32.gmra.mxu1 %v8276_v22  ;;  %v8278_v39 = vld [vmem:[%s9836_s26 + $0x108] sm:$0xff] }
 0x68b   : > { %v3664_v20 = vpop.f32.mrf.mxu3  ;;  %v4323_v31 = vpop.f32.mrf.mxu2 }
 0x68c   : > { %v3665_v56 = vadd.f32 %v3664_v20, %v11030_v55  ;;  %v4324_v17 = vadd.f32 %v4323_v31, %v4186_v21  ;;  %v4050_v4 = vpop.f32.mrf.mxu0  ;;  %v4604_v55 = vld [vmem:[#allocation11 + $0x788] sm:$0xff]  ;;  %v13296_v31 = vld [vmem:[#allocation46_spill] sm:$0xff] }
 0x68d   : > { %4665 = vmatpush.msra.mxu3 %v4604_v55  ;;  %v8281_v20 = vld [vmem:[%s9836_s26 + $0x110] sm:$0xff] }
 0x68e   : > { %v3805_v60 = vrot.slane %v3665_v56, 2  ;;  %v4466_v32 = vrot.slane %v4324_v17, 3  ;;  %v4188_v3 = vpop.f32.mrf.mxu1 }
 0x68f   : > { %4097 = vmatmul.f32.gmra.mxu0 %v8277_v28  ;;  %v4189_v42 = vadd.f32 %v4188_v3, %v4050_v4  ;;  %v4636_v4 = vld [vmem:[#allocation11 + $0x888] sm:$0xff]  ;;  %v8282_v28 = vld [vmem:[%s9839_s21 + $0x108] sm:$0xff] }
 0x690   : > { %v3806_v7 = vsel %vm3110_vm1, %v3803_v5, %v3805_v60  ;;  %v4467_v61 = vsel %vm4440_vm3, %v4464_v51, %v4466_v32  ;;  %3714 = vmatmul.f32.gmra.mxu3 %v8278_v39  ;;  %4373 = vmatmul.f32.gmra.mxu2 %v8275_v58 }
 0x691   : > { %v3910_v38 = vadd.f32 %v3806_v7, %v13295_v49  ;;  %v11483_v8 = vadd.f32 %v4467_v61, %v3909_v34  ;;  %4235 = vmatmul.f32.gmra.mxu1 %v8279_v36  ;;  %v8280_v34 = vld [vmem:[%s9829_s7 + $0x108] sm:$0xff] }
 0x692   : > { %4941 = vmatpush.msra.mxu1 %v4636_v4  ;;  %v8286_v4 = vld [vmem:[%s9829_s7 + $0x118] sm:$0xff] }
 0x693   : > { %v3667_v23 = vpop.f32.mrf.mxu3  ;;  %v4326_v10 = vpop.f32.mrf.mxu2 }
 0x694   : > { %v3668_v5 = vadd.f32 %v3667_v23, %v11042_v30  ;;  %v4327_v51 = vadd.f32 %v4326_v10, %v4189_v42  ;;  %v4053_v62 = vpop.f32.mrf.mxu0  ;;  %v4620_v30 = vld [vmem:[#allocation11 + $0x808] sm:$0xff]  ;;  %v13297_v10 = vld [vmem:[#allocation51_spill] sm:$0xff] }
 0x695   : > { %4803 = vmatpush.msra.mxu0 %v4620_v30  ;;  %v8284_v23 = vld [vmem:[%s9836_s26 + $0x118] sm:$0xff] }
 0x696   : > { %v3807_v29 = vrot.slane %v3668_v5, 2  ;;  %v4468_v40 = vrot.slane %v4327_v51, 3  ;;  %v4191_v58 = vpop.f32.mrf.mxu1 }
 0x697   : > { %4100 = vmatmul.f32.gmra.mxu0 %v8280_v34  ;;  %v4192_v3 = vadd.f32 %v4191_v58, %v4053_v62  ;;  %v8285_v62 = vld [vmem:[%s9839_s21 + $0x110] sm:$0xff] }
 0x698   : > { %v3808_v21 = vsel %vm3110_vm1, %v3805_v60, %v3807_v29  ;;  %v4469_v22 = vsel %vm4440_vm3, %v4466_v32, %v4468_v40  ;;  %3717 = vmatmul.f32.gmra.mxu3 %v8281_v20  ;;  %4376 = vmatmul.f32.gmra.mxu2 %v8278_v39  ;;  %v4603_v58 = vld [vmem:[#allocation11 + $0x780] sm:$0xff] }
 0x699   : > { %v3911_v56 = vadd.f32 %v3808_v21, %v13296_v31  ;;  %v11492_v17 = vadd.f32 %v4469_v22, %v3910_v38  ;;  %4238 = vmatmul.f32.gmra.mxu1 %v8282_v28  ;;  %4666 = vmatpush.msra.mxu3 %v4603_v58  ;;  %v8287_v28 = vld [vmem:[%s9836_s26 + $0x120] sm:$0xff] }
 0x69b   : > { %v3670_v7 = vpop.f32.mrf.mxu3  ;;  %v4329_v61 = vpop.f32.mrf.mxu2 }
 0x69c   : > { %v3671_v60 = vadd.f32 %v3670_v7, %v11054_v44  ;;  %v4330_v32 = vadd.f32 %v4329_v61, %v4192_v3  ;;  %v4056_v39 = vpop.f32.mrf.mxu0 }
 0x69e   : > { %v3809_v49 = vrot.slane %v3671_v60, 2  ;;  %v4470_v55 = vrot.slane %v4330_v32, 3  ;;  %v4194_v38 = vpop.f32.mrf.mxu1  ;;  %v4619_v60 = vld [vmem:[#allocation11 + $0x800] sm:$0xff] }
 0x69f   : > { %4103 = vmatmul.f32.gmra.mxu0 %v8283_v16  ;;  %v4195_v44 = vadd.f32 %v4194_v38, %v4056_v39  ;;  %v4635_v32 = vld [vmem:[#allocation11 + $0x880] sm:$0xff]  ;;  %v8288_v38 = vld [vmem:[%s9839_s21 + $0x118] sm:$0xff] }
 0x6a0   : > { %v3810_v42 = vsel %vm3110_vm1, %v3807_v29, %v3809_v49  ;;  %v4471_v36 = vsel %vm4440_vm3, %v4468_v40, %v4470_v55  ;;  %3720 = vmatmul.f32.gmra.mxu3 %v8284_v23  ;;  %4379 = vmatmul.f32.gmra.mxu2 %v8281_v20 }
 0x6a1   : > { %v3912_v5 = vadd.f32 %v3810_v42, %v13297_v10  ;;  %v11501_v51 = vadd.f32 %v4471_v36, %v3911_v56  ;;  %4241 = vmatmul.f32.gmra.mxu1 %v8285_v62  ;;  %4804 = vmatpush.msra.mxu0 %v4619_v60 }
 0x6a2   : > { %4942 = vmatpush.msra.mxu1 %v4635_v32 }
 0x6a3   : > { %v3673_v34 = vpop.f32.mrf.mxu3  ;;  %v4332_v21 = vpop.f32.mrf.mxu2 }
 0x6a4   : > { %v3674_v29 = vadd.f32 %v3673_v34, %v11066_v33  ;;  %v4333_v22 = vadd.f32 %v4332_v21, %v4195_v44  ;;  %v4059_v40 = vpop.f32.mrf.mxu0  ;;  %v5267_v33 = vld [vmem:[#allocation11 + $0x900] sm:$0xff]  ;;  %v8289_v44 = vld [vmem:[%s9829_s7 + $0x120] sm:$0xff] }
 0x6a5   : > { %5330 = vmatpush.msra.mxu2 %v5267_v33  ;;  %v8290_v34 = vld [vmem:[%s9836_s26 + $0x128] sm:$0xff] }
 0x6a6   : > { %v3811_v31 = vrot.slane %v3674_v29, 2  ;;  %v4472_v20 = vrot.slane %v4333_v22, 3  ;;  %v4197_v30 = vpop.f32.mrf.mxu1  ;;  %v13299_v21 = vld [vmem:[#allocation42_spill] sm:$0xff] }
 0x6a7   : > { %4106 = vmatmul.f32.gmra.mxu0 %v8286_v4  ;;  %v4198_v39 = vadd.f32 %v4197_v30, %v4059_v40  ;;  %v8291_v30 = vld [vmem:[%s9839_s21 + $0x120] sm:$0xff] }
 0x6a8   : > { %v3812_v56 = vsel %vm3110_vm1, %v3809_v49, %v3811_v31  ;;  %v4473_v3 = vsel %vm4440_vm3, %v4470_v55, %v4472_v20  ;;  %3723 = vmatmul.f32.gmra.mxu3 %v8287_v28  ;;  %4382 = vmatmul.f32.gmra.mxu2 %v8284_v23  ;;  %v13298_v55 = vld [vmem:[#allocation52_spill] sm:$0xff] }
 0x6a9   : > { %v3913_v7 = vadd.f32 %v3812_v56, %v11039_v11  ;;  %v11510_v61 = vadd.f32 %v4473_v3, %v3912_v5  ;;  %4244 = vmatmul.f32.gmra.mxu1 %v8288_v38  ;;  %v8293_v38 = vld [vmem:[%s9836_s26 + $0x130] sm:$0xff] }
 0x6ab   : > { %v3676_v16 = vpop.f32.mrf.mxu3  ;;  %v4335_v49 = vpop.f32.mrf.mxu2 }
 0x6ac   : > { %v3677_v42 = vadd.f32 %v3676_v16, %v13298_v55  ;;  %v4336_v36 = vadd.f32 %v4335_v49, %v4198_v39  ;;  %v4062_v11 = vpop.f32.mrf.mxu0  ;;  %v8292_v39 = vld [vmem:[%s9829_s7 + $0x128] sm:$0xff] }
 0x6ad   : > { %v13300_v16 = vld [vmem:[#allocation43_spill] sm:$0xff] }
 0x6ae   : > { %v3813_v23 = vrot.slane %v3677_v42, 2  ;;  %v4474_v10 = vrot.slane %v4336_v36, 3  ;;  %v4200_v5 = vpop.f32.mrf.mxu1  ;;  %v5944_v42 = vld [vmem:[#allocation11 + $0xb78] sm:$0xff] }
 0x6af   : > { %4109 = vmatmul.f32.gmra.mxu0 %v8289_v44  ;;  %v4201_v40 = vadd.f32 %v4200_v5, %v4062_v11  ;;  %v8294_v11 = vld [vmem:[%s9839_s21 + $0x128] sm:$0xff]  ;;  %6097 = vmatpush.msrb.mxu2 %v5944_v42  ;;  %v8298_v42 = vld [vmem:[%s9829_s7 + $0x138] sm:$0xff] }
 0x6b0   : > { %v3814_v62 = vsel %vm3110_vm1, %v3811_v31, %v3813_v23  ;;  %v4475_v58 = vsel %vm4440_vm3, %v4472_v20, %v4474_v10  ;;  %3726 = vmatmul.f32.gmra.mxu3 %v8290_v34  ;;  %4385 = vmatmul.f32.gmra.mxu2 %v8287_v28 }
 0x6b1   : > { %v3914_v29 = vadd.f32 %v3814_v62, %v13299_v21  ;;  %v11519_v22 = vadd.f32 %v4475_v58, %v3913_v7  ;;  %4247 = vmatmul.f32.gmra.mxu1 %v8291_v30 }
 0x6b3   : > { %v3679_v4 = vpop.f32.mrf.mxu3  ;;  %v4338_v56 = vpop.f32.mrf.mxu2 }
 0x6b4   : > { %v3680_v3 = vadd.f32 %v3679_v4, %v11090_v2  ;;  %v4339_v33 = vadd.f32 %v4338_v56, %v4201_v40  ;;  %v4065_v31 = vpop.f32.mrf.mxu0  ;;  %v5298_v2 = vld [vmem:[#allocation11 + $0x9f8] sm:$0xff]  ;;  %v8296_v4 = vld [vmem:[%s9836_s26 + $0x138] sm:$0xff] }
 0x6b5   : > { %5451 = vmatpush.msrb.mxu3 %v5298_v2  ;;  %v13301_v56 = vld [vmem:[#allocation44_spill] sm:$0xff] }
 0x6b6   : > { %v3815_v20 = vrot.slane %v3680_v3, 2  ;;  %v4476_v60 = vrot.slane %v4339_v33, 3  ;;  %v4203_v32 = vpop.f32.mrf.mxu1 }
 0x6b7   : > { %4112 = vmatmul.f32.gmra.mxu0 %v8292_v39  ;;  %v4204_v36 = vadd.f32 %v4203_v32, %v4065_v31  ;;  %v5928_v31 = vld [vmem:[#allocation11 + $0xaf8] sm:$0xff]  ;;  %v8297_v39 = vld [vmem:[%s9839_s21 + $0x130] sm:$0xff] }
 0x6b8   : > { %v3816_v28 = vsel %vm3110_vm1, %v3813_v23, %v3815_v20  ;;  %v4477_v7 = vsel %vm4440_vm3, %v4474_v10, %v4476_v60  ;;  %3729 = vmatmul.f32.gmra.mxu3 %v8293_v38  ;;  %4388 = vmatmul.f32.gmra.mxu2 %v8290_v34 }
 0x6b9   : > { %v3915_v49 = vadd.f32 %v3816_v28, %v13300_v16  ;;  %v11528_v55 = vadd.f32 %v4477_v7, %v3914_v29  ;;  %4250 = vmatmul.f32.gmra.mxu1 %v8294_v11  ;;  %v8295_v29 = vld [vmem:[%s9829_s7 + $0x130] sm:$0xff] }
 0x6ba   : > { %5961 = vmatpush.msrb.mxu1 %v5928_v31  ;;  %v8301_v31 = vld [vmem:[%s9829_s7 + $0x140] sm:$0xff] }
 0x6bb   : > { %v3682_v5 = vpop.f32.mrf.mxu3  ;;  %v4341_v44 = vpop.f32.mrf.mxu2 }
 0x6bc   : > { %v3683_v23 = vadd.f32 %v3682_v5, %v11102_v53  ;;  %v4342_v10 = vadd.f32 %v4341_v44, %v4204_v36  ;;  %v4068_v62 = vpop.f32.mrf.mxu0  ;;  %v5314_v53 = vld [vmem:[#allocation11 + $0xa78] sm:$0xff]  ;;  %v13302_v44 = vld [vmem:[#allocation56_spill] sm:$0xff] }
 0x6bd   : > { %5587 = vmatpush.msrb.mxu0 %v5314_v53  ;;  %v8299_v5 = vld [vmem:[%s9836_s26 + $0x140] sm:$0xff] }
 0x6be   : > { %v3817_v58 = vrot.slane %v3683_v23, 2  ;;  %v4478_v34 = vrot.slane %v4342_v10, 3  ;;  %v4206_v21 = vpop.f32.mrf.mxu1 }
 0x6bf   : > { %4115 = vmatmul.f32.gmra.mxu0 %v8295_v29  ;;  %v4207_v32 = vadd.f32 %v4206_v21, %v4068_v62  ;;  %v8300_v62 = vld [vmem:[%s9839_s21 + $0x138] sm:$0xff] }
 0x6c0   : > { %v3818_v40 = vsel %vm3110_vm1, %v3815_v20, %v3817_v58  ;;  %v4479_v30 = vsel %vm4440_vm3, %v4476_v60, %v4478_v34  ;;  %3732 = vmatmul.f32.gmra.mxu3 %v8296_v4  ;;  %4391 = vmatmul.f32.gmra.mxu2 %v8293_v38 }
 0x6c1   : > { %v3916_v3 = vadd.f32 %v3818_v40, %v13301_v56  ;;  %v11537_v33 = vadd.f32 %v4479_v30, %v3915_v49  ;;  %4253 = vmatmul.f32.gmra.mxu1 %v8297_v39  ;;  %v13303_v39 = vld [vmem:[#allocation45_spill] sm:$0xff] }
 0x6c3   : > { %v3685_v28 = vpop.f32.mrf.mxu3  ;;  %v4344_v7 = vpop.f32.mrf.mxu2 }
 0x6c4   : > { %v3686_v20 = vadd.f32 %v3685_v28, %v11114_v26  ;;  %v4345_v60 = vadd.f32 %v4344_v7, %v4207_v32  ;;  %v4071_v38 = vpop.f32.mrf.mxu0  ;;  %v8302_v32 = vld [vmem:[%s9829_s7] sm:$0xff] }
 0x6c6   : > { %v3819_v16 = vrot.slane %v3686_v20, 2  ;;  %v4480_v2 = vrot.slane %v4345_v60, 3  ;;  %v4209_v49 = vpop.f32.mrf.mxu1  ;;  %v5943_v20 = vld [vmem:[#allocation11 + $0xb70] sm:$0xff] }
 0x6c7   : > { %4118 = vmatmul.f32.gmra.mxu0 %v8298_v42  ;;  %v4210_v26 = vadd.f32 %v4209_v49, %v4071_v38  ;;  %v5313_v60 = vld [vmem:[#allocation11 + $0xa70] sm:$0xff]  ;;  %6098 = vmatpush.msrb.mxu2 %v5943_v20 }
 0x6c8   : > { %v3820_v36 = vsel %vm3110_vm1, %v3817_v58, %v3819_v16  ;;  %v4481_v11 = vsel %vm4440_vm3, %v4478_v34, %v4480_v2  ;;  %3735 = vmatmul.f32.gmra.mxu3 %v8299_v5  ;;  %4394 = vmatmul.f32.gmra.mxu2 %v8296_v4  ;;  %v8303_v49 = vld [vmem:[%s9839_s21 + $0x140] sm:$0xff] }
 0x6c9   : > { %v3917_v23 = vadd.f32 %v3820_v36, %v13302_v44  ;;  %v11546_v10 = vadd.f32 %v4481_v11, %v3916_v3  ;;  %4256 = vmatmul.f32.gmra.mxu1 %v8300_v62  ;;  %v5927_v42 = vld [vmem:[#allocation11 + $0xaf0] sm:$0xff]  ;;  %5588 = vmatpush.msrb.mxu0 %v5313_v60 }
 0x6ca   : > { %5962 = vmatpush.msrb.mxu1 %v5927_v42  ;;  %v8304_v62 = vld [vmem:[%s9839_s21] sm:$0xff]  ;;  %v13305_v42 = vld [vmem:[#allocation48_spill] sm:$0xff] }
 0x6cb   : > { %v3688_v21 = vpop.f32.mrf.mxu3  ;;  %v4347_v29 = vpop.f32.mrf.mxu2 }
 0x6cc   : > { %v3689_v40 = vadd.f32 %v3688_v21, %v11126_v59  ;;  %v4348_v30 = vadd.f32 %v4347_v29, %v4210_v26  ;;  %v4074_v58 = vpop.f32.mrf.mxu0  ;;  %v5297_v59 = vld [vmem:[#allocation11 + $0x9f0] sm:$0xff] }
 0x6cd   : > { %5452 = vmatpush.msrb.mxu3 %v5297_v59 }
 0x6ce   : > { %v3821_v56 = vrot.slane %v3689_v40, 2  ;;  %v4482_v34 = vrot.slane %v4348_v30, 3  ;;  %v4212_v53 = vpop.f32.mrf.mxu1  ;;  %v8305_v40 = vld [vmem:[%s9829_s7 + $0x8] sm:$0xff]  ;;  %v13304_v30 = vld [vmem:[#allocation57_spill] sm:$0xff] }
 0x6cf   : > { %4121 = vmatmul.f32.gmra.mxu0 %v8301_v31  ;;  %v4213_v38 = vadd.f32 %v4212_v53, %v4074_v58  ;;  %v8306_v31 = vld [vmem:[%s9836_s26] sm:$0xff] }
 0x6d0   : > { %v3822_v4 = vsel %vm3110_vm1, %v3819_v16, %v3821_v56  ;;  %v4483_v3 = vsel %vm4440_vm3, %v4480_v2, %v4482_v34  ;;  %4397 = vmatmul.f32.gmra.mxu2 %v8299_v5  ;;  %4667 = vmatmul.f32.vlgmr.msra.gmra.mxu3 %v8302_v32 }
 0x6d1   : > { %v3918_v28 = vadd.f32 %v3822_v4, %v13303_v39  ;;  %v11555_v7 = vadd.f32 %v4483_v3, %v3917_v23  ;;  %4259 = vmatmul.f32.gmra.mxu1 %v8303_v49  ;;  %v8308_v49 = vld [vmem:[%s9829_s7 + $0x10] sm:$0xff] }
 0x6d3   : > { %v3691_v16 = vpop.f32.mrf.mxu3  ;;  %v4350_v36 = vpop.f32.mrf.mxu2 }
 0x6d4   : > { %v3692_v2 = vadd.f32 %v3691_v16, %v11138_v9  ;;  %v4351_v11 = vadd.f32 %v4350_v36, %v4213_v38  ;;  %v4077_v5 = vpop.f32.mrf.mxu0  ;;  %v8307_v38 = vld [vmem:[%s9839_s21 + $0x8] sm:$0xff] }
 0x6d6   : > { %v3823_v44 = vrot.slane %v3692_v2, 2  ;;  %v4484_v23 = vrot.slane %v4351_v11, 3  ;;  %v4215_v26 = vpop.f32.mrf.mxu1  ;;  %v5942_v2 = vld [vmem:[#allocation11 + $0xb68] sm:$0xff] }
 0x6d7   : > { %4805 = vmatmul.f32.vlgmr.msra.gmra.mxu0 %v8304_v62  ;;  %v4216_v53 = vadd.f32 %v4215_v26, %v4077_v5  ;;  %v8309_v5 = vld [vmem:[%s9836_s26 + $0x8] sm:$0xff]  ;;  %6099 = vmatpush.msrb.mxu2 %v5942_v2  ;;  %v8313_v2 = vld [vmem:[%s9839_s21 + $0x18] sm:$0xff] }
 0x6d8   : > { %v3824_v21 = vsel %vm3110_vm1, %v3821_v56, %v3823_v44  ;;  %v4485_v29 = vsel %vm4440_vm3, %v4482_v34, %v4484_v23  ;;  %4669 = vmatmul.f32.gmra.mxu3 %v8305_v40  ;;  %5331 = vmatmul.f32.vlgmr.msra.gmra.mxu2 %v8302_v32 }
 0x6d9   : > { %v3919_v58 = vadd.f32 %v3824_v21, %v13304_v30  ;;  %v11564_v9 = vadd.f32 %v4485_v29, %v3918_v28  ;;  %4943 = vmatmul.f32.vlgmr.msra.gmra.mxu1 %v8306_v31 }
 0x6db   : > { %v3694_v4 = vpop.f32.mrf.mxu3  ;;  %v4353_v3 = vpop.f32.mrf.mxu2 }
 0x6dc   : > { %v3695_v39 = vadd.f32 %v3694_v4, %v11150_v13  ;;  %v4354_v59 = vadd.f32 %v4353_v3, %v4216_v53  ;;  %v4080_v56 = vpop.f32.mrf.mxu0  ;;  %v5296_v13 = vld [vmem:[#allocation11 + $0x9e8] sm:$0xff] }
 0x6dd   : > { %5453 = vmatpush.msrb.mxu3 %v5296_v13  ;;  %v8311_v4 = vld [vmem:[%s9829_s7 + $0x18] sm:$0xff] }
 0x6de   : > { %v3825_v34 = vrot.slane %v3695_v39, 2  ;;  %v4486_v20 = vrot.slane %v4354_v59, 3  ;;  %v4218_v60 = vpop.f32.mrf.mxu1  ;;  %v13306_v3 = vld [vmem:[#allocation49_spill] sm:$0xff] }
 0x6df   : > { %4807 = vmatmul.f32.gmra.mxu0 %v8307_v38  ;;  %v4219_v11 = vadd.f32 %v4218_v60, %v4080_v56  ;;  %v5926_v56 = vld [vmem:[#allocation11 + $0xae8] sm:$0xff] }
 0x6e0   : > { %v3826_v32 = vsel %vm3110_vm1, %v3823_v44, %v3825_v34  ;;  %v4487_v28 = vsel %vm4440_vm3, %v4484_v23, %v4486_v20  ;;  %4671 = vmatmul.f32.gmra.mxu3 %v8308_v49  ;;  %5333 = vmatmul.f32.gmra.mxu2 %v8305_v40  ;;  %v8312_v38 = vld [vmem:[%s9836_s26 + $0x10] sm:$0xff] }
 0x6e1   : > { %v3920_v16 = vadd.f32 %v3826_v32, %v13305_v42  ;;  %v11573_v36 = vadd.f32 %v4487_v28, %v3919_v58  ;;  %4945 = vmatmul.f32.gmra.mxu1 %v8309_v5  ;;  %v8310_v58 = vld [vmem:[%s9839_s21 + $0x10] sm:$0xff] }
 0x6e2   : > { %5963 = vmatpush.msrb.mxu1 %v5926_v56  ;;  %v8316_v56 = vld [vmem:[%s9839_s21 + $0x20] sm:$0xff] }
 0x6e3   : > { %v3697_v26 = vpop.f32.mrf.mxu3  ;;  %v4356_v62 = vpop.f32.mrf.mxu2 }
 0x6e4   : > { %v3698_v44 = vadd.f32 %v3697_v26, %v11162_v57  ;;  %v4357_v23 = vadd.f32 %v4356_v62, %v4219_v11  ;;  %v4083_v21 = vpop.f32.mrf.mxu0  ;;  %v5312_v57 = vld [vmem:[#allocation11 + $0xa68] sm:$0xff]  ;;  %v8314_v26 = vld [vmem:[%s9829_s7 + $0x20] sm:$0xff] }
 0x6e5   : > { %5589 = vmatpush.msrb.mxu0 %v5312_v57  ;;  %v13307_v62 = vld [vmem:[#allocation50_spill] sm:$0xff] }
 0x6e6   : > { %v3827_v29 = vrot.slane %v3698_v44, 2  ;;  %v4488_v40 = vrot.slane %v4357_v23, 3  ;;  %v4221_v30 = vpop.f32.mrf.mxu1 }
 0x6e7   : > { %4809 = vmatmul.f32.gmra.mxu0 %v8310_v58  ;;  %v4222_v60 = vadd.f32 %v4221_v30, %v4083_v21  ;;  %v8315_v21 = vld [vmem:[%s9836_s26 + $0x18] sm:$0xff] }
 0x6e8   : > { %v3828_v53 = vsel %vm3110_vm1, %v3825_v34, %v3827_v29  ;;  %v4489_v31 = vsel %vm4440_vm3, %v4486_v20, %v4488_v40  ;;  %4674 = vmatmul.f32.gmra.mxu3 %v8311_v4  ;;  %5335 = vmatmul.f32.gmra.mxu2 %v8308_v49 }
 0x6e9   : > { %v3921_v39 = vadd.f32 %v3828_v53, %v13306_v3  ;;  %v11582_v59 = vadd.f32 %v4489_v31, %v3920_v16  ;;  %4947 = vmatmul.f32.gmra.mxu1 %v8312_v38  ;;  %v13308_v38 = vld [vmem:[#allocation53_spill] sm:$0xff] }
 0x6eb   : > { %v3700_v32 = vpop.f32.mrf.mxu3  ;;  %v4359_v28 = vpop.f32.mrf.mxu2 }
 0x6ec   : > { %v3701_v34 = vadd.f32 %v3700_v32, %v11174_v52  ;;  %v4360_v20 = vadd.f32 %v4359_v28, %v4222_v60  ;;  %v4086_v49 = vpop.f32.mrf.mxu0  ;;  %v8317_v60 = vld [vmem:[%s9829_s7 + $0x28] sm:$0xff] }
 0x6ee   : > { %v3829_v42 = vrot.slane %v3701_v34, 2  ;;  %v4490_v13 = vrot.slane %v4360_v20, 3  ;;  %v4224_v16 = vpop.f32.mrf.mxu1  ;;  %v5941_v34 = vld [vmem:[#allocation11 + $0xb60] sm:$0xff] }
 0x6ef   : > { %4812 = vmatmul.f32.gmra.mxu0 %v8313_v2  ;;  %v4225_v52 = vadd.f32 %v4224_v16, %v4086_v49  ;;  %v8318_v49 = vld [vmem:[%s9836_s26 + $0x20] sm:$0xff]  ;;  %v5311_v16 = vld [vmem:[#allocation11 + $0xa60] sm:$0xff]  ;;  %6100 = vmatpush.msrb.mxu2 %v5941_v34 }
 0x6f0   : > { %v3830_v11 = vsel %vm3110_vm1, %v3827_v29, %v3829_v42  ;;  %v4491_v5 = vsel %vm4440_vm3, %v4488_v40, %v4490_v13  ;;  %4677 = vmatmul.f32.gmra.mxu3 %v8314_v26  ;;  %5337 = vmatmul.f32.gmra.mxu2 %v8311_v4  ;;  %v5925_v2 = vld [vmem:[#allocation11 + $0xae0] sm:$0xff] }
 0x6f1   : > { %v3922_v44 = vadd.f32 %v3830_v11, %v13307_v62  ;;  %v11591_v23 = vadd.f32 %v4491_v5, %v3921_v39  ;;  %4950 = vmatmul.f32.gmra.mxu1 %v8315_v21  ;;  %5590 = vmatpush.msrb.mxu0 %v5311_v16  ;;  %v8319_v21 = vld [vmem:[%s9839_s21 + $0x28] sm:$0xff]  ;;  %v8323_v16 = vld [vmem:[%s9829_s7 + $0x38] sm:$0xff] }
 0x6f2   : > { %5964 = vmatpush.msrb.mxu1 %v5925_v2  ;;  %v13310_v2 = vld [vmem:[#allocation55_spill] sm:$0xff] }
 0x6f3   : > { %v3703_v30 = vpop.f32.mrf.mxu3  ;;  %v4362_v58 = vpop.f32.mrf.mxu2 }
 0x6f4   : > { %v3704_v53 = vadd.f32 %v3703_v30, %v11186_v0  ;;  %v4363_v31 = vadd.f32 %v4362_v58, %v4225_v52  ;;  %v4089_v29 = vpop.f32.mrf.mxu0  ;;  %v5295_v0 = vld [vmem:[#allocation11 + $0x9e0] sm:$0xff] }
 0x6f5   : > { %5454 = vmatpush.msrb.mxu3 %v5295_v0 }
 0x6f6   : > { %v3831_v40 = vrot.slane %v3704_v53, 2  ;;  %v4492_v3 = vrot.slane %v4363_v31, 3  ;;  %v4227_v57 = vpop.f32.mrf.mxu1  ;;  %v8320_v53 = vld [vmem:[%s9829_s7 + $0x30] sm:$0xff]  ;;  %v13309_v31 = vld [vmem:[#allocation54_spill] sm:$0xff] }
 0x6f7   : > { %4815 = vmatmul.f32.gmra.mxu0 %v8316_v56  ;;  %v4228_v20 = vadd.f32 %v4227_v57, %v4089_v29  ;;  %v8321_v56 = vld [vmem:[%s9836_s26 + $0x28] sm:$0xff] }
 0x6f8   : > { %v3832_v4 = vsel %vm3110_vm1, %v3829_v42, %v3831_v40  ;;  %v4493_v39 = vsel %vm4440_vm3, %v4490_v13, %v4492_v3  ;;  %4680 = vmatmul.f32.gmra.mxu3 %v8317_v60  ;;  %5339 = vmatmul.f32.gmra.mxu2 %v8314_v26 }
 0x6f9   : > { %v3923_v32 = vadd.f32 %v3832_v4, %v13308_v38  ;;  %v11600_v28 = vadd.f32 %v4493_v39, %v3922_v44  ;;  %4953 = vmatmul.f32.gmra.mxu1 %v8318_v49  ;;  %v8322_v49 = vld [vmem:[%s9839_s21 + $0x30] sm:$0xff] }
 0x6fb   : > { %v3706_v42 = vpop.f32.mrf.mxu3  ;;  %v4365_v11 = vpop.f32.mrf.mxu2 }
 0x6fc   : > { %v3707_v13 = vadd.f32 %v3706_v42, %v11198_v48  ;;  %v4366_v5 = vadd.f32 %v4365_v11, %v4228_v20  ;;  %v4092_v26 = vpop.f32.mrf.mxu0 }
 0x6fe   : > { %v3833_v62 = vrot.slane %v3707_v13, 2  ;;  %v4494_v44 = vrot.slane %v4366_v5, 3  ;;  %v4230_v52 = vpop.f32.mrf.mxu1  ;;  %v8324_v5 = vld [vmem:[%s9836_s26 + $0x30] sm:$0xff] }
 0x6ff   : > { %4818 = vmatmul.f32.gmra.mxu0 %v8319_v21  ;;  %v4231_v57 = vadd.f32 %v4230_v52, %v4092_v26  ;;  %v5940_v26 = vld [vmem:[#allocation11 + $0xb58] sm:$0xff] }
 0x700   : > { %v3834_v30 = vsel %vm3110_vm1, %v3831_v40, %v3833_v62  ;;  %v4495_v58 = vsel %vm4440_vm3, %v4492_v3, %v4494_v44  ;;  %4683 = vmatmul.f32.gmra.mxu3 %v8320_v53  ;;  %5342 = vmatmul.f32.gmra.mxu2 %v8317_v60 }
 0x701   : > { %v3924_v29 = vadd.f32 %v3834_v30, %v13309_v31  ;;  %v11609_v48 = vadd.f32 %v4495_v58, %v3923_v32  ;;  %4956 = vmatmul.f32.gmra.mxu1 %v8321_v56  ;;  %6101 = vmatpush.msrb.mxu2 %v5940_v26 }
 0x703   : > { %v3709_v4 = vpop.f32.mrf.mxu3  ;;  %v4368_v39 = vpop.f32.mrf.mxu2 }
 0x704   : > { %v3710_v38 = vadd.f32 %v3709_v4, %v11210_v45  ;;  %v4369_v0 = vadd.f32 %v4368_v39, %v4231_v57  ;;  %v4095_v40 = vpop.f32.mrf.mxu0  ;;  %v5294_v45 = vld [vmem:[#allocation11 + $0x9d8] sm:$0xff] }
 0x705   : > { %5455 = vmatpush.msrb.mxu3 %v5294_v45  ;;  %v8326_v4 = vld [vmem:[%s9829_s7 + $0x40] sm:$0xff] }
 0x706   : > { %v3835_v3 = vrot.slane %v3710_v38, 2  ;;  %v4496_v34 = vrot.slane %v4369_v0, 3  ;;  %v4233_v20 = vpop.f32.mrf.mxu1  ;;  %v13311_v39 = vld [vmem:[#allocation58_spill] sm:$0xff] }
 0x707   : > { %4821 = vmatmul.f32.gmra.mxu0 %v8322_v49  ;;  %v4234_v13 = vadd.f32 %v4233_v20, %v4095_v40  ;;  %v5924_v40 = vld [vmem:[#allocation11 + $0xad8] sm:$0xff]  ;;  %v8327_v49 = vld [vmem:[%s9836_s26 + $0x38] sm:$0xff] }
 0x708   : > { %v3836_v60 = vsel %vm3110_vm1, %v3833_v62, %v3835_v3  ;;  %v4497_v32 = vsel %vm4440_vm3, %v4494_v44, %v4496_v34  ;;  %4686 = vmatmul.f32.gmra.mxu3 %v8323_v16  ;;  %5345 = vmatmul.f32.gmra.mxu2 %v8320_v53 }
 0x709   : > { %v3925_v42 = vadd.f32 %v3836_v60, %v13310_v2  ;;  %v11618_v11 = vadd.f32 %v4497_v32, %v3924_v29  ;;  %4959 = vmatmul.f32.gmra.mxu1 %v8324_v5  ;;  %v8325_v29 = vld [vmem:[%s9839_s21 + $0x38] sm:$0xff] }
 0x70a   : > { %5965 = vmatpush.msrb.mxu1 %v5924_v40  ;;  %v8331_v40 = vld [vmem:[%s9839_s21 + $0x48] sm:$0xff] }
 0x70b   : > { %v3712_v52 = vpop.f32.mrf.mxu3  ;;  %v4371_v21 = vpop.f32.mrf.mxu2 }
 0x70c   : > { %v3713_v62 = vadd.f32 %v3712_v52, %v11222_v41  ;;  %v4372_v44 = vadd.f32 %v4371_v21, %v4234_v13  ;;  %v4098_v30 = vpop.f32.mrf.mxu0  ;;  %v5310_v41 = vld [vmem:[#allocation11 + $0xa58] sm:$0xff] }
 0x70d   : > { %5591 = vmatpush.msrb.mxu0 %v5310_v41  ;;  %v8328_v13 = vld [vmem:[%s9839_s21 + $0x40] sm:$0xff]  ;;  %v8329_v52 = vld [vmem:[%s9829_s7 + $0x48] sm:$0xff] }
 0x70e   : > { %v3837_v58 = vrot.slane %v3713_v62, 2  ;;  %v4498_v53 = vrot.slane %v4372_v44, 3  ;;  %v4236_v31 = vpop.f32.mrf.mxu1  ;;  %v13312_v21 = vld [vmem:[#allocation59_spill] sm:$0xff] }
 0x70f   : > { %4824 = vmatmul.f32.gmra.mxu0 %v8325_v29  ;;  %v4237_v20 = vadd.f32 %v4236_v31, %v4098_v30  ;;  %v8330_v30 = vld [vmem:[%s9836_s26 + $0x40] sm:$0xff] }
 0x710   : > { %v3838_v57 = vsel %vm3110_vm1, %v3835_v3, %v3837_v58  ;;  %v4499_v56 = vsel %vm4440_vm3, %v4496_v34, %v4498_v53  ;;  %4689 = vmatmul.f32.gmra.mxu3 %v8326_v4  ;;  %5348 = vmatmul.f32.gmra.mxu2 %v8323_v16 }
 0x711   : > { %v3926_v38 = vadd.f32 %v3838_v57, %v13311_v39  ;;  %v11627_v0 = vadd.f32 %v4499_v56, %v3925_v42  ;;  %4962 = vmatmul.f32.gmra.mxu1 %v8327_v49  ;;  %v13313_v49 = vld [vmem:[#allocation60_spill] sm:$0xff] }
 0x713   : > { %v3715_v60 = vpop.f32.mrf.mxu3  ;;  %v4374_v32 = vpop.f32.mrf.mxu2 }
 0x714   : > { %v3716_v3 = vadd.f32 %v3715_v60, %v11234_v24  ;;  %v4375_v34 = vadd.f32 %v4374_v32, %v4237_v20  ;;  %v4101_v16 = vpop.f32.mrf.mxu0  ;;  %v8332_v20 = vld [vmem:[%s9829_s7 + $0x50] sm:$0xff] }
 0x716   : > { %v3839_v2 = vrot.slane %v3716_v3, 2  ;;  %v4500_v45 = vrot.slane %v4375_v34, 3  ;;  %v4239_v42 = vpop.f32.mrf.mxu1  ;;  %v5939_v3 = vld [vmem:[#allocation11 + $0xb50] sm:$0xff] }
 0x717   : > { %4827 = vmatmul.f32.gmra.mxu0 %v8328_v13  ;;  %v4240_v24 = vadd.f32 %v4239_v42, %v4101_v16  ;;  %v8333_v16 = vld [vmem:[%s9836_s26 + $0x48] sm:$0xff]  ;;  %6102 = vmatpush.msrb.mxu2 %v5939_v3  ;;  %v8337_v3 = vld [vmem:[%s9839_s21 + $0x58] sm:$0xff] }
 0x718   : > { %v3840_v5 = vsel %vm3110_vm1, %v3837_v58, %v3839_v2  ;;  %v4501_v26 = vsel %vm4440_vm3, %v4498_v53, %v4500_v45  ;;  %4692 = vmatmul.f32.gmra.mxu3 %v8329_v52  ;;  %5351 = vmatmul.f32.gmra.mxu2 %v8326_v4 }
 0x719   : > { %v3927_v62 = vadd.f32 %v3840_v5, %v13312_v21  ;;  %v11636_v44 = vadd.f32 %v4501_v26, %v3926_v38  ;;  %4965 = vmatmul.f32.gmra.mxu1 %v8330_v30 }
 0x71b   : > { %v3718_v31 = vpop.f32.mrf.mxu3  ;;  %v4377_v29 = vpop.f32.mrf.mxu2 }
 0x71c   : > { %v3719_v57 = vadd.f32 %v3718_v31, %v11246_v12  ;;  %v4378_v56 = vadd.f32 %v4377_v29, %v4240_v24  ;;  %v4104_v58 = vpop.f32.mrf.mxu0  ;;  %v5293_v12 = vld [vmem:[#allocation11 + $0x9d0] sm:$0xff] }
 0x71d   : > { %5456 = vmatpush.msrb.mxu3 %v5293_v12  ;;  %v8335_v31 = vld [vmem:[%s9829_s7 + $0x58] sm:$0xff] }
 0x71e   : > { %v3841_v53 = vrot.slane %v3719_v57, 2  ;;  %v4502_v39 = vrot.slane %v4378_v56, 3  ;;  %v4242_v41 = vpop.f32.mrf.mxu1  ;;  %v13314_v29 = vld [vmem:[#allocation61_spill] sm:$0xff] }
 0x71f   : > { %4830 = vmatmul.f32.gmra.mxu0 %v8331_v40  ;;  %v4243_v34 = vadd.f32 %v4242_v41, %v4104_v58  ;;  %v5923_v58 = vld [vmem:[#allocation11 + $0xad0] sm:$0xff]  ;;  %v8336_v40 = vld [vmem:[%s9836_s26 + $0x50] sm:$0xff] }
 0x720   : > { %v3842_v4 = vsel %vm3110_vm1, %v3839_v2, %v3841_v53  ;;  %v4503_v38 = vsel %vm4440_vm3, %v4500_v45, %v4502_v39  ;;  %4695 = vmatmul.f32.gmra.mxu3 %v8332_v20  ;;  %5354 = vmatmul.f32.gmra.mxu2 %v8329_v52 }
 0x721   : > { %v3928_v60 = vadd.f32 %v3842_v4, %v13313_v49  ;;  %v11645_v32 = vadd.f32 %v4503_v38, %v3927_v62  ;;  %4968 = vmatmul.f32.gmra.mxu1 %v8333_v16  ;;  %v8334_v62 = vld [vmem:[%s9839_s21 + $0x50] sm:$0xff] }
 0x722   : > { %5966 = vmatpush.msrb.mxu1 %v5923_v58  ;;  %v8340_v58 = vld [vmem:[%s9839_s21 + $0x60] sm:$0xff] }
 0x723   : > { %v3721_v42 = vpop.f32.mrf.mxu3  ;;  %v4380_v13 = vpop.f32.mrf.mxu2 }
 0x724   : > { %v3722_v2 = vadd.f32 %v3721_v42, %v11258_v25  ;;  %v4381_v45 = vadd.f32 %v4380_v13, %v4243_v34  ;;  %v4107_v5 = vpop.f32.mrf.mxu0  ;;  %v5309_v25 = vld [vmem:[#allocation11 + $0xa50] sm:$0xff] }
 0x725   : > { %5592 = vmatpush.msrb.mxu0 %v5309_v25  ;;  %v8338_v42 = vld [vmem:[%s9829_s7 + $0x60] sm:$0xff] }
 0x726   : > { %v3843_v26 = vrot.slane %v3722_v2, 2  ;;  %v4504_v52 = vrot.slane %v4381_v45, 3  ;;  %v4245_v21 = vpop.f32.mrf.mxu1  ;;  %v13315_v13 = vld [vmem:[#allocation62_spill] sm:$0xff] }
 0x727   : > { %4833 = vmatmul.f32.gmra.mxu0 %v8334_v62  ;;  %v4246_v41 = vadd.f32 %v4245_v21, %v4107_v5  ;;  %v8339_v21 = vld [vmem:[%s9836_s26 + $0x58] sm:$0xff] }
 0x728   : > { %v3844_v24 = vsel %vm3110_vm1, %v3841_v53, %v3843_v26  ;;  %v4505_v30 = vsel %vm4440_vm3, %v4502_v39, %v4504_v52  ;;  %4698 = vmatmul.f32.gmra.mxu3 %v8335_v31  ;;  %5357 = vmatmul.f32.gmra.mxu2 %v8332_v20 }
 0x729   : > { %v3929_v57 = vadd.f32 %v3844_v24, %v13314_v29  ;;  %v11654_v56 = vadd.f32 %v4505_v30, %v3928_v60  ;;  %4971 = vmatmul.f32.gmra.mxu1 %v8336_v40  ;;  %v8341_v40 = vld [vmem:[%s9829_s7 + $0x68] sm:$0xff] }
 0x72b   : > { %v3724_v4 = vpop.f32.mrf.mxu3  ;;  %v4383_v38 = vpop.f32.mrf.mxu2 }
 0x72c   : > { %v3725_v53 = vadd.f32 %v3724_v4, %v11270_v54  ;;  %v4384_v39 = vadd.f32 %v4383_v38, %v4246_v41  ;;  %v4110_v20 = vpop.f32.mrf.mxu0  ;;  %v5292_v54 = vld [vmem:[#allocation11 + $0x9c8] sm:$0xff]  ;;  %v13316_v4 = vld [vmem:[#allocation63_spill] sm:$0xff] }
 0x72d   : > { %5457 = vmatpush.msrb.mxu3 %v5292_v54 }
 0x72e   : > { %v3845_v49 = vrot.slane %v3725_v53, 2  ;;  %v4506_v12 = vrot.slane %v4384_v39, 3  ;;  %v4248_v60 = vpop.f32.mrf.mxu1  ;;  %v5308_v39 = vld [vmem:[#allocation11 + $0xa48] sm:$0xff] }
 0x72f   : > { %4836 = vmatmul.f32.gmra.mxu0 %v8337_v3  ;;  %v4249_v5 = vadd.f32 %v4248_v60, %v4110_v20  ;;  %v5922_v20 = vld [vmem:[#allocation11 + $0xac8] sm:$0xff]  ;;  %v8342_v3 = vld [vmem:[%s9836_s26 + $0x60] sm:$0xff] }
 0x730   : > { %v3846_v34 = vsel %vm3110_vm1, %v3843_v26, %v3845_v49  ;;  %v4507_v16 = vsel %vm4440_vm3, %v4504_v52, %v4506_v12  ;;  %4701 = vmatmul.f32.gmra.mxu3 %v8338_v42  ;;  %5360 = vmatmul.f32.gmra.mxu2 %v8335_v31 }
 0x731   : > { %v3930_v2 = vadd.f32 %v3846_v34, %v13315_v13  ;;  %v11663_v45 = vadd.f32 %v4507_v16, %v3929_v57  ;;  %4974 = vmatmul.f32.gmra.mxu1 %v8339_v21  ;;  %5593 = vmatpush.msrb.mxu0 %v5308_v39  ;;  %v8343_v21 = vld [vmem:[%s9839_s21 + $0x68] sm:$0xff] }
 0x732   : > { %5967 = vmatpush.msrb.mxu1 %v5922_v20 }
 0x733   : > { %v3727_v62 = vpop.f32.mrf.mxu3  ;;  %v4386_v24 = vpop.f32.mrf.mxu2 }
 0x734   : > { %v3728_v26 = vadd.f32 %v3727_v62, %v11282_v43  ;;  %v4387_v30 = vadd.f32 %v4386_v24, %v4249_v5  ;;  %v4113_v52 = vpop.f32.mrf.mxu0  ;;  %v5938_v43 = vld [vmem:[#allocation11 + $0xb48] sm:$0xff] }
 0x735   : > { %6103 = vmatpush.msrb.mxu2 %v5938_v43  ;;  %v13319_v43 = vld [vmem:[#allocation69_spill] sm:$0xff] }
 0x736   : > { %v3847_v29 = vrot.slane %v3728_v26, 2  ;;  %v4508_v31 = vrot.slane %v4387_v30, 3  ;;  %v4251_v25 = vpop.f32.mrf.mxu1  ;;  %v8344_v26 = vld [vmem:[%s9829_s7 + $0x70] sm:$0xff] }
 0x737   : > { %4839 = vmatmul.f32.gmra.mxu0 %v8340_v58  ;;  %v4252_v60 = vadd.f32 %v4251_v25, %v4113_v52  ;;  %v13318_v30 = vld [vmem:[#allocation64_spill] sm:$0xff] }
 0x738   : > { %v3848_v57 = vsel %vm3110_vm1, %v3845_v49, %v3847_v29  ;;  %v4509_v41 = vsel %vm4440_vm3, %v4506_v12, %v4508_v31  ;;  %4704 = vmatmul.f32.gmra.mxu3 %v8341_v40  ;;  %5363 = vmatmul.f32.gmra.mxu2 %v8338_v42  ;;  %v13317_v12 = vld [vmem:[#allocation67_spill] sm:$0xff] }
 0x739   : > { %v3931_v38 = vadd.f32 %v3848_v57, %v13316_v4  ;;  %v11672_v53 = vadd.f32 %v4509_v41, %v3930_v2  ;;  %4977 = vmatmul.f32.gmra.mxu1 %v8342_v3  ;;  %v8345_v57 = vld [vmem:[%s9836_s26 + $0x68] sm:$0xff] }
 0x73b   : > { %v3730_v34 = vpop.f32.mrf.mxu3  ;;  %v4389_v49 = vpop.f32.mrf.mxu2 }
 0x73c   : > { %v3731_v16 = vadd.f32 %v3730_v34, %v13317_v12  ;;  %v4390_v42 = vadd.f32 %v4389_v49, %v4252_v60  ;;  %v4116_v13 = vpop.f32.mrf.mxu0  ;;  %v8346_v34 = vld [vmem:[%s9839_s21 + $0x70] sm:$0xff]  ;;  %v8347_v12 = vld [vmem:[%s9829_s7 + $0x78] sm:$0xff] }
 0x73e   : > { %v3849_v2 = vrot.slane %v3731_v16, 2  ;;  %v4510_v54 = vrot.slane %v4390_v42, 3  ;;  %v4254_v5 = vpop.f32.mrf.mxu1  ;;  %v13320_v16 = vld [vmem:[#allocation65_spill] sm:$0xff] }
 0x73f   : > { %4842 = vmatmul.f32.gmra.mxu0 %v8343_v21  ;;  %v4255_v58 = vadd.f32 %v4254_v5, %v4116_v13  ;;  %v8348_v21 = vld [vmem:[%s9836_s26 + $0x70] sm:$0xff] }
 0x740   : > { %v3850_v62 = vsel %vm3110_vm1, %v3847_v29, %v3849_v2  ;;  %v4511_v24 = vsel %vm4440_vm3, %v4508_v31, %v4510_v54  ;;  %4707 = vmatmul.f32.gmra.mxu3 %v8344_v26  ;;  %5366 = vmatmul.f32.gmra.mxu2 %v8341_v40  ;;  %v5291_v31 = vld [vmem:[#allocation11 + $0x9c0] sm:$0xff] }
 0x741   : > { %v3932_v52 = vadd.f32 %v3850_v62, %v13318_v30  ;;  %v11681_v25 = vadd.f32 %v4511_v24, %v3931_v38  ;;  %4980 = vmatmul.f32.gmra.mxu1 %v8345_v57  ;;  %5458 = vmatpush.msrb.mxu3 %v5291_v31  ;;  %v5937_v62 = vld [vmem:[#allocation11 + $0xb40] sm:$0xff]  ;;  %v8350_v31 = vld [vmem:[%s9829_s7 + $0x80] sm:$0xff] }
 0x742   : > { %6104 = vmatpush.msrb.mxu2 %v5937_v62 }
 0x743   : > { %v3733_v41 = vpop.f32.mrf.mxu3  ;;  %v4392_v4 = vpop.f32.mrf.mxu2 }
 0x744   : > { %v3734_v39 = vadd.f32 %v3733_v41, %v13319_v43  ;;  %v4393_v20 = vadd.f32 %v4392_v4, %v4255_v58  ;;  %v4119_v29 = vpop.f32.mrf.mxu0  ;;  %v5307_v58 = vld [vmem:[#allocation11 + $0xa40] sm:$0xff]  ;;  %v8349_v43 = vld [vmem:[%s9839_s21 + $0x78] sm:$0xff] }
 0x745   : > { %5594 = vmatpush.msrb.mxu0 %v5307_v58 }
 0x746   : > { %v3851_v60 = vrot.slane %v3734_v39, 2  ;;  %v4512_v3 = vrot.slane %v4393_v20, 3  ;;  %v4257_v40 = vpop.f32.mrf.mxu1 }
 0x747   : > { %4845 = vmatmul.f32.gmra.mxu0 %v8346_v34  ;;  %v4258_v5 = vadd.f32 %v4257_v40, %v4119_v29  ;;  %v13322_v34 = vld [vmem:[#allocation68_spill] sm:$0xff] }
 0x748   : > { %v3852_v38 = vsel %vm3110_vm1, %v3849_v2, %v3851_v60  ;;  %v4513_v49 = vsel %vm4440_vm3, %v4510_v54, %v4512_v3  ;;  %4710 = vmatmul.f32.gmra.mxu3 %v8347_v12  ;;  %5369 = vmatmul.f32.gmra.mxu2 %v8344_v26  ;;  %v5921_v2 = vld [vmem:[#allocation11 + $0xac0] sm:$0xff] }
 0x749   : > { %v3933_v42 = vadd.f32 %v3852_v38, %v13320_v16  ;;  %v11690_v13 = vadd.f32 %v4513_v49, %v3932_v52  ;;  %4983 = vmatmul.f32.gmra.mxu1 %v8348_v21 }
 0x74a   : > { %5968 = vmatpush.msrb.mxu1 %v5921_v2  ;;  %v13323_v2 = vld [vmem:[#allocation71_spill] sm:$0xff] }
 0x74b   : > { %v3736_v24 = vpop.f32.mrf.mxu3  ;;  %v4395_v30 = vpop.f32.mrf.mxu2 }
 0x74c   : > { %v3737_v54 = vadd.f32 %v3736_v24, %v11323_v37  ;;  %v4396_v57 = vadd.f32 %v4395_v30, %v4258_v5  ;;  %v4122_v41 = vpop.f32.mrf.mxu0  ;;  %v13321_v37 = vld [vmem:[#allocation66_spill] sm:$0xff]  ;;  %v8351_v5 = vld [vmem:[%s9836_s26 + $0x78] sm:$0xff] }
 0x74d   : > { %v8352_v30 = vld [vmem:[%s9839_s21 + $0x80] sm:$0xff] }
 0x74e   : > { %v3853_v26 = vrot.slane %v3737_v54, 2  ;;  %v4514_v52 = vrot.slane %v4396_v57, 3  ;;  %v4260_v4 = vpop.f32.mrf.mxu1 }
 0x74f   : > { %4848 = vmatmul.f32.gmra.mxu0 %v8349_v43  ;;  %v4261_v16 = vadd.f32 %v4260_v4, %v4122_v41  ;;  %v8354_v41 = vld [vmem:[%s9836_s26 + $0x80] sm:$0xff] }
 0x750   : > { %v3854_v39 = vsel %vm3110_vm1, %v3851_v60, %v3853_v26  ;;  %v3855_v20 = vsel %vm3110_vm1, %v3853_v26, %v11313_v63  ;;  %v4515_v29 = vsel %vm4440_vm3, %v4512_v3, %v4514_v52  ;;  %4713 = vmatmul.f32.gmra.mxu3 %v8350_v31  ;;  %5372 = vmatmul.f32.gmra.mxu2 %v8347_v12 }
 0x751   : > { %v3934_v40 = vadd.f32 %v3854_v39, %v13321_v37  ;;  %v3935_v38 = vadd.f32 %v3855_v20, %v13322_v34  ;;  %v11702_v49 = vadd.f32 %v4515_v29, %v3933_v42  ;;  %4986 = vmatmul.f32.gmra.mxu1 %v8351_v5  ;;  %v8353_v42 = vld [vmem:[%s9829_s7 + $0x88] sm:$0xff]  ;;  %v8356_v37 = vld [vmem:[%s9829_s7 + $0x90] sm:$0xff] }
 0x752   : > { %v5290_v39 = vld [vmem:[#allocation11 + $0x9b8] sm:$0xff] }
 0x753   : > { %v4398_v60 = vpop.f32.mrf.mxu2  ;;  %v4668_v21 = vpop.f32.mrf.mxu3  ;;  %5459 = vmatpush.msrb.mxu3 %v5290_v39  ;;  %v8355_v29 = vld [vmem:[%s9839_s21 + $0x88] sm:$0xff] }
 0x754   : > { %v4399_v63 = vadd.f32 %v4398_v60, %v4261_v16  ;;  %v4806_v62 = vpop.f32.mrf.mxu0  ;;  %v5306_v16 = vld [vmem:[#allocation11 + $0xa38] sm:$0xff]  ;;  %v8358_v21 = vld [vmem:[%s9839_s21 + $0x90] sm:$0xff] }
 0x755   : > { %v5920_v5 = vld [vmem:[#allocation11 + $0xab8] sm:$0xff]  ;;  %5595 = vmatpush.msrb.mxu0 %v5306_v16  ;;  %v5289_v16 = vld [vmem:[#allocation11 + $0x9b0] sm:$0xff] }
 0x756   : > { %v4516_v3 = vrot.slane %v4399_v63, 3  ;;  %v4944_v24 = vpop.f32.mrf.mxu1  ;;  %5969 = vmatpush.msrb.mxu1 %v5920_v5  ;;  %v8359_v63 = vld [vmem:[%s9829_s7 + $0x98] sm:$0xff]  ;;  %5460 = vmatpush.msrb.mxu3 %v5289_v16 }
 0x757   : > { %4851 = vmatmul.f32.gmra.mxu0 %v8352_v30  ;;  %v5935_v5 = vld [vmem:[#allocation11 + $0xb30] sm:$0xff] }
 0x758   : > { %v4517_v58 = vsel %vm4440_vm3, %v4514_v52, %v4516_v3  ;;  %v4519_v54 = vsel %vm4440_vm3, %v4516_v3, %v13323_v2  ;;  %4716 = vmatmul.f32.gmra.mxu3 %v8353_v42  ;;  %5375 = vmatmul.f32.gmra.mxu2 %v8350_v31  ;;  %v5936_v52 = vld [vmem:[#allocation11 + $0xb38] sm:$0xff]  ;;  %v8360_v3 = vld [vmem:[%s9836_s26 + $0x90] sm:$0xff] }
 0x759   : > { %v11710_v12 = vadd.f32 %v4517_v58, %v3934_v40  ;;  %v11712_v57 = vadd.f32 %v4519_v54, %v3935_v38  ;;  %4989 = vmatmul.f32.gmra.mxu1 %v8354_v41  ;;  %6105 = vmatpush.msrb.mxu2 %v5936_v52  ;;  %v8357_v40 = vld [vmem:[%s9836_s26 + $0x88] sm:$0xff]  ;;  %v8361_v41 = vld [vmem:[%s9839_s21 + $0x98] sm:$0xff] }
 0x75a   : > { %v8363_v52 = vld [vmem:[%s9836_s26 + $0x98] sm:$0xff] }
 0x75b   : > { %v4670_v26 = vpop.f32.mrf.mxu3  ;;  %v5332_v4 = vpop.f32.mrf.mxu2  ;;  %6106 = vmatpush.msrb.mxu2 %v5935_v5 }
 0x75c   : > { %v4808_v43 = vpop.f32.mrf.mxu0  ;;  %v8362_v4 = vld [vmem:[%s9829_s7 + $0xa0] sm:$0xff] }
 0x75e   : > { %v4946_v20 = vpop.f32.mrf.mxu1 }
 0x75f   : > { %4854 = vmatmul.f32.gmra.mxu0 %v8355_v29 }
 0x760   : > { %4719 = vmatmul.f32.gmra.mxu3 %v8356_v37  ;;  %5378 = vmatmul.f32.gmra.mxu2 %v8353_v42 }
 0x761   : > { %4992 = vmatmul.f32.gmra.mxu1 %v8357_v40 }
 0x763   : > { %v4672_v31 = vpop.f32.mrf.mxu3  ;;  %v5334_v34 = vpop.f32.mrf.mxu2 }
 0x764   : > { %v4810_v38 = vpop.f32.mrf.mxu0 }
 0x765   : > { %v4811_v62 = vadd.f32 %v4810_v38, %v4672_v31  ;;  %v13324_v31 = vld [vmem:[#allocation73_spill] sm:$0xff] }
 0x766   : > { %v4948_v60 = vpop.f32.mrf.mxu1 }
 0x767   : > { %4857 = vmatmul.f32.gmra.mxu0 %v8358_v21  ;;  %v4949_v54 = vadd.f32 %v4948_v60, %v4811_v62  ;;  %v5305_v60 = vld [vmem:[#allocation11 + $0xa30] sm:$0xff] }
 0x768   : > { %4722 = vmatmul.f32.gmra.mxu3 %v8359_v63  ;;  %5381 = vmatmul.f32.gmra.mxu2 %v8356_v37  ;;  %v5919_v21 = vld [vmem:[#allocation11 + $0xab0] sm:$0xff] }
 0x769   : > { %4995 = vmatmul.f32.gmra.mxu1 %v8360_v3  ;;  %v5105_v43 = vrot.slane %v4949_v54, 4  ;;  %v8364_v62 = vld [vmem:[%s9839_s21 + $0xa0] sm:$0xff]  ;;  %5596 = vmatpush.msrb.mxu0 %v5305_v60  ;;  %v5288_v60 = vld [vmem:[#allocation11 + $0x9a8] sm:$0xff] }
 0x76a   : > { %5970 = vmatpush.msrb.mxu1 %v5919_v21  ;;  %v5934_v21 = vld [vmem:[#allocation11 + $0xb28] sm:$0xff]  ;;  %5461 = vmatpush.msrb.mxu3 %v5288_v60 }
 0x76b   : > { %v4675_v24 = vpop.f32.mrf.mxu3  ;;  %v5336_v30 = vpop.f32.mrf.mxu2  ;;  %6107 = vmatpush.msrb.mxu2 %v5934_v21 }
 0x76c   : > { %v4813_v58 = vpop.f32.mrf.mxu0 }
 0x76d   : > { %v4814_v2 = vadd.f32 %v4813_v58, %v4675_v24  ;;  %v8365_v24 = vld [vmem:[%s9829_s7 + $0xa8] sm:$0xff]  ;;  %v8366_v58 = vld [vmem:[%s9836_s26 + $0xa0] sm:$0xff] }
 0x76e   : > { %v4951_v42 = vpop.f32.mrf.mxu1 }
 0x76f   : > { %4860 = vmatmul.f32.gmra.mxu0 %v8361_v41  ;;  %v4952_v26 = vadd.f32 %v4951_v42, %v4814_v2 }
 0x770   : > { %4725 = vmatmul.f32.gmra.mxu3 %v8362_v4  ;;  %5384 = vmatmul.f32.gmra.mxu2 %v8359_v63 }
 0x771   : > { %v5106_v39 = vrot.slane %v4952_v26, 4  ;;  %4998 = vmatmul.f32.gmra.mxu1 %v8363_v52 }
 0x773   : > { %v4678_v20 = vpop.f32.mrf.mxu3  ;;  %v5338_v29 = vpop.f32.mrf.mxu2  ;;  %v5107_v37 = vsel %vm5104_vm4, %v5105_v43, %v5106_v39 }
 0x774   : > { %v4816_v40 = vpop.f32.mrf.mxu0  ;;  %v11726_v34 = vadd.f32 %v5107_v37, %v13324_v31  ;;  %v8368_v37 = vld [vmem:[%s9829_s7 + $0xb0] sm:$0xff] }
 0x775   : > { %v4817_v38 = vadd.f32 %v4816_v40, %v4678_v20  ;;  %v8367_v20 = vld [vmem:[%s9839_s21 + $0xa8] sm:$0xff] }
 0x776   : > { %v4954_v63 = vpop.f32.mrf.mxu1  ;;  %v8369_v40 = vld [vmem:[%s9836_s26 + $0xa8] sm:$0xff] }
 0x777   : > { %4863 = vmatmul.f32.gmra.mxu0 %v8364_v62  ;;  %v4955_v3 = vadd.f32 %v4954_v63, %v4817_v38  ;;  %v8370_v62 = vld [vmem:[%s9839_s21 + $0xb0] sm:$0xff] }
 0x778   : > { %4728 = vmatmul.f32.gmra.mxu3 %v8365_v24  ;;  %5387 = vmatmul.f32.gmra.mxu2 %v8362_v4 }
 0x779   : > { %v5108_v30 = vrot.slane %v4955_v3, 4  ;;  %5001 = vmatmul.f32.gmra.mxu1 %v8366_v58 }
 0x77b   : > { %v4681_v2 = vpop.f32.mrf.mxu3  ;;  %v11731_v54 = vpop.f32.mrf.mxu2  ;;  %v5109_v42 = vsel %vm5104_vm4, %v5106_v39, %v5108_v30 }
 0x77c   : > { %v4819_v41 = vpop.f32.mrf.mxu0  ;;  %v11735_v26 = vadd.f32 %v5109_v42, %v11384_v18 }
 0x77d   : > { %v4820_v43 = vadd.f32 %v4819_v41, %v4681_v2 }
 0x77e   : > { %v4957_v52 = vpop.f32.mrf.mxu1 }
 0x77f   : > { %4866 = vmatmul.f32.gmra.mxu0 %v8367_v20  ;;  %v4958_v29 = vadd.f32 %v4957_v52, %v4820_v43  ;;  %v5304_v20 = vld [vmem:[#allocation11 + $0xa28] sm:$0xff] }
 0x780   : > { %4731 = vmatmul.f32.gmra.mxu3 %v8368_v37  ;;  %5390 = vmatmul.f32.gmra.mxu2 %v8365_v24  ;;  %v8371_v24 = vld [vmem:[%s9829_s7 + $0xb8] sm:$0xff] }
 0x781   : > { %v5110_v4 = vrot.slane %v4958_v29, 4  ;;  %5004 = vmatmul.f32.gmra.mxu1 %v8369_v40  ;;  %v5918_v29 = vld [vmem:[#allocation11 + $0xaa8] sm:$0xff]  ;;  %5597 = vmatpush.msrb.mxu0 %v5304_v20 }
 0x782   : > { %5971 = vmatpush.msrb.mxu1 %v5918_v29  ;;  %v8373_v40 = vld [vmem:[%s9839_s21 + $0xb8] sm:$0xff] }
 0x783   : > { %v4684_v31 = vpop.f32.mrf.mxu3  ;;  %v11740_v38 = vpop.f32.mrf.mxu2  ;;  %v5111_v39 = vsel %vm5104_vm4, %v5108_v30, %v5110_v4  ;;  %v8372_v30 = vld [vmem:[%s9836_s26 + $0xb0] sm:$0xff] }
 0x784   : > { %v4822_v18 = vpop.f32.mrf.mxu0  ;;  %v11744_v16 = vadd.f32 %v5111_v39, %v11393_v14  ;;  %v8374_v39 = vld [vmem:[%s9829_s7 + $0xc0] sm:$0xff] }
 0x785   : > { %v4823_v5 = vadd.f32 %v4822_v18, %v4684_v31  ;;  %v8375_v18 = vld [vmem:[%s9836_s26 + $0xb8] sm:$0xff] }
 0x786   : > { %v4960_v63 = vpop.f32.mrf.mxu1 }
 0x787   : > { %4869 = vmatmul.f32.gmra.mxu0 %v8370_v62  ;;  %v4961_v3 = vadd.f32 %v4960_v63, %v4823_v5 }
 0x788   : > { %4734 = vmatmul.f32.gmra.mxu3 %v8371_v24  ;;  %5393 = vmatmul.f32.gmra.mxu2 %v8368_v37 }
 0x789   : > { %v5112_v58 = vrot.slane %v4961_v3, 4  ;;  %5007 = vmatmul.f32.gmra.mxu1 %v8372_v30  ;;  %v8376_v30 = vld [vmem:[%s9839_s21 + $0xc0] sm:$0xff] }
 0x78b   : > { %v4687_v2 = vpop.f32.mrf.mxu3  ;;  %v11749_v14 = vpop.f32.mrf.mxu2  ;;  %v5113_v42 = vsel %vm5104_vm4, %v5110_v4, %v5112_v58 }
 0x78c   : > { %v4825_v41 = vpop.f32.mrf.mxu0  ;;  %v11753_v43 = vadd.f32 %v5113_v42, %v11402_v50  ;;  %v8377_v42 = vld [vmem:[%s9829_s7 + $0xc8] sm:$0xff] }
 0x78d   : > { %v4826_v52 = vadd.f32 %v4825_v41, %v4687_v2  ;;  %v8378_v41 = vld [vmem:[%s9836_s26 + $0xc0] sm:$0xff] }
 0x78e   : > { %v4963_v37 = vpop.f32.mrf.mxu1 }
 0x78f   : > { %4872 = vmatmul.f32.gmra.mxu0 %v8373_v40  ;;  %v4964_v31 = vadd.f32 %v4963_v37, %v4826_v52  ;;  %v5287_v40 = vld [vmem:[#allocation11 + $0x9a0] sm:$0xff] }
 0x790   : > { %4737 = vmatmul.f32.gmra.mxu3 %v8374_v39  ;;  %5396 = vmatmul.f32.gmra.mxu2 %v8371_v24 }
 0x791   : > { %v5114_v4 = vrot.slane %v4964_v31, 4  ;;  %5010 = vmatmul.f32.gmra.mxu1 %v8375_v18  ;;  %v5933_v31 = vld [vmem:[#allocation11 + $0xb20] sm:$0xff]  ;;  %5462 = vmatpush.msrb.mxu3 %v5287_v40 }
 0x792   : > { %v5303_v18 = vld [vmem:[#allocation11 + $0xa20] sm:$0xff]  ;;  %6108 = vmatpush.msrb.mxu2 %v5933_v31  ;;  %v8383_v31 = vld [vmem:[%s9829_s7 + $0xd8] sm:$0xff] }
 0x793   : > { %v4690_v50 = vpop.f32.mrf.mxu3  ;;  %v11758_v5 = vpop.f32.mrf.mxu2  ;;  %v5115_v60 = vsel %vm5104_vm4, %v5112_v58, %v5114_v4  ;;  %5598 = vmatpush.msrb.mxu0 %v5303_v18  ;;  %v8384_v18 = vld [vmem:[%s9836_s26 + $0xd0] sm:$0xff] }
 0x794   : > { %v4828_v21 = vpop.f32.mrf.mxu0  ;;  %v11762_v63 = vadd.f32 %v5115_v60, %v11411_v1  ;;  %v8379_v60 = vld [vmem:[%s9839_s21 + $0xc8] sm:$0xff] }
 0x795   : > { %v4829_v62 = vadd.f32 %v4828_v21, %v4690_v50 }
 0x796   : > { %v4966_v3 = vpop.f32.mrf.mxu1 }
 0x797   : > { %4875 = vmatmul.f32.gmra.mxu0 %v8376_v30  ;;  %v4967_v2 = vadd.f32 %v4966_v3, %v4829_v62  ;;  %v8380_v62 = vld [vmem:[%s9829_s7 + $0xd0] sm:$0xff] }
 0x798   : > { %4740 = vmatmul.f32.gmra.mxu3 %v8377_v42  ;;  %5399 = vmatmul.f32.gmra.mxu2 %v8374_v39  ;;  %v5917_v39 = vld [vmem:[#allocation11 + $0xaa0] sm:$0xff] }
 0x799   : > { %v5116_v24 = vrot.slane %v4967_v2, 4  ;;  %5013 = vmatmul.f32.gmra.mxu1 %v8378_v41 }
 0x79a   : > { %5972 = vmatpush.msrb.mxu1 %v5917_v39 }
 0x79b   : > { %v4693_v52 = vpop.f32.mrf.mxu3  ;;  %v11767_v20 = vpop.f32.mrf.mxu2  ;;  %v5117_v58 = vsel %vm5104_vm4, %v5114_v4, %v5116_v24  ;;  %v8381_v4 = vld [vmem:[%s9836_s26 + $0xc8] sm:$0xff] }
 0x79c   : > { %v4831_v1 = vpop.f32.mrf.mxu0  ;;  %v11771_v29 = vadd.f32 %v5117_v58, %v11420_v6 }
 0x79d   : > { %v4832_v37 = vadd.f32 %v4831_v1, %v4693_v52 }
 0x79e   : > { %v4969_v50 = vpop.f32.mrf.mxu1 }
 0x79f   : > { %4878 = vmatmul.f32.gmra.mxu0 %v8379_v60  ;;  %v4970_v21 = vadd.f32 %v4969_v50, %v4832_v37  ;;  %v8382_v37 = vld [vmem:[%s9839_s21 + $0xd0] sm:$0xff] }
 0x7a0   : > { %4743 = vmatmul.f32.gmra.mxu3 %v8380_v62  ;;  %5402 = vmatmul.f32.gmra.mxu2 %v8377_v42 }
 0x7a1   : > { %v5118_v6 = vrot.slane %v4970_v21, 4  ;;  %5016 = vmatmul.f32.gmra.mxu1 %v8381_v4  ;;  %v5286_v4 = vld [vmem:[#allocation11 + $0x998] sm:$0xff] }
 0x7a2   : > { %5463 = vmatpush.msrb.mxu3 %v5286_v4  ;;  %v8388_v4 = vld [vmem:[%s9839_s21 + $0xe0] sm:$0xff] }
 0x7a3   : > { %v4696_v3 = vpop.f32.mrf.mxu3  ;;  %v11776_v30 = vpop.f32.mrf.mxu2  ;;  %v5119_v2 = vsel %vm5104_vm4, %v5116_v24, %v5118_v6 }
 0x7a4   : > { %v4834_v41 = vpop.f32.mrf.mxu0  ;;  %v11780_v52 = vadd.f32 %v5119_v2, %v11429_v27  ;;  %v8385_v2 = vld [vmem:[%s9839_s21 + $0xd8] sm:$0xff] }
 0x7a5   : > { %v4835_v58 = vadd.f32 %v4834_v41, %v4696_v3  ;;  %v5932_v3 = vld [vmem:[#allocation11 + $0xb18] sm:$0xff] }
 0x7a6   : > { %v4972_v1 = vpop.f32.mrf.mxu1  ;;  %6109 = vmatpush.msrb.mxu2 %v5932_v3 }
 0x7a7   : > { %4881 = vmatmul.f32.gmra.mxu0 %v8382_v37  ;;  %v4973_v40 = vadd.f32 %v4972_v1, %v4835_v58  ;;  %v8386_v58 = vld [vmem:[%s9829_s7 + $0xe0] sm:$0xff] }
 0x7a8   : > { %4746 = vmatmul.f32.gmra.mxu3 %v8383_v31  ;;  %5405 = vmatmul.f32.gmra.mxu2 %v8380_v62 }
 0x7a9   : > { %v5120_v42 = vrot.slane %v4973_v40, 4  ;;  %5019 = vmatmul.f32.gmra.mxu1 %v8384_v18 }
 0x7ab   : > { %v4699_v39 = vpop.f32.mrf.mxu3  ;;  %v11785_v50 = vpop.f32.mrf.mxu2  ;;  %v5121_v24 = vsel %vm5104_vm4, %v5118_v6, %v5120_v42  ;;  %v8387_v6 = vld [vmem:[%s9836_s26 + $0xd8] sm:$0xff] }
 0x7ac   : > { %v4837_v27 = vpop.f32.mrf.mxu0  ;;  %v11789_v60 = vadd.f32 %v5121_v24, %v11438_v47 }
 0x7ad   : > { %v4838_v21 = vadd.f32 %v4837_v27, %v4699_v39  ;;  %v5302_v27 = vld [vmem:[#allocation11 + $0xa18] sm:$0xff] }
 0x7ae   : > { %v4975_v62 = vpop.f32.mrf.mxu1  ;;  %5599 = vmatpush.msrb.mxu0 %v5302_v27 }
 0x7af   : > { %4884 = vmatmul.f32.gmra.mxu0 %v8385_v2  ;;  %v4976_v41 = vadd.f32 %v4975_v62, %v4838_v21  ;;  %v5916_v21 = vld [vmem:[#allocation11 + $0xa98] sm:$0xff] }
 0x7b0   : > { %4749 = vmatmul.f32.gmra.mxu3 %v8386_v58  ;;  %5408 = vmatmul.f32.gmra.mxu2 %v8383_v31  ;;  %v8389_v62 = vld [vmem:[%s9829_s7 + $0xe8] sm:$0xff]  ;;  %v8390_v2 = vld [vmem:[%s9836_s26 + $0xe0] sm:$0xff] }
 0x7b1   : > { %v5122_v1 = vrot.slane %v4976_v41, 4  ;;  %5022 = vmatmul.f32.gmra.mxu1 %v8387_v6 }
 0x7b2   : > { %5973 = vmatpush.msrb.mxu1 %v5916_v21 }
 0x7b3   : > { %v4702_v37 = vpop.f32.mrf.mxu3  ;;  %v11794_v47 = vpop.f32.mrf.mxu2  ;;  %v5123_v40 = vsel %vm5104_vm4, %v5120_v42, %v5122_v1 }
 0x7b4   : > { %v4840_v18 = vpop.f32.mrf.mxu0  ;;  %v11798_v39 = vadd.f32 %v5123_v40, %v11447_v46 }
 0x7b5   : > { %v4841_v24 = vadd.f32 %v4840_v18, %v4702_v37 }
 0x7b6   : > { %v4978_v31 = vpop.f32.mrf.mxu1 }
 0x7b7   : > { %4887 = vmatmul.f32.gmra.mxu0 %v8388_v4  ;;  %v4979_v3 = vadd.f32 %v4978_v31, %v4841_v24  ;;  %v8391_v24 = vld [vmem:[%s9839_s21 + $0xe8] sm:$0xff]  ;;  %v8392_v31 = vld [vmem:[%s9829_s7 + $0xf0] sm:$0xff] }
 0x7b8   : > { %4752 = vmatmul.f32.gmra.mxu3 %v8389_v62  ;;  %5411 = vmatmul.f32.gmra.mxu2 %v8386_v58  ;;  %v8393_v4 = vld [vmem:[%s9836_s26 + $0xe8] sm:$0xff] }
 0x7b9   : > { %v5124_v42 = vrot.slane %v4979_v3, 4  ;;  %5025 = vmatmul.f32.gmra.mxu1 %v8390_v2 }
 0x7bb   : > { %v4705_v46 = vpop.f32.mrf.mxu3  ;;  %v11803_v41 = vpop.f32.mrf.mxu2  ;;  %v5125_v6 = vsel %vm5104_vm4, %v5122_v1, %v5124_v42 }
 0x7bc   : > { %v4843_v37 = vpop.f32.mrf.mxu0  ;;  %v11807_v40 = vadd.f32 %v5125_v6, %v11456_v35 }
 0x7bd   : > { %v4844_v18 = vadd.f32 %v4843_v37, %v4705_v46  ;;  %v5285_v37 = vld [vmem:[#allocation11 + $0x990] sm:$0xff] }
 0x7be   : > { %13325 = vst [vmem:[#allocation74_spill] sm:$0xff] %v11807_v40  ;;  %v4981_v27 = vpop.f32.mrf.mxu1  ;;  %5464 = vmatpush.msrb.mxu3 %v5285_v37 }
 0x7bf   : > { %4890 = vmatmul.f32.gmra.mxu0 %v8391_v24  ;;  %v4982_v21 = vadd.f32 %v4981_v27, %v4844_v18  ;;  %v5931_v18 = vld [vmem:[#allocation11 + $0xb10] sm:$0xff]  ;;  %v8394_v27 = vld [vmem:[%s9839_s21 + $0xf0] sm:$0xff] }
 0x7c0   : > { %4755 = vmatmul.f32.gmra.mxu3 %v8392_v31  ;;  %5414 = vmatmul.f32.gmra.mxu2 %v8389_v62 }
 0x7c1   : > { %v5126_v58 = vrot.slane %v4982_v21, 4  ;;  %5028 = vmatmul.f32.gmra.mxu1 %v8393_v4  ;;  %6110 = vmatpush.msrb.mxu2 %v5931_v18  ;;  %v8395_v21 = vld [vmem:[%s9829_s7 + $0xf8] sm:$0xff] }
 0x7c2   : > { %v5915_v18 = vld [vmem:[#allocation11 + $0xa90] sm:$0xff] }
 0x7c3   : > { %v4708_v3 = vpop.f32.mrf.mxu3  ;;  %v11812_v2 = vpop.f32.mrf.mxu2  ;;  %v5127_v1 = vsel %vm5104_vm4, %v5124_v42, %v5126_v58  ;;  %v8396_v42 = vld [vmem:[%s9836_s26 + $0xf0] sm:$0xff]  ;;  %5974 = vmatpush.msrb.mxu1 %v5915_v18 }
 0x7c4   : > { %v4846_v35 = vpop.f32.mrf.mxu0  ;;  %v11816_v46 = vadd.f32 %v5127_v1, %v11465_v15 }
 0x7c5   : > { %v4847_v6 = vadd.f32 %v4846_v35, %v4708_v3 }
 0x7c6   : > { %13326 = vst [vmem:[#allocation75_spill] sm:$0xff] %v11816_v46  ;;  %v4984_v62 = vpop.f32.mrf.mxu1 }
 0x7c7   : > { %4893 = vmatmul.f32.gmra.mxu0 %v8394_v27  ;;  %v4985_v24 = vadd.f32 %v4984_v62, %v4847_v6  ;;  %v5301_v6 = vld [vmem:[#allocation11 + $0xa10] sm:$0xff] }
 0x7c8   : > { %4758 = vmatmul.f32.gmra.mxu3 %v8395_v21  ;;  %5417 = vmatmul.f32.gmra.mxu2 %v8392_v31  ;;  %v8397_v62 = vld [vmem:[%s9839_s21 + $0xf8] sm:$0xff] }
 0x7c9   : > { %v5128_v4 = vrot.slane %v4985_v24, 4  ;;  %5031 = vmatmul.f32.gmra.mxu1 %v8396_v42  ;;  %5600 = vmatpush.msrb.mxu0 %v5301_v6  ;;  %v8398_v24 = vld [vmem:[%s9829_s7 + $0x100] sm:$0xff]  ;;  %v8399_v42 = vld [vmem:[%s9836_s26 + $0xf8] sm:$0xff] }
 0x7cb   : > { %v4711_v40 = vpop.f32.mrf.mxu3  ;;  %v11821_v15 = vpop.f32.mrf.mxu2  ;;  %v5129_v3 = vsel %vm5104_vm4, %v5126_v58, %v5128_v4 }
 0x7cc   : > { %v4849_v1 = vpop.f32.mrf.mxu0  ;;  %v11825_v35 = vadd.f32 %v5129_v3, %v11474_v19 }
 0x7cd   : > { %v4850_v37 = vadd.f32 %v4849_v1, %v4711_v40 }
 0x7ce   : > { %13327 = vst [vmem:[#allocation25_spill] sm:$0xff] %v11825_v35  ;;  %v4987_v31 = vpop.f32.mrf.mxu1 }
 0x7cf   : > { %4896 = vmatmul.f32.gmra.mxu0 %v8397_v62  ;;  %v4988_v27 = vadd.f32 %v4987_v31, %v4850_v37  ;;  %v5284_v37 = vld [vmem:[#allocation11 + $0x988] sm:$0xff]  ;;  %v8400_v31 = vld [vmem:[%s9839_s21 + $0x100] sm:$0xff]  ;;  %v8401_v62 = vld [vmem:[%s9829_s7 + $0x108] sm:$0xff] }
 0x7d0   : > { %4761 = vmatmul.f32.gmra.mxu3 %v8398_v24  ;;  %5420 = vmatmul.f32.gmra.mxu2 %v8395_v21 }
 0x7d1   : > { %v5130_v58 = vrot.slane %v4988_v27, 4  ;;  %5034 = vmatmul.f32.gmra.mxu1 %v8399_v42  ;;  %5465 = vmatpush.msrb.mxu3 %v5284_v37  ;;  %v8402_v42 = vld [vmem:[%s9836_s26 + $0x100] sm:$0xff]  ;;  %v5300_v37 = vld [vmem:[#allocation11 + $0xa08] sm:$0xff] }
 0x7d2   : > { %5601 = vmatpush.msrb.mxu0 %v5300_v37 }
 0x7d3   : > { %v4714_v46 = vpop.f32.mrf.mxu3  ;;  %v5131_v19 = vsel %vm5104_vm4, %v5128_v4, %v5130_v58  ;;  %v11831_v40 = vpop.f32.mrf.mxu2 }
 0x7d4   : > { %v4852_v3 = vpop.f32.mrf.mxu0  ;;  %v11834_v1 = vadd.f32 %v5131_v19, %v11483_v8 }
 0x7d5   : > { %v4853_v6 = vadd.f32 %v4852_v3, %v4714_v46 }
 0x7d6   : > { %13328 = vst [vmem:[#allocation26_spill] sm:$0xff] %v11834_v1  ;;  %v4990_v18 = vpop.f32.mrf.mxu1 }
 0x7d7   : > { %4899 = vmatmul.f32.gmra.mxu0 %v8400_v31  ;;  %v4991_v21 = vadd.f32 %v4990_v18, %v4853_v6  ;;  %v5930_v6 = vld [vmem:[#allocation11 + $0xb08] sm:$0xff]  ;;  %v8403_v31 = vld [vmem:[%s9839_s21 + $0x108] sm:$0xff] }
 0x7d8   : > { %4764 = vmatmul.f32.gmra.mxu3 %v8401_v62  ;;  %5423 = vmatmul.f32.gmra.mxu2 %v8398_v24  ;;  %v5914_v18 = vld [vmem:[#allocation11 + $0xa88] sm:$0xff] }
 0x7d9   : > { %v5132_v27 = vrot.slane %v4991_v21, 4  ;;  %5037 = vmatmul.f32.gmra.mxu1 %v8402_v42  ;;  %6111 = vmatpush.msrb.mxu2 %v5930_v6 }
 0x7da   : > { %5975 = vmatpush.msrb.mxu1 %v5914_v18 }
 0x7db   : > { %v4717_v4 = vpop.f32.mrf.mxu3  ;;  %v5133_v35 = vsel %vm5104_vm4, %v5130_v58, %v5132_v27  ;;  %v11840_v8 = vpop.f32.mrf.mxu2  ;;  %v8404_v58 = vld [vmem:[%s9829_s7 + $0x110] sm:$0xff] }
 0x7dc   : > { %v4855_v46 = vpop.f32.mrf.mxu0  ;;  %v11843_v19 = vadd.f32 %v5133_v35, %v11492_v17  ;;  %v8405_v17 = vld [vmem:[%s9836_s26 + $0x108] sm:$0xff] }
 0x7dd   : > { %v4856_v3 = vadd.f32 %v4855_v46, %v4717_v4 }
 0x7de   : > { %13329 = vst [vmem:[#allocation24_spill] sm:$0xff] %v11843_v19  ;;  %v4993_v24 = vpop.f32.mrf.mxu1  ;;  %v8407_v19 = vld [vmem:[%s9829_s7 + $0x118] sm:$0xff] }
 0x7df   : > { %4902 = vmatmul.f32.gmra.mxu0 %v8403_v31  ;;  %v4994_v21 = vadd.f32 %v4993_v24, %v4856_v3  ;;  %v8406_v3 = vld [vmem:[%s9839_s21 + $0x110] sm:$0xff] }
 0x7e0   : > { %4767 = vmatmul.f32.gmra.mxu3 %v8404_v58  ;;  %5426 = vmatmul.f32.gmra.mxu2 %v8401_v62 }
 0x7e1   : > { %v5134_v42 = vrot.slane %v4994_v21, 4  ;;  %5040 = vmatmul.f32.gmra.mxu1 %v8405_v17  ;;  %v8408_v21 = vld [vmem:[%s9836_s26 + $0x110] sm:$0xff] }
 0x7e3   : > { %v4720_v35 = vpop.f32.mrf.mxu3  ;;  %v5135_v4 = vsel %vm5104_vm4, %v5132_v27, %v5134_v42  ;;  %v11849_v46 = vpop.f32.mrf.mxu2 }
 0x7e4   : > { %v4858_v6 = vpop.f32.mrf.mxu0  ;;  %v11852_v37 = vadd.f32 %v5135_v4, %v11501_v51 }
 0x7e5   : > { %v4859_v31 = vadd.f32 %v4858_v6, %v4720_v35  ;;  %v5283_v6 = vld [vmem:[#allocation11 + $0x980] sm:$0xff] }
 0x7e6   : > { %13330 = vst [vmem:[#allocation78_spill] sm:$0xff] %v11852_v37  ;;  %v4996_v18 = vpop.f32.mrf.mxu1  ;;  %5466 = vmatpush.msrb.mxu3 %v5283_v6 }
 0x7e7   : > { %4905 = vmatmul.f32.gmra.mxu0 %v8406_v3  ;;  %v4997_v24 = vadd.f32 %v4996_v18, %v4859_v31  ;;  %v5929_v31 = vld [vmem:[#allocation11 + $0xb00] sm:$0xff]  ;;  %v8409_v18 = vld [vmem:[%s9839_s21 + $0x118] sm:$0xff] }
 0x7e8   : > { %4770 = vmatmul.f32.gmra.mxu3 %v8407_v19  ;;  %5429 = vmatmul.f32.gmra.mxu2 %v8404_v58 }
 0x7e9   : > { %v5136_v62 = vrot.slane %v4997_v24, 4  ;;  %5043 = vmatmul.f32.gmra.mxu1 %v8408_v21  ;;  %6112 = vmatpush.msrb.mxu2 %v5929_v31  ;;  %v8410_v24 = vld [vmem:[%s9829_s7 + $0x120] sm:$0xff]  ;;  %v8411_v21 = vld [vmem:[%s9836_s26 + $0x118] sm:$0xff]  ;;  %v5913_v31 = vld [vmem:[#allocation11 + $0xa80] sm:$0xff] }
 0x7ea   : > { %5976 = vmatpush.msrb.mxu1 %v5913_v31 }
 0x7eb   : > { %v4723_v27 = vpop.f32.mrf.mxu3  ;;  %v5137_v17 = vsel %vm5104_vm4, %v5134_v42, %v5136_v62  ;;  %v11858_v1 = vpop.f32.mrf.mxu2 }
 0x7ec   : > { %v4861_v51 = vpop.f32.mrf.mxu0  ;;  %v11861_v35 = vadd.f32 %v5137_v17, %v11510_v61 }
 0x7ed   : > { %v4862_v4 = vadd.f32 %v4861_v51, %v4723_v27 }
 0x7ee   : > { %13331 = vst [vmem:[#allocation28_spill] sm:$0xff] %v11861_v35  ;;  %v4999_v58 = vpop.f32.mrf.mxu1 }
 0x7ef   : > { %4908 = vmatmul.f32.gmra.mxu0 %v8409_v18  ;;  %v5000_v3 = vadd.f32 %v4999_v58, %v4862_v4  ;;  %v5299_v4 = vld [vmem:[#allocation11 + $0xa00] sm:$0xff]  ;;  %v8412_v58 = vld [vmem:[%s9839_s21 + $0x120] sm:$0xff] }
 0x7f0   : > { %4773 = vmatmul.f32.gmra.mxu3 %v8410_v24  ;;  %5432 = vmatmul.f32.gmra.mxu2 %v8407_v19 }
 0x7f1   : > { %v5138_v42 = vrot.slane %v5000_v3, 4  ;;  %5046 = vmatmul.f32.gmra.mxu1 %v8411_v21  ;;  %5602 = vmatpush.msrb.mxu0 %v5299_v4  ;;  %v8413_v3 = vld [vmem:[%s9829_s7 + $0x128] sm:$0xff]  ;;  %v8414_v21 = vld [vmem:[%s9836_s26 + $0x120] sm:$0xff] }
 0x7f3   : > { %v4726_v37 = vpop.f32.mrf.mxu3  ;;  %v5139_v61 = vsel %vm5104_vm4, %v5136_v62, %v5138_v42  ;;  %v11867_v27 = vpop.f32.mrf.mxu2 }
 0x7f4   : > { %v4864_v17 = vpop.f32.mrf.mxu0  ;;  %v11870_v51 = vadd.f32 %v5139_v61, %v11519_v22 }
 0x7f5   : > { %v4865_v6 = vadd.f32 %v4864_v17, %v4726_v37 }
 0x7f6   : > { %13332 = vst [vmem:[#allocation27_spill] sm:$0xff] %v11870_v51  ;;  %v5002_v19 = vpop.f32.mrf.mxu1 }
 0x7f7   : > { %4911 = vmatmul.f32.gmra.mxu0 %v8412_v58  ;;  %v5003_v18 = vadd.f32 %v5002_v19, %v4865_v6  ;;  %v5960_v6 = vld [vmem:[#allocation11 + $0xbf8] sm:$0xff]  ;;  %v8416_v58 = vld [vmem:[%s9829_s7 + $0x130] sm:$0xff] }
 0x7f8   : > { %4776 = vmatmul.f32.gmra.mxu3 %v8413_v3  ;;  %5435 = vmatmul.f32.gmra.mxu2 %v8410_v24  ;;  %v8415_v19 = vld [vmem:[%s9839_s21 + $0x128] sm:$0xff] }
 0x7f9   : > { %v5140_v62 = vrot.slane %v5003_v18, 4  ;;  %5049 = vmatmul.f32.gmra.mxu1 %v8414_v21  ;;  %6233 = vmatpush.msra.mxu3 %v5960_v6  ;;  %v8417_v21 = vld [vmem:[%s9836_s26 + $0x128] sm:$0xff] }
 0x7fa   : > { %v6578_v6 = vld [vmem:[#allocation11 + $0xc78] sm:$0xff] }
 0x7fb   : > { %v4729_v35 = vpop.f32.mrf.mxu3  ;;  %v5141_v22 = vsel %vm5104_vm4, %v5138_v42, %v5140_v62  ;;  %v11876_v37 = vpop.f32.mrf.mxu2  ;;  %6611 = vmatpush.msra.mxu0 %v6578_v6 }
 0x7fc   : > { %v4867_v61 = vpop.f32.mrf.mxu0  ;;  %v11879_v17 = vadd.f32 %v5141_v22, %v11528_v55 }
 0x7fd   : > { %v4868_v4 = vadd.f32 %v4867_v61, %v4729_v35 }
 0x7fe   : > { %13333 = vst [vmem:[#allocation30_spill] sm:$0xff] %v11879_v17  ;;  %v5005_v31 = vpop.f32.mrf.mxu1 }
 0x7ff   : > { %4914 = vmatmul.f32.gmra.mxu0 %v8415_v19  ;;  %v5006_v24 = vadd.f32 %v5005_v31, %v4868_v4  ;;  %v6610_v4 = vld [vmem:[#allocation11 + $0xd78] sm:$0xff]  ;;  %v8418_v19 = vld [vmem:[%s9839_s21 + $0x130] sm:$0xff] }
 0x800   : > { %4779 = vmatmul.f32.gmra.mxu3 %v8416_v58  ;;  %5438 = vmatmul.f32.gmra.mxu2 %v8413_v3  ;;  %v6594_v31 = vld [vmem:[#allocation11 + $0xcf8] sm:$0xff] }
 0x801   : > { %v5142_v18 = vrot.slane %v5006_v24, 4  ;;  %5052 = vmatmul.f32.gmra.mxu1 %v8417_v21  ;;  %6883 = vmatpush.msra.mxu2 %v6610_v4 }
 0x802   : > { %6747 = vmatpush.msra.mxu1 %v6594_v31 }
 0x803   : > { %v4732_v42 = vpop.f32.mrf.mxu3  ;;  %v5143_v51 = vsel %vm5104_vm4, %v5140_v62, %v5142_v18  ;;  %v11885_v55 = vpop.f32.mrf.mxu2  ;;  %v8419_v62 = vld [vmem:[%s9829_s7 + $0x138] sm:$0xff] }
 0x804   : > { %v4870_v35 = vpop.f32.mrf.mxu0  ;;  %v11888_v22 = vadd.f32 %v5143_v51, %v11537_v33  ;;  %v8420_v33 = vld [vmem:[%s9836_s26 + $0x130] sm:$0xff] }
 0x805   : > { %v4871_v61 = vadd.f32 %v4870_v35, %v4732_v42 }
 0x806   : > { %13334 = vst [vmem:[#allocation31_spill] sm:$0xff] %v11888_v22  ;;  %v5008_v3 = vpop.f32.mrf.mxu1  ;;  %v8422_v22 = vld [vmem:[%s9829_s7 + $0x140] sm:$0xff] }
 0x807   : > { %4917 = vmatmul.f32.gmra.mxu0 %v8418_v19  ;;  %v5009_v24 = vadd.f32 %v5008_v3, %v4871_v61  ;;  %v8421_v61 = vld [vmem:[%s9839_s21 + $0x138] sm:$0xff] }
 0x808   : > { %4782 = vmatmul.f32.gmra.mxu3 %v8419_v62  ;;  %5441 = vmatmul.f32.gmra.mxu2 %v8416_v58 }
 0x809   : > { %v5144_v21 = vrot.slane %v5009_v24, 4  ;;  %5055 = vmatmul.f32.gmra.mxu1 %v8420_v33  ;;  %v8423_v24 = vld [vmem:[%s9836_s26 + $0x138] sm:$0xff] }
 0x80b   : > { %v4735_v51 = vpop.f32.mrf.mxu3  ;;  %v5145_v42 = vsel %vm5104_vm4, %v5142_v18, %v5144_v21  ;;  %v11894_v35 = vpop.f32.mrf.mxu2 }
 0x80c   : > { %v4873_v4 = vpop.f32.mrf.mxu0  ;;  %v11897_v6 = vadd.f32 %v5145_v42, %v11546_v10 }
 0x80d   : > { %v4874_v19 = vadd.f32 %v4873_v4, %v4735_v51  ;;  %v5959_v4 = vld [vmem:[#allocation11 + $0xbf0] sm:$0xff] }
 0x80e   : > { %13335 = vst [vmem:[#allocation76_spill] sm:$0xff] %v11897_v6  ;;  %v5011_v31 = vpop.f32.mrf.mxu1  ;;  %6234 = vmatpush.msra.mxu3 %v5959_v4 }
 0x80f   : > { %4920 = vmatmul.f32.gmra.mxu0 %v8421_v61  ;;  %v5012_v3 = vadd.f32 %v5011_v31, %v4874_v19  ;;  %v6609_v19 = vld [vmem:[#allocation11 + $0xd70] sm:$0xff] }
 0x810   : > { %4785 = vmatmul.f32.gmra.mxu3 %v8422_v22  ;;  %5444 = vmatmul.f32.gmra.mxu2 %v8419_v62  ;;  %v8424_v31 = vld [vmem:[%s9839_s21 + $0x140] sm:$0xff] }
 0x811   : > { %v5146_v58 = vrot.slane %v5012_v3, 4  ;;  %5058 = vmatmul.f32.gmra.mxu1 %v8423_v24  ;;  %6884 = vmatpush.msra.mxu2 %v6609_v19  ;;  %v8425_v3 = vld [vmem:[%s9839_s21] sm:$0xff] }
 0x812   : > { %v8426_v24 = vld [vmem:[%s9836_s26 + $0x140] sm:$0xff] }
 0x813   : > { %v4738_v18 = vpop.f32.mrf.mxu3  ;;  %v5147_v33 = vsel %vm5104_vm4, %v5144_v21, %v5146_v58  ;;  %v11903_v17 = vpop.f32.mrf.mxu2  ;;  %v6593_v19 = vld [vmem:[#allocation11 + $0xcf0] sm:$0xff] }
 0x814   : > { %v4876_v10 = vpop.f32.mrf.mxu0  ;;  %v11906_v51 = vadd.f32 %v5147_v33, %v11555_v7  ;;  %6748 = vmatpush.msra.mxu1 %v6593_v19 }
 0x815   : > { %v4877_v42 = vadd.f32 %v4876_v10, %v4738_v18 }
 0x816   : > { %13336 = vst [vmem:[#allocation77_spill] sm:$0xff] %v11906_v51  ;;  %v5014_v62 = vpop.f32.mrf.mxu1 }
 0x817   : > { %4923 = vmatmul.f32.gmra.mxu0 %v8424_v31  ;;  %v5015_v61 = vadd.f32 %v5014_v62, %v4877_v42  ;;  %v6577_v42 = vld [vmem:[#allocation11 + $0xc70] sm:$0xff] }
 0x818   : > { %5467 = vmatmul.f32.vlgmr.msrb.gmra.mxu3 %v8425_v3  ;;  %5447 = vmatmul.f32.gmra.mxu2 %v8422_v22  ;;  %v8427_v62 = vld [vmem:[%s9836_s26] sm:$0xff] }
 0x819   : > { %v5148_v21 = vrot.slane %v5015_v61, 4  ;;  %5061 = vmatmul.f32.gmra.mxu1 %v8426_v24  ;;  %6612 = vmatpush.msra.mxu0 %v6577_v42  ;;  %v8428_v61 = vld [vmem:[%s9839_s21 + $0x8] sm:$0xff]  ;;  %v8429_v24 = vld [vmem:[%s9829_s7] sm:$0xff] }
 0x81b   : > { %v4741_v6 = vpop.f32.mrf.mxu3  ;;  %v5149_v7 = vsel %vm5104_vm4, %v5146_v58, %v5148_v21  ;;  %v11912_v18 = vpop.f32.mrf.mxu2 }
 0x81c   : > { %v4879_v33 = vpop.f32.mrf.mxu0  ;;  %v11915_v10 = vadd.f32 %v5149_v7, %v11564_v9 }
 0x81d   : > { %v4880_v4 = vadd.f32 %v4879_v33, %v4741_v6 }
 0x81e   : > { %13337 = vst [vmem:[#allocation32_spill] sm:$0xff] %v11915_v10  ;;  %v5017_v22 = vpop.f32.mrf.mxu1  ;;  %v8431_v10 = vld [vmem:[%s9839_s21 + $0x10] sm:$0xff] }
 0x81f   : > { %5603 = vmatmul.f32.vlgmr.msrb.gmra.mxu0 %v8427_v62  ;;  %v5018_v31 = vadd.f32 %v5017_v22, %v4880_v4  ;;  %v8430_v4 = vld [vmem:[%s9836_s26 + $0x8] sm:$0xff] }
 0x820   : > { %5469 = vmatmul.f32.gmra.mxu3 %v8428_v61  ;;  %6113 = vmatmul.f32.vlgmr.msrb.gmra.mxu2 %v8425_v3 }
 0x821   : > { %v5150_v58 = vrot.slane %v5018_v31, 4  ;;  %5977 = vmatmul.f32.vlgmr.msrb.gmra.mxu1 %v8429_v24  ;;  %v8432_v31 = vld [vmem:[%s9829_s7 + $0x8] sm:$0xff] }
 0x823   : > { %v4744_v9 = vpop.f32.mrf.mxu3  ;;  %v5151_v6 = vsel %vm5104_vm4, %v5148_v21, %v5150_v58  ;;  %v11921_v7 = vpop.f32.mrf.mxu2 }
 0x824   : > { %v4882_v33 = vpop.f32.mrf.mxu0  ;;  %v11924_v42 = vadd.f32 %v5151_v6, %v11573_v36 }
 0x825   : > { %v4883_v19 = vadd.f32 %v4882_v33, %v4744_v9  ;;  %v5958_v33 = vld [vmem:[#allocation11 + $0xbe8] sm:$0xff] }
 0x826   : > { %13338 = vst [vmem:[#allocation79_spill] sm:$0xff] %v11924_v42  ;;  %v5020_v62 = vpop.f32.mrf.mxu1  ;;  %6235 = vmatpush.msra.mxu3 %v5958_v33 }
 0x827   : > { %5605 = vmatmul.f32.gmra.mxu0 %v8430_v4  ;;  %v5021_v22 = vadd.f32 %v5020_v62, %v4883_v19  ;;  %v6608_v19 = vld [vmem:[#allocation11 + $0xd68] sm:$0xff] }
 0x828   : > { %5471 = vmatmul.f32.gmra.mxu3 %v8431_v10  ;;  %6115 = vmatmul.f32.gmra.mxu2 %v8428_v61  ;;  %v6576_v62 = vld [vmem:[#allocation11 + $0xc68] sm:$0xff] }
 0x829   : > { %v5152_v3 = vrot.slane %v5021_v22, 4  ;;  %5979 = vmatmul.f32.gmra.mxu1 %v8432_v31  ;;  %6885 = vmatpush.msra.mxu2 %v6608_v19  ;;  %v6592_v61 = vld [vmem:[#allocation11 + $0xce8] sm:$0xff] }
 0x82a   : > { %v8433_v22 = vld [vmem:[%s9836_s26 + $0x10] sm:$0xff]  ;;  %6749 = vmatpush.msra.mxu1 %v6592_v61  ;;  %v8434_v31 = vld [vmem:[%s9839_s21 + $0x18] sm:$0xff]  ;;  %6613 = vmatpush.msra.mxu0 %v6576_v62  ;;  %v8437_v62 = vld [vmem:[%s9839_s21 + $0x20] sm:$0xff] }
 0x82b   : > { %v4747_v24 = vpop.f32.mrf.mxu3  ;;  %v5153_v21 = vsel %vm5104_vm4, %v5150_v58, %v5152_v3  ;;  %v11930_v51 = vpop.f32.mrf.mxu2 }
 0x82c   : > { %v4885_v36 = vpop.f32.mrf.mxu0  ;;  %v11933_v9 = vadd.f32 %v5153_v21, %v11582_v59 }
 0x82d   : > { %v4886_v6 = vadd.f32 %v4885_v36, %v4747_v24  ;;  %v8435_v24 = vld [vmem:[%s9829_s7 + $0x10] sm:$0xff] }
 0x82e   : > { %13339 = vst [vmem:[#allocation80_spill] sm:$0xff] %v11933_v9  ;;  %v5023_v4 = vpop.f32.mrf.mxu1 }
 0x82f   : > { %5607 = vmatmul.f32.gmra.mxu0 %v8433_v22  ;;  %v5024_v58 = vadd.f32 %v5023_v4, %v4886_v6  ;;  %v8436_v4 = vld [vmem:[%s9836_s26 + $0x18] sm:$0xff] }
 0x830   : > { %5473 = vmatmul.f32.gmra.mxu3 %v8434_v31  ;;  %6117 = vmatmul.f32.gmra.mxu2 %v8431_v10 }
 0x831   : > { %v5154_v59 = vrot.slane %v5024_v58, 4  ;;  %5981 = vmatmul.f32.gmra.mxu1 %v8435_v24  ;;  %v8438_v58 = vld [vmem:[%s9829_s7 + $0x18] sm:$0xff] }
 0x833   : > { %v4750_v21 = vpop.f32.mrf.mxu3  ;;  %v5155_v36 = vsel %vm5104_vm4, %v5152_v3, %v5154_v59  ;;  %v11939_v33 = vpop.f32.mrf.mxu2 }
 0x834   : > { %v4888_v19 = vpop.f32.mrf.mxu0  ;;  %v11942_v22 = vadd.f32 %v5155_v36, %v11591_v23 }
 0x835   : > { %v4889_v61 = vadd.f32 %v4888_v19, %v4750_v21  ;;  %v5957_v19 = vld [vmem:[#allocation11 + $0xbe0] sm:$0xff] }
 0x836   : > { %13340 = vst [vmem:[#allocation33_spill] sm:$0xff] %v11942_v22  ;;  %v5026_v6 = vpop.f32.mrf.mxu1  ;;  %6236 = vmatpush.msra.mxu3 %v5957_v19 }
 0x837   : > { %5609 = vmatmul.f32.gmra.mxu0 %v8436_v4  ;;  %v5027_v9 = vadd.f32 %v5026_v6, %v4889_v61  ;;  %v6607_v61 = vld [vmem:[#allocation11 + $0xd60] sm:$0xff] }
 0x838   : > { %5475 = vmatmul.f32.gmra.mxu3 %v8437_v62  ;;  %6119 = vmatmul.f32.gmra.mxu2 %v8434_v31  ;;  %v8440_v4 = vld [vmem:[%s9839_s21 + $0x28] sm:$0xff] }
 0x839   : > { %v5156_v10 = vrot.slane %v5027_v9, 4  ;;  %5983 = vmatmul.f32.gmra.mxu1 %v8438_v58  ;;  %6886 = vmatpush.msra.mxu2 %v6607_v61  ;;  %v8439_v9 = vld [vmem:[%s9836_s26 + $0x20] sm:$0xff]  ;;  %v6591_v61 = vld [vmem:[#allocation11 + $0xce0] sm:$0xff] }
 0x83a   : > { %v8441_v58 = vld [vmem:[%s9829_s7 + $0x20] sm:$0xff]  ;;  %6750 = vmatpush.msra.mxu1 %v6591_v61 }
 0x83b   : > { %v4753_v3 = vpop.f32.mrf.mxu3  ;;  %v5157_v24 = vsel %vm5104_vm4, %v5154_v59, %v5156_v10  ;;  %v11948_v42 = vpop.f32.mrf.mxu2 }
 0x83c   : > { %v4891_v23 = vpop.f32.mrf.mxu0  ;;  %v11951_v21 = vadd.f32 %v5157_v24, %v11600_v28 }
 0x83d   : > { %v4892_v36 = vadd.f32 %v4891_v23, %v4753_v3 }
 0x83e   : > { %13341 = vst [vmem:[#allocation81_spill] sm:$0xff] %v11951_v21  ;;  %v5029_v31 = vpop.f32.mrf.mxu1 }
 0x83f   : > { %5611 = vmatmul.f32.gmra.mxu0 %v8439_v9  ;;  %v5030_v6 = vadd.f32 %v5029_v31, %v4892_v36  ;;  %v6575_v36 = vld [vmem:[#allocation11 + $0xc60] sm:$0xff] }
 0x840   : > { %5478 = vmatmul.f32.gmra.mxu3 %v8440_v4  ;;  %6121 = vmatmul.f32.gmra.mxu2 %v8437_v62  ;;  %v8442_v31 = vld [vmem:[%s9836_s26 + $0x28] sm:$0xff] }
 0x841   : > { %v5158_v59 = vrot.slane %v5030_v6, 4  ;;  %5985 = vmatmul.f32.gmra.mxu1 %v8441_v58  ;;  %6614 = vmatpush.msra.mxu0 %v6575_v36  ;;  %v8443_v6 = vld [vmem:[%s9839_s21 + $0x30] sm:$0xff]  ;;  %v8444_v58 = vld [vmem:[%s9829_s7 + $0x28] sm:$0xff] }
 0x843   : > { %v4756_v22 = vpop.f32.mrf.mxu3  ;;  %v5159_v28 = vsel %vm5104_vm4, %v5156_v10, %v5158_v59  ;;  %v11957_v3 = vpop.f32.mrf.mxu2 }
 0x844   : > { %v4894_v24 = vpop.f32.mrf.mxu0  ;;  %v11960_v23 = vadd.f32 %v5159_v28, %v11609_v48 }
 0x845   : > { %v4895_v19 = vadd.f32 %v4894_v24, %v4756_v22 }
 0x846   : > { %13342 = vst [vmem:[#allocation82_spill] sm:$0xff] %v11960_v23  ;;  %v5032_v62 = vpop.f32.mrf.mxu1  ;;  %v8446_v23 = vld [vmem:[%s9839_s21 + $0x38] sm:$0xff] }
 0x847   : > { %5614 = vmatmul.f32.gmra.mxu0 %v8442_v31  ;;  %v5033_v9 = vadd.f32 %v5032_v62, %v4895_v19  ;;  %v8445_v19 = vld [vmem:[%s9836_s26 + $0x30] sm:$0xff] }
 0x848   : > { %5481 = vmatmul.f32.gmra.mxu3 %v8443_v6  ;;  %6124 = vmatmul.f32.gmra.mxu2 %v8440_v4 }
 0x849   : > { %v5160_v10 = vrot.slane %v5033_v9, 4  ;;  %5988 = vmatmul.f32.gmra.mxu1 %v8444_v58  ;;  %v8447_v9 = vld [vmem:[%s9829_s7 + $0x30] sm:$0xff] }
 0x84b   : > { %v4759_v48 = vpop.f32.mrf.mxu3  ;;  %v5161_v22 = vsel %vm5104_vm4, %v5158_v59, %v5160_v10  ;;  %v11966_v28 = vpop.f32.mrf.mxu2 }
 0x84c   : > { %v4897_v24 = vpop.f32.mrf.mxu0  ;;  %v11969_v36 = vadd.f32 %v5161_v22, %v11618_v11 }
 0x84d   : > { %v4898_v61 = vadd.f32 %v4897_v24, %v4759_v48  ;;  %v5956_v24 = vld [vmem:[#allocation11 + $0xbd8] sm:$0xff] }
 0x84e   : > { %13343 = vst [vmem:[#allocation83_spill] sm:$0xff] %v11969_v36  ;;  %v5035_v31 = vpop.f32.mrf.mxu1  ;;  %6237 = vmatpush.msra.mxu3 %v5956_v24 }
 0x84f   : > { %5617 = vmatmul.f32.gmra.mxu0 %v8445_v19  ;;  %v5036_v62 = vadd.f32 %v5035_v31, %v4898_v61  ;;  %v6606_v61 = vld [vmem:[#allocation11 + $0xd58] sm:$0xff] }
 0x850   : > { %5484 = vmatmul.f32.gmra.mxu3 %v8446_v23  ;;  %6127 = vmatmul.f32.gmra.mxu2 %v8443_v6  ;;  %v6574_v31 = vld [vmem:[#allocation11 + $0xc58] sm:$0xff] }
 0x851   : > { %v5162_v4 = vrot.slane %v5036_v62, 4  ;;  %5991 = vmatmul.f32.gmra.mxu1 %v8447_v9  ;;  %6887 = vmatpush.msra.mxu2 %v6606_v61  ;;  %v6590_v6 = vld [vmem:[#allocation11 + $0xcd8] sm:$0xff]  ;;  %v8448_v62 = vld [vmem:[%s9836_s26 + $0x38] sm:$0xff] }
 0x852   : > { %6751 = vmatpush.msra.mxu1 %v6590_v6  ;;  %v8449_v9 = vld [vmem:[%s9839_s21 + $0x40] sm:$0xff]  ;;  %6615 = vmatpush.msra.mxu0 %v6574_v31 }
 0x853   : > { %v4762_v58 = vpop.f32.mrf.mxu3  ;;  %v5163_v59 = vsel %vm5104_vm4, %v5160_v10, %v5162_v4  ;;  %v11975_v21 = vpop.f32.mrf.mxu2 }
 0x854   : > { %v4900_v11 = vpop.f32.mrf.mxu0  ;;  %v11978_v48 = vadd.f32 %v5163_v59, %v11627_v0 }
 0x855   : > { %v4901_v22 = vadd.f32 %v4900_v11, %v4762_v58  ;;  %v8450_v58 = vld [vmem:[%s9829_s7 + $0x38] sm:$0xff] }
 0x856   : > { %13344 = vst [vmem:[#allocation84_spill] sm:$0xff] %v11978_v48  ;;  %v5038_v19 = vpop.f32.mrf.mxu1 }
 0x857   : > { %5620 = vmatmul.f32.gmra.mxu0 %v8448_v62  ;;  %v5039_v10 = vadd.f32 %v5038_v19, %v4901_v22  ;;  %v8451_v19 = vld [vmem:[%s9836_s26 + $0x40] sm:$0xff] }
 0x858   : > { %5487 = vmatmul.f32.gmra.mxu3 %v8449_v9  ;;  %6130 = vmatmul.f32.gmra.mxu2 %v8446_v23  ;;  %v8452_v23 = vld [vmem:[%s9839_s21 + $0x48] sm:$0xff] }
 0x859   : > { %v5164_v0 = vrot.slane %v5039_v10, 4  ;;  %5994 = vmatmul.f32.gmra.mxu1 %v8450_v58  ;;  %v8453_v10 = vld [vmem:[%s9829_s7 + $0x40] sm:$0xff] }
 0x85b   : > { %v4765_v59 = vpop.f32.mrf.mxu3  ;;  %v5165_v11 = vsel %vm5104_vm4, %v5162_v4, %v5164_v0  ;;  %v11984_v24 = vpop.f32.mrf.mxu2 }
 0x85c   : > { %v4903_v61 = vpop.f32.mrf.mxu0  ;;  %v11987_v62 = vadd.f32 %v5165_v11, %v11636_v44 }
 0x85d   : > { %v4904_v6 = vadd.f32 %v4903_v61, %v4765_v59  ;;  %v5955_v61 = vld [vmem:[#allocation11 + $0xbd0] sm:$0xff] }
 0x85e   : > { %13345 = vst [vmem:[#allocation85_spill] sm:$0xff] %v11987_v62  ;;  %v5041_v22 = vpop.f32.mrf.mxu1  ;;  %6238 = vmatpush.msra.mxu3 %v5955_v61  ;;  %v6573_v61 = vld [vmem:[#allocation11 + $0xc50] sm:$0xff] }
 0x85f   : > { %5623 = vmatmul.f32.gmra.mxu0 %v8451_v19  ;;  %v5042_v48 = vadd.f32 %v5041_v22, %v4904_v6  ;;  %v8454_v22 = vld [vmem:[%s9836_s26 + $0x48] sm:$0xff] }
 0x860   : > { %5490 = vmatmul.f32.gmra.mxu3 %v8452_v23  ;;  %6133 = vmatmul.f32.gmra.mxu2 %v8449_v9 }
 0x861   : > { %v5166_v31 = vrot.slane %v5042_v48, 4  ;;  %5997 = vmatmul.f32.gmra.mxu1 %v8453_v10  ;;  %v8455_v48 = vld [vmem:[%s9839_s21 + $0x50] sm:$0xff]  ;;  %v8456_v10 = vld [vmem:[%s9829_s7 + $0x48] sm:$0xff]  ;;  %6616 = vmatpush.msra.mxu0 %v6573_v61 }
 0x863   : > { %v4768_v4 = vpop.f32.mrf.mxu3  ;;  %v5167_v58 = vsel %vm5104_vm4, %v5164_v0, %v5166_v31  ;;  %v11993_v36 = vpop.f32.mrf.mxu2 }
 0x864   : > { %v4906_v44 = vpop.f32.mrf.mxu0  ;;  %v11996_v59 = vadd.f32 %v5167_v58, %v11645_v32 }
 0x865   : > { %v4907_v11 = vadd.f32 %v4906_v44, %v4768_v4 }
 0x866   : > { %13346 = vst [vmem:[#allocation86_spill] sm:$0xff] %v11996_v59  ;;  %v5044_v6 = vpop.f32.mrf.mxu1 }
 0x867   : > { %5626 = vmatmul.f32.gmra.mxu0 %v8454_v22  ;;  %v5045_v9 = vadd.f32 %v5044_v6, %v4907_v11  ;;  %v6605_v11 = vld [vmem:[#allocation11 + $0xd50] sm:$0xff]  ;;  %v8457_v22 = vld [vmem:[%s9836_s26 + $0x50] sm:$0xff] }
 0x868   : > { %5493 = vmatmul.f32.gmra.mxu3 %v8455_v48  ;;  %6136 = vmatmul.f32.gmra.mxu2 %v8452_v23  ;;  %v6589_v6 = vld [vmem:[#allocation11 + $0xcd0] sm:$0xff] }
 0x869   : > { %v5168_v19 = vrot.slane %v5045_v9, 4  ;;  %6000 = vmatmul.f32.gmra.mxu1 %v8456_v10  ;;  %6888 = vmatpush.msra.mxu2 %v6605_v11 }
 0x86a   : > { %6752 = vmatpush.msra.mxu1 %v6589_v6 }
 0x86b   : > { %v4771_v0 = vpop.f32.mrf.mxu3  ;;  %v5169_v62 = vsel %vm5104_vm4, %v5166_v31, %v5168_v19  ;;  %v12002_v32 = vpop.f32.mrf.mxu2  ;;  %v8458_v31 = vld [vmem:[%s9839_s21 + $0x58] sm:$0xff] }
 0x86c   : > { %v4909_v4 = vpop.f32.mrf.mxu0  ;;  %v12005_v58 = vadd.f32 %v5169_v62, %v11654_v56  ;;  %v8459_v56 = vld [vmem:[%s9829_s7 + $0x50] sm:$0xff] }
 0x86d   : > { %v4910_v44 = vadd.f32 %v4909_v4, %v4771_v0 }
 0x86e   : > { %13347 = vst [vmem:[#allocation87_spill] sm:$0xff] %v12005_v58  ;;  %v5047_v23 = vpop.f32.mrf.mxu1 }
 0x86f   : > { %5629 = vmatmul.f32.gmra.mxu0 %v8457_v22  ;;  %v5048_v9 = vadd.f32 %v5047_v23, %v4910_v44  ;;  %v8460_v44 = vld [vmem:[%s9836_s26 + $0x58] sm:$0xff] }
 0x870   : > { %5496 = vmatmul.f32.gmra.mxu3 %v8458_v31  ;;  %6139 = vmatmul.f32.gmra.mxu2 %v8455_v48  ;;  %v8461_v48 = vld [vmem:[%s9839_s21 + $0x60] sm:$0xff] }
 0x871   : > { %v5170_v10 = vrot.slane %v5048_v9, 4  ;;  %6003 = vmatmul.f32.gmra.mxu1 %v8459_v56  ;;  %v8462_v56 = vld [vmem:[%s9829_s7 + $0x58] sm:$0xff] }
 0x873   : > { %v4774_v62 = vpop.f32.mrf.mxu3  ;;  %v5171_v0 = vsel %vm5104_vm4, %v5168_v19, %v5170_v10  ;;  %v12011_v4 = vpop.f32.mrf.mxu2 }
 0x874   : > { %v4912_v11 = vpop.f32.mrf.mxu0  ;;  %v12014_v61 = vadd.f32 %v5171_v0, %v11663_v45 }
 0x875   : > { %v4913_v22 = vadd.f32 %v4912_v11, %v4774_v62 }
 0x876   : > { %13348 = vst [vmem:[#allocation94_spill] sm:$0xff] %v12014_v61  ;;  %v5050_v6 = vpop.f32.mrf.mxu1 }
 0x877   : > { %5632 = vmatmul.f32.gmra.mxu0 %v8460_v44  ;;  %v5051_v23 = vadd.f32 %v5050_v6, %v4913_v22  ;;  %v8463_v22 = vld [vmem:[%s9836_s26 + $0x60] sm:$0xff] }
 0x878   : > { %5499 = vmatmul.f32.gmra.mxu3 %v8461_v48  ;;  %6142 = vmatmul.f32.gmra.mxu2 %v8458_v31  ;;  %v8464_v31 = vld [vmem:[%s9839_s21 + $0x68] sm:$0xff] }
 0x879   : > { %v5172_v9 = vrot.slane %v5051_v23, 4  ;;  %6006 = vmatmul.f32.gmra.mxu1 %v8462_v56  ;;  %v8465_v23 = vld [vmem:[%s9829_s7 + $0x60] sm:$0xff] }
 0x87b   : > { %v4777_v19 = vpop.f32.mrf.mxu3  ;;  %v5173_v58 = vsel %vm5104_vm4, %v5170_v10, %v5172_v9  ;;  %v12020_v59 = vpop.f32.mrf.mxu2 }
 0x87c   : > { %v4915_v45 = vpop.f32.mrf.mxu0  ;;  %v12023_v62 = vadd.f32 %v5173_v58, %v11672_v53 }
 0x87d   : > { %v4916_v0 = vadd.f32 %v4915_v45, %v4777_v19 }
 0x87e   : > { %13349 = vst [vmem:[#allocation88_spill] sm:$0xff] %v12023_v62  ;;  %v5053_v11 = vpop.f32.mrf.mxu1 }
 0x87f   : > { %5635 = vmatmul.f32.gmra.mxu0 %v8463_v22  ;;  %v5054_v6 = vadd.f32 %v5053_v11, %v4916_v0  ;;  %v8466_v0 = vld [vmem:[%s9836_s26 + $0x68] sm:$0xff]  ;;  %v8467_v22 = vld [vmem:[%s9839_s21 + $0x70] sm:$0xff] }
 0x880   : > { %5502 = vmatmul.f32.gmra.mxu3 %v8464_v31  ;;  %6145 = vmatmul.f32.gmra.mxu2 %v8461_v48 }
 0x881   : > { %v5174_v44 = vrot.slane %v5054_v6, 4  ;;  %6009 = vmatmul.f32.gmra.mxu1 %v8465_v23  ;;  %v8468_v6 = vld [vmem:[%s9829_s7 + $0x68] sm:$0xff] }
 0x883   : > { %v4780_v10 = vpop.f32.mrf.mxu3  ;;  %v5175_v56 = vsel %vm5104_vm4, %v5172_v9, %v5174_v44  ;;  %v12029_v61 = vpop.f32.mrf.mxu2 }
 0x884   : > { %v4918_v53 = vpop.f32.mrf.mxu0  ;;  %v12032_v58 = vadd.f32 %v5175_v56, %v11681_v25 }
 0x885   : > { %v4919_v19 = vadd.f32 %v4918_v53, %v4780_v10  ;;  %v5954_v53 = vld [vmem:[#allocation11 + $0xbc8] sm:$0xff] }
 0x886   : > { %13350 = vst [vmem:[#allocation89_spill] sm:$0xff] %v12032_v58  ;;  %v5056_v45 = vpop.f32.mrf.mxu1  ;;  %6239 = vmatpush.msra.mxu3 %v5954_v53  ;;  %v8470_v58 = vld [vmem:[%s9839_s21 + $0x78] sm:$0xff] }
 0x887   : > { %5638 = vmatmul.f32.gmra.mxu0 %v8466_v0  ;;  %v5057_v11 = vadd.f32 %v5056_v45, %v4919_v19  ;;  %v6604_v19 = vld [vmem:[#allocation11 + $0xd48] sm:$0xff] }
 0x888   : > { %5505 = vmatmul.f32.gmra.mxu3 %v8467_v22  ;;  %6148 = vmatmul.f32.gmra.mxu2 %v8464_v31  ;;  %v6572_v45 = vld [vmem:[#allocation11 + $0xc48] sm:$0xff] }
 0x889   : > { %v5176_v48 = vrot.slane %v5057_v11, 4  ;;  %6012 = vmatmul.f32.gmra.mxu1 %v8468_v6  ;;  %v8469_v31 = vld [vmem:[%s9836_s26 + $0x70] sm:$0xff]  ;;  %6889 = vmatpush.msra.mxu2 %v6604_v19 }
 0x88a   : > { %v5953_v11 = vld [vmem:[#allocation11 + $0xbc0] sm:$0xff]  ;;  %6617 = vmatpush.msra.mxu0 %v6572_v45 }
 0x88b   : > { %v4783_v9 = vpop.f32.mrf.mxu3  ;;  %v5177_v23 = vsel %vm5104_vm4, %v5174_v44, %v5176_v48  ;;  %v12038_v62 = vpop.f32.mrf.mxu2  ;;  %v6588_v44 = vld [vmem:[#allocation11 + $0xcc8] sm:$0xff]  ;;  %6240 = vmatpush.msra.mxu3 %v5953_v11  ;;  %v6571_v19 = vld [vmem:[#allocation11 + $0xc40] sm:$0xff] }
 0x88c   : > { %13351 = vst [vmem:[#allocation90_spill] sm:$0xff] %v12038_v62  ;;  %v4921_v25 = vpop.f32.mrf.mxu0  ;;  %v12041_v10 = vadd.f32 %v5177_v23, %v11690_v13  ;;  %v6603_v62 = vld [vmem:[#allocation11 + $0xd40] sm:$0xff]  ;;  %6753 = vmatpush.msra.mxu1 %v6588_v44  ;;  %6618 = vmatpush.msra.mxu0 %v6571_v19  ;;  %v8472_v11 = vld [vmem:[%s9836_s26 + $0x78] sm:$0xff] }
 0x88d   : > { %v4922_v56 = vadd.f32 %v4921_v25, %v4783_v9  ;;  %v8471_v23 = vld [vmem:[%s9829_s7 + $0x70] sm:$0xff]  ;;  %6890 = vmatpush.msra.mxu2 %v6603_v62  ;;  %v8473_v62 = vld [vmem:[%s9839_s21 + $0x80] sm:$0xff]  ;;  %v8474_v44 = vld [vmem:[%s9829_s7 + $0x78] sm:$0xff] }
 0x88e   : > { %13352 = vst [vmem:[#allocation91_spill] sm:$0xff] %v12041_v10  ;;  %v5059_v0 = vpop.f32.mrf.mxu1 }
 0x88f   : > { %5641 = vmatmul.f32.gmra.mxu0 %v8469_v31  ;;  %v5060_v6 = vadd.f32 %v5059_v0, %v4922_v56  ;;  %v6587_v0 = vld [vmem:[#allocation11 + $0xcc0] sm:$0xff] }
 0x890   : > { %5508 = vmatmul.f32.gmra.mxu3 %v8470_v58  ;;  %6151 = vmatmul.f32.gmra.mxu2 %v8467_v22 }
 0x891   : > { %v5178_v13 = vrot.slane %v5060_v6, 4  ;;  %6015 = vmatmul.f32.gmra.mxu1 %v8471_v23 }
 0x892   : > { %6754 = vmatpush.msra.mxu1 %v6587_v0 }
 0x893   : > { %v4786_v9 = vpop.f32.mrf.mxu3  ;;  %v5179_v25 = vsel %vm5104_vm4, %v5176_v48, %v5178_v13  ;;  %v12047_v53 = vpop.f32.mrf.mxu2 }
 0x894   : > { %v4924_v56 = vpop.f32.mrf.mxu0  ;;  %v12050_v22 = vadd.f32 %v5179_v25, %v11702_v49  ;;  %v13354_v49 = vld [vmem:[#allocation70_spill] sm:$0xff] }
 0x895   : > { %v4925_v45 = vadd.f32 %v4924_v56, %v4786_v9 }
 0x896   : > { %13353 = vst [vmem:[#allocation92_spill] sm:$0xff] %v12050_v22  ;;  %v5062_v31 = vpop.f32.mrf.mxu1  ;;  %v6602_v22 = vld [vmem:[#allocation11 + $0xd38] sm:$0xff] }
 0x897   : > { %5644 = vmatmul.f32.gmra.mxu0 %v8472_v11  ;;  %v5063_v6 = vadd.f32 %v5062_v31, %v4925_v45  ;;  %v8475_v31 = vld [vmem:[%s9836_s26 + $0x80] sm:$0xff]  ;;  %6891 = vmatpush.msra.mxu2 %v6602_v22 }
 0x898   : > { %5511 = vmatmul.f32.gmra.mxu3 %v8473_v62  ;;  %6154 = vmatmul.f32.gmra.mxu2 %v8470_v58 }
 0x899   : > { %v5180_v48 = vrot.slane %v5063_v6, 4  ;;  %6018 = vmatmul.f32.gmra.mxu1 %v8474_v44  ;;  %v8476_v6 = vld [vmem:[%s9839_s21 + $0x88] sm:$0xff] }
 0x89b   : > { %v5468_v23 = vpop.f32.mrf.mxu3  ;;  %v5181_v10 = vsel %vm5104_vm4, %v5178_v13, %v5180_v48  ;;  %v5183_v9 = vsel %vm5104_vm4, %v5180_v48, %v13354_v49  ;;  %v12058_v25 = vpop.f32.mrf.mxu2  ;;  %v13355_v13 = vld [vmem:[#allocation29_spill] sm:$0xff] }
 0x89c   : > { %v5604_v56 = vpop.f32.mrf.mxu0  ;;  %v5262_v19 = vadd.f32 %v5181_v10, %v11710_v12  ;;  %v5263_v0 = vadd.f32 %v5183_v9, %v11712_v57  ;;  %v5952_v23 = vld [vmem:[#allocation11 + $0xbb8] sm:$0xff]  ;;  %v13356_v12 = vld [vmem:[#allocation72_spill] sm:$0xff] }
 0x89d   : > { %v8477_v56 = vld [vmem:[%s9829_s7 + $0x80] sm:$0xff]  ;;  %6241 = vmatpush.msra.mxu3 %v5952_v23  ;;  %v8480_v23 = vld [vmem:[%s9839_s21 + $0x90] sm:$0xff] }
 0x89e   : > { %v5908_v58 = vadd.f32 %v5262_v19, %v13354_v49  ;;  %v5909_v45 = vadd.f32 %v5263_v0, %v13354_v49  ;;  %v5978_v11 = vpop.f32.mrf.mxu1  ;;  %v8481_v49 = vld [vmem:[#allocation14] ss:$0 sm:$0xff] }
 0x89f   : > { %5647 = vmatmul.f32.gmra.mxu0 %v8475_v31  ;;  %v8478_v31 = vld [vmem:[#allocation13] ss:$0 sm:$0xff] }
 0x8a0   : > { %5514 = vmatmul.f32.gmra.mxu3 %v8476_v6  ;;  %v6558_v44 = vadd.f32 %v13355_v13, %v5908_v58  ;;  %v6559_v48 = vadd.f32 %v13355_v13, %v5909_v45  ;;  %6157 = vmatmul.f32.gmra.mxu2 %v8473_v62  ;;  %v8479_v13 = vld [vmem:[%s9836_s26 + $0x88] sm:$0xff] }
 0x8a1   : > { %6021 = vmatmul.f32.gmra.mxu1 %v8477_v56 }
 0x8a2   : > { %v7208_v57 = vadd.f32 %v13356_v12, %v6558_v44  ;;  %v7209_v10 = vadd.f32 %v13356_v12, %v6559_v48  ;;  %v8530_v12 = vld [vmem:[%s9839_s21 + $0x110] sm:$0xff] }
 0x8a3   : > { %v5470_v9 = vpop.f32.mrf.mxu3  ;;  %v6114_v19 = vpop.f32.mrf.mxu2 }
 0x8a4   : > { %v5606_v0 = vpop.f32.mrf.mxu0  ;;  %v7253_v11 = vadd.f32 %v8478_v31, %v7208_v57  ;;  %v7254_v58 = vadd.f32 %v8478_v31, %v7209_v10  ;;  %v8482_v9 = vld [vmem:[%s9829_s7 + $0x88] sm:$0xff]  ;;  %v8483_v57 = vld [vmem:[#allocation16] ss:$0 sm:$0xff] }
 0x8a5   : > { %v6570_v0 = vld [vmem:[#allocation11 + $0xc38] sm:$0xff] }
 0x8a6   : > { %v7294_v62 = vmax.f32 %v7253_v11, 0.0  ;;  %v7295_v45 = vmax.f32 %v7254_v58, 0.0  ;;  %v5980_v56 = vpop.f32.mrf.mxu1  ;;  %6619 = vmatpush.msra.mxu0 %v6570_v0  ;;  %v8485_v58 = vld [vmem:[%s9839_s21 + $0x98] sm:$0xff] }
 0x8a7   : > { %5650 = vmatmul.f32.gmra.mxu0 %v8479_v13  ;;  %v6586_v13 = vld [vmem:[#allocation11 + $0xcb8] sm:$0xff]  ;;  %v6601_v0 = vld [vmem:[#allocation11 + $0xd30] sm:$0xff] }
 0x8a8   : > { %5517 = vmatmul.f32.gmra.mxu3 %v8480_v23  ;;  %v7339_v44 = vmul.f32 %v8481_v49, %v7294_v62  ;;  %v7340_v48 = vmul.f32 %v8481_v49, %v7295_v45  ;;  %6160 = vmatmul.f32.gmra.mxu2 %v8476_v6  ;;  %v8484_v49 = vld [vmem:[%s9836_s26 + $0x90] sm:$0xff] }
 0x8a9   : > { %6024 = vmatmul.f32.gmra.mxu1 %v8482_v9  ;;  %v8486_v62 = vld [vmem:[%s9829_s7 + $0x90] sm:$0xff]  ;;  %6892 = vmatpush.msra.mxu2 %v6601_v0 }
 0x8aa   : > { %v7384_v10 = vadd.f32 %v8483_v57, %v7339_v44  ;;  %v7385_v22 = vadd.f32 %v8483_v57, %v7340_v48  ;;  %6755 = vmatpush.msra.mxu1 %v6586_v13  ;;  %v8487_v48 = vld [vmem:[%s9836_s26 + $0x98] sm:$0xff]  ;;  %v8488_v57 = vld [vmem:[%s9839_s21 + $0xa0] sm:$0xff] }
 0x8ab   : > { %v5472_v19 = vpop.f32.mrf.mxu3  ;;  %v6116_v31 = vpop.f32.mrf.mxu2 }
 0x8ac   : > { %v5608_v11 = vpop.f32.mrf.mxu0  ;;  %7426 = vst.msk [vmem:[%s9285_s11 + $0x128] sm:$0xff] %vm7388_vm2, %v7384_v10  ;;  %v8489_v10 = vld [vmem:[%s9829_s7 + $0x98] sm:$0xff]  ;;  %v8490_v31 = vld [vmem:[%s9836_s26 + $0xa0] sm:$0xff] }
 0x8ad   : > { %7427 = vst.msk [vmem:[%s9285_s11 + $0x130] sm:$0xff] %vm7388_vm2, %v7385_v22  ;;  %v5951_v19 = vld [vmem:[#allocation11 + $0xbb0] sm:$0xff] }
 0x8ae   : > { %v5982_v6 = vpop.f32.mrf.mxu1  ;;  %6242 = vmatpush.msra.mxu3 %v5951_v19 }
 0x8af   : > { %5653 = vmatmul.f32.gmra.mxu0 %v8484_v49  ;;  %v8491_v6 = vld [vmem:[%s9839_s21 + $0xa8] sm:$0xff] }
 0x8b0   : > { %5520 = vmatmul.f32.gmra.mxu3 %v8485_v58  ;;  %6163 = vmatmul.f32.gmra.mxu2 %v8480_v23 }
 0x8b1   : > { %6027 = vmatmul.f32.gmra.mxu1 %v8486_v62 }
 0x8b3   : > { %v5474_v45 = vpop.f32.mrf.mxu3  ;;  %v6118_v56 = vpop.f32.mrf.mxu2 }
 0x8b4   : > { %v5610_v44 = vpop.f32.mrf.mxu0  ;;  %v6569_v45 = vld [vmem:[#allocation11 + $0xc30] sm:$0xff] }
 0x8b5   : > { %v6585_v56 = vld [vmem:[#allocation11 + $0xcb0] sm:$0xff]  ;;  %6620 = vmatpush.msra.mxu0 %v6569_v45 }
 0x8b6   : > { %v5984_v9 = vpop.f32.mrf.mxu1  ;;  %6756 = vmatpush.msra.mxu1 %v6585_v56 }
 0x8b7   : > { %5656 = vmatmul.f32.gmra.mxu0 %v8487_v48 }
 0x8b8   : > { %5523 = vmatmul.f32.gmra.mxu3 %v8488_v57  ;;  %6166 = vmatmul.f32.gmra.mxu2 %v8485_v58  ;;  %v8492_v58 = vld [vmem:[%s9829_s7 + $0xa0] sm:$0xff] }
 0x8b9   : > { %6030 = vmatmul.f32.gmra.mxu1 %v8489_v10 }
 0x8bb   : > { %v5476_v22 = vpop.f32.mrf.mxu3  ;;  %v6120_v23 = vpop.f32.mrf.mxu2 }
 0x8bc   : > { %v5612_v13 = vpop.f32.mrf.mxu0  ;;  %v5477_v49 = vadd.f32 %v5476_v22, %v11731_v54  ;;  %v8493_v22 = vld [vmem:[%s9836_s26 + $0xa8] sm:$0xff] }
 0x8be   : > { %v5986_v11 = vpop.f32.mrf.mxu1  ;;  %v5613_v44 = vadd.f32 %v5612_v13, %v5477_v49 }
 0x8bf   : > { %5659 = vmatmul.f32.gmra.mxu0 %v8490_v31  ;;  %v8494_v31 = vld [vmem:[%s9839_s21 + $0xb0] sm:$0xff] }
 0x8c0   : > { %5526 = vmatmul.f32.gmra.mxu3 %v8491_v6  ;;  %6169 = vmatmul.f32.gmra.mxu2 %v8488_v57  ;;  %v5760_v0 = vrot.slane %v5613_v44, 4  ;;  %v5950_v44 = vld [vmem:[#allocation11 + $0xba8] sm:$0xff] }
 0x8c1   : > { %6033 = vmatmul.f32.gmra.mxu1 %v8492_v58  ;;  %6243 = vmatpush.msra.mxu3 %v5950_v44 }
 0x8c3   : > { %v5479_v62 = vpop.f32.mrf.mxu3  ;;  %v6122_v9 = vpop.f32.mrf.mxu2 }
 0x8c4   : > { %v5480_v48 = vadd.f32 %v5479_v62, %v11740_v38  ;;  %v5615_v10 = vpop.f32.mrf.mxu0  ;;  %v12089_v19 = vadd.f32 %v6122_v9, %v5986_v11  ;;  %v8495_v38 = vld [vmem:[%s9829_s7 + $0xa8] sm:$0xff] }
 0x8c6   : > { %v5616_v54 = vadd.f32 %v5615_v10, %v5480_v48  ;;  %v5989_v57 = vpop.f32.mrf.mxu1 }
 0x8c7   : > { %5662 = vmatmul.f32.gmra.mxu0 %v8493_v22  ;;  %v8498_v22 = vld [vmem:[%s9829_s7 + $0xb0] sm:$0xff] }
 0x8c8   : > { %v5761_v23 = vrot.slane %v5616_v54, 4  ;;  %5529 = vmatmul.f32.gmra.mxu3 %v8494_v31  ;;  %6172 = vmatmul.f32.gmra.mxu2 %v8491_v6  ;;  %v8496_v6 = vld [vmem:[%s9836_s26 + $0xb0] sm:$0xff]  ;;  %v8497_v54 = vld [vmem:[%s9839_s21 + $0xb8] sm:$0xff] }
 0x8c9   : > { %6036 = vmatmul.f32.gmra.mxu1 %v8495_v38  ;;  %v6584_v38 = vld [vmem:[#allocation11 + $0xca8] sm:$0xff] }
 0x8ca   : > { %v5762_v13 = vsel %vm5104_vm4, %v5760_v0, %v5761_v23  ;;  %v6600_v0 = vld [vmem:[#allocation11 + $0xd28] sm:$0xff]  ;;  %6757 = vmatpush.msra.mxu1 %v6584_v38 }
 0x8cb   : > { %v12096_v49 = vadd.f32 %v5762_v13, %v11726_v34  ;;  %v5482_v11 = vpop.f32.mrf.mxu3  ;;  %v6125_v62 = vpop.f32.mrf.mxu2  ;;  %v6568_v13 = vld [vmem:[#allocation11 + $0xc28] sm:$0xff]  ;;  %6893 = vmatpush.msra.mxu2 %v6600_v0 }
 0x8cc   : > { %v5483_v58 = vadd.f32 %v5482_v11, %v11749_v14  ;;  %v5618_v45 = vpop.f32.mrf.mxu0  ;;  %v12099_v56 = vadd.f32 %v6125_v62, %v5989_v57  ;;  %6621 = vmatpush.msra.mxu0 %v6568_v13 }
 0x8ce   : > { %v5619_v48 = vadd.f32 %v5618_v45, %v5483_v58  ;;  %v5992_v9 = vpop.f32.mrf.mxu1  ;;  %v8499_v45 = vld [vmem:[%s9836_s26 + $0xb8] sm:$0xff] }
 0x8cf   : > { %5665 = vmatmul.f32.gmra.mxu0 %v8496_v6  ;;  %v8501_v6 = vld [vmem:[%s9829_s7 + $0xb8] sm:$0xff] }
 0x8d0   : > { %v5763_v10 = vrot.slane %v5619_v48, 4  ;;  %5532 = vmatmul.f32.gmra.mxu3 %v8497_v54  ;;  %6175 = vmatmul.f32.gmra.mxu2 %v8494_v31  ;;  %v8500_v48 = vld [vmem:[%s9839_s21 + $0xc0] sm:$0xff] }
 0x8d1   : > { %6039 = vmatmul.f32.gmra.mxu1 %v8498_v22 }
 0x8d2   : > { %v5764_v34 = vsel %vm5104_vm4, %v5761_v23, %v5763_v10 }
 0x8d3   : > { %v12106_v14 = vadd.f32 %v5764_v34, %v11735_v26  ;;  %v5485_v57 = vpop.f32.mrf.mxu3  ;;  %v6128_v58 = vpop.f32.mrf.mxu2 }
 0x8d4   : > { %v5486_v11 = vadd.f32 %v5485_v57, %v11758_v5  ;;  %v5621_v62 = vpop.f32.mrf.mxu0  ;;  %v12109_v31 = vadd.f32 %v6128_v58, %v5992_v9 }
 0x8d6   : > { %v5622_v23 = vadd.f32 %v5621_v62, %v5486_v11  ;;  %v5995_v26 = vpop.f32.mrf.mxu1  ;;  %v8502_v11 = vld [vmem:[%s9836_s26 + $0xc0] sm:$0xff]  ;;  %v8503_v62 = vld [vmem:[%s9839_s21 + $0xc8] sm:$0xff] }
 0x8d7   : > { %5668 = vmatmul.f32.gmra.mxu0 %v8499_v45  ;;  %v5949_v45 = vld [vmem:[#allocation11 + $0xba0] sm:$0xff] }
 0x8d8   : > { %v5765_v44 = vrot.slane %v5622_v23, 4  ;;  %5535 = vmatmul.f32.gmra.mxu3 %v8500_v48  ;;  %6178 = vmatmul.f32.gmra.mxu2 %v8497_v54 }
 0x8d9   : > { %6042 = vmatmul.f32.gmra.mxu1 %v8501_v6  ;;  %6244 = vmatpush.msra.mxu3 %v5949_v45 }
 0x8da   : > { %v5766_v5 = vsel %vm5104_vm4, %v5763_v10, %v5765_v44 }
 0x8db   : > { %v12116_v34 = vadd.f32 %v5766_v5, %v11744_v16  ;;  %v5488_v9 = vpop.f32.mrf.mxu3  ;;  %v6131_v57 = vpop.f32.mrf.mxu2  ;;  %v8504_v16 = vld [vmem:[%s9829_s7 + $0xc0] sm:$0xff] }
 0x8dc   : > { %v5489_v22 = vadd.f32 %v5488_v9, %v11767_v20  ;;  %v5624_v0 = vpop.f32.mrf.mxu0  ;;  %v12119_v13 = vadd.f32 %v6131_v57, %v5995_v26  ;;  %v6599_v26 = vld [vmem:[#allocation11 + $0xd20] sm:$0xff] }
 0x8dd   : > { %6894 = vmatpush.msra.mxu2 %v6599_v26 }
 0x8de   : > { %v5625_v38 = vadd.f32 %v5624_v0, %v5489_v22  ;;  %v5998_v58 = vpop.f32.mrf.mxu1 }
 0x8df   : > { %5671 = vmatmul.f32.gmra.mxu0 %v8502_v11  ;;  %v8507_v11 = vld [vmem:[%s9829_s7 + $0xc8] sm:$0xff] }
 0x8e0   : > { %v5767_v54 = vrot.slane %v5625_v38, 4  ;;  %5538 = vmatmul.f32.gmra.mxu3 %v8503_v62  ;;  %6181 = vmatmul.f32.gmra.mxu2 %v8500_v48  ;;  %v8506_v38 = vld [vmem:[%s9839_s21 + $0xd0] sm:$0xff] }
 0x8e1   : > { %6045 = vmatmul.f32.gmra.mxu1 %v8504_v16  ;;  %v6583_v16 = vld [vmem:[#allocation11 + $0xca0] sm:$0xff] }
 0x8e2   : > { %v5768_v10 = vsel %vm5104_vm4, %v5765_v44, %v5767_v54  ;;  %v8505_v44 = vld [vmem:[%s9836_s26 + $0xc8] sm:$0xff]  ;;  %6758 = vmatpush.msra.mxu1 %v6583_v16 }
 0x8e3   : > { %v12126_v20 = vadd.f32 %v5768_v10, %v11753_v43  ;;  %v5491_v23 = vpop.f32.mrf.mxu3  ;;  %v6134_v6 = vpop.f32.mrf.mxu2  ;;  %v5948_v16 = vld [vmem:[#allocation11 + $0xb98] sm:$0xff] }
 0x8e4   : > { %v5492_v5 = vadd.f32 %v5491_v23, %v11776_v30  ;;  %v5627_v9 = vpop.f32.mrf.mxu0  ;;  %v12129_v22 = vadd.f32 %v6134_v6, %v5998_v58  ;;  %v6567_v58 = vld [vmem:[#allocation11 + $0xc20] sm:$0xff]  ;;  %6245 = vmatpush.msra.mxu3 %v5948_v16 }
 0x8e5   : > { %6622 = vmatpush.msra.mxu0 %v6567_v58 }
 0x8e6   : > { %v5628_v48 = vadd.f32 %v5627_v9, %v5492_v5  ;;  %v6001_v57 = vpop.f32.mrf.mxu1 }
 0x8e7   : > { %5674 = vmatmul.f32.gmra.mxu0 %v8505_v44  ;;  %v8510_v44 = vld [vmem:[%s9829_s7 + $0xd0] sm:$0xff] }
 0x8e8   : > { %v5769_v0 = vrot.slane %v5628_v48, 4  ;;  %5541 = vmatmul.f32.gmra.mxu3 %v8506_v38  ;;  %6184 = vmatmul.f32.gmra.mxu2 %v8503_v62 }
 0x8e9   : > { %6048 = vmatmul.f32.gmra.mxu1 %v8507_v11 }
 0x8ea   : > { %v5770_v43 = vsel %vm5104_vm4, %v5767_v54, %v5769_v0  ;;  %v8508_v54 = vld [vmem:[%s9836_s26 + $0xd0] sm:$0xff] }
 0x8eb   : > { %v12136_v30 = vadd.f32 %v5770_v43, %v11762_v63  ;;  %v5494_v10 = vpop.f32.mrf.mxu3  ;;  %v6137_v45 = vpop.f32.mrf.mxu2  ;;  %v8509_v63 = vld [vmem:[%s9839_s21 + $0xd8] sm:$0xff] }
 0x8ec   : > { %v5495_v23 = vadd.f32 %v5494_v10, %v11785_v50  ;;  %v5630_v26 = vpop.f32.mrf.mxu0  ;;  %v12139_v5 = vadd.f32 %v6137_v45, %v6001_v57 }
 0x8ee   : > { %v5631_v62 = vadd.f32 %v5630_v26, %v5495_v23  ;;  %v6004_v6 = vpop.f32.mrf.mxu1  ;;  %v8512_v26 = vld [vmem:[%s9839_s21 + $0xe0] sm:$0xff] }
 0x8ef   : > { %5677 = vmatmul.f32.gmra.mxu0 %v8508_v54 }
 0x8f0   : > { %v5771_v9 = vrot.slane %v5631_v62, 4  ;;  %5544 = vmatmul.f32.gmra.mxu3 %v8509_v63  ;;  %6187 = vmatmul.f32.gmra.mxu2 %v8506_v38  ;;  %v8511_v38 = vld [vmem:[%s9836_s26 + $0xd8] sm:$0xff] }
 0x8f1   : > { %6051 = vmatmul.f32.gmra.mxu1 %v8510_v44  ;;  %v8513_v62 = vld [vmem:[%s9829_s7 + $0xd8] sm:$0xff]  ;;  %v6582_v44 = vld [vmem:[#allocation11 + $0xc98] sm:$0xff] }
 0x8f2   : > { %v5772_v48 = vsel %vm5104_vm4, %v5769_v0, %v5771_v9  ;;  %6759 = vmatpush.msra.mxu1 %v6582_v44 }
 0x8f3   : > { %v12146_v50 = vadd.f32 %v5772_v48, %v11771_v29  ;;  %v5497_v43 = vpop.f32.mrf.mxu3  ;;  %v6140_v11 = vpop.f32.mrf.mxu2  ;;  %v6566_v48 = vld [vmem:[#allocation11 + $0xc18] sm:$0xff] }
 0x8f4   : > { %v5498_v57 = vadd.f32 %v5497_v43, %v11794_v47  ;;  %v5633_v10 = vpop.f32.mrf.mxu0  ;;  %v12149_v58 = vadd.f32 %v6140_v11, %v6004_v6  ;;  %v6598_v6 = vld [vmem:[#allocation11 + $0xd18] sm:$0xff]  ;;  %6623 = vmatpush.msra.mxu0 %v6566_v48 }
 0x8f5   : > { %6895 = vmatpush.msra.mxu2 %v6598_v6 }
 0x8f6   : > { %v5634_v23 = vadd.f32 %v5633_v10, %v5498_v57  ;;  %v6007_v0 = vpop.f32.mrf.mxu1  ;;  %v8514_v10 = vld [vmem:[%s9836_s26 + $0xe0] sm:$0xff] }
 0x8f7   : > { %5680 = vmatmul.f32.gmra.mxu0 %v8511_v38  ;;  %v8516_v38 = vld [vmem:[%s9829_s7 + $0xe0] sm:$0xff] }
 0x8f8   : > { %v5773_v45 = vrot.slane %v5634_v23, 4  ;;  %5547 = vmatmul.f32.gmra.mxu3 %v8512_v26  ;;  %6190 = vmatmul.f32.gmra.mxu2 %v8509_v63  ;;  %v8515_v23 = vld [vmem:[%s9839_s21 + $0xe8] sm:$0xff] }
 0x8f9   : > { %6054 = vmatmul.f32.gmra.mxu1 %v8513_v62 }
 0x8fa   : > { %v5774_v29 = vsel %vm5104_vm4, %v5771_v9, %v5773_v45 }
 0x8fb   : > { %v12156_v47 = vadd.f32 %v5774_v29, %v11780_v52  ;;  %v5500_v54 = vpop.f32.mrf.mxu3  ;;  %v6143_v57 = vpop.f32.mrf.mxu2 }
 0x8fc   : > { %v5501_v43 = vadd.f32 %v5500_v54, %v11803_v41  ;;  %v5636_v11 = vpop.f32.mrf.mxu0  ;;  %v12159_v63 = vadd.f32 %v6143_v57, %v6007_v0 }
 0x8fe   : > { %v5637_v9 = vadd.f32 %v5636_v11, %v5501_v43  ;;  %v6010_v52 = vpop.f32.mrf.mxu1  ;;  %v8517_v43 = vld [vmem:[%s9836_s26 + $0xe8] sm:$0xff]  ;;  %v8518_v11 = vld [vmem:[%s9839_s21 + $0xf0] sm:$0xff] }
 0x8ff   : > { %5683 = vmatmul.f32.gmra.mxu0 %v8514_v10  ;;  %v5947_v10 = vld [vmem:[#allocation11 + $0xb90] sm:$0xff] }
 0x900   : > { %v5775_v16 = vrot.slane %v5637_v9, 4  ;;  %5550 = vmatmul.f32.gmra.mxu3 %v8515_v23  ;;  %6193 = vmatmul.f32.gmra.mxu2 %v8512_v26 }
 0x901   : > { %6057 = vmatmul.f32.gmra.mxu1 %v8516_v38  ;;  %6246 = vmatpush.msra.mxu3 %v5947_v10 }
 0x902   : > { %v5776_v41 = vsel %vm5104_vm4, %v5773_v45, %v5775_v16 }
 0x903   : > { %v12166_v29 = vadd.f32 %v5776_v41, %v11789_v60  ;;  %v5503_v0 = vpop.f32.mrf.mxu3  ;;  %v6146_v54 = vpop.f32.mrf.mxu2  ;;  %v8519_v60 = vld [vmem:[%s9829_s7 + $0xe8] sm:$0xff] }
 0x904   : > { %v5504_v62 = vadd.f32 %v5503_v0, %v11812_v2  ;;  %v5639_v6 = vpop.f32.mrf.mxu0  ;;  %v12169_v48 = vadd.f32 %v6146_v54, %v6010_v52 }
 0x906   : > { %v5640_v44 = vadd.f32 %v5639_v6, %v5504_v62  ;;  %v6013_v57 = vpop.f32.mrf.mxu1  ;;  %v6597_v62 = vld [vmem:[#allocation11 + $0xd10] sm:$0xff] }
 0x907   : > { %5686 = vmatmul.f32.gmra.mxu0 %v8517_v43  ;;  %6896 = vmatpush.msra.mxu2 %v6597_v62  ;;  %v13357_v43 = vld [vmem:[#allocation74_spill] sm:$0xff] }
 0x908   : > { %v5777_v26 = vrot.slane %v5640_v44, 4  ;;  %5553 = vmatmul.f32.gmra.mxu3 %v8518_v11  ;;  %6196 = vmatmul.f32.gmra.mxu2 %v8515_v23  ;;  %v8521_v44 = vld [vmem:[%s9839_s21 + $0xf8] sm:$0xff] }
 0x909   : > { %6060 = vmatmul.f32.gmra.mxu1 %v8519_v60  ;;  %v6565_v60 = vld [vmem:[#allocation11 + $0xc10] sm:$0xff] }
 0x90a   : > { %v5778_v45 = vsel %vm5104_vm4, %v5775_v16, %v5777_v26  ;;  %v8520_v16 = vld [vmem:[%s9836_s26 + $0xf0] sm:$0xff]  ;;  %6624 = vmatpush.msra.mxu0 %v6565_v60 }
 0x90b   : > { %v12176_v2 = vadd.f32 %v5778_v45, %v11798_v39  ;;  %v5506_v9 = vpop.f32.mrf.mxu3  ;;  %v6149_v41 = vpop.f32.mrf.mxu2 }
 0x90c   : > { %v5507_v52 = vadd.f32 %v5506_v9, %v11821_v15  ;;  %v5642_v38 = vpop.f32.mrf.mxu0  ;;  %v12179_v0 = vadd.f32 %v6149_v41, %v6013_v57  ;;  %v8522_v15 = vld [vmem:[%s9829_s7 + $0xf0] sm:$0xff]  ;;  %v6581_v9 = vld [vmem:[#allocation11 + $0xc90] sm:$0xff] }
 0x90d   : > { %6760 = vmatpush.msra.mxu1 %v6581_v9 }
 0x90e   : > { %v5643_v23 = vadd.f32 %v5642_v38, %v5507_v52  ;;  %v6016_v54 = vpop.f32.mrf.mxu1 }
 0x90f   : > { %5689 = vmatmul.f32.gmra.mxu0 %v8520_v16  ;;  %v8524_v16 = vld [vmem:[%s9839_s21 + $0x100] sm:$0xff] }
 0x910   : > { %v5779_v6 = vrot.slane %v5643_v23, 4  ;;  %5556 = vmatmul.f32.gmra.mxu3 %v8521_v44  ;;  %6199 = vmatmul.f32.gmra.mxu2 %v8518_v11 }
 0x911   : > { %6063 = vmatmul.f32.gmra.mxu1 %v8522_v15  ;;  %v8525_v15 = vld [vmem:[%s9829_s7 + $0xf8] sm:$0xff] }
 0x912   : > { %v5780_v39 = vsel %vm5104_vm4, %v5777_v26, %v5779_v6  ;;  %v8523_v26 = vld [vmem:[%s9836_s26 + $0xf8] sm:$0xff] }
 0x913   : > { %v12186_v45 = vadd.f32 %v5780_v39, %v13357_v43  ;;  %v5509_v57 = vpop.f32.mrf.mxu3  ;;  %v6152_v52 = vpop.f32.mrf.mxu2 }
 0x914   : > { %v5510_v10 = vadd.f32 %v5509_v57, %v11831_v40  ;;  %v5645_v41 = vpop.f32.mrf.mxu0  ;;  %v12189_v38 = vadd.f32 %v6152_v52, %v6016_v54  ;;  %v13358_v40 = vld [vmem:[#allocation75_spill] sm:$0xff] }
 0x916   : > { %v5646_v11 = vadd.f32 %v5645_v41, %v5510_v10  ;;  %v6019_v62 = vpop.f32.mrf.mxu1  ;;  %v8526_v41 = vld [vmem:[%s9836_s26 + $0x100] sm:$0xff] }
 0x917   : > { %5692 = vmatmul.f32.gmra.mxu0 %v8523_v26  ;;  %v8527_v26 = vld [vmem:[%s9839_s21 + $0x108] sm:$0xff] }
 0x918   : > { %v5781_v23 = vrot.slane %v5646_v11, 4  ;;  %5559 = vmatmul.f32.gmra.mxu3 %v8524_v16  ;;  %6202 = vmatmul.f32.gmra.mxu2 %v8521_v44 }
 0x919   : > { %6066 = vmatmul.f32.gmra.mxu1 %v8525_v15  ;;  %v8528_v15 = vld [vmem:[%s9829_s7 + $0x100] sm:$0xff] }
 0x91a   : > { %v5782_v39 = vsel %vm5104_vm4, %v5779_v6, %v5781_v23 }
 0x91b   : > { %v12196_v43 = vadd.f32 %v5782_v39, %v13358_v40  ;;  %v5512_v54 = vpop.f32.mrf.mxu3  ;;  %v6155_v60 = vpop.f32.mrf.mxu2  ;;  %v13359_v39 = vld [vmem:[#allocation25_spill] sm:$0xff] }
 0x91c   : > { %v5513_v57 = vadd.f32 %v5512_v54, %v11840_v8  ;;  %v5648_v9 = vpop.f32.mrf.mxu0  ;;  %v12199_v10 = vadd.f32 %v6155_v60, %v6019_v62  ;;  %v5946_v54 = vld [vmem:[#allocation11 + $0xb88] sm:$0xff] }
 0x91d   : > { %v6596_v62 = vld [vmem:[#allocation11 + $0xd08] sm:$0xff]  ;;  %6247 = vmatpush.msra.mxu3 %v5946_v54 }
 0x91e   : > { %v5649_v52 = vadd.f32 %v5648_v9, %v5513_v57  ;;  %v6022_v11 = vpop.f32.mrf.mxu1  ;;  %6897 = vmatpush.msra.mxu2 %v6596_v62 }
 0x91f   : > { %5695 = vmatmul.f32.gmra.mxu0 %v8526_v41 }
 0x920   : > { %v5783_v44 = vrot.slane %v5649_v52, 4  ;;  %5562 = vmatmul.f32.gmra.mxu3 %v8527_v26  ;;  %6205 = vmatmul.f32.gmra.mxu2 %v8524_v16  ;;  %v6580_v52 = vld [vmem:[#allocation11 + $0xc88] sm:$0xff] }
 0x921   : > { %6069 = vmatmul.f32.gmra.mxu1 %v8528_v15 }
 0x922   : > { %v5784_v6 = vsel %vm5104_vm4, %v5781_v23, %v5783_v44  ;;  %v6564_v23 = vld [vmem:[#allocation11 + $0xc08] sm:$0xff]  ;;  %6761 = vmatpush.msra.mxu1 %v6580_v52 }
 0x923   : > { %v12206_v40 = vadd.f32 %v5784_v6, %v13359_v39  ;;  %v5515_v8 = vpop.f32.mrf.mxu3  ;;  %v6158_v60 = vpop.f32.mrf.mxu2  ;;  %6625 = vmatpush.msra.mxu0 %v6564_v23  ;;  %v8529_v6 = vld [vmem:[%s9836_s26 + $0x108] sm:$0xff] }
 0x924   : > { %v5516_v57 = vadd.f32 %v5515_v8, %v11849_v46  ;;  %v5651_v9 = vpop.f32.mrf.mxu0  ;;  %v12209_v16 = vadd.f32 %v6158_v60, %v6022_v11  ;;  %v8531_v8 = vld [vmem:[%s9829_s7 + $0x108] sm:$0xff] }
 0x925   : > { %13360 = vst [vmem:[#allocation93_spill] sm:$0xff] %v12206_v40  ;;  %v13361_v11 = vld [vmem:[#allocation26_spill] sm:$0xff]  ;;  %v8533_v40 = vld [vmem:[%s9839_s21 + $0x118] sm:$0xff] }
 0x926   : > { %v5652_v41 = vadd.f32 %v5651_v9, %v5516_v57  ;;  %v6025_v15 = vpop.f32.mrf.mxu1 }
 0x927   : > { %5698 = vmatmul.f32.gmra.mxu0 %v8529_v6 }
 0x928   : > { %v5785_v39 = vrot.slane %v5652_v41, 4  ;;  %5565 = vmatmul.f32.gmra.mxu3 %v8530_v12  ;;  %6208 = vmatmul.f32.gmra.mxu2 %v8527_v26  ;;  %v8532_v41 = vld [vmem:[%s9836_s26 + $0x110] sm:$0xff] }
 0x929   : > { %6072 = vmatmul.f32.gmra.mxu1 %v8531_v8  ;;  %v13363_v8 = vld [vmem:[#allocation24_spill] sm:$0xff] }
 0x92a   : > { %v5786_v46 = vsel %vm5104_vm4, %v5783_v44, %v5785_v39 }
 0x92b   : > { %v12216_v54 = vadd.f32 %v5786_v46, %v13361_v11  ;;  %v5518_v62 = vpop.f32.mrf.mxu3  ;;  %v6161_v60 = vpop.f32.mrf.mxu2  ;;  %v8534_v46 = vld [vmem:[%s9829_s7 + $0x110] sm:$0xff] }
 0x92c   : > { %v5519_v57 = vadd.f32 %v5518_v62, %v11858_v1  ;;  %v5654_v9 = vpop.f32.mrf.mxu0  ;;  %v12219_v23 = vadd.f32 %v6161_v60, %v6025_v15  ;;  %v5945_v15 = vld [vmem:[#allocation11 + $0xb80] sm:$0xff] }
 0x92d   : > { %13362 = vst [vmem:[#allocation95_spill] sm:$0xff] %v12216_v54  ;;  %6248 = vmatpush.msra.mxu3 %v5945_v15  ;;  %v8536_v54 = vld [vmem:[%s9839_s21 + $0x120] sm:$0xff]  ;;  %v6563_v15 = vld [vmem:[#allocation11 + $0xc00] sm:$0xff] }
 0x92e   : > { %v5655_v52 = vadd.f32 %v5654_v9, %v5519_v57  ;;  %v6028_v6 = vpop.f32.mrf.mxu1  ;;  %6626 = vmatpush.msra.mxu0 %v6563_v15 }
 0x92f   : > { %5701 = vmatmul.f32.gmra.mxu0 %v8532_v41 }
 0x930   : > { %v5787_v26 = vrot.slane %v5655_v52, 4  ;;  %5568 = vmatmul.f32.gmra.mxu3 %v8533_v40  ;;  %6211 = vmatmul.f32.gmra.mxu2 %v8530_v12  ;;  %v6595_v52 = vld [vmem:[#allocation11 + $0xd00] sm:$0xff] }
 0x931   : > { %6075 = vmatmul.f32.gmra.mxu1 %v8534_v46  ;;  %6898 = vmatpush.msra.mxu2 %v6595_v52 }
 0x932   : > { %v5788_v44 = vsel %vm5104_vm4, %v5785_v39, %v5787_v26  ;;  %v8535_v39 = vld [vmem:[%s9836_s26 + $0x118] sm:$0xff] }
 0x933   : > { %v12226_v1 = vadd.f32 %v5788_v44, %v13363_v8  ;;  %v5521_v11 = vpop.f32.mrf.mxu3  ;;  %v6164_v57 = vpop.f32.mrf.mxu2  ;;  %v13364_v8 = vld [vmem:[#allocation78_spill] sm:$0xff] }
 0x934   : > { %v5522_v62 = vadd.f32 %v5521_v11, %v11867_v27  ;;  %v5657_v60 = vpop.f32.mrf.mxu0  ;;  %v12229_v9 = vadd.f32 %v6164_v57, %v6028_v6  ;;  %v8537_v27 = vld [vmem:[%s9829_s7 + $0x118] sm:$0xff] }
 0x936   : > { %v5658_v12 = vadd.f32 %v5657_v60, %v5522_v62  ;;  %v6031_v41 = vpop.f32.mrf.mxu1  ;;  %v6579_v62 = vld [vmem:[#allocation11 + $0xc80] sm:$0xff] }
 0x937   : > { %5704 = vmatmul.f32.gmra.mxu0 %v8535_v39  ;;  %6762 = vmatpush.msra.mxu1 %v6579_v62 }
 0x938   : > { %v5789_v46 = vrot.slane %v5658_v12, 4  ;;  %5571 = vmatmul.f32.gmra.mxu3 %v8536_v54  ;;  %6214 = vmatmul.f32.gmra.mxu2 %v8533_v40 }
 0x939   : > { %6078 = vmatmul.f32.gmra.mxu1 %v8537_v27 }
 0x93a   : > { %v5790_v44 = vsel %vm5104_vm4, %v5787_v26, %v5789_v46  ;;  %v8538_v26 = vld [vmem:[%s9836_s26 + $0x120] sm:$0xff] }
 0x93b   : > { %v12236_v11 = vadd.f32 %v5790_v44, %v13364_v8  ;;  %v5524_v6 = vpop.f32.mrf.mxu3  ;;  %v6167_v60 = vpop.f32.mrf.mxu2  ;;  %v8539_v44 = vld [vmem:[%s9839_s21 + $0x128] sm:$0xff] }
 0x93c   : > { %v5525_v57 = vadd.f32 %v5524_v6, %v11876_v37  ;;  %v5660_v52 = vpop.f32.mrf.mxu0  ;;  %v12239_v12 = vadd.f32 %v6167_v60, %v6031_v41  ;;  %v13366_v37 = vld [vmem:[#allocation28_spill] sm:$0xff] }
 0x93d   : > { %13365 = vst [vmem:[#allocation96_spill] sm:$0xff] %v12236_v11  ;;  %v8540_v11 = vld [vmem:[%s9829_s7 + $0x120] sm:$0xff] }
 0x93e   : > { %v5661_v40 = vadd.f32 %v5660_v52, %v5525_v57  ;;  %v6034_v39 = vpop.f32.mrf.mxu1 }
 0x93f   : > { %5707 = vmatmul.f32.gmra.mxu0 %v8538_v26 }
 0x940   : > { %v5791_v27 = vrot.slane %v5661_v40, 4  ;;  %5574 = vmatmul.f32.gmra.mxu3 %v8539_v44  ;;  %6217 = vmatmul.f32.gmra.mxu2 %v8536_v54  ;;  %v8541_v40 = vld [vmem:[%s9836_s26 + $0x128] sm:$0xff] }
 0x941   : > { %6081 = vmatmul.f32.gmra.mxu1 %v8540_v11 }
 0x942   : > { %v5792_v8 = vsel %vm5104_vm4, %v5789_v46, %v5791_v27  ;;  %v8542_v46 = vld [vmem:[%s9839_s21 + $0x130] sm:$0xff] }
 0x943   : > { %v12246_v6 = vadd.f32 %v5792_v8, %v13366_v37  ;;  %v5527_v41 = vpop.f32.mrf.mxu3  ;;  %v6170_v62 = vpop.f32.mrf.mxu2  ;;  %v8543_v8 = vld [vmem:[%s9829_s7 + $0x128] sm:$0xff] }
 0x944   : > { %v5528_v15 = vadd.f32 %v5527_v41, %v11885_v55  ;;  %v5663_v57 = vpop.f32.mrf.mxu0  ;;  %v12249_v60 = vadd.f32 %v6170_v62, %v6034_v39  ;;  %v13368_v37 = vld [vmem:[#allocation27_spill] sm:$0xff] }
 0x945   : > { %13367 = vst [vmem:[#allocation97_spill] sm:$0xff] %v12246_v6 }
 0x946   : > { %v5664_v52 = vadd.f32 %v5663_v57, %v5528_v15  ;;  %v6037_v54 = vpop.f32.mrf.mxu1 }
 0x947   : > { %5710 = vmatmul.f32.gmra.mxu0 %v8541_v40  ;;  %v8544_v40 = vld [vmem:[%s9836_s26 + $0x130] sm:$0xff] }
 0x948   : > { %v5793_v26 = vrot.slane %v5664_v52, 4  ;;  %5577 = vmatmul.f32.gmra.mxu3 %v8542_v46  ;;  %6220 = vmatmul.f32.gmra.mxu2 %v8539_v44 }
 0x949   : > { %6084 = vmatmul.f32.gmra.mxu1 %v8543_v8  ;;  %v8546_v8 = vld [vmem:[%s9829_s7 + $0x130] sm:$0xff] }
 0x94a   : > { %v5794_v11 = vsel %vm5104_vm4, %v5791_v27, %v5793_v26  ;;  %v8545_v27 = vld [vmem:[%s9839_s21 + $0x138] sm:$0xff] }
 0x94b   : > { %v12256_v55 = vadd.f32 %v5794_v11, %v13368_v37  ;;  %v5530_v39 = vpop.f32.mrf.mxu3  ;;  %v6173_v15 = vpop.f32.mrf.mxu2  ;;  %v13370_v37 = vld [vmem:[#allocation30_spill] sm:$0xff] }
 0x94c   : > { %v5531_v41 = vadd.f32 %v5530_v39, %v11894_v35  ;;  %v5666_v62 = vpop.f32.mrf.mxu0  ;;  %v12259_v57 = vadd.f32 %v6173_v15, %v6037_v54 }
 0x94d   : > { %13369 = vst [vmem:[#allocation98_spill] sm:$0xff] %v12256_v55 }
 0x94e   : > { %v5667_v52 = vadd.f32 %v5666_v62, %v5531_v41  ;;  %v6040_v44 = vpop.f32.mrf.mxu1 }
 0x94f   : > { %5713 = vmatmul.f32.gmra.mxu0 %v8544_v40  ;;  %v8547_v40 = vld [vmem:[%s9836_s26 + $0x138] sm:$0xff] }
 0x950   : > { %v5795_v6 = vrot.slane %v5667_v52, 4  ;;  %5580 = vmatmul.f32.gmra.mxu3 %v8545_v27  ;;  %6223 = vmatmul.f32.gmra.mxu2 %v8542_v46 }
 0x951   : > { %6087 = vmatmul.f32.gmra.mxu1 %v8546_v8  ;;  %v8549_v8 = vld [vmem:[%s9829_s7 + $0x138] sm:$0xff] }
 0x952   : > { %v5796_v11 = vsel %vm5104_vm4, %v5793_v26, %v5795_v6  ;;  %v8548_v26 = vld [vmem:[%s9839_s21 + $0x140] sm:$0xff] }
 0x953   : > { %v12266_v35 = vadd.f32 %v5796_v11, %v13370_v37  ;;  %v5533_v54 = vpop.f32.mrf.mxu3  ;;  %v6176_v41 = vpop.f32.mrf.mxu2  ;;  %v13372_v37 = vld [vmem:[#allocation31_spill] sm:$0xff] }
 0x954   : > { %v5534_v39 = vadd.f32 %v5533_v54, %v11903_v17  ;;  %v5669_v15 = vpop.f32.mrf.mxu0  ;;  %v12269_v62 = vadd.f32 %v6176_v41, %v6040_v44 }
 0x955   : > { %13371 = vst [vmem:[#allocation99_spill] sm:$0xff] %v12266_v35 }
 0x956   : > { %v5670_v52 = vadd.f32 %v5669_v15, %v5534_v39  ;;  %v6043_v46 = vpop.f32.mrf.mxu1 }
 0x957   : > { %5716 = vmatmul.f32.gmra.mxu0 %v8547_v40  ;;  %v8550_v40 = vld [vmem:[%s9836_s26 + $0x140] sm:$0xff] }
 0x958   : > { %v5797_v55 = vrot.slane %v5670_v52, 4  ;;  %5583 = vmatmul.f32.gmra.mxu3 %v8548_v26  ;;  %6226 = vmatmul.f32.gmra.mxu2 %v8545_v27 }
 0x959   : > { %6090 = vmatmul.f32.gmra.mxu1 %v8549_v8  ;;  %v8552_v8 = vld [vmem:[%s9829_s7 + $0x140] sm:$0xff] }
 0x95a   : > { %v5798_v11 = vsel %vm5104_vm4, %v5795_v6, %v5797_v55  ;;  %v8551_v6 = vld [vmem:[%s9836_s26] sm:$0xff] }
 0x95b   : > { %v12276_v17 = vadd.f32 %v5798_v11, %v13372_v37  ;;  %v5536_v44 = vpop.f32.mrf.mxu3  ;;  %v6179_v39 = vpop.f32.mrf.mxu2  ;;  %v13374_v37 = vld [vmem:[#allocation76_spill] sm:$0xff] }
 0x95c   : > { %v5537_v54 = vadd.f32 %v5536_v44, %v11912_v18  ;;  %v5672_v41 = vpop.f32.mrf.mxu0  ;;  %v12279_v15 = vadd.f32 %v6179_v39, %v6043_v46 }
 0x95d   : > { %13373 = vst [vmem:[#allocation100_spill] sm:$0xff] %v12276_v17  ;;  %v8553_v17 = vld [vmem:[%s9829_s7] sm:$0xff] }
 0x95e   : > { %v5673_v52 = vadd.f32 %v5672_v41, %v5537_v54  ;;  %v6046_v35 = vpop.f32.mrf.mxu1 }
 0x95f   : > { %5719 = vmatmul.f32.gmra.mxu0 %v8550_v40 }
 0x960   : > { %v5799_v27 = vrot.slane %v5673_v52, 4  ;;  %6249 = vmatmul.f32.vlgmr.msra.gmra.mxu3 %v8551_v6  ;;  %6229 = vmatmul.f32.gmra.mxu2 %v8548_v26 }
 0x961   : > { %6093 = vmatmul.f32.gmra.mxu1 %v8552_v8  ;;  %v8555_v8 = vld [vmem:[%s9839_s21] sm:$0xff] }
 0x962   : > { %v5800_v11 = vsel %vm5104_vm4, %v5797_v55, %v5799_v27  ;;  %v8554_v55 = vld [vmem:[%s9836_s26 + $0x8] sm:$0xff] }
 0x963   : > { %v12286_v18 = vadd.f32 %v5800_v11, %v13374_v37  ;;  %v5539_v46 = vpop.f32.mrf.mxu3  ;;  %v6182_v54 = vpop.f32.mrf.mxu2  ;;  %v13376_v37 = vld [vmem:[#allocation77_spill] sm:$0xff] }
 0x964   : > { %v5540_v44 = vadd.f32 %v5539_v46, %v11921_v7  ;;  %v5675_v39 = vpop.f32.mrf.mxu0  ;;  %v12289_v41 = vadd.f32 %v6182_v54, %v6046_v35 }
 0x965   : > { %13375 = vst [vmem:[#allocation101_spill] sm:$0xff] %v12286_v18  ;;  %v8556_v18 = vld [vmem:[%s9829_s7 + $0x8] sm:$0xff] }
 0x966   : > { %v5676_v52 = vadd.f32 %v5675_v39, %v5540_v44  ;;  %v6049_v40 = vpop.f32.mrf.mxu1 }
 0x967   : > { %6627 = vmatmul.f32.vlgmr.msra.gmra.mxu0 %v8553_v17 }
 0x968   : > { %v5801_v26 = vrot.slane %v5676_v52, 4  ;;  %6251 = vmatmul.f32.gmra.mxu3 %v8554_v55  ;;  %6899 = vmatmul.f32.vlgmr.msra.gmra.mxu2 %v8551_v6 }
 0x969   : > { %6763 = vmatmul.f32.vlgmr.msra.gmra.mxu1 %v8555_v8  ;;  %v8558_v8 = vld [vmem:[%s9839_s21 + $0x8] sm:$0xff] }
 0x96a   : > { %v5802_v11 = vsel %vm5104_vm4, %v5799_v27, %v5801_v26  ;;  %v8557_v27 = vld [vmem:[%s9836_s26 + $0x10] sm:$0xff] }
 0x96b   : > { %v12296_v7 = vadd.f32 %v5802_v11, %v13376_v37  ;;  %v5542_v35 = vpop.f32.mrf.mxu3  ;;  %v6185_v44 = vpop.f32.mrf.mxu2  ;;  %v13378_v37 = vld [vmem:[#allocation32_spill] sm:$0xff] }
 0x96c   : > { %v5543_v46 = vadd.f32 %v5542_v35, %v11930_v51  ;;  %v5678_v54 = vpop.f32.mrf.mxu0  ;;  %v12299_v17 = vadd.f32 %v6185_v44, %v6049_v40 }
 0x96d   : > { %13377 = vst [vmem:[#allocation102_spill] sm:$0xff] %v12296_v7  ;;  %v8559_v7 = vld [vmem:[%s9829_s7 + $0x10] sm:$0xff] }
 0x96e   : > { %v5679_v39 = vadd.f32 %v5678_v54, %v5543_v46  ;;  %v6052_v52 = vpop.f32.mrf.mxu1 }
 0x96f   : > { %6629 = vmatmul.f32.gmra.mxu0 %v8556_v18 }
 0x970   : > { %v5803_v6 = vrot.slane %v5679_v39, 4  ;;  %6253 = vmatmul.f32.gmra.mxu3 %v8557_v27  ;;  %6901 = vmatmul.f32.gmra.mxu2 %v8554_v55 }
 0x971   : > { %6765 = vmatmul.f32.gmra.mxu1 %v8558_v8  ;;  %v8561_v8 = vld [vmem:[%s9839_s21 + $0x10] sm:$0xff] }
 0x972   : > { %v5804_v11 = vsel %vm5104_vm4, %v5801_v26, %v5803_v6  ;;  %v8560_v26 = vld [vmem:[%s9836_s26 + $0x18] sm:$0xff] }
 0x973   : > { %v12306_v51 = vadd.f32 %v5804_v11, %v13378_v37  ;;  %v5545_v40 = vpop.f32.mrf.mxu3  ;;  %v6188_v46 = vpop.f32.mrf.mxu2  ;;  %v13380_v37 = vld [vmem:[#allocation79_spill] sm:$0xff] }
 0x974   : > { %v5546_v35 = vadd.f32 %v5545_v40, %v11939_v33  ;;  %v5681_v44 = vpop.f32.mrf.mxu0  ;;  %v12309_v18 = vadd.f32 %v6188_v46, %v6052_v52 }
 0x975   : > { %13379 = vst [vmem:[#allocation103_spill] sm:$0xff] %v12306_v51  ;;  %v8562_v51 = vld [vmem:[%s9829_s7 + $0x18] sm:$0xff] }
 0x976   : > { %v5682_v54 = vadd.f32 %v5681_v44, %v5546_v35  ;;  %v6055_v39 = vpop.f32.mrf.mxu1 }
 0x977   : > { %6631 = vmatmul.f32.gmra.mxu0 %v8559_v7 }
 0x978   : > { %v5805_v55 = vrot.slane %v5682_v54, 4  ;;  %6255 = vmatmul.f32.gmra.mxu3 %v8560_v26  ;;  %6903 = vmatmul.f32.gmra.mxu2 %v8557_v27 }
 0x979   : > { %6767 = vmatmul.f32.gmra.mxu1 %v8561_v8  ;;  %v8564_v8 = vld [vmem:[%s9839_s21 + $0x18] sm:$0xff] }
 0x97a   : > { %v5806_v11 = vsel %vm5104_vm4, %v5803_v6, %v5805_v55  ;;  %v8563_v6 = vld [vmem:[%s9836_s26 + $0x20] sm:$0xff] }
 0x97b   : > { %v12316_v33 = vadd.f32 %v5806_v11, %v13380_v37  ;;  %v5548_v52 = vpop.f32.mrf.mxu3  ;;  %v6191_v35 = vpop.f32.mrf.mxu2  ;;  %v13382_v37 = vld [vmem:[#allocation80_spill] sm:$0xff] }
 0x97c   : > { %v5549_v40 = vadd.f32 %v5548_v52, %v11948_v42  ;;  %v5684_v46 = vpop.f32.mrf.mxu0  ;;  %v12319_v7 = vadd.f32 %v6191_v35, %v6055_v39 }
 0x97d   : > { %13381 = vst [vmem:[#allocation104_spill] sm:$0xff] %v12316_v33  ;;  %v8565_v33 = vld [vmem:[%s9829_s7 + $0x20] sm:$0xff] }
 0x97e   : > { %v5685_v44 = vadd.f32 %v5684_v46, %v5549_v40  ;;  %v6058_v54 = vpop.f32.mrf.mxu1 }
 0x97f   : > { %6633 = vmatmul.f32.gmra.mxu0 %v8562_v51 }
 0x980   : > { %v5807_v27 = vrot.slane %v5685_v44, 4  ;;  %6257 = vmatmul.f32.gmra.mxu3 %v8563_v6  ;;  %6905 = vmatmul.f32.gmra.mxu2 %v8560_v26 }
 0x981   : > { %6769 = vmatmul.f32.gmra.mxu1 %v8564_v8  ;;  %v8567_v8 = vld [vmem:[%s9839_s21 + $0x20] sm:$0xff] }
 0x982   : > { %v5808_v11 = vsel %vm5104_vm4, %v5805_v55, %v5807_v27  ;;  %v8566_v55 = vld [vmem:[%s9836_s26 + $0x28] sm:$0xff] }
 0x983   : > { %v12326_v42 = vadd.f32 %v5808_v11, %v13382_v37  ;;  %v5551_v39 = vpop.f32.mrf.mxu3  ;;  %v6194_v40 = vpop.f32.mrf.mxu2  ;;  %v13384_v37 = vld [vmem:[#allocation33_spill] sm:$0xff] }
 0x984   : > { %v5552_v52 = vadd.f32 %v5551_v39, %v11957_v3  ;;  %v5687_v35 = vpop.f32.mrf.mxu0  ;;  %v12329_v51 = vadd.f32 %v6194_v40, %v6058_v54 }
 0x985   : > { %13383 = vst [vmem:[#allocation105_spill] sm:$0xff] %v12326_v42  ;;  %v8568_v42 = vld [vmem:[%s9829_s7 + $0x28] sm:$0xff] }
 0x986   : > { %v5688_v46 = vadd.f32 %v5687_v35, %v5552_v52  ;;  %v6061_v44 = vpop.f32.mrf.mxu1 }
 0x987   : > { %6635 = vmatmul.f32.gmra.mxu0 %v8565_v33 }
 0x988   : > { %v5809_v26 = vrot.slane %v5688_v46, 4  ;;  %6260 = vmatmul.f32.gmra.mxu3 %v8566_v55  ;;  %6907 = vmatmul.f32.gmra.mxu2 %v8563_v6 }
 0x989   : > { %6771 = vmatmul.f32.gmra.mxu1 %v8567_v8  ;;  %v8570_v8 = vld [vmem:[%s9839_s21 + $0x28] sm:$0xff] }
 0x98a   : > { %v5810_v11 = vsel %vm5104_vm4, %v5807_v27, %v5809_v26  ;;  %v8569_v27 = vld [vmem:[%s9836_s26 + $0x30] sm:$0xff] }
 0x98b   : > { %v12336_v3 = vadd.f32 %v5810_v11, %v13384_v37  ;;  %v5554_v54 = vpop.f32.mrf.mxu3  ;;  %v6197_v52 = vpop.f32.mrf.mxu2  ;;  %v13386_v37 = vld [vmem:[#allocation81_spill] sm:$0xff] }
 0x98c   : > { %v5555_v39 = vadd.f32 %v5554_v54, %v11966_v28  ;;  %v5690_v40 = vpop.f32.mrf.mxu0  ;;  %v12339_v33 = vadd.f32 %v6197_v52, %v6061_v44 }
 0x98d   : > { %13385 = vst [vmem:[#allocation106_spill] sm:$0xff] %v12336_v3  ;;  %v8571_v3 = vld [vmem:[%s9829_s7 + $0x30] sm:$0xff] }
 0x98e   : > { %v5691_v35 = vadd.f32 %v5690_v40, %v5555_v39  ;;  %v6064_v46 = vpop.f32.mrf.mxu1 }
 0x98f   : > { %6638 = vmatmul.f32.gmra.mxu0 %v8568_v42 }
 0x990   : > { %v5811_v6 = vrot.slane %v5691_v35, 4  ;;  %6263 = vmatmul.f32.gmra.mxu3 %v8569_v27  ;;  %6910 = vmatmul.f32.gmra.mxu2 %v8566_v55 }
 0x991   : > { %6774 = vmatmul.f32.gmra.mxu1 %v8570_v8  ;;  %v8573_v8 = vld [vmem:[%s9839_s21 + $0x30] sm:$0xff] }
 0x992   : > { %v5812_v11 = vsel %vm5104_vm4, %v5809_v26, %v5811_v6  ;;  %v8572_v26 = vld [vmem:[%s9836_s26 + $0x38] sm:$0xff] }
 0x993   : > { %v12346_v28 = vadd.f32 %v5812_v11, %v13386_v37  ;;  %v5557_v44 = vpop.f32.mrf.mxu3  ;;  %v6200_v39 = vpop.f32.mrf.mxu2  ;;  %v13388_v37 = vld [vmem:[#allocation82_spill] sm:$0xff] }
 0x994   : > { %v5558_v54 = vadd.f32 %v5557_v44, %v11975_v21  ;;  %v5693_v52 = vpop.f32.mrf.mxu0  ;;  %v12349_v42 = vadd.f32 %v6200_v39, %v6064_v46 }
 0x995   : > { %13387 = vst [vmem:[#allocation107_spill] sm:$0xff] %v12346_v28  ;;  %v8574_v28 = vld [vmem:[%s9829_s7 + $0x38] sm:$0xff] }
 0x996   : > { %v5694_v40 = vadd.f32 %v5693_v52, %v5558_v54  ;;  %v6067_v35 = vpop.f32.mrf.mxu1 }
 0x997   : > { %6641 = vmatmul.f32.gmra.mxu0 %v8571_v3 }
 0x998   : > { %v5813_v55 = vrot.slane %v5694_v40, 4  ;;  %6266 = vmatmul.f32.gmra.mxu3 %v8572_v26  ;;  %6913 = vmatmul.f32.gmra.mxu2 %v8569_v27 }
 0x999   : > { %6777 = vmatmul.f32.gmra.mxu1 %v8573_v8  ;;  %v8576_v8 = vld [vmem:[%s9839_s21 + $0x38] sm:$0xff] }
 0x99a   : > { %v5814_v11 = vsel %vm5104_vm4, %v5811_v6, %v5813_v55  ;;  %v8575_v6 = vld [vmem:[%s9836_s26 + $0x40] sm:$0xff] }
 0x99b   : > { %v12356_v21 = vadd.f32 %v5814_v11, %v13388_v37  ;;  %v5560_v46 = vpop.f32.mrf.mxu3  ;;  %v6203_v54 = vpop.f32.mrf.mxu2  ;;  %v13390_v37 = vld [vmem:[#allocation83_spill] sm:$0xff] }
 0x99c   : > { %v5561_v44 = vadd.f32 %v5560_v46, %v11984_v24  ;;  %v5696_v39 = vpop.f32.mrf.mxu0  ;;  %v12359_v3 = vadd.f32 %v6203_v54, %v6067_v35 }
 0x99d   : > { %13389 = vst [vmem:[#allocation108_spill] sm:$0xff] %v12356_v21  ;;  %v8577_v21 = vld [vmem:[%s9829_s7 + $0x40] sm:$0xff] }
 0x99e   : > { %v5697_v52 = vadd.f32 %v5696_v39, %v5561_v44  ;;  %v6070_v40 = vpop.f32.mrf.mxu1 }
 0x99f   : > { %6644 = vmatmul.f32.gmra.mxu0 %v8574_v28 }
 0x9a0   : > { %v5815_v27 = vrot.slane %v5697_v52, 4  ;;  %6269 = vmatmul.f32.gmra.mxu3 %v8575_v6  ;;  %6916 = vmatmul.f32.gmra.mxu2 %v8572_v26 }
 0x9a1   : > { %6780 = vmatmul.f32.gmra.mxu1 %v8576_v8  ;;  %v8579_v8 = vld [vmem:[%s9839_s21 + $0x40] sm:$0xff] }
 0x9a2   : > { %v5816_v11 = vsel %vm5104_vm4, %v5813_v55, %v5815_v27  ;;  %v8578_v55 = vld [vmem:[%s9836_s26 + $0x48] sm:$0xff] }
 0x9a3   : > { %v12366_v24 = vadd.f32 %v5816_v11, %v13390_v37  ;;  %v5563_v35 = vpop.f32.mrf.mxu3  ;;  %v6206_v44 = vpop.f32.mrf.mxu2  ;;  %v13392_v37 = vld [vmem:[#allocation84_spill] sm:$0xff] }
 0x9a4   : > { %v5564_v46 = vadd.f32 %v5563_v35, %v11993_v36  ;;  %v5699_v54 = vpop.f32.mrf.mxu0  ;;  %v12369_v28 = vadd.f32 %v6206_v44, %v6070_v40 }
 0x9a5   : > { %13391 = vst [vmem:[#allocation115_spill] sm:$0xff] %v12366_v24  ;;  %v8580_v24 = vld [vmem:[%s9829_s7 + $0x48] sm:$0xff] }
 0x9a6   : > { %v5700_v39 = vadd.f32 %v5699_v54, %v5564_v46  ;;  %v6073_v52 = vpop.f32.mrf.mxu1 }
 0x9a7   : > { %6647 = vmatmul.f32.gmra.mxu0 %v8577_v21 }
 0x9a8   : > { %v5817_v26 = vrot.slane %v5700_v39, 4  ;;  %6272 = vmatmul.f32.gmra.mxu3 %v8578_v55  ;;  %6919 = vmatmul.f32.gmra.mxu2 %v8575_v6 }
 0x9a9   : > { %6783 = vmatmul.f32.gmra.mxu1 %v8579_v8  ;;  %v8582_v8 = vld [vmem:[%s9839_s21 + $0x48] sm:$0xff] }
 0x9aa   : > { %v5818_v11 = vsel %vm5104_vm4, %v5815_v27, %v5817_v26  ;;  %v8581_v27 = vld [vmem:[%s9836_s26 + $0x50] sm:$0xff] }
 0x9ab   : > { %v12376_v36 = vadd.f32 %v5818_v11, %v13392_v37  ;;  %v5566_v40 = vpop.f32.mrf.mxu3  ;;  %v6209_v46 = vpop.f32.mrf.mxu2  ;;  %v13394_v37 = vld [vmem:[#allocation85_spill] sm:$0xff] }
 0x9ac   : > { %v5567_v35 = vadd.f32 %v5566_v40, %v12002_v32  ;;  %v5702_v44 = vpop.f32.mrf.mxu0  ;;  %v12379_v21 = vadd.f32 %v6209_v46, %v6073_v52 }
 0x9ad   : > { %13393 = vst [vmem:[#allocation109_spill] sm:$0xff] %v12376_v36  ;;  %v8583_v36 = vld [vmem:[%s9829_s7 + $0x50] sm:$0xff] }
 0x9ae   : > { %v5703_v54 = vadd.f32 %v5702_v44, %v5567_v35  ;;  %v6076_v39 = vpop.f32.mrf.mxu1 }
 0x9af   : > { %6650 = vmatmul.f32.gmra.mxu0 %v8580_v24 }
 0x9b0   : > { %v5819_v6 = vrot.slane %v5703_v54, 4  ;;  %6275 = vmatmul.f32.gmra.mxu3 %v8581_v27  ;;  %6922 = vmatmul.f32.gmra.mxu2 %v8578_v55 }
 0x9b1   : > { %6786 = vmatmul.f32.gmra.mxu1 %v8582_v8  ;;  %v8585_v8 = vld [vmem:[%s9839_s21 + $0x50] sm:$0xff] }
 0x9b2   : > { %v5820_v11 = vsel %vm5104_vm4, %v5817_v26, %v5819_v6  ;;  %v8584_v26 = vld [vmem:[%s9836_s26 + $0x58] sm:$0xff] }
 0x9b3   : > { %v12386_v32 = vadd.f32 %v5820_v11, %v13394_v37  ;;  %v5569_v52 = vpop.f32.mrf.mxu3  ;;  %v6212_v35 = vpop.f32.mrf.mxu2  ;;  %v13396_v37 = vld [vmem:[#allocation86_spill] sm:$0xff] }
 0x9b4   : > { %v5570_v40 = vadd.f32 %v5569_v52, %v12011_v4  ;;  %v5705_v46 = vpop.f32.mrf.mxu0  ;;  %v12389_v24 = vadd.f32 %v6212_v35, %v6076_v39 }
 0x9b5   : > { %13395 = vst [vmem:[#allocation110_spill] sm:$0xff] %v12386_v32  ;;  %v8586_v32 = vld [vmem:[%s9829_s7 + $0x58] sm:$0xff] }
 0x9b6   : > { %v5706_v44 = vadd.f32 %v5705_v46, %v5570_v40  ;;  %v6079_v54 = vpop.f32.mrf.mxu1 }
 0x9b7   : > { %6653 = vmatmul.f32.gmra.mxu0 %v8583_v36 }
 0x9b8   : > { %v5821_v55 = vrot.slane %v5706_v44, 4  ;;  %6278 = vmatmul.f32.gmra.mxu3 %v8584_v26  ;;  %6925 = vmatmul.f32.gmra.mxu2 %v8581_v27 }
 0x9b9   : > { %6789 = vmatmul.f32.gmra.mxu1 %v8585_v8  ;;  %v8588_v8 = vld [vmem:[%s9839_s21 + $0x58] sm:$0xff] }
 0x9ba   : > { %v5822_v11 = vsel %vm5104_vm4, %v5819_v6, %v5821_v55  ;;  %v8587_v6 = vld [vmem:[%s9836_s26 + $0x60] sm:$0xff] }
 0x9bb   : > { %v12396_v4 = vadd.f32 %v5822_v11, %v13396_v37  ;;  %v5572_v39 = vpop.f32.mrf.mxu3  ;;  %v6215_v40 = vpop.f32.mrf.mxu2  ;;  %v13398_v37 = vld [vmem:[#allocation87_spill] sm:$0xff] }
 0x9bc   : > { %v5573_v52 = vadd.f32 %v5572_v39, %v12020_v59  ;;  %v5708_v35 = vpop.f32.mrf.mxu0  ;;  %v12399_v36 = vadd.f32 %v6215_v40, %v6079_v54 }
 0x9bd   : > { %13397 = vst [vmem:[#allocation111_spill] sm:$0xff] %v12396_v4  ;;  %v8589_v4 = vld [vmem:[%s9829_s7 + $0x60] sm:$0xff] }
 0x9be   : > { %v5709_v46 = vadd.f32 %v5708_v35, %v5573_v52  ;;  %v6082_v44 = vpop.f32.mrf.mxu1 }
 0x9bf   : > { %6656 = vmatmul.f32.gmra.mxu0 %v8586_v32 }
 0x9c0   : > { %v5823_v27 = vrot.slane %v5709_v46, 4  ;;  %6281 = vmatmul.f32.gmra.mxu3 %v8587_v6  ;;  %6928 = vmatmul.f32.gmra.mxu2 %v8584_v26 }
 0x9c1   : > { %6792 = vmatmul.f32.gmra.mxu1 %v8588_v8  ;;  %v8591_v8 = vld [vmem:[%s9839_s21 + $0x60] sm:$0xff] }
 0x9c2   : > { %v5824_v11 = vsel %vm5104_vm4, %v5821_v55, %v5823_v27  ;;  %v8590_v55 = vld [vmem:[%s9836_s26 + $0x68] sm:$0xff] }
 0x9c3   : > { %v12406_v59 = vadd.f32 %v5824_v11, %v13398_v37  ;;  %v5575_v54 = vpop.f32.mrf.mxu3  ;;  %v6218_v52 = vpop.f32.mrf.mxu2  ;;  %v13401_v37 = vld [vmem:[#allocation94_spill] sm:$0xff] }
 0x9c4   : > { %v5576_v39 = vadd.f32 %v5575_v54, %v12029_v61  ;;  %v5711_v40 = vpop.f32.mrf.mxu0  ;;  %v12409_v32 = vadd.f32 %v6218_v52, %v6082_v44  ;;  %v13403_v54 = vld [vmem:[#allocation90_spill] sm:$0xff] }
 0x9c5   : > { %13399 = vst [vmem:[#allocation112_spill] sm:$0xff] %v12406_v59 }
 0x9c6   : > { %13400 = vst [vmem:[#allocation113_spill] sm:$0xff] %v12409_v32  ;;  %v5712_v35 = vadd.f32 %v5711_v40, %v5576_v39  ;;  %v6085_v46 = vpop.f32.mrf.mxu1  ;;  %v8592_v32 = vld [vmem:[%s9829_s7 + $0x68] sm:$0xff] }
 0x9c7   : > { %6659 = vmatmul.f32.gmra.mxu0 %v8589_v4 }
 0x9c8   : > { %v5825_v26 = vrot.slane %v5712_v35, 4  ;;  %6284 = vmatmul.f32.gmra.mxu3 %v8590_v55  ;;  %6931 = vmatmul.f32.gmra.mxu2 %v8587_v6 }
 0x9c9   : > { %6795 = vmatmul.f32.gmra.mxu1 %v8591_v8  ;;  %v8594_v8 = vld [vmem:[%s9839_s21 + $0x68] sm:$0xff] }
 0x9ca   : > { %v5826_v11 = vsel %vm5104_vm4, %v5823_v27, %v5825_v26  ;;  %v8593_v27 = vld [vmem:[%s9836_s26 + $0x70] sm:$0xff] }
 0x9cb   : > { %v12416_v61 = vadd.f32 %v5826_v11, %v13401_v37  ;;  %v5578_v44 = vpop.f32.mrf.mxu3  ;;  %v6221_v52 = vpop.f32.mrf.mxu2  ;;  %v13404_v37 = vld [vmem:[#allocation88_spill] sm:$0xff] }
 0x9cc   : > { %v5579_v39 = vadd.f32 %v5578_v44, %v13403_v54  ;;  %v5714_v40 = vpop.f32.mrf.mxu0  ;;  %v12419_v4 = vadd.f32 %v6221_v52, %v6085_v46 }
 0x9cd   : > { %13402 = vst [vmem:[#allocation114_spill] sm:$0xff] %v12416_v61  ;;  %v8595_v61 = vld [vmem:[%s9829_s7 + $0x70] sm:$0xff] }
 0x9ce   : > { %v5715_v35 = vadd.f32 %v5714_v40, %v5579_v39  ;;  %v6088_v59 = vpop.f32.mrf.mxu1 }
 0x9cf   : > { %6662 = vmatmul.f32.gmra.mxu0 %v8592_v32 }
 0x9d0   : > { %v5827_v6 = vrot.slane %v5715_v35, 4  ;;  %6287 = vmatmul.f32.gmra.mxu3 %v8593_v27  ;;  %6934 = vmatmul.f32.gmra.mxu2 %v8590_v55 }
 0x9d1   : > { %6798 = vmatmul.f32.gmra.mxu1 %v8594_v8  ;;  %v8597_v8 = vld [vmem:[%s9839_s21 + $0x70] sm:$0xff] }
 0x9d2   : > { %v5828_v11 = vsel %vm5104_vm4, %v5825_v26, %v5827_v6  ;;  %v8596_v26 = vld [vmem:[%s9836_s26 + $0x78] sm:$0xff] }
 0x9d3   : > { %v12426_v44 = vadd.f32 %v5828_v11, %v13404_v37  ;;  %v5581_v46 = vpop.f32.mrf.mxu3  ;;  %v6224_v39 = vpop.f32.mrf.mxu2  ;;  %v13407_v37 = vld [vmem:[#allocation89_spill] sm:$0xff] }
 0x9d4   : > { %v5582_v54 = vadd.f32 %v5581_v46, %v12047_v53  ;;  %v5717_v52 = vpop.f32.mrf.mxu0  ;;  %v12429_v32 = vadd.f32 %v6224_v39, %v6088_v59 }
 0x9d5   : > { %13405 = vst [vmem:[#allocation116_spill] sm:$0xff] %v12426_v44  ;;  %v8598_v44 = vld [vmem:[%s9829_s7 + $0x78] sm:$0xff] }
 0x9d6   : > { %13406 = vst [vmem:[#allocation117_spill] sm:$0xff] %v12429_v32  ;;  %v5718_v40 = vadd.f32 %v5717_v52, %v5582_v54  ;;  %v6091_v35 = vpop.f32.mrf.mxu1 }
 0x9d7   : > { %6665 = vmatmul.f32.gmra.mxu0 %v8595_v61 }
 0x9d8   : > { %v5829_v55 = vrot.slane %v5718_v40, 4  ;;  %6290 = vmatmul.f32.gmra.mxu3 %v8596_v26  ;;  %6937 = vmatmul.f32.gmra.mxu2 %v8593_v27 }
 0x9d9   : > { %6801 = vmatmul.f32.gmra.mxu1 %v8597_v8  ;;  %v13410_v8 = vld [vmem:[#allocation70_spill] sm:$0xff] }
 0x9da   : > { %v5830_v11 = vsel %vm5104_vm4, %v5827_v6, %v5829_v55  ;;  %v8599_v6 = vld [vmem:[%s9836_s26 + $0x80] sm:$0xff] }
 0x9db   : > { %v12436_v53 = vadd.f32 %v5830_v11, %v13407_v37  ;;  %v5584_v59 = vpop.f32.mrf.mxu3  ;;  %v6227_v54 = vpop.f32.mrf.mxu2  ;;  %v8600_v37 = vld [vmem:[%s9839_s21 + $0x78] sm:$0xff] }
 0x9dc   : > { %v5585_v46 = vadd.f32 %v5584_v59, %v12058_v25  ;;  %v5720_v39 = vpop.f32.mrf.mxu0  ;;  %v12439_v61 = vadd.f32 %v6227_v54, %v6091_v35  ;;  %v13411_v35 = vld [vmem:[#allocation91_spill] sm:$0xff] }
 0x9dd   : > { %13408 = vst [vmem:[#allocation118_spill] sm:$0xff] %v12436_v53  ;;  %v8601_v53 = vld [vmem:[%s9829_s7 + $0x80] sm:$0xff] }
 0x9de   : > { %13409 = vst [vmem:[#allocation119_spill] sm:$0xff] %v12439_v61  ;;  %v5721_v52 = vadd.f32 %v5720_v39, %v5585_v46  ;;  %v6094_v40 = vpop.f32.mrf.mxu1  ;;  %v13413_v46 = vld [vmem:[#allocation92_spill] sm:$0xff] }
 0x9df   : > { %6668 = vmatmul.f32.gmra.mxu0 %v8598_v44 }
 0x9e0   : > { %v5831_v27 = vrot.slane %v5721_v52, 4  ;;  %6293 = vmatmul.f32.gmra.mxu3 %v8599_v6  ;;  %6940 = vmatmul.f32.gmra.mxu2 %v8596_v26 }
 0x9e1   : > { %6804 = vmatmul.f32.gmra.mxu1 %v8600_v37 }
 0x9e2   : > { %v5832_v11 = vsel %vm5104_vm4, %v5829_v55, %v5831_v27  ;;  %v5833_v25 = vsel %vm5104_vm4, %v5831_v27, %v13410_v8  ;;  %v8602_v27 = vld [vmem:[%s9836_s26 + $0x88] sm:$0xff]  ;;  %v8603_v8 = vld [vmem:[%s9839_s21 + $0x80] sm:$0xff] }
 0x9e3   : > { %v12448_v59 = vadd.f32 %v5832_v11, %v13411_v35  ;;  %v12451_v54 = vadd.f32 %v5833_v25, %v13413_v46  ;;  %v6250_v44 = vpop.f32.mrf.mxu3  ;;  %v6230_v39 = vpop.f32.mrf.mxu2  ;;  %v8604_v46 = vld [vmem:[%s9829_s7 + $0x88] sm:$0xff] }
 0x9e4   : > { %v6628_v52 = vpop.f32.mrf.mxu0  ;;  %v12453_v26 = vadd.f32 %v6230_v39, %v6094_v40  ;;  %v8605_v40 = vld [vmem:[%s9836_s26 + $0x90] sm:$0xff]  ;;  %v8606_v44 = vld [vmem:[%s9839_s21 + $0x88] sm:$0xff] }
 0x9e5   : > { %13412 = vst [vmem:[#allocation120_spill] sm:$0xff] %v12448_v59  ;;  %v8616_v59 = vld [vmem:[%s9829_s7 + $0xa8] sm:$0xff] }
 0x9e6   : > { %13414 = vst [vmem:[#allocation121_spill] sm:$0xff] %v12451_v54  ;;  %v6764_v55 = vpop.f32.mrf.mxu1 }
 0x9e7   : > { %13415 = vst [vmem:[#allocation122_spill] sm:$0xff] %v12453_v26  ;;  %6671 = vmatmul.f32.gmra.mxu0 %v8601_v53  ;;  %v8607_v55 = vld [vmem:[%s9829_s7 + $0x90] sm:$0xff] }
 0x9e8   : > { %6296 = vmatmul.f32.gmra.mxu3 %v8602_v27  ;;  %6943 = vmatmul.f32.gmra.mxu2 %v8599_v6  ;;  %v8617_v26 = vld [vmem:[%s9836_s26 + $0xb0] sm:$0xff] }
 0x9e9   : > { %6807 = vmatmul.f32.gmra.mxu1 %v8603_v8  ;;  %v8608_v8 = vld [vmem:[%s9836_s26 + $0x98] sm:$0xff] }
 0x9eb   : > { %v6252_v11 = vpop.f32.mrf.mxu3  ;;  %v6900_v25 = vpop.f32.mrf.mxu2 }
 0x9ec   : > { %v6630_v37 = vpop.f32.mrf.mxu0  ;;  %v8609_v11 = vld [vmem:[%s9839_s21 + $0x90] sm:$0xff] }
 0x9ee   : > { %v6766_v35 = vpop.f32.mrf.mxu1 }
 0x9ef   : > { %6674 = vmatmul.f32.gmra.mxu0 %v8604_v46  ;;  %v8610_v46 = vld [vmem:[%s9829_s7 + $0x98] sm:$0xff] }
 0x9f0   : > { %6299 = vmatmul.f32.gmra.mxu3 %v8605_v40  ;;  %6946 = vmatmul.f32.gmra.mxu2 %v8602_v27 }
 0x9f1   : > { %6810 = vmatmul.f32.gmra.mxu1 %v8606_v44  ;;  %v8611_v44 = vld [vmem:[%s9836_s26 + $0xa0] sm:$0xff] }
 0x9f3   : > { %v6254_v53 = vpop.f32.mrf.mxu3  ;;  %v6902_v39 = vpop.f32.mrf.mxu2 }
 0x9f4   : > { %v6632_v6 = vpop.f32.mrf.mxu0  ;;  %v8612_v53 = vld [vmem:[%s9839_s21 + $0x98] sm:$0xff] }
 0x9f6   : > { %v6768_v52 = vpop.f32.mrf.mxu1 }
 0x9f7   : > { %6677 = vmatmul.f32.gmra.mxu0 %v8607_v55  ;;  %v8613_v55 = vld [vmem:[%s9829_s7 + $0xa0] sm:$0xff] }
 0x9f8   : > { %6302 = vmatmul.f32.gmra.mxu3 %v8608_v8  ;;  %6949 = vmatmul.f32.gmra.mxu2 %v8605_v40 }
 0x9f9   : > { %6813 = vmatmul.f32.gmra.mxu1 %v8609_v11  ;;  %v8614_v11 = vld [vmem:[%s9836_s26 + $0xa8] sm:$0xff] }
 0x9fb   : > { %v6256_v25 = vpop.f32.mrf.mxu3  ;;  %v6904_v37 = vpop.f32.mrf.mxu2 }
 0x9fc   : > { %v6634_v27 = vpop.f32.mrf.mxu0  ;;  %v8615_v37 = vld [vmem:[%s9839_s21 + $0xa0] sm:$0xff] }
 0x9fe   : > { %v6770_v35 = vpop.f32.mrf.mxu1 }
 0x9ff   : > { %6680 = vmatmul.f32.gmra.mxu0 %v8610_v46 }
 0xa00   : > { %6305 = vmatmul.f32.gmra.mxu3 %v8611_v44  ;;  %6952 = vmatmul.f32.gmra.mxu2 %v8608_v8 }
 0xa01   : > { %6816 = vmatmul.f32.gmra.mxu1 %v8612_v53 }
 0xa03   : > { %v6258_v39 = vpop.f32.mrf.mxu3  ;;  %v6906_v6 = vpop.f32.mrf.mxu2 }
 0xa04   : > { %v6636_v52 = vpop.f32.mrf.mxu0  ;;  %v6259_v25 = vadd.f32 %v6258_v39, %v12089_v19  ;;  %v8618_v39 = vld [vmem:[%s9839_s21 + $0xa8] sm:$0xff] }
 0xa06   : > { %v6772_v40 = vpop.f32.mrf.mxu1  ;;  %v6407_v53 = vrot.slane %v6259_v25, 5 }
 0xa07   : > { %6683 = vmatmul.f32.gmra.mxu0 %v8613_v55 }
 0xa08   : > { %6308 = vmatmul.f32.gmra.mxu3 %v8614_v11  ;;  %6955 = vmatmul.f32.gmra.mxu2 %v8611_v44  ;;  %v6773_v44 = vadd.f32 %v6772_v40, %v6636_v52 }
 0xa09   : > { %6819 = vmatmul.f32.gmra.mxu1 %v8615_v37 }
 0xa0b   : > { %v6261_v27 = vpop.f32.mrf.mxu3  ;;  %v6908_v35 = vpop.f32.mrf.mxu2 }
 0xa0c   : > { %v6262_v8 = vadd.f32 %v6261_v27, %v12099_v56  ;;  %v6639_v46 = vpop.f32.mrf.mxu0  ;;  %v6909_v56 = vadd.f32 %v6908_v35, %v6773_v44 }
 0xa0e   : > { %v6408_v6 = vrot.slane %v6262_v8, 5  ;;  %v6775_v54 = vpop.f32.mrf.mxu1  ;;  %v7057_v32 = vrot.slane %v6909_v56, 6  ;;  %v12484_v56 = vld [vmem:[#allocation13] ss:$0 sm:$0xff] }
 0xa0f   : > { %6686 = vmatmul.f32.gmra.mxu0 %v8616_v59  ;;  %v6776_v37 = vadd.f32 %v6775_v54, %v6639_v46  ;;  %v8621_v46 = vld [vmem:[%s9839_s21 + $0xb0] sm:$0xff] }
 0xa10   : > { %v6409_v55 = vsel %vm6406_vm5, %v6407_v53, %v6408_v6  ;;  %6311 = vmatmul.f32.gmra.mxu3 %v8617_v26  ;;  %6958 = vmatmul.f32.gmra.mxu2 %v8614_v11 }
 0xa11   : > { %v6521_v19 = vadd.f32 %v6409_v55, %v12096_v49  ;;  %6822 = vmatmul.f32.gmra.mxu1 %v8618_v39  ;;  %v8619_v49 = vld [vmem:[%s9829_s7 + $0xb0] sm:$0xff]  ;;  %v8620_v55 = vld [vmem:[%s9836_s26 + $0xb8] sm:$0xff] }
 0xa13   : > { %v6264_v27 = vpop.f32.mrf.mxu3  ;;  %v6911_v8 = vpop.f32.mrf.mxu2 }
 0xa14   : > { %v6265_v25 = vadd.f32 %v6264_v27, %v12109_v31  ;;  %v6642_v61 = vpop.f32.mrf.mxu0  ;;  %v6912_v59 = vadd.f32 %v6911_v8, %v6776_v37 }
 0xa16   : > { %v6410_v53 = vrot.slane %v6265_v25, 5  ;;  %v7058_v52 = vrot.slane %v6912_v59, 6  ;;  %v6778_v40 = vpop.f32.mrf.mxu1 }
 0xa17   : > { %6689 = vmatmul.f32.gmra.mxu0 %v8619_v49  ;;  %v6779_v44 = vadd.f32 %v6778_v40, %v6642_v61  ;;  %v12489_v61 = vld [vmem:[#allocation14] ss:$0 sm:$0xff] }
 0xa18   : > { %v6411_v11 = vsel %vm6406_vm5, %v6408_v6, %v6410_v53  ;;  %6314 = vmatmul.f32.gmra.mxu3 %v8620_v55  ;;  %v7059_v35 = vsel %vm7056_vm6, %v7057_v32, %v7058_v52  ;;  %6961 = vmatmul.f32.gmra.mxu2 %v8617_v26 }
 0xa19   : > { %v6522_v54 = vadd.f32 %v6411_v11, %v12106_v14  ;;  %v7171_v31 = vadd.f32 %v7059_v35, %v6521_v19  ;;  %6825 = vmatmul.f32.gmra.mxu1 %v8621_v46  ;;  %v8623_v19 = vld [vmem:[%s9829_s7 + $0xb8] sm:$0xff]  ;;  %v8625_v11 = vld [vmem:[%s9836_s26 + $0xc0] sm:$0xff] }
 0xa1b   : > { %v6267_v39 = vpop.f32.mrf.mxu3  ;;  %v7216_v37 = vadd.f32 %v12484_v56, %v7171_v31  ;;  %v6914_v27 = vpop.f32.mrf.mxu2  ;;  %v12496_v31 = vld [vmem:[#allocation16] ss:$0 sm:$0xff] }
 0xa1c   : > { %v6268_v6 = vadd.f32 %v6267_v39, %v12119_v13  ;;  %v6645_v25 = vpop.f32.mrf.mxu0  ;;  %v6915_v8 = vadd.f32 %v6914_v27, %v6779_v44  ;;  %v8627_v39 = vld [vmem:[%s9839_s21 + $0xb8] sm:$0xff] }
 0xa1d   : > { %v7257_v14 = vmax.f32 %v7216_v37, 0.0 }
 0xa1e   : > { %v6412_v59 = vrot.slane %v6268_v6, 5  ;;  %v7060_v32 = vrot.slane %v6915_v8, 6  ;;  %v6781_v26 = vpop.f32.mrf.mxu1 }
 0xa1f   : > { %6692 = vmatmul.f32.gmra.mxu0 %v8623_v19  ;;  %v7302_v40 = vmul.f32 %v12489_v61, %v7257_v14  ;;  %v6782_v37 = vadd.f32 %v6781_v26, %v6645_v25 }
 0xa20   : > { %v6413_v49 = vsel %vm6406_vm5, %v6410_v53, %v6412_v59  ;;  %6317 = vmatmul.f32.gmra.mxu3 %v8625_v11  ;;  %v7061_v35 = vsel %vm7056_vm6, %v7058_v52, %v7060_v32  ;;  %6964 = vmatmul.f32.gmra.mxu2 %v8620_v55 }
 0xa21   : > { %v6523_v13 = vadd.f32 %v6413_v49, %v12116_v34  ;;  %v7347_v46 = vadd.f32 %v12496_v31, %v7302_v40  ;;  %v7172_v44 = vadd.f32 %v7061_v35, %v6522_v54  ;;  %6828 = vmatmul.f32.gmra.mxu1 %v8627_v39  ;;  %v8628_v54 = vld [vmem:[%s9829_s7 + $0xc0] sm:$0xff]  ;;  %v8629_v49 = vld [vmem:[%s9836_s26 + $0xc8] sm:$0xff] }
 0xa22   : > { %v8630_v39 = vld [vmem:[%s9839_s21 + $0xc0] sm:$0xff] }
 0xa23   : > { %v6270_v6 = vpop.f32.mrf.mxu3  ;;  %7389 = vst.msk [vmem:[%s9285_s11] sm:$0xff] %vm7388_vm2, %v7347_v46  ;;  %v7217_v53 = vadd.f32 %v12484_v56, %v7172_v44  ;;  %v6917_v27 = vpop.f32.mrf.mxu2 }
 0xa24   : > { %v6271_v34 = vadd.f32 %v6270_v6, %v12129_v22  ;;  %v6648_v52 = vpop.f32.mrf.mxu0  ;;  %v6918_v55 = vadd.f32 %v6917_v27, %v6782_v37 }
 0xa25   : > { %v7258_v8 = vmax.f32 %v7217_v53, 0.0 }
 0xa26   : > { %v6414_v14 = vrot.slane %v6271_v34, 5  ;;  %v7062_v19 = vrot.slane %v6918_v55, 6  ;;  %v6784_v40 = vpop.f32.mrf.mxu1 }
 0xa27   : > { %6695 = vmatmul.f32.gmra.mxu0 %v8628_v54  ;;  %v7303_v25 = vmul.f32 %v12489_v61, %v7258_v8  ;;  %v6785_v37 = vadd.f32 %v6784_v40, %v6648_v52  ;;  %v8632_v54 = vld [vmem:[%s9836_s26 + $0xd0] sm:$0xff] }
 0xa28   : > { %v6415_v26 = vsel %vm6406_vm5, %v6412_v59, %v6414_v14  ;;  %6320 = vmatmul.f32.gmra.mxu3 %v8629_v49  ;;  %v7063_v22 = vsel %vm7056_vm6, %v7060_v32, %v7062_v19  ;;  %6967 = vmatmul.f32.gmra.mxu2 %v8625_v11 }
 0xa29   : > { %v6524_v35 = vadd.f32 %v6415_v26, %v12126_v20  ;;  %v7348_v46 = vadd.f32 %v12496_v31, %v7303_v25  ;;  %v7173_v44 = vadd.f32 %v7063_v22, %v6523_v13  ;;  %6831 = vmatmul.f32.gmra.mxu1 %v8630_v39  ;;  %v8631_v13 = vld [vmem:[%s9829_s7 + $0xc8] sm:$0xff] }
 0xa2b   : > { %v6273_v6 = vpop.f32.mrf.mxu3  ;;  %7390 = vst.msk [vmem:[%s9285_s11 + $0x8] sm:$0xff] %vm7388_vm2, %v7348_v46  ;;  %v7218_v59 = vadd.f32 %v12484_v56, %v7173_v44  ;;  %v6920_v34 = vpop.f32.mrf.mxu2  ;;  %v8633_v46 = vld [vmem:[%s9839_s21 + $0xc8] sm:$0xff] }
 0xa2c   : > { %v6274_v53 = vadd.f32 %v6273_v6, %v12139_v5  ;;  %v6651_v20 = vpop.f32.mrf.mxu0  ;;  %v6921_v27 = vadd.f32 %v6920_v34, %v6785_v37 }
 0xa2d   : > { %v7259_v32 = vmax.f32 %v7218_v59, 0.0 }
 0xa2e   : > { %v6416_v11 = vrot.slane %v6274_v53, 5  ;;  %v7064_v55 = vrot.slane %v6921_v27, 6  ;;  %v6787_v8 = vpop.f32.mrf.mxu1 }
 0xa2f   : > { %6698 = vmatmul.f32.gmra.mxu0 %v8631_v13  ;;  %v7304_v52 = vmul.f32 %v12489_v61, %v7259_v32  ;;  %v6788_v44 = vadd.f32 %v6787_v8, %v6651_v20  ;;  %v8635_v32 = vld [vmem:[%s9836_s26 + $0xd8] sm:$0xff] }
 0xa30   : > { %v6417_v40 = vsel %vm6406_vm5, %v6414_v14, %v6416_v11  ;;  %6323 = vmatmul.f32.gmra.mxu3 %v8632_v54  ;;  %v7065_v5 = vsel %vm7056_vm6, %v7062_v19, %v7064_v55  ;;  %6970 = vmatmul.f32.gmra.mxu2 %v8629_v49 }
 0xa31   : > { %v6525_v25 = vadd.f32 %v6417_v40, %v12136_v30  ;;  %v7349_v26 = vadd.f32 %v12496_v31, %v7304_v52  ;;  %v7174_v22 = vadd.f32 %v7065_v5, %v6524_v35  ;;  %6834 = vmatmul.f32.gmra.mxu1 %v8633_v46  ;;  %v8634_v35 = vld [vmem:[%s9829_s7 + $0xd0] sm:$0xff] }
 0xa32   : > { %v8636_v40 = vld [vmem:[%s9839_s21 + $0xd0] sm:$0xff] }
 0xa33   : > { %v6276_v39 = vpop.f32.mrf.mxu3  ;;  %7391 = vst.msk [vmem:[%s9285_s11 + $0x10] sm:$0xff] %vm7388_vm2, %v7349_v26  ;;  %v7219_v14 = vadd.f32 %v12484_v56, %v7174_v22  ;;  %v6923_v6 = vpop.f32.mrf.mxu2 }
 0xa34   : > { %v6277_v37 = vadd.f32 %v6276_v39, %v12149_v58  ;;  %v6654_v30 = vpop.f32.mrf.mxu0  ;;  %v6924_v59 = vadd.f32 %v6923_v6, %v6788_v44 }
 0xa35   : > { %v7260_v19 = vmax.f32 %v7219_v14, 0.0 }
 0xa36   : > { %v6418_v49 = vrot.slane %v6277_v37, 5  ;;  %v7066_v53 = vrot.slane %v6924_v59, 6  ;;  %v6790_v34 = vpop.f32.mrf.mxu1 }
 0xa37   : > { %6701 = vmatmul.f32.gmra.mxu0 %v8634_v35  ;;  %v7305_v20 = vmul.f32 %v12489_v61, %v7260_v19  ;;  %v6791_v5 = vadd.f32 %v6790_v34, %v6654_v30  ;;  %v8638_v30 = vld [vmem:[%s9836_s26 + $0xe0] sm:$0xff]  ;;  %v8639_v35 = vld [vmem:[%s9839_s21 + $0xd8] sm:$0xff] }
 0xa38   : > { %v6419_v27 = vsel %vm6406_vm5, %v6416_v11, %v6418_v49  ;;  %6326 = vmatmul.f32.gmra.mxu3 %v8635_v32  ;;  %v7067_v58 = vsel %vm7056_vm6, %v7064_v55, %v7066_v53  ;;  %6973 = vmatmul.f32.gmra.mxu2 %v8632_v54 }
 0xa39   : > { %v6526_v8 = vadd.f32 %v6419_v27, %v12146_v50  ;;  %v7350_v13 = vadd.f32 %v12496_v31, %v7305_v20  ;;  %v7175_v52 = vadd.f32 %v7067_v58, %v6525_v25  ;;  %6837 = vmatmul.f32.gmra.mxu1 %v8636_v40  ;;  %v8637_v25 = vld [vmem:[%s9829_s7 + $0xd8] sm:$0xff] }
 0xa3b   : > { %v6279_v26 = vpop.f32.mrf.mxu3  ;;  %7392 = vst.msk [vmem:[%s9285_s11 + $0x18] sm:$0xff] %vm7388_vm2, %v7350_v13  ;;  %v7220_v11 = vadd.f32 %v12484_v56, %v7175_v52  ;;  %v6926_v46 = vpop.f32.mrf.mxu2 }
 0xa3c   : > { %v6280_v22 = vadd.f32 %v6279_v26, %v12159_v63  ;;  %v6657_v50 = vpop.f32.mrf.mxu0  ;;  %v6927_v44 = vadd.f32 %v6926_v46, %v6791_v5 }
 0xa3d   : > { %v7261_v55 = vmax.f32 %v7220_v11, 0.0 }
 0xa3e   : > { %v6420_v54 = vrot.slane %v6280_v22, 5  ;;  %v7068_v39 = vrot.slane %v6927_v44, 6  ;;  %v6793_v14 = vpop.f32.mrf.mxu1  ;;  %v8641_v22 = vld [vmem:[%s9836_s26 + $0xe8] sm:$0xff] }
 0xa3f   : > { %6704 = vmatmul.f32.gmra.mxu0 %v8637_v25  ;;  %v7306_v37 = vmul.f32 %v12489_v61, %v7261_v55  ;;  %v6794_v20 = vadd.f32 %v6793_v14, %v6657_v50  ;;  %v8642_v55 = vld [vmem:[%s9839_s21 + $0xe0] sm:$0xff] }
 0xa40   : > { %v6421_v6 = vsel %vm6406_vm5, %v6418_v49, %v6420_v54  ;;  %6329 = vmatmul.f32.gmra.mxu3 %v8638_v30  ;;  %v7069_v63 = vsel %vm7056_vm6, %v7066_v53, %v7068_v39  ;;  %6976 = vmatmul.f32.gmra.mxu2 %v8635_v32 }
 0xa41   : > { %v6527_v59 = vadd.f32 %v6421_v6, %v12156_v47  ;;  %v7351_v19 = vadd.f32 %v12496_v31, %v7306_v37  ;;  %v7176_v34 = vadd.f32 %v7069_v63, %v6526_v8  ;;  %6840 = vmatmul.f32.gmra.mxu1 %v8639_v35  ;;  %v8640_v8 = vld [vmem:[%s9829_s7 + $0xe0] sm:$0xff] }
 0xa43   : > { %v6282_v27 = vpop.f32.mrf.mxu3  ;;  %7393 = vst.msk [vmem:[%s9285_s11 + $0x20] sm:$0xff] %vm7388_vm2, %v7351_v19  ;;  %v7221_v49 = vadd.f32 %v12484_v56, %v7176_v34  ;;  %v6929_v13 = vpop.f32.mrf.mxu2 }
 0xa44   : > { %v6283_v58 = vadd.f32 %v6282_v27, %v12169_v48  ;;  %v6660_v47 = vpop.f32.mrf.mxu0  ;;  %v6930_v52 = vadd.f32 %v6929_v13, %v6794_v20  ;;  %v8644_v27 = vld [vmem:[%s9836_s26 + $0xf0] sm:$0xff] }
 0xa45   : > { %v7262_v53 = vmax.f32 %v7221_v49, 0.0 }
 0xa46   : > { %v6422_v32 = vrot.slane %v6283_v58, 5  ;;  %v7070_v40 = vrot.slane %v6930_v52, 6  ;;  %v6796_v5 = vpop.f32.mrf.mxu1 }
 0xa47   : > { %6707 = vmatmul.f32.gmra.mxu0 %v8640_v8  ;;  %v7307_v26 = vmul.f32 %v12489_v61, %v7262_v53  ;;  %v6797_v14 = vadd.f32 %v6796_v5, %v6660_v47  ;;  %v8645_v47 = vld [vmem:[%s9839_s21 + $0xe8] sm:$0xff] }
 0xa48   : > { %v6423_v11 = vsel %vm6406_vm5, %v6420_v54, %v6422_v32  ;;  %6332 = vmatmul.f32.gmra.mxu3 %v8641_v22  ;;  %v7071_v48 = vsel %vm7056_vm6, %v7068_v39, %v7070_v40  ;;  %6979 = vmatmul.f32.gmra.mxu2 %v8638_v30 }
 0xa49   : > { %v6528_v46 = vadd.f32 %v6423_v11, %v12166_v29  ;;  %v7352_v50 = vadd.f32 %v12496_v31, %v7307_v26  ;;  %v7177_v44 = vadd.f32 %v7071_v48, %v6527_v59  ;;  %6843 = vmatmul.f32.gmra.mxu1 %v8642_v55  ;;  %v8643_v59 = vld [vmem:[%s9829_s7 + $0xe8] sm:$0xff]  ;;  %v8647_v55 = vld [vmem:[%s9836_s26 + $0xf8] sm:$0xff] }
 0xa4b   : > { %v6285_v25 = vpop.f32.mrf.mxu3  ;;  %7394 = vst.msk [vmem:[%s9285_s11 + $0x28] sm:$0xff] %vm7388_vm2, %v7352_v50  ;;  %v7222_v54 = vadd.f32 %v12484_v56, %v7177_v44  ;;  %v6932_v6 = vpop.f32.mrf.mxu2 }
 0xa4c   : > { %v6286_v37 = vadd.f32 %v6285_v25, %v12179_v0  ;;  %v6663_v29 = vpop.f32.mrf.mxu0  ;;  %v6933_v63 = vadd.f32 %v6932_v6, %v6797_v14 }
 0xa4d   : > { %v7263_v39 = vmax.f32 %v7222_v54, 0.0 }
 0xa4e   : > { %v6424_v30 = vrot.slane %v6286_v37, 5  ;;  %v7072_v19 = vrot.slane %v6933_v63, 6  ;;  %v6799_v34 = vpop.f32.mrf.mxu1  ;;  %v8648_v37 = vld [vmem:[%s9839_s21 + $0xf0] sm:$0xff] }
 0xa4f   : > { %6710 = vmatmul.f32.gmra.mxu0 %v8643_v59  ;;  %v7308_v35 = vmul.f32 %v12489_v61, %v7263_v39  ;;  %v6800_v52 = vadd.f32 %v6799_v34, %v6663_v29 }
 0xa50   : > { %v6425_v20 = vsel %vm6406_vm5, %v6422_v32, %v6424_v30  ;;  %6335 = vmatmul.f32.gmra.mxu3 %v8644_v27  ;;  %v7073_v0 = vsel %vm7056_vm6, %v7070_v40, %v7072_v19  ;;  %6982 = vmatmul.f32.gmra.mxu2 %v8641_v22 }
 0xa51   : > { %v6529_v49 = vadd.f32 %v6425_v20, %v12176_v2  ;;  %v7353_v58 = vadd.f32 %v12496_v31, %v7308_v35  ;;  %v7178_v13 = vadd.f32 %v7073_v0, %v6528_v46  ;;  %6846 = vmatmul.f32.gmra.mxu1 %v8645_v47  ;;  %v8646_v46 = vld [vmem:[%s9829_s7 + $0xf0] sm:$0xff] }
 0xa53   : > { %v6288_v53 = vpop.f32.mrf.mxu3  ;;  %7395 = vst.msk [vmem:[%s9285_s11 + $0x30] sm:$0xff] %vm7388_vm2, %v7353_v58  ;;  %v7223_v32 = vadd.f32 %v12484_v56, %v7178_v13  ;;  %v6935_v8 = vpop.f32.mrf.mxu2  ;;  %v8650_v58 = vld [vmem:[%s9836_s26 + $0x100] sm:$0xff] }
 0xa54   : > { %v6289_v5 = vadd.f32 %v6288_v53, %v12189_v38  ;;  %v6666_v2 = vpop.f32.mrf.mxu0  ;;  %v6936_v26 = vadd.f32 %v6935_v8, %v6800_v52  ;;  %v8651_v53 = vld [vmem:[%s9839_s21 + $0xf8] sm:$0xff] }
 0xa55   : > { %v7264_v40 = vmax.f32 %v7223_v32, 0.0 }
 0xa56   : > { %v6426_v11 = vrot.slane %v6289_v5, 5  ;;  %v7074_v22 = vrot.slane %v6936_v26, 6  ;;  %v6802_v48 = vpop.f32.mrf.mxu1 }
 0xa57   : > { %6713 = vmatmul.f32.gmra.mxu0 %v8646_v46  ;;  %v7309_v50 = vmul.f32 %v12489_v61, %v7264_v40  ;;  %v6803_v6 = vadd.f32 %v6802_v48, %v6666_v2 }
 0xa58   : > { %v6427_v44 = vsel %vm6406_vm5, %v6424_v30, %v6426_v11  ;;  %6338 = vmatmul.f32.gmra.mxu3 %v8647_v55  ;;  %v7075_v38 = vsel %vm7056_vm6, %v7072_v19, %v7074_v22  ;;  %6985 = vmatmul.f32.gmra.mxu2 %v8644_v27  ;;  %v8649_v27 = vld [vmem:[%s9829_s7 + $0xf8] sm:$0xff] }
 0xa59   : > { %v6530_v14 = vadd.f32 %v6427_v44, %v12186_v45  ;;  %v7354_v25 = vadd.f32 %v12496_v31, %v7309_v50  ;;  %v7179_v54 = vadd.f32 %v7075_v38, %v6529_v49  ;;  %6849 = vmatmul.f32.gmra.mxu1 %v8648_v37  ;;  %v8652_v50 = vld [vmem:[%s9829_s7 + $0x100] sm:$0xff] }
 0xa5a   : > { %v13416_v38 = vld [vmem:[#allocation93_spill] sm:$0xff] }
 0xa5b   : > { %v6291_v29 = vpop.f32.mrf.mxu3  ;;  %7396 = vst.msk [vmem:[%s9285_s11 + $0x38] sm:$0xff] %vm7388_vm2, %v7354_v25  ;;  %v7224_v63 = vadd.f32 %v12484_v56, %v7179_v54  ;;  %v6938_v30 = vpop.f32.mrf.mxu2 }
 0xa5c   : > { %v6292_v39 = vadd.f32 %v6291_v29, %v12199_v10  ;;  %v6669_v45 = vpop.f32.mrf.mxu0  ;;  %v6939_v34 = vadd.f32 %v6938_v30, %v6803_v6  ;;  %v8654_v6 = vld [vmem:[%s9839_s21 + $0x100] sm:$0xff] }
 0xa5d   : > { %v7265_v19 = vmax.f32 %v7224_v63, 0.0 }
 0xa5e   : > { %v6428_v59 = vrot.slane %v6292_v39, 5  ;;  %v7076_v35 = vrot.slane %v6939_v34, 6  ;;  %v6805_v20 = vpop.f32.mrf.mxu1 }
 0xa5f   : > { %6716 = vmatmul.f32.gmra.mxu0 %v8649_v27  ;;  %v7310_v49 = vmul.f32 %v12489_v61, %v7265_v19  ;;  %v6806_v32 = vadd.f32 %v6805_v20, %v6669_v45 }
 0xa60   : > { %v6429_v0 = vsel %vm6406_vm5, %v6426_v11, %v6428_v59  ;;  %6341 = vmatmul.f32.gmra.mxu3 %v8650_v58  ;;  %v7077_v10 = vsel %vm7056_vm6, %v7074_v22, %v7076_v35  ;;  %6988 = vmatmul.f32.gmra.mxu2 %v8647_v55 }
 0xa61   : > { %v6531_v13 = vadd.f32 %v6429_v0, %v12196_v43  ;;  %v7355_v47 = vadd.f32 %v12496_v31, %v7310_v49  ;;  %v7180_v52 = vadd.f32 %v7077_v10, %v6530_v14  ;;  %6852 = vmatmul.f32.gmra.mxu1 %v8651_v53  ;;  %v8653_v14 = vld [vmem:[%s9836_s26 + $0x108] sm:$0xff] }
 0xa62   : > { %v8655_v49 = vld [vmem:[%s9829_s7 + $0x108] sm:$0xff] }
 0xa63   : > { %v6294_v5 = vpop.f32.mrf.mxu3  ;;  %7397 = vst.msk [vmem:[%s9285_s11 + $0x40] sm:$0xff] %vm7388_vm2, %v7355_v47  ;;  %v7225_v8 = vadd.f32 %v12484_v56, %v7180_v52  ;;  %v6941_v26 = vpop.f32.mrf.mxu2  ;;  %v13417_v10 = vld [vmem:[#allocation95_spill] sm:$0xff] }
 0xa64   : > { %v6295_v2 = vadd.f32 %v6294_v5, %v12209_v16  ;;  %v6672_v43 = vpop.f32.mrf.mxu0  ;;  %v6942_v40 = vadd.f32 %v6941_v26, %v6806_v32  ;;  %v8657_v32 = vld [vmem:[%s9839_s21 + $0x108] sm:$0xff] }
 0xa65   : > { %v7266_v11 = vmax.f32 %v7225_v8, 0.0 }
 0xa66   : > { %v6430_v22 = vrot.slane %v6295_v2, 5  ;;  %v7078_v48 = vrot.slane %v6942_v40, 6  ;;  %v6808_v46 = vpop.f32.mrf.mxu1 }
 0xa67   : > { %6719 = vmatmul.f32.gmra.mxu0 %v8652_v50  ;;  %v7311_v44 = vmul.f32 %v12489_v61, %v7266_v11  ;;  %v6809_v29 = vadd.f32 %v6808_v46, %v6672_v43 }
 0xa68   : > { %v6431_v55 = vsel %vm6406_vm5, %v6428_v59, %v6430_v22  ;;  %6344 = vmatmul.f32.gmra.mxu3 %v8653_v14  ;;  %v7079_v16 = vsel %vm7056_vm6, %v7076_v35, %v7078_v48  ;;  %6991 = vmatmul.f32.gmra.mxu2 %v8650_v58 }
 0xa69   : > { %v6532_v25 = vadd.f32 %v6431_v55, %v13416_v38  ;;  %v7356_v54 = vadd.f32 %v12496_v31, %v7311_v44  ;;  %v7181_v37 = vadd.f32 %v7079_v16, %v6531_v13  ;;  %6855 = vmatmul.f32.gmra.mxu1 %v8654_v6  ;;  %v8656_v13 = vld [vmem:[%s9836_s26 + $0x110] sm:$0xff]  ;;  %v8659_v38 = vld [vmem:[%s9836_s26 + $0x118] sm:$0xff] }
 0xa6a   : > { %v8658_v44 = vld [vmem:[%s9829_s7 + $0x110] sm:$0xff] }
 0xa6b   : > { %v6297_v63 = vpop.f32.mrf.mxu3  ;;  %7398 = vst.msk [vmem:[%s9285_s11 + $0x48] sm:$0xff] %vm7388_vm2, %v7356_v54  ;;  %v7226_v39 = vadd.f32 %v12484_v56, %v7181_v37  ;;  %v6944_v45 = vpop.f32.mrf.mxu2  ;;  %v8660_v37 = vld [vmem:[%s9839_s21 + $0x110] sm:$0xff] }
 0xa6c   : > { %v6298_v30 = vadd.f32 %v6297_v63, %v12219_v23  ;;  %v6675_v34 = vpop.f32.mrf.mxu0  ;;  %v6945_v19 = vadd.f32 %v6944_v45, %v6809_v29 }
 0xa6d   : > { %v7267_v59 = vmax.f32 %v7226_v39, 0.0 }
 0xa6e   : > { %v6432_v35 = vrot.slane %v6298_v30, 5  ;;  %v7080_v20 = vrot.slane %v6945_v19, 6  ;;  %v6811_v27 = vpop.f32.mrf.mxu1 }
 0xa6f   : > { %6722 = vmatmul.f32.gmra.mxu0 %v8655_v49  ;;  %v7312_v0 = vmul.f32 %v12489_v61, %v7267_v59  ;;  %v6812_v5 = vadd.f32 %v6811_v27, %v6675_v34 }
 0xa70   : > { %v6433_v58 = vsel %vm6406_vm5, %v6430_v22, %v6432_v35  ;;  %6347 = vmatmul.f32.gmra.mxu3 %v8656_v13  ;;  %v7081_v23 = vsel %vm7056_vm6, %v7078_v48, %v7080_v20  ;;  %6994 = vmatmul.f32.gmra.mxu2 %v8653_v14 }
 0xa71   : > { %v6533_v47 = vadd.f32 %v6433_v58, %v13417_v10  ;;  %v7357_v52 = vadd.f32 %v12496_v31, %v7312_v0  ;;  %v7182_v53 = vadd.f32 %v7081_v23, %v6532_v25  ;;  %6858 = vmatmul.f32.gmra.mxu1 %v8657_v32  ;;  %v8662_v0 = vld [vmem:[%s9836_s26 + $0x120] sm:$0xff]  ;;  %v13418_v58 = vld [vmem:[#allocation96_spill] sm:$0xff] }
 0xa72   : > { %v8663_v23 = vld [vmem:[%s9839_s21 + $0x118] sm:$0xff] }
 0xa73   : > { %v6300_v8 = vpop.f32.mrf.mxu3  ;;  %7399 = vst.msk [vmem:[%s9285_s11 + $0x50] sm:$0xff] %vm7388_vm2, %v7357_v52  ;;  %v7227_v2 = vadd.f32 %v12484_v56, %v7182_v53  ;;  %v6947_v43 = vpop.f32.mrf.mxu2 }
 0xa74   : > { %v6301_v26 = vadd.f32 %v6300_v8, %v12229_v9  ;;  %v6678_v40 = vpop.f32.mrf.mxu0  ;;  %v6948_v11 = vadd.f32 %v6947_v43, %v6812_v5 }
 0xa75   : > { %v7268_v22 = vmax.f32 %v7227_v2, 0.0 }
 0xa76   : > { %v6434_v48 = vrot.slane %v6301_v26, 5  ;;  %v7082_v46 = vrot.slane %v6948_v11, 6  ;;  %v6814_v50 = vpop.f32.mrf.mxu1 }
 0xa77   : > { %6725 = vmatmul.f32.gmra.mxu0 %v8658_v44  ;;  %v7313_v55 = vmul.f32 %v12489_v61, %v7268_v22  ;;  %v6815_v6 = vadd.f32 %v6814_v50, %v6678_v40  ;;  %v8665_v44 = vld [vmem:[%s9836_s26 + $0x128] sm:$0xff] }
 0xa78   : > { %v6435_v14 = vsel %vm6406_vm5, %v6432_v35, %v6434_v48  ;;  %6350 = vmatmul.f32.gmra.mxu3 %v8659_v38  ;;  %v7083_v9 = vsel %vm7056_vm6, %v7080_v20, %v7082_v46  ;;  %6997 = vmatmul.f32.gmra.mxu2 %v8656_v13  ;;  %v8661_v20 = vld [vmem:[%s9829_s7 + $0x118] sm:$0xff] }
 0xa79   : > { %v6534_v25 = vadd.f32 %v6435_v14, %v12226_v1  ;;  %v7358_v16 = vadd.f32 %v12496_v31, %v7313_v55  ;;  %v7183_v54 = vadd.f32 %v7083_v9, %v6533_v47  ;;  %6861 = vmatmul.f32.gmra.mxu1 %v8660_v37  ;;  %v13419_v55 = vld [vmem:[#allocation97_spill] sm:$0xff] }
 0xa7a   : > { %v8666_v9 = vld [vmem:[%s9839_s21 + $0x120] sm:$0xff] }
 0xa7b   : > { %v6303_v29 = vpop.f32.mrf.mxu3  ;;  %7400 = vst.msk [vmem:[%s9285_s11 + $0x58] sm:$0xff] %vm7388_vm2, %v7358_v16  ;;  %v7228_v63 = vadd.f32 %v12484_v56, %v7183_v54  ;;  %v6950_v30 = vpop.f32.mrf.mxu2 }
 0xa7c   : > { %v6304_v39 = vadd.f32 %v6303_v29, %v12239_v12  ;;  %v6681_v1 = vpop.f32.mrf.mxu0  ;;  %v6951_v45 = vadd.f32 %v6950_v30, %v6815_v6 }
 0xa7d   : > { %v7269_v34 = vmax.f32 %v7228_v63, 0.0 }
 0xa7e   : > { %v6436_v19 = vrot.slane %v6304_v39, 5  ;;  %v7084_v59 = vrot.slane %v6951_v45, 6  ;;  %v6817_v35 = vpop.f32.mrf.mxu1 }
 0xa7f   : > { %6728 = vmatmul.f32.gmra.mxu0 %v8661_v20  ;;  %v7314_v27 = vmul.f32 %v12489_v61, %v7269_v34  ;;  %v6818_v52 = vadd.f32 %v6817_v35, %v6681_v1  ;;  %v8668_v20 = vld [vmem:[%s9836_s26 + $0x130] sm:$0xff] }
 0xa80   : > { %v6437_v49 = vsel %vm6406_vm5, %v6434_v48, %v6436_v19  ;;  %6353 = vmatmul.f32.gmra.mxu3 %v8662_v0  ;;  %v7085_v12 = vsel %vm7056_vm6, %v7082_v46, %v7084_v59  ;;  %7000 = vmatmul.f32.gmra.mxu2 %v8659_v38  ;;  %v8664_v48 = vld [vmem:[%s9829_s7 + $0x120] sm:$0xff] }
 0xa81   : > { %v6535_v13 = vadd.f32 %v6437_v49, %v13418_v58  ;;  %v7359_v10 = vadd.f32 %v12496_v31, %v7314_v27  ;;  %v7184_v47 = vadd.f32 %v7085_v12, %v6534_v25  ;;  %6864 = vmatmul.f32.gmra.mxu1 %v8663_v23  ;;  %v13420_v27 = vld [vmem:[#allocation98_spill] sm:$0xff] }
 0xa83   : > { %v6306_v53 = vpop.f32.mrf.mxu3  ;;  %7401 = vst.msk [vmem:[%s9285_s11 + $0x60] sm:$0xff] %vm7388_vm2, %v7359_v10  ;;  %v7229_v32 = vadd.f32 %v12484_v56, %v7184_v47  ;;  %v6953_v8 = vpop.f32.mrf.mxu2 }
 0xa84   : > { %v6307_v5 = vadd.f32 %v6306_v53, %v12249_v60  ;;  %v6684_v2 = vpop.f32.mrf.mxu0  ;;  %v6954_v26 = vadd.f32 %v6953_v8, %v6818_v52 }
 0xa85   : > { %v7270_v43 = vmax.f32 %v7229_v32, 0.0 }
 0xa86   : > { %v6438_v40 = vrot.slane %v6307_v5, 5  ;;  %v7086_v11 = vrot.slane %v6954_v26, 6  ;;  %v6820_v22 = vpop.f32.mrf.mxu1 }
 0xa87   : > { %6731 = vmatmul.f32.gmra.mxu0 %v8664_v48  ;;  %v7315_v46 = vmul.f32 %v12489_v61, %v7270_v43  ;;  %v6821_v16 = vadd.f32 %v6820_v22, %v6684_v2  ;;  %v8670_v43 = vld [vmem:[%s9829_s7 + $0x130] sm:$0xff]  ;;  %v8671_v22 = vld [vmem:[%s9836_s26 + $0x138] sm:$0xff] }
 0xa88   : > { %v6439_v50 = vsel %vm6406_vm5, %v6436_v19, %v6438_v40  ;;  %6356 = vmatmul.f32.gmra.mxu3 %v8665_v44  ;;  %v7087_v60 = vsel %vm7056_vm6, %v7084_v59, %v7086_v11  ;;  %7003 = vmatmul.f32.gmra.mxu2 %v8662_v0  ;;  %v8667_v19 = vld [vmem:[%s9829_s7 + $0x128] sm:$0xff] }
 0xa89   : > { %v6536_v14 = vadd.f32 %v6439_v50, %v13419_v55  ;;  %v7360_v38 = vadd.f32 %v12496_v31, %v7315_v46  ;;  %v7185_v25 = vadd.f32 %v7087_v60, %v6535_v13  ;;  %6867 = vmatmul.f32.gmra.mxu1 %v8666_v9  ;;  %v8669_v13 = vld [vmem:[%s9839_s21 + $0x128] sm:$0xff]  ;;  %v8672_v55 = vld [vmem:[%s9839_s21 + $0x130] sm:$0xff] }
 0xa8a   : > { %v13421_v48 = vld [vmem:[#allocation99_spill] sm:$0xff] }
 0xa8b   : > { %v6309_v54 = vpop.f32.mrf.mxu3  ;;  %7402 = vst.msk [vmem:[%s9285_s11 + $0x68] sm:$0xff] %vm7388_vm2, %v7360_v38  ;;  %v7230_v37 = vadd.f32 %v12484_v56, %v7185_v25  ;;  %v6956_v29 = vpop.f32.mrf.mxu2 }
 0xa8c   : > { %v6310_v6 = vadd.f32 %v6309_v54, %v12259_v57  ;;  %v6687_v63 = vpop.f32.mrf.mxu0  ;;  %v6957_v39 = vadd.f32 %v6956_v29, %v6821_v16 }
 0xa8d   : > { %v7271_v30 = vmax.f32 %v7230_v37, 0.0 }
 0xa8e   : > { %v6440_v1 = vrot.slane %v6310_v6, 5  ;;  %v7088_v45 = vrot.slane %v6957_v39, 6  ;;  %v6823_v34 = vpop.f32.mrf.mxu1  ;;  %v8673_v39 = vld [vmem:[%s9829_s7 + $0x138] sm:$0xff] }
 0xa8f   : > { %6734 = vmatmul.f32.gmra.mxu0 %v8667_v19  ;;  %v7316_v59 = vmul.f32 %v12489_v61, %v7271_v30  ;;  %v6824_v12 = vadd.f32 %v6823_v34, %v6687_v63  ;;  %v13422_v34 = vld [vmem:[#allocation100_spill] sm:$0xff] }
 0xa90   : > { %v6441_v35 = vsel %vm6406_vm5, %v6438_v40, %v6440_v1  ;;  %6359 = vmatmul.f32.gmra.mxu3 %v8668_v20  ;;  %v7089_v57 = vsel %vm7056_vm6, %v7086_v11, %v7088_v45  ;;  %7006 = vmatmul.f32.gmra.mxu2 %v8665_v44 }
 0xa91   : > { %v6537_v49 = vadd.f32 %v6441_v35, %v13420_v27  ;;  %v7361_v0 = vadd.f32 %v12496_v31, %v7316_v59  ;;  %v7186_v58 = vadd.f32 %v7089_v57, %v6536_v14  ;;  %6870 = vmatmul.f32.gmra.mxu1 %v8669_v13 }
 0xa93   : > { %v6312_v10 = vpop.f32.mrf.mxu3  ;;  %7403 = vst.msk [vmem:[%s9285_s11 + $0x70] sm:$0xff] %vm7388_vm2, %v7361_v0  ;;  %v7231_v47 = vadd.f32 %v12484_v56, %v7186_v58  ;;  %v6959_v52 = vpop.f32.mrf.mxu2 }
 0xa94   : > { %v6313_v23 = vadd.f32 %v6312_v10, %v12269_v62  ;;  %v6690_v53 = vpop.f32.mrf.mxu0  ;;  %v6960_v32 = vadd.f32 %v6959_v52, %v6824_v12 }
 0xa95   : > { %v7272_v5 = vmax.f32 %v7231_v47, 0.0 }
 0xa96   : > { %v6442_v8 = vrot.slane %v6313_v23, 5  ;;  %v7090_v2 = vrot.slane %v6960_v32, 6  ;;  %v6826_v26 = vpop.f32.mrf.mxu1 }
 0xa97   : > { %6737 = vmatmul.f32.gmra.mxu0 %v8670_v43  ;;  %v7317_v40 = vmul.f32 %v12489_v61, %v7272_v5  ;;  %v6827_v14 = vadd.f32 %v6826_v26, %v6690_v53  ;;  %v8676_v53 = vld [vmem:[%s9829_s7 + $0x140] sm:$0xff] }
 0xa98   : > { %v6443_v11 = vsel %vm6406_vm5, %v6440_v1, %v6442_v8  ;;  %6362 = vmatmul.f32.gmra.mxu3 %v8671_v22  ;;  %v7091_v62 = vsel %vm7056_vm6, %v7088_v45, %v7090_v2  ;;  %7009 = vmatmul.f32.gmra.mxu2 %v8668_v20  ;;  %v8674_v45 = vld [vmem:[%s9836_s26 + $0x140] sm:$0xff]  ;;  %v8675_v20 = vld [vmem:[%s9839_s21 + $0x138] sm:$0xff] }
 0xa99   : > { %v6538_v46 = vadd.f32 %v6443_v11, %v13421_v48  ;;  %v7362_v50 = vadd.f32 %v12496_v31, %v7317_v40  ;;  %v7187_v44 = vadd.f32 %v7091_v62, %v6537_v49  ;;  %6873 = vmatmul.f32.gmra.mxu1 %v8672_v55  ;;  %v8677_v40 = vld [vmem:[%s9839_s21 + $0x140] sm:$0xff] }
 0xa9b   : > { %v6315_v60 = vpop.f32.mrf.mxu3  ;;  %7404 = vst.msk [vmem:[%s9285_s11 + $0x78] sm:$0xff] %vm7388_vm2, %v7362_v50  ;;  %v7232_v38 = vadd.f32 %v12484_v56, %v7187_v44  ;;  %v6962_v9 = vpop.f32.mrf.mxu2 }
 0xa9c   : > { %v6316_v25 = vadd.f32 %v6315_v60, %v12279_v15  ;;  %v6693_v16 = vpop.f32.mrf.mxu0  ;;  %v6963_v54 = vadd.f32 %v6962_v9, %v6827_v14 }
 0xa9d   : > { %v7273_v37 = vmax.f32 %v7232_v38, 0.0 }
 0xa9e   : > { %v6444_v6 = vrot.slane %v6316_v25, 5  ;;  %v7092_v29 = vrot.slane %v6963_v54, 6  ;;  %v6829_v63 = vpop.f32.mrf.mxu1 }
 0xa9f   : > { %6740 = vmatmul.f32.gmra.mxu0 %v8673_v39  ;;  %v7318_v30 = vmul.f32 %v12489_v61, %v7273_v37  ;;  %v6830_v27 = vadd.f32 %v6829_v63, %v6693_v16  ;;  %v13424_v16 = vld [vmem:[#allocation102_spill] sm:$0xff] }
 0xaa0   : > { %v6445_v1 = vsel %vm6406_vm5, %v6442_v8, %v6444_v6  ;;  %6365 = vmatmul.f32.gmra.mxu3 %v8674_v45  ;;  %v7093_v15 = vsel %vm7056_vm6, %v7090_v2, %v7092_v29  ;;  %7012 = vmatmul.f32.gmra.mxu2 %v8671_v22  ;;  %v13423_v8 = vld [vmem:[#allocation101_spill] sm:$0xff] }
 0xaa1   : > { %v6539_v19 = vadd.f32 %v6445_v1, %v13422_v34  ;;  %v7363_v59 = vadd.f32 %v12496_v31, %v7318_v30  ;;  %v7188_v35 = vadd.f32 %v7093_v15, %v6538_v46  ;;  %6876 = vmatmul.f32.gmra.mxu1 %v8675_v20 }
 0xaa3   : > { %v6318_v49 = vpop.f32.mrf.mxu3  ;;  %7405 = vst.msk [vmem:[%s9285_s11 + $0x80] sm:$0xff] %vm7388_vm2, %v7363_v59  ;;  %v7233_v57 = vadd.f32 %v12484_v56, %v7188_v35  ;;  %v6965_v58 = vpop.f32.mrf.mxu2 }
 0xaa4   : > { %v6319_v0 = vadd.f32 %v6318_v49, %v12289_v41  ;;  %v6696_v13 = vpop.f32.mrf.mxu0  ;;  %v6966_v12 = vadd.f32 %v6965_v58, %v6830_v27  ;;  %v13425_v49 = vld [vmem:[#allocation103_spill] sm:$0xff] }
 0xaa5   : > { %v7274_v10 = vmax.f32 %v7233_v57, 0.0 }
 0xaa6   : > { %v6446_v47 = vrot.slane %v6319_v0, 5  ;;  %v7094_v23 = vrot.slane %v6966_v12, 6  ;;  %v6832_v52 = vpop.f32.mrf.mxu1 }
 0xaa7   : > { %6743 = vmatmul.f32.gmra.mxu0 %v8676_v53  ;;  %v7319_v32 = vmul.f32 %v12489_v61, %v7274_v10  ;;  %v6833_v11 = vadd.f32 %v6832_v52, %v6696_v13 }
 0xaa8   : > { %v6447_v5 = vsel %vm6406_vm5, %v6444_v6, %v6446_v47  ;;  %v7095_v26 = vsel %vm7056_vm6, %v7092_v29, %v7094_v23  ;;  %7015 = vmatmul.f32.gmra.mxu2 %v8674_v45 }
 0xaa9   : > { %v6540_v2 = vadd.f32 %v6447_v5, %v13423_v8  ;;  %v7364_v41 = vadd.f32 %v12496_v31, %v7319_v32  ;;  %v7189_v43 = vadd.f32 %v7095_v26, %v6539_v19  ;;  %6879 = vmatmul.f32.gmra.mxu1 %v8677_v40 }
 0xaab   : > { %v6321_v22 = vpop.f32.mrf.mxu3  ;;  %7406 = vst.msk [vmem:[%s9285_s11 + $0x88] sm:$0xff] %vm7388_vm2, %v7364_v41  ;;  %v7234_v48 = vadd.f32 %v12484_v56, %v7189_v43  ;;  %v6968_v62 = vpop.f32.mrf.mxu2  ;;  %v13426_v43 = vld [vmem:[#allocation104_spill] sm:$0xff] }
 0xaac   : > { %v6322_v46 = vadd.f32 %v6321_v22, %v12299_v17  ;;  %v6699_v50 = vpop.f32.mrf.mxu0  ;;  %v6969_v44 = vadd.f32 %v6968_v62, %v6833_v11 }
 0xaad   : > { %v7275_v55 = vmax.f32 %v7234_v48, 0.0 }
 0xaae   : > { %v6448_v14 = vrot.slane %v6322_v46, 5  ;;  %v7096_v60 = vrot.slane %v6969_v44, 6  ;;  %v6835_v38 = vpop.f32.mrf.mxu1 }
 0xaaf   : > { %v7320_v25 = vmul.f32 %v12489_v61, %v7275_v55  ;;  %v6836_v17 = vadd.f32 %v6835_v38, %v6699_v50 }
 0xab0   : > { %v6449_v9 = vsel %vm6406_vm5, %v6446_v47, %v6448_v14  ;;  %v7097_v37 = vsel %vm7056_vm6, %v7094_v23, %v7096_v60 }
 0xab1   : > { %v6541_v54 = vadd.f32 %v6449_v9, %v13424_v16  ;;  %v7365_v6 = vadd.f32 %v12496_v31, %v7320_v25  ;;  %v7190_v29 = vadd.f32 %v7097_v37, %v6540_v2  ;;  %v13427_v37 = vld [vmem:[#allocation105_spill] sm:$0xff] }
 0xab3   : > { %v6324_v63 = vpop.f32.mrf.mxu3  ;;  %7407 = vst.msk [vmem:[%s9285_s11 + $0x90] sm:$0xff] %vm7388_vm2, %v7365_v6  ;;  %v7235_v39 = vadd.f32 %v12484_v56, %v7190_v29  ;;  %v6971_v1 = vpop.f32.mrf.mxu2 }
 0xab4   : > { %v6325_v30 = vadd.f32 %v6324_v63, %v12309_v18  ;;  %v6702_v45 = vpop.f32.mrf.mxu0  ;;  %v6972_v34 = vadd.f32 %v6971_v1, %v6836_v17 }
 0xab5   : > { %v7276_v19 = vmax.f32 %v7235_v39, 0.0 }
 0xab6   : > { %v6450_v15 = vrot.slane %v6325_v30, 5  ;;  %v7098_v59 = vrot.slane %v6972_v34, 6  ;;  %v6838_v35 = vpop.f32.mrf.mxu1 }
 0xab7   : > { %v7321_v20 = vmul.f32 %v12489_v61, %v7276_v19  ;;  %v6839_v18 = vadd.f32 %v6838_v35, %v6702_v45 }
 0xab8   : > { %v6451_v27 = vsel %vm6406_vm5, %v6448_v14, %v6450_v15  ;;  %v7099_v0 = vsel %vm7056_vm6, %v7096_v60, %v7098_v59 }
 0xab9   : > { %v6542_v57 = vadd.f32 %v6451_v27, %v13425_v49  ;;  %v7366_v58 = vadd.f32 %v12496_v31, %v7321_v20  ;;  %v7191_v13 = vadd.f32 %v7099_v0, %v6541_v54 }
 0xabb   : > { %v6327_v12 = vpop.f32.mrf.mxu3  ;;  %7408 = vst.msk [vmem:[%s9285_s11 + $0x98] sm:$0xff] %vm7388_vm2, %v7366_v58  ;;  %v7236_v10 = vadd.f32 %v12484_v56, %v7191_v13  ;;  %v6974_v23 = vpop.f32.mrf.mxu2 }
 0xabc   : > { %v6328_v47 = vadd.f32 %v6327_v12, %v12319_v7  ;;  %v6705_v52 = vpop.f32.mrf.mxu0  ;;  %v6975_v53 = vadd.f32 %v6974_v23, %v6839_v18 }
 0xabd   : > { %v7277_v32 = vmax.f32 %v7236_v10, 0.0 }
 0xabe   : > { %v6452_v5 = vrot.slane %v6328_v47, 5  ;;  %v7100_v8 = vrot.slane %v6975_v53, 6  ;;  %v6841_v2 = vpop.f32.mrf.mxu1 }
 0xabf   : > { %v7322_v26 = vmul.f32 %v12489_v61, %v7277_v32  ;;  %v6842_v7 = vadd.f32 %v6841_v2, %v6705_v52 }
 0xac0   : > { %v6453_v41 = vsel %vm6406_vm5, %v6450_v15, %v6452_v5  ;;  %v7101_v11 = vsel %vm7056_vm6, %v7098_v59, %v7100_v8 }
 0xac1   : > { %v6543_v40 = vadd.f32 %v6453_v41, %v13426_v43  ;;  %v7367_v22 = vadd.f32 %v12496_v31, %v7322_v26  ;;  %v7192_v48 = vadd.f32 %v7101_v11, %v6542_v57  ;;  %v13428_v57 = vld [vmem:[#allocation106_spill] sm:$0xff]  ;;  %v13429_v43 = vld [vmem:[#allocation107_spill] sm:$0xff] }
 0xac3   : > { %v6330_v46 = vpop.f32.mrf.mxu3  ;;  %7409 = vst.msk [vmem:[%s9285_s11 + $0xa0] sm:$0xff] %vm7388_vm2, %v7367_v22  ;;  %v7237_v62 = vadd.f32 %v12484_v56, %v7192_v48  ;;  %v6977_v44 = vpop.f32.mrf.mxu2 }
 0xac4   : > { %v6331_v50 = vadd.f32 %v6330_v46, %v12329_v51  ;;  %v6708_v55 = vpop.f32.mrf.mxu0  ;;  %v6978_v14 = vadd.f32 %v6977_v44, %v6842_v7 }
 0xac5   : > { %v7278_v60 = vmax.f32 %v7237_v62, 0.0 }
 0xac6   : > { %v6454_v38 = vrot.slane %v6331_v50, 5  ;;  %v7102_v25 = vrot.slane %v6978_v14, 6  ;;  %v6844_v9 = vpop.f32.mrf.mxu1 }
 0xac7   : > { %v7323_v16 = vmul.f32 %v12489_v61, %v7278_v60  ;;  %v6845_v51 = vadd.f32 %v6844_v9, %v6708_v55 }
 0xac8   : > { %v6455_v54 = vsel %vm6406_vm5, %v6452_v5, %v6454_v38  ;;  %v7103_v29 = vsel %vm7056_vm6, %v7100_v8, %v7102_v25 }
 0xac9   : > { %v6544_v6 = vadd.f32 %v6455_v54, %v13427_v37  ;;  %v7368_v17 = vadd.f32 %v12496_v31, %v7323_v16  ;;  %v7193_v63 = vadd.f32 %v7103_v29, %v6543_v40  ;;  %v13430_v54 = vld [vmem:[#allocation108_spill] sm:$0xff] }
 0xacb   : > { %v6333_v39 = vpop.f32.mrf.mxu3  ;;  %7410 = vst.msk [vmem:[%s9285_s11 + $0xa8] sm:$0xff] %vm7388_vm2, %v7368_v17  ;;  %v7238_v30 = vadd.f32 %v12484_v56, %v7193_v63  ;;  %v6980_v45 = vpop.f32.mrf.mxu2  ;;  %v12768_v63 = vld [vmem:[#allocation13] ss:$0 sm:$0xff] }
 0xacc   : > { %v6334_v1 = vadd.f32 %v6333_v39, %v12339_v33  ;;  %v6711_v34 = vpop.f32.mrf.mxu0  ;;  %v6981_v19 = vadd.f32 %v6980_v45, %v6845_v51 }
 0xacd   : > { %v7279_v15 = vmax.f32 %v7238_v30, 0.0 }
 0xace   : > { %v6456_v59 = vrot.slane %v6334_v1, 5  ;;  %v7104_v35 = vrot.slane %v6981_v19, 6  ;;  %v6847_v20 = vpop.f32.mrf.mxu1 }
 0xacf   : > { %v7324_v27 = vmul.f32 %v12489_v61, %v7279_v15  ;;  %v6848_v33 = vadd.f32 %v6847_v20, %v6711_v34  ;;  %v13431_v20 = vld [vmem:[#allocation115_spill] sm:$0xff] }
 0xad0   : > { %v6457_v49 = vsel %vm6406_vm5, %v6454_v38, %v6456_v59  ;;  %v7105_v58 = vsel %vm7056_vm6, %v7102_v25, %v7104_v35 }
 0xad1   : > { %v6545_v0 = vadd.f32 %v6457_v49, %v13428_v57  ;;  %v7369_v13 = vadd.f32 %v12496_v31, %v7324_v27  ;;  %v7194_v18 = vadd.f32 %v7105_v58, %v6544_v6  ;;  %v12778_v57 = vld [vmem:[#allocation16] ss:$0 sm:$0xff] }
 0xad3   : > { %v6336_v12 = vpop.f32.mrf.mxu3  ;;  %7411 = vst.msk [vmem:[%s9285_s11 + $0xb0] sm:$0xff] %vm7388_vm2, %v7369_v13  ;;  %v7239_v10 = vadd.f32 %v12484_v56, %v7194_v18  ;;  %v6983_v23 = vpop.f32.mrf.mxu2 }
 0xad4   : > { %v6337_v47 = vadd.f32 %v6336_v12, %v12349_v42  ;;  %v6714_v52 = vpop.f32.mrf.mxu0  ;;  %v6984_v53 = vadd.f32 %v6983_v23, %v6848_v33 }
 0xad5   : > { %v7280_v32 = vmax.f32 %v7239_v10, 0.0 }
 0xad6   : > { %v6458_v5 = vrot.slane %v6337_v47, 5  ;;  %v7106_v8 = vrot.slane %v6984_v53, 6  ;;  %v6850_v2 = vpop.f32.mrf.mxu1 }
 0xad7   : > { %v7325_v26 = vmul.f32 %v12489_v61, %v7280_v32  ;;  %v6851_v42 = vadd.f32 %v6850_v2, %v6714_v52  ;;  %v13432_v2 = vld [vmem:[#allocation109_spill] sm:$0xff] }
 0xad8   : > { %v6459_v41 = vsel %vm6406_vm5, %v6456_v59, %v6458_v5  ;;  %v7107_v11 = vsel %vm7056_vm6, %v7104_v35, %v7106_v8 }
 0xad9   : > { %v6546_v40 = vadd.f32 %v6459_v41, %v13429_v43  ;;  %v7370_v22 = vadd.f32 %v12496_v31, %v7325_v26  ;;  %v7195_v48 = vadd.f32 %v7107_v11, %v6545_v0 }
 0xadb   : > { %v6339_v7 = vpop.f32.mrf.mxu3  ;;  %7412 = vst.msk [vmem:[%s9285_s11 + $0xb8] sm:$0xff] %vm7388_vm2, %v7370_v22  ;;  %v7240_v46 = vadd.f32 %v12484_v56, %v7195_v48  ;;  %v6986_v50 = vpop.f32.mrf.mxu2 }
 0xadc   : > { %v6340_v62 = vadd.f32 %v6339_v7, %v12359_v3  ;;  %v6717_v44 = vpop.f32.mrf.mxu0  ;;  %v6987_v55 = vadd.f32 %v6986_v50, %v6851_v42 }
 0xadd   : > { %v7281_v14 = vmax.f32 %v7240_v46, 0.0 }
 0xade   : > { %v6460_v60 = vrot.slane %v6340_v62, 5  ;;  %v7108_v38 = vrot.slane %v6987_v55, 6  ;;  %v6853_v25 = vpop.f32.mrf.mxu1 }
 0xadf   : > { %v7326_v9 = vmul.f32 %v12489_v61, %v7281_v14  ;;  %v6854_v3 = vadd.f32 %v6853_v25, %v6717_v44 }
 0xae0   : > { %v6461_v16 = vsel %vm6406_vm5, %v6458_v5, %v6460_v60  ;;  %v7109_v6 = vsel %vm7056_vm6, %v7106_v8, %v7108_v38 }
 0xae1   : > { %v6547_v37 = vadd.f32 %v6461_v16, %v13430_v54  ;;  %v7371_v56 = vadd.f32 %v12496_v31, %v7326_v9  ;;  %v7196_v29 = vadd.f32 %v7109_v6, %v6546_v40  ;;  %v12772_v31 = vld [vmem:[#allocation14] ss:$0 sm:$0xff] }
 0xae3   : > { %v6342_v17 = vpop.f32.mrf.mxu3  ;;  %7413 = vst.msk [vmem:[%s9285_s11 + $0xc0] sm:$0xff] %vm7388_vm2, %v7371_v56  ;;  %v7241_v51 = vadd.f32 %v12768_v63, %v7196_v29  ;;  %v6989_v61 = vpop.f32.mrf.mxu2 }
 0xae4   : > { %v6343_v39 = vadd.f32 %v6342_v17, %v12369_v28  ;;  %v6720_v30 = vpop.f32.mrf.mxu0  ;;  %v6990_v1 = vadd.f32 %v6989_v61, %v6854_v3 }
 0xae5   : > { %v7282_v45 = vmax.f32 %v7241_v51, 0.0 }
 0xae6   : > { %v6462_v34 = vrot.slane %v6343_v39, 5  ;;  %v7110_v19 = vrot.slane %v6990_v1, 6  ;;  %v6856_v15 = vpop.f32.mrf.mxu1 }
 0xae7   : > { %v7327_v59 = vmul.f32 %v12772_v31, %v7282_v45  ;;  %v6857_v58 = vadd.f32 %v6856_v15, %v6720_v30 }
 0xae8   : > { %v6463_v35 = vsel %vm6406_vm5, %v6460_v60, %v6462_v34  ;;  %v7111_v49 = vsel %vm7056_vm6, %v7108_v38, %v7110_v19  ;;  %v13433_v38 = vld [vmem:[#allocation110_spill] sm:$0xff] }
 0xae9   : > { %v6548_v27 = vadd.f32 %v6463_v35, %v13431_v20  ;;  %v7372_v28 = vadd.f32 %v12778_v57, %v7327_v59  ;;  %v7197_v0 = vadd.f32 %v7111_v49, %v6547_v37  ;;  %v13435_v49 = vld [vmem:[#allocation113_spill] sm:$0xff] }
 0xaeb   : > { %v6345_v13 = vpop.f32.mrf.mxu3  ;;  %7414 = vst.msk [vmem:[%s9285_s11 + $0xc8] sm:$0xff] %vm7388_vm2, %v7372_v28  ;;  %v7242_v18 = vadd.f32 %v12768_v63, %v7197_v0  ;;  %v6992_v12 = vpop.f32.mrf.mxu2 }
 0xaec   : > { %v6346_v33 = vadd.f32 %v6345_v13, %v12379_v21  ;;  %v6723_v10 = vpop.f32.mrf.mxu0  ;;  %v6993_v47 = vadd.f32 %v6992_v12, %v6857_v58 }
 0xaed   : > { %v7283_v23 = vmax.f32 %v7242_v18, 0.0 }
 0xaee   : > { %v6464_v52 = vrot.slane %v6346_v33, 5  ;;  %v7112_v53 = vrot.slane %v6993_v47, 6  ;;  %v6859_v32 = vpop.f32.mrf.mxu1 }
 0xaef   : > { %v7328_v5 = vmul.f32 %v12772_v31, %v7283_v23  ;;  %v6860_v21 = vadd.f32 %v6859_v32, %v6723_v10 }
 0xaf0   : > { %v6465_v8 = vsel %vm6406_vm5, %v6462_v34, %v6464_v52  ;;  %v7113_v41 = vsel %vm7056_vm6, %v7110_v19, %v7112_v53  ;;  %v13434_v34 = vld [vmem:[#allocation111_spill] sm:$0xff] }
 0xaf1   : > { %v6549_v26 = vadd.f32 %v6465_v8, %v13432_v2  ;;  %v7373_v43 = vadd.f32 %v12778_v57, %v7328_v5  ;;  %v7198_v40 = vadd.f32 %v7113_v41, %v6548_v27 }
 0xaf3   : > { %v6348_v11 = vpop.f32.mrf.mxu3  ;;  %7415 = vst.msk [vmem:[%s9285_s11 + $0xd0] sm:$0xff] %vm7388_vm2, %v7373_v43  ;;  %v7243_v22 = vadd.f32 %v12768_v63, %v7198_v40  ;;  %v6995_v42 = vpop.f32.mrf.mxu2 }
 0xaf4   : > { %v6349_v48 = vadd.f32 %v6348_v11, %v12389_v24  ;;  %v6726_v7 = vpop.f32.mrf.mxu0  ;;  %v6996_v46 = vadd.f32 %v6995_v42, %v6860_v21 }
 0xaf5   : > { %v7284_v62 = vmax.f32 %v7243_v22, 0.0 }
 0xaf6   : > { %v6466_v50 = vrot.slane %v6349_v48, 5  ;;  %v7114_v44 = vrot.slane %v6996_v46, 6  ;;  %v6862_v55 = vpop.f32.mrf.mxu1 }
 0xaf7   : > { %v7329_v14 = vmul.f32 %v12772_v31, %v7284_v62  ;;  %v6863_v24 = vadd.f32 %v6862_v55, %v6726_v7 }
 0xaf8   : > { %v6467_v60 = vsel %vm6406_vm5, %v6464_v52, %v6466_v50  ;;  %v7115_v9 = vsel %vm7056_vm6, %v7112_v53, %v7114_v44  ;;  %v13436_v52 = vld [vmem:[#allocation112_spill] sm:$0xff] }
 0xaf9   : > { %v6550_v25 = vadd.f32 %v6467_v60, %v13433_v38  ;;  %v7374_v16 = vadd.f32 %v12778_v57, %v7329_v14  ;;  %v7199_v54 = vadd.f32 %v7115_v9, %v6549_v26  ;;  %v13438_v9 = vld [vmem:[#allocation117_spill] sm:$0xff] }
 0xafb   : > { %v6351_v37 = vpop.f32.mrf.mxu3  ;;  %7416 = vst.msk [vmem:[%s9285_s11 + $0xd8] sm:$0xff] %vm7388_vm2, %v7374_v16  ;;  %v7244_v6 = vadd.f32 %v12768_v63, %v7199_v54  ;;  %v6998_v29 = vpop.f32.mrf.mxu2 }
 0xafc   : > { %v6352_v56 = vadd.f32 %v6351_v37, %v12399_v36  ;;  %v6729_v3 = vpop.f32.mrf.mxu0  ;;  %v6999_v17 = vadd.f32 %v6998_v29, %v6863_v24 }
 0xafd   : > { %v7285_v51 = vmax.f32 %v7244_v6, 0.0 }
 0xafe   : > { %v6468_v39 = vrot.slane %v6352_v56, 5  ;;  %v7116_v61 = vrot.slane %v6999_v17, 6  ;;  %v6865_v30 = vpop.f32.mrf.mxu1 }
 0xaff   : > { %v7330_v1 = vmul.f32 %v12772_v31, %v7285_v51  ;;  %v6866_v36 = vadd.f32 %v6865_v30, %v6729_v3 }
 0xb00   : > { %v6469_v45 = vsel %vm6406_vm5, %v6466_v50, %v6468_v39  ;;  %v7117_v15 = vsel %vm7056_vm6, %v7114_v44, %v7116_v61  ;;  %v13437_v50 = vld [vmem:[#allocation114_spill] sm:$0xff] }
 0xb01   : > { %v6551_v19 = vadd.f32 %v6469_v45, %v13434_v34  ;;  %v7375_v59 = vadd.f32 %v12778_v57, %v7330_v1  ;;  %v7200_v35 = vadd.f32 %v7117_v15, %v6550_v25 }
 0xb03   : > { %v6354_v20 = vpop.f32.mrf.mxu3  ;;  %7417 = vst.msk [vmem:[%s9285_s11 + $0xe0] sm:$0xff] %vm7388_vm2, %v7375_v59  ;;  %v7245_v27 = vadd.f32 %v12768_v63, %v7200_v35  ;;  %v7001_v0 = vpop.f32.mrf.mxu2  ;;  %v13440_v59 = vld [vmem:[#allocation119_spill] sm:$0xff] }
 0xb04   : > { %v6355_v28 = vadd.f32 %v6354_v20, %v13435_v49  ;;  %v6732_v58 = vpop.f32.mrf.mxu0  ;;  %v7002_v13 = vadd.f32 %v7001_v0, %v6866_v36 }
 0xb05   : > { %v7286_v18 = vmax.f32 %v7245_v27, 0.0 }
 0xb06   : > { %v6470_v33 = vrot.slane %v6355_v28, 5  ;;  %v7118_v12 = vrot.slane %v7002_v13, 6  ;;  %v6868_v10 = vpop.f32.mrf.mxu1 }
 0xb07   : > { %v7331_v47 = vmul.f32 %v12772_v31, %v7286_v18  ;;  %v6869_v2 = vadd.f32 %v6868_v10, %v6732_v58 }
 0xb08   : > { %v6471_v23 = vsel %vm6406_vm5, %v6468_v39, %v6470_v33  ;;  %v7119_v32 = vsel %vm7056_vm6, %v7116_v61, %v7118_v12  ;;  %v13439_v39 = vld [vmem:[#allocation116_spill] sm:$0xff] }
 0xb09   : > { %v6552_v53 = vadd.f32 %v6471_v23, %v13436_v52  ;;  %v7376_v5 = vadd.f32 %v12778_v57, %v7331_v47  ;;  %v7201_v8 = vadd.f32 %v7119_v32, %v6551_v19 }
 0xb0b   : > { %v6357_v26 = vpop.f32.mrf.mxu3  ;;  %7418 = vst.msk [vmem:[%s9285_s11 + $0xe8] sm:$0xff] %vm7388_vm2, %v7376_v5  ;;  %v7246_v41 = vadd.f32 %v12768_v63, %v7201_v8  ;;  %v7004_v40 = vpop.f32.mrf.mxu2  ;;  %v13442_v5 = vld [vmem:[#allocation122_spill] sm:$0xff] }
 0xb0c   : > { %v6358_v43 = vadd.f32 %v6357_v26, %v12419_v4  ;;  %v6735_v21 = vpop.f32.mrf.mxu0  ;;  %v7005_v11 = vadd.f32 %v7004_v40, %v6869_v2 }
 0xb0d   : > { %v7287_v22 = vmax.f32 %v7246_v41, 0.0 }
 0xb0e   : > { %v6472_v48 = vrot.slane %v6358_v43, 5  ;;  %v7120_v42 = vrot.slane %v7005_v11, 6  ;;  %v6871_v7 = vpop.f32.mrf.mxu1 }
 0xb0f   : > { %v7332_v46 = vmul.f32 %v12772_v31, %v7287_v22  ;;  %v6872_v4 = vadd.f32 %v6871_v7, %v6735_v21  ;;  %v13443_v22 = vld [vmem:[#allocation29_spill] sm:$0xff] }
 0xb10   : > { %v6473_v62 = vsel %vm6406_vm5, %v6470_v33, %v6472_v48  ;;  %v7121_v55 = vsel %vm7056_vm6, %v7118_v12, %v7120_v42  ;;  %v13441_v33 = vld [vmem:[#allocation118_spill] sm:$0xff] }
 0xb11   : > { %v6553_v44 = vadd.f32 %v6473_v62, %v13437_v50  ;;  %v7377_v14 = vadd.f32 %v12778_v57, %v7332_v46  ;;  %v7202_v60 = vadd.f32 %v7121_v55, %v6552_v53  ;;  %v13444_v46 = vld [vmem:[#allocation120_spill] sm:$0xff]  ;;  %v13445_v50 = vld [vmem:[#allocation121_spill] sm:$0xff] }
 0xb13   : > { %v6360_v38 = vpop.f32.mrf.mxu3  ;;  %7419 = vst.msk [vmem:[%s9285_s11 + $0xf0] sm:$0xff] %vm7388_vm2, %v7377_v14  ;;  %v7247_v25 = vadd.f32 %v12768_v63, %v7202_v60  ;;  %v7007_v54 = vpop.f32.mrf.mxu2 }
 0xb14   : > { %v6361_v16 = vadd.f32 %v6360_v38, %v13438_v9  ;;  %v6738_v24 = vpop.f32.mrf.mxu0  ;;  %v7008_v37 = vadd.f32 %v7007_v54, %v6872_v4 }
 0xb15   : > { %v7288_v6 = vmax.f32 %v7247_v25, 0.0 }
 0xb16   : > { %v6474_v56 = vrot.slane %v6361_v16, 5  ;;  %v7122_v29 = vrot.slane %v7008_v37, 6  ;;  %v6874_v3 = vpop.f32.mrf.mxu1 }
 0xb17   : > { %v7333_v17 = vmul.f32 %v12772_v31, %v7288_v6  ;;  %v6875_v34 = vadd.f32 %v6874_v3, %v6738_v24  ;;  %v13446_v6 = vld [vmem:[#allocation72_spill] sm:$0xff] }
 0xb18   : > { %v6475_v51 = vsel %vm6406_vm5, %v6472_v48, %v6474_v56  ;;  %v7123_v30 = vsel %vm7056_vm6, %v7120_v42, %v7122_v29 }
 0xb19   : > { %v6554_v61 = vadd.f32 %v6475_v51, %v13439_v39  ;;  %v7378_v1 = vadd.f32 %v12778_v57, %v7333_v17  ;;  %v7203_v45 = vadd.f32 %v7123_v30, %v6553_v44 }
 0xb1b   : > { %v6363_v19 = vpop.f32.mrf.mxu3  ;;  %7420 = vst.msk [vmem:[%s9285_s11 + $0xf8] sm:$0xff] %vm7388_vm2, %v7378_v1  ;;  %v7248_v15 = vadd.f32 %v12768_v63, %v7203_v45  ;;  %v7010_v36 = vpop.f32.mrf.mxu2 }
 0xb1c   : > { %v6364_v35 = vadd.f32 %v6363_v19, %v13440_v59  ;;  %v7011_v20 = vadd.f32 %v7010_v36, %v6875_v34  ;;  %v6741_v28 = vpop.f32.mrf.mxu0 }
 0xb1d   : > { %v7289_v27 = vmax.f32 %v7248_v15, 0.0 }
 0xb1e   : > { %v6476_v49 = vrot.slane %v6364_v35, 5  ;;  %v7124_v0 = vrot.slane %v7011_v20, 6  ;;  %v6877_v58 = vpop.f32.mrf.mxu1 }
 0xb1f   : > { %v7334_v13 = vmul.f32 %v12772_v31, %v7289_v27  ;;  %v6878_v52 = vadd.f32 %v6877_v58, %v6741_v28 }
 0xb20   : > { %v6477_v18 = vsel %vm6406_vm5, %v6474_v56, %v6476_v49  ;;  %v7125_v10 = vsel %vm7056_vm6, %v7122_v29, %v7124_v0 }
 0xb21   : > { %v6555_v12 = vadd.f32 %v6477_v18, %v13441_v33  ;;  %v7379_v47 = vadd.f32 %v12778_v57, %v7334_v13  ;;  %v7204_v23 = vadd.f32 %v7125_v10, %v6554_v61 }
 0xb23   : > { %v6366_v53 = vpop.f32.mrf.mxu3  ;;  %7421 = vst.msk [vmem:[%s9285_s11 + $0x100] sm:$0xff] %vm7388_vm2, %v7379_v47  ;;  %v7249_v32 = vadd.f32 %v12768_v63, %v7204_v23  ;;  %v7013_v2 = vpop.f32.mrf.mxu2 }
 0xb24   : > { %v6367_v8 = vadd.f32 %v6366_v53, %v13442_v5  ;;  %v7014_v26 = vadd.f32 %v7013_v2, %v6878_v52  ;;  %v6744_v42 = vpop.f32.mrf.mxu0 }
 0xb25   : > { %v7290_v41 = vmax.f32 %v7249_v32, 0.0 }
 0xb26   : > { %v6478_v43 = vrot.slane %v6367_v8, 5  ;;  %v7126_v40 = vrot.slane %v7014_v26, 6  ;;  %v6880_v7 = vpop.f32.mrf.mxu1 }
 0xb27   : > { %v7335_v21 = vmul.f32 %v12772_v31, %v7290_v41  ;;  %v6881_v4 = vadd.f32 %v6880_v7, %v6744_v42 }
 0xb28   : > { %v6479_v11 = vsel %vm6406_vm5, %v6476_v49, %v6478_v43  ;;  %v6481_v48 = vsel %vm6406_vm5, %v6478_v43, %v13443_v22  ;;  %v7127_v55 = vsel %vm7056_vm6, %v7124_v0, %v7126_v40 }
 0xb29   : > { %v6556_v62 = vadd.f32 %v6479_v11, %v13444_v46  ;;  %v6557_v44 = vadd.f32 %v6481_v48, %v13445_v50  ;;  %v7380_v14 = vadd.f32 %v12778_v57, %v7335_v21  ;;  %v7205_v60 = vadd.f32 %v7127_v55, %v6555_v12 }
 0xb2b   : > { %7422 = vst.msk [vmem:[%s9285_s11 + $0x108] sm:$0xff] %vm7388_vm2, %v7380_v14  ;;  %v7250_v38 = vadd.f32 %v12768_v63, %v7205_v60  ;;  %v7016_v25 = vpop.f32.mrf.mxu2 }
 0xb2c   : > { %v7017_v9 = vadd.f32 %v7016_v25, %v6881_v4 }
 0xb2d   : > { %v7291_v16 = vmax.f32 %v7250_v38, 0.0 }
 0xb2e   : > { %v7128_v54 = vrot.slane %v7017_v9, 6 }
 0xb2f   : > { %v7336_v24 = vmul.f32 %v12772_v31, %v7291_v16 }
 0xb30   : > { %v7129_v37 = vsel %vm7056_vm6, %v7126_v40, %v7128_v54  ;;  %v7131_v56 = vsel %vm7056_vm6, %v7128_v54, %v13446_v6 }
 0xb31   : > { %v7381_v29 = vadd.f32 %v12778_v57, %v7336_v24  ;;  %v7206_v3 = vadd.f32 %v7129_v37, %v6556_v62  ;;  %v7207_v17 = vadd.f32 %v7131_v56, %v6557_v44 }
 0xb33   : > { %7423 = vst.msk [vmem:[%s9285_s11 + $0x110] sm:$0xff] %vm7388_vm2, %v7381_v29  ;;  %v7251_v51 = vadd.f32 %v12768_v63, %v7206_v3  ;;  %v7252_v39 = vadd.f32 %v12768_v63, %v7207_v17 }
 0xb35   : > { %v7292_v61 = vmax.f32 %v7251_v51, 0.0  ;;  %v7293_v30 = vmax.f32 %v7252_v39, 0.0 }
 0xb37   : > { %v7337_v1 = vmul.f32 %v12772_v31, %v7292_v61  ;;  %v7338_v45 = vmul.f32 %v12772_v31, %v7293_v30 }
 0xb39   : > { %v7382_v34 = vadd.f32 %v12778_v57, %v7337_v1  ;;  %v7383_v19 = vadd.f32 %v12778_v57, %v7338_v45 }
 0xb3b   : > { %7424 = vst.msk [vmem:[%s9285_s11 + $0x118] sm:$0xff] %vm7388_vm2, %v7382_v34 }
 0xb3c   : > { %7425 = vst.msk [vmem:[%s9285_s11 + $0x120] sm:$0xff] %vm7388_vm2, %v7383_v19 }
 0xb3d PF: > { %s27_s20 = sadd.s32 1, %s9033_s20   ;;  %s13447_s23 = smov %s9240_s13 }
 0xb3e   : > { %p24_p6 = scmp.ge.s32.totalorder %s27_s20, 36   ;;  %s13448_s13 = smov %s9009_s14 }
 0xb3f   : > { %s13449_s14 = smov %s9013_s15  ;;  %s13450_s15 = smov %s13447_s23 }
 0xb40   : > { %s13451_s16 = smov %s9025_s18  ;;  %s13452_s17 = smov %s9029_s19 }
 0xb41   : > { %s13453_s18 = smov %s13456_s27  ;;  %s13454_s19 = smov %s13460_s10 }
 0xb42   :  { %26 = sbr.rel (!%p24_p6) target bundleno = 18 (0x12), region = 161 }
 0xb47   :  { %7468 = vsyncpa [#allocation4], 1 }
 0xb48   :  { %7470 = vsyncpa [#allocation4 + $0x1], 1 }
 0xb49   :  { %7471 = vsyncpa [#allocation6], 1 }
 0xb4a   :  { %7472 = vsyncpa [#allocation9], 1 }
 0xb4b   :  { %7473 = vsyncpa [#allocation12], 1 }
 0xb4c   :  { %7474 = vsyncpa [#allocation15], 1 }

</bundles_post_ra>
